<compile_context>
chip_gen: v6e
topology: v6e:2x2x1
jax: 0.10.0
libtpu: 0.0.40
codegen_flags: <defaults>
</compile_context>

<pallas_src>
import numpy as np
import jax
import jax.numpy as jnp
from jax import lax
from jax.experimental import pallas as pl
from jax.experimental.pallas import tpu as pltpu

_EPS = 1e-5


def _ru(x, m):
    return ((x + m - 1) // m) * m


# ----------------------------------------------------------------- host-side folding
def _fold_bn(conv_bias, bn):
    """Eval-mode BatchNorm folded into per-channel scale / bias (conv bias included)."""
    gamma, beta, mean, var = bn
    scale = gamma / jnp.sqrt(var + _EPS)
    bias = beta + (conv_bias - mean) * scale
    return scale, bias


def _pad_row(vec, width):
    out = jnp.zeros((1, width), jnp.float32)
    return out.at[0, :vec.shape[0]].set(vec.astype(jnp.float32))


def _conv_weight_padded(w_oihw, cinp, coutp):
    """OIHW conv weight -> (KH*KW*cinp, coutp) tap-major matmul matrix, zero padded."""
    cout, cin, kh, kw = w_oihw.shape
    wt = jnp.zeros((kh, kw, cinp, coutp), jnp.float32)
    wt = wt.at[:, :, :cin, :cout].set(jnp.transpose(w_oihw, (2, 3, 1, 0)))
    return wt.reshape(kh * kw * cinp, coutp)


def _pool_matrix(h, w, src_stride, ph, pw, count_pad, pad_h, pad_w, wn_next, rows_out):
    """AvgPool(ph, pw) of an (h, w) valid grid laid out with row stride `src_stride`,
    scattered into the next stage's zero-halo layout (width wn_next, halo pad_h/pad_w,
    rows_out total rows).  All-zero rows write the next conv's 'same' padding and the
    sublane-alignment padding, so halos never have to be materialized explicitly.
    count_pad=True reproduces MP_Conv's ZeroPad2d-then-AvgPool (zeros in the divisor)."""
    hp = (h + (ph - 1 if count_pad else 0)) // ph
    wp = (w + (pw - 1 if count_pad else 0)) // pw
    nv_src = (h - 1) * src_stride + w
    p = np.zeros((rows_out, nv_src), np.float32)
    inv = 1.0 / (ph * pw)
    for i in range(hp):
        for j in range(wp):
            r = (i + pad_h) * wn_next + (j + pad_w)
            for di in range(ph):
                for dj in range(pw):
                    hh, ww = i * ph + di, j * pw + dj
                    if hh < h and ww < w:          # cells past H/W are the (zero) pad
                        p[r, hh * src_stride + ww] = inv
    return p


# ------------------------------------------------------------------------ fused model
def build_fc_mfcc(params, *, batch, in_hw, compute_dtype=jnp.bfloat16):
    """Fold / pad all parameters once (host side) and return a jit-able forward(x_nchw)
    whose whole network body is a single fused pallas_call."""
    nb = int(batch)
    h0, w0 = int(in_hw[0]), int(in_hw[1])
    cdt = compute_dtype
    n_classes = int(params["head"]["w"].shape[0])
    ncp = _ru(n_classes, 128)

    tower_sizes = [(3, 3), (9, 1), (1, 11)]
    pools = [(2, 2), (2, 2), (2, 2), (2, 1), (2, 1)]      # pool after stage s (s=0..4)
    count_pad = [True, False, False, False, False]        # only MP_Conv has ZeroPad2d
    mid_kernels = [tuple(int(d) for d in p["w"].shape[2:]) for p in params["middle"]]
    mid_couts = [int(p["w"].shape[0]) for p in params["middle"]]

    # ---------------- stage 0: the three MP_Conv towers fused into one matmul --------
    k_tot = sum(kh * kw for kh, kw in tower_sizes)        # 9 + 9 + 11 = 29
    k0p = _ru(k_tot, 8)                                   # pad contraction 29 -> 32
    c0 = 32 * len(tower_sizes)                            # 96
    c0p = _ru(c0, 128)
    r0, r0p = h0 * w0, _ru(h0 * w0, 16)

    w0m = jnp.zeros((k0p, c0p), jnp.float32)
    sc_parts, bi_parts = [], []
    ro = co = 0
    for p, (kh, kw) in zip(params["initial"], tower_sizes):
        wb = jnp.transpose(p["w"], (2, 3, 1, 0)).reshape(kh * kw, -1)   # cin = 1
        w0m = w0m.at[ro:ro + kh * kw, co:co + wb.shape[1]].set(wb)
        ro += kh * kw
        co += wb.shape[1]
        s, b = _fold_bn(p["b"], p["bn"])
        sc_parts.append(s)
        bi_parts.append(b)
    sc0 = _pad_row(jnp.concatenate(sc_parts), c0p)
    bi0 = _pad_row(jnp.concatenate(bi_parts), c0p)

    # per-stage geometry of the zero-halo flat layouts
    geo = [dict(kh=1, kw=1, wpad=w0, RIN=r0p, nv=r0, L=nb * r0p, cinp=k0p, coutp=c0p)]
    h, w = h0, w0                                         # current stage's valid grid

    pool_mats, w_mats, sc_list, bi_list = [], [], [], []
    for s in range(1, 6):
        ph, pw = pools[s - 1]
        cpd = count_pad[s - 1]
        kh, kw = mid_kernels[s - 1]
        pad_h, pad_w = kh // 2, kw // 2
        hp = (h + (ph - 1 if cpd else 0)) // ph
        wp = (w + (pw - 1 if cpd else 0)) // pw
        assert hp > 0 and wp > 0, "input too small for the pooling pyramid"
        hpad, wpad = hp + 2 * pad_h, wp + 2 * pad_w
        RIN = _ru(hpad * wpad, 16)
        nv = (hp - 1) * wpad + wp
        L = (nb - 1) * RIN + nv
        cinp = geo[s - 1]["coutp"]
        coutp = _ru(mid_couts[s - 1], 128)
        pm = _pool_matrix(h, w, geo[s - 1]["wpad"], ph, pw, cpd,
                          pad_h, pad_w, wpad, RIN)
        pool_mats.append(jnp.asarray(pm).astype(cdt))
        geo.append(dict(kh=kh, kw=kw, wpad=wpad, RIN=RIN, nv=nv, L=L,
                        cinp=cinp, coutp=coutp))
        pmid = params["middle"][s - 1]
        w_mats.append(_conv_weight_padded(pmid["w"], cinp, coutp).astype(cdt))
        sf, bf = _fold_bn(pmid["b"], pmid["bn"])
        sc_list.append(_pad_row(sf, coutp))
        bi_list.append(_pad_row(bf, coutp))
        h, w = hp, wp

    # ---------------- fused epilogue: AdaptiveAvgPool2d(1) + Linear head -------------
    g5 = geo[5]
    amat = np.zeros((nb, g5["L"]), np.float32)
    for b in range(nb):
        for i in range(h):
            for j in range(w):
                amat[b, b * g5["RIN"] + i * g5["wpad"] + j] = 1.0 / (h * w)
    amat = jnp.asarray(amat).astype(cdt)
    c_last = int(params["head"]["w"].shape[1])
    wh = jnp.zeros((g5["coutp"], ncp), jnp.float32)
    wh = wh.at[:c_last, :n_classes].set(params["head"]["w"].T).astype(cdt)
    bh = _pad_row(params["head"]["b"], ncp)
    # TODO(synk): Dropout(0.3) is identity here (inference path); training-mode dropout
    # and batch-statistics BatchNorm are not implemented.

    # ---------------- kernel operands ------------------------------------------------
    # resident-in-VMEM operands (small and/or needed immediately by stage 0)
    vmem_ops = [w0m.astype(cdt), sc0, bi0, pool_mats[0]]
    for s in range(1, 5):
        vmem_ops += [sc_list[s - 1], bi_list[s - 1], pool_mats[s]]
    vmem_ops += [sc_list[4], bi_list[4], amat, bh]
    # HBM-resident operands prefetched by the kernel itself (hide the upfront DMA)
    hbm_ops = list(w_mats) + [wh]
    n_vmem = 1 + len(vmem_ops)                 # +1: per-call im2col input (cols0)
    n_hbm = len(hbm_ops)
    n_act = 5

    # ---------------- the single fused kernel ----------------------------------------
    def kernel(*refs):
        vr = refs[:n_vmem]
        hr = refs[n_vmem:n_vmem + n_hbm]
        o_ref = refs[n_vmem + n_hbm]
        scr = refs[n_vmem + n_hbm + 1:]
        acts = scr[:n_act]
        wbufs = scr[n_act:n_act + n_hbm]
        dma_sem = scr[n_act + n_hbm]

        # Kick off all late-stage weight DMAs immediately; each is awaited right before
        # its consuming stage, so the transfers hide behind earlier stages' compute.
        copies = [pltpu.make_async_copy(hr[i], wbufs[i], dma_sem.at[i])
                  for i in range(n_hbm)]
        for cp in copies:
            cp.start()

        def conv_bn_relu(a_ref, wmat, sc, bi, g):
            # 'same' conv over the zero-halo flat layout: the KH*KW shifted slices are
            # concatenated along lanes into an im2col slab -> ONE MXU matmul per stage
            # (K = KH*KW*cin_pad), f32 accumulation, folded BN + ReLU on the VPU.
            taps = [a_ref[ki * g["wpad"] + kj: ki * g["wpad"] + kj + g["L"], :]
                    for ki in range(g["kh"]) for kj in range(g["kw"])]
            slab = taps[0] if len(taps) == 1 else jnp.concatenate(taps, axis=-1)
            acc = jnp.dot(slab, wmat, preferred_element_type=jnp.float32)
            return jnp.maximum(acc * sc + bi, 0.0)

        def pool_into(y_bf16, pmat, g, g_next, dst):
            # AvgPool + re-embedding into the next stage's zero-halo layout; per-batch
            # offsets are 16-sublane aligned and lanes are 128-dense so loads/stores
            # stay unmasked.  Zero rows of pmat write the halo / alignment padding.
            for b in range(nb):
                chunk = y_bf16[b * g["RIN"]: b * g["RIN"] + g["nv"], :]
                dst[b * g_next["RIN"]:(b + 1) * g_next["RIN"], :] = jnp.dot(
                    pmat, chunk, preferred_element_type=jnp.float32).astype(dst.dtype)

        # stage 0: fused towers (input already im2col'ed on the host)
        y = conv_bn_relu(vr[0], vr[1][...], vr[2][...], vr[3][...], geo[0])
        pool_into(y.astype(cdt), vr[4][...], geo[0], geo[1], acts[0])

        # middle stages 1..5 (5 is the 1x1 conv)
        vi = 5
        for s in range(1, 6):
            copies[s - 1].wait()                     # weight prefetch for this stage
            sc = vr[vi][...]
            bi = vr[vi + 1][...]
            vi += 2
            y = conv_bn_relu(acts[s - 1], wbufs[s - 1][...], sc, bi, geo[s])
            if s < 5:
                pmat = vr[vi][...]
                vi += 1
                pool_into(y.astype(cdt), pmat, geo[s], geo[s + 1], acts[s])

        # fused epilogue: global average pool (constant matrix) + classifier head
        copies[n_hbm - 1].wait()
        a_mat = vr[vi][...]
        head_b = vr[vi + 1][...]
        pooled = jnp.dot(a_mat, y.astype(cdt), preferred_element_type=jnp.float32)
        logits = jnp.dot(pooled.astype(cdt), wbufs[n_hbm - 1][...],
                         preferred_element_type=jnp.float32) + head_b
        o_ref[...] = logits

    # ---------------- pallas_call plumbing -------------------------------------------
    act_scratch = [pltpu.VMEM((nb * geo[s]["RIN"], geo[s]["cinp"]), cdt)
                   for s in range(1, 6)]
    wbuf_scratch = [pltpu.VMEM(tuple(op.shape), cdt) for op in hbm_ops]
    scratch_shapes = act_scratch + wbuf_scratch + [pltpu.SemaphoreType.DMA((n_hbm,))]

    vmem_spec = pl.BlockSpec(memory_space=pltpu.MemorySpace.VMEM)
    in_specs = ([vmem_spec] * n_vmem +
                [pl.BlockSpec(memory_space=pl.ANY)] * n_hbm)

    flops = 0
    for s in range(6):
        g = geo[s]
        flops += 2 * g["L"] * (g["kh"] * g["kw"] * g["cinp"]) * g["coutp"]
    for s in range(5):
        flops += 2 * nb * geo[s + 1]["RIN"] * geo[s]["nv"] * geo[s]["coutp"]
    flops += 2 * nb * g5["L"] * g5["coutp"] + 2 * nb * g5["coutp"] * ncp
    bytes_accessed = (nb * r0p * k0p * 2 + nb * ncp * 4 +
                      sum(int(np.prod(op.shape)) * op.dtype.itemsize
                          for op in vmem_ops + hbm_ops))

    fused_call = pl.pallas_call(
        kernel,
        out_shape=jax.ShapeDtypeStruct((nb, ncp), jnp.float32),
        in_specs=in_specs,
        out_specs=vmem_spec,
        scratch_shapes=scratch_shapes,
        compiler_params=pltpu.CompilerParams(vmem_limit_bytes=16 * 1024 * 1024),
        cost_estimate=pl.CostEstimate(flops=int(flops), transcendentals=0,
                                      bytes_accessed=int(bytes_accessed)),
    )
    # TODO(synk): on v7x (2 TensorCores) a size-nb "parallel" grid axis / core_map
    # batch split would roughly halve compute; intentionally not added because on
    # v5e/v6e (1 TC) the same grid is a serial loop of pure per-step overhead.

    def forward(x_nchw):
        # Host-side stage-0 im2col: one patch-extraction op per tower (3 XLA ops)
        # instead of ~30 pad/slice/concat ops.
        xs = x_nchw.astype(jnp.float32)
        cols_parts = [jnp.moveaxis(
            lax.conv_general_dilated_patches(xs, (kh, kw), (1, 1), "SAME"), 1, -1)
            for (kh, kw) in tower_sizes]
        cols = jnp.concatenate(cols_parts, axis=-1).reshape(nb, r0, k_tot)
        cols0 = jnp.pad(cols.astype(cdt), ((0, 0), (0, r0p - r0), (0, k0p - k_tot)))
        cols0 = cols0.reshape(nb * r0p, k0p)
        out = fused_call(cols0, *vmem_ops, *hbm_ops)
        return out[:, :n_classes]

    return forward


# --------------------------------------------------------------------- parameter init
def _init_conv_bn(key, cin, cout, kh, kw):
    ks = jax.random.split(key, 6)
    fan_in = cin * kh * kw
    w = jax.random.normal(ks[0], (cout, cin, kh, kw), jnp.float32) / np.sqrt(fan_in)
    b = 0.01 * jax.random.normal(ks[1], (cout,), jnp.float32)
    gamma = 1.0 + 0.1 * jax.random.normal(ks[2], (cout,), jnp.float32)
    beta = 0.1 * jax.random.normal(ks[3], (cout,), jnp.float32)
    mean = 0.1 * jax.random.normal(ks[4], (cout,), jnp.float32)
    var = 1.0 + 0.1 * jnp.abs(jax.random.normal(ks[5], (cout,), jnp.float32))
    return {"w": w, "b": b, "bn": (gamma, beta, mean, var)}


def init_params(key, n_classes):
    keys = jax.random.split(key, 10)
    initial_sizes = [(3, 3), (9, 1), (1, 11)]
    initial = [_init_conv_bn(keys[i], 1, 32, kh, kw)
               for i, (kh, kw) in enumerate(initial_sizes)]
    mid_cin = [96, 64, 96, 128, 160]
    mid_cout = [64, 96, 128, 160, 320]
    mid_k = [(3, 3)] * 4 + [(1, 1)]
    middle = [_init_conv_bn(keys[3 + i], mid_cin[i], mid_cout[i], *mid_k[i])
              for i in range(5)]
    hw = jax.random.normal(keys[8], (n_classes, 320), jnp.float32) / np.sqrt(320.0)
    hb = 0.01 * jax.random.normal(keys[9], (n_classes,), jnp.float32)
    return {"initial": initial, "middle": middle, "head": {"w": hw, "b": hb}}


# -------------------------------------------------------------------- pure-JAX reference
def _ref_conv_bn_relu(x_nchw, p):
    y = jax.lax.conv_general_dilated(
        x_nchw, p["w"], window_strides=(1, 1), padding="SAME",
        dimension_numbers=("NCHW", "OIHW", "NCHW"),
        precision=jax.lax.Precision.HIGHEST)
    y = y + p["b"][None, :, None, None]
    g, be, m, v = p["bn"]
    y = (y - m[None, :, None, None]) * (g[None, :, None, None]
         / jnp.sqrt(v[None, :, None, None] + _EPS)) + be[None, :, None, None]
    return jnp.maximum(y, 0.0)


def _ref_avg_pool(y, ph, pw):
    s = jax.lax.reduce_window(y, 0.0, jax.lax.add, (1, 1, ph, pw), (1, 1, ph, pw), "VALID")
    return s / float(ph * pw)


def ref_forward(params, x_nchw):
    outs = []
    for p in params["initial"]:
        y = _ref_conv_bn_relu(x_nchw, p)
        y = jnp.pad(y, ((0, 0), (0, 0), (0, 1), (0, 1)))   # ZeroPad2d((0,1,0,1))
        outs.append(_ref_avg_pool(y, 2, 2))
    x = jnp.concatenate(outs, axis=1)
    pools = [(2, 2), (2, 2), (2, 1), (2, 1)]
    n_mid = len(params["middle"])
    for i, p in enumerate(params["middle"]):
        y = _ref_conv_bn_relu(x, p)
        if i < n_mid - 1:
            x = _ref_avg_pool(y, *pools[i])
        else:
            x = jnp.mean(y, axis=(2, 3), keepdims=True)    # AdaptiveAvgPool2d(1)
    x = x.reshape(x.shape[0], -1)
    return x @ params["head"]["w"].T + params["head"]["b"]


# ------------------------------------------------------------------------------- main
if __name__ == "__main__":
    key = jax.random.PRNGKey(0)
    pkey, xkey = jax.random.split(key)
    n_classes = 10
    params = init_params(pkey, n_classes)

    # MFCC-like input, NCHW as in PyTorch: batch=2, 1 channel, 32 "mel" rows, 16 frames.
    x = jax.random.normal(xkey, (2, 1, 32, 16), jnp.float32)

    fwd = jax.jit(build_fc_mfcc(params, batch=2, in_hw=(32, 16)))
    out = jax.block_until_ready(fwd(x))
    assert out.shape == (2, n_classes)

    ref = jax.block_until_ready(ref_forward(params, x))
    err = float(jnp.max(jnp.abs(out - ref)))
    tol = 5e-2 * (1.0 + float(jnp.max(jnp.abs(ref))))
    assert np.isfinite(err) and err <= tol, f"mismatch vs reference: {err} > {tol}"

    print("KERNEL_OK")
</pallas_src>

<mosaic_0001>
module attributes {stable_mosaic.version = 11 : i64} {
  func.func @kernel(%arg0: memref<1024x32xbf16, #tpu.memory_space<vmem>>, %arg1: memref<32x128xbf16, #tpu.memory_space<vmem>>, %arg2: memref<1x128xf32, #tpu.memory_space<vmem>>, %arg3: memref<1x128xf32, #tpu.memory_space<vmem>>, %arg4: memref<192x512xbf16, #tpu.memory_space<vmem>>, %arg5: memref<1x128xf32, #tpu.memory_space<vmem>>, %arg6: memref<1x128xf32, #tpu.memory_space<vmem>>, %arg7: memref<64x158xbf16, #tpu.memory_space<vmem>>, %arg8: memref<1x128xf32, #tpu.memory_space<vmem>>, %arg9: memref<1x128xf32, #tpu.memory_space<vmem>>, %arg10: memref<32x46xbf16, #tpu.memory_space<vmem>>, %arg11: memref<1x128xf32, #tpu.memory_space<vmem>>, %arg12: memref<1x128xf32, #tpu.memory_space<vmem>>, %arg13: memref<16x14xbf16, #tpu.memory_space<vmem>>, %arg14: memref<1x256xf32, #tpu.memory_space<vmem>>, %arg15: memref<1x256xf32, #tpu.memory_space<vmem>>, %arg16: memref<16x6xbf16, #tpu.memory_space<vmem>>, %arg17: memref<1x384xf32, #tpu.memory_space<vmem>>, %arg18: memref<1x384xf32, #tpu.memory_space<vmem>>, %arg19: memref<2x18xbf16, #tpu.memory_space<vmem>>, %arg20: memref<1x128xf32, #tpu.memory_space<vmem>>, %arg21: memref<1152x128xbf16, #tpu.memory_space<any>>, %arg22: memref<1152x128xbf16, #tpu.memory_space<any>>, %arg23: memref<1152x128xbf16, #tpu.memory_space<any>>, %arg24: memref<1152x256xbf16, #tpu.memory_space<any>>, %arg25: memref<256x384xbf16, #tpu.memory_space<any>>, %arg26: memref<384x128xbf16, #tpu.memory_space<any>>, %arg27: memref<2x128xf32, #tpu.memory_space<vmem>>, %arg28: memref<384x128xbf16, #tpu.memory_space<vmem>>, %arg29: memref<128x128xbf16, #tpu.memory_space<vmem>>, %arg30: memref<64x128xbf16, #tpu.memory_space<vmem>>, %arg31: memref<32x128xbf16, #tpu.memory_space<vmem>>, %arg32: memref<32x256xbf16, #tpu.memory_space<vmem>>, %arg33: memref<1152x128xbf16, #tpu.memory_space<vmem>>, %arg34: memref<1152x128xbf16, #tpu.memory_space<vmem>>, %arg35: memref<1152x128xbf16, #tpu.memory_space<vmem>>, %arg36: memref<1152x256xbf16, #tpu.memory_space<vmem>>, %arg37: memref<256x384xbf16, #tpu.memory_space<vmem>>, %arg38: memref<384x128xbf16, #tpu.memory_space<vmem>>, %arg39: memref<6x!tpu.dma_semaphore, #tpu.memory_space<semaphore_mem>>) attributes {dimension_semantics = [], scalar_prefetch = 0 : i64, scratch_operands = 12 : i64, tpu.core_type = #tpu.core_type<tc>} {
    %c0_i32 = arith.constant 0 : i32
    %0 = tpu.memref_slice %arg39[%c0_i32] : memref<6x!tpu.dma_semaphore, #tpu.memory_space<semaphore_mem>> -> memref<1x!tpu.dma_semaphore, #tpu.memory_space<semaphore_mem>>
    %1 = tpu.memref_squeeze %0 : memref<1x!tpu.dma_semaphore, #tpu.memory_space<semaphore_mem>> -> memref<!tpu.dma_semaphore, #tpu.memory_space<semaphore_mem>>
    tpu.enqueue_dma source(%arg21 : memref<1152x128xbf16, #tpu.memory_space<any>>) target(%arg33 : memref<1152x128xbf16, #tpu.memory_space<vmem>>) target_semaphore(%1 : memref<!tpu.dma_semaphore, #tpu.memory_space<semaphore_mem>>)
    %c1_i32 = arith.constant 1 : i32
    %2 = tpu.memref_slice %arg39[%c1_i32] : memref<6x!tpu.dma_semaphore, #tpu.memory_space<semaphore_mem>> -> memref<1x!tpu.dma_semaphore, #tpu.memory_space<semaphore_mem>>
    %3 = tpu.memref_squeeze %2 : memref<1x!tpu.dma_semaphore, #tpu.memory_space<semaphore_mem>> -> memref<!tpu.dma_semaphore, #tpu.memory_space<semaphore_mem>>
    tpu.enqueue_dma source(%arg22 : memref<1152x128xbf16, #tpu.memory_space<any>>) target(%arg34 : memref<1152x128xbf16, #tpu.memory_space<vmem>>) target_semaphore(%3 : memref<!tpu.dma_semaphore, #tpu.memory_space<semaphore_mem>>)
    %c2_i32 = arith.constant 2 : i32
    %4 = tpu.memref_slice %arg39[%c2_i32] : memref<6x!tpu.dma_semaphore, #tpu.memory_space<semaphore_mem>> -> memref<1x!tpu.dma_semaphore, #tpu.memory_space<semaphore_mem>>
    %5 = tpu.memref_squeeze %4 : memref<1x!tpu.dma_semaphore, #tpu.memory_space<semaphore_mem>> -> memref<!tpu.dma_semaphore, #tpu.memory_space<semaphore_mem>>
    tpu.enqueue_dma source(%arg23 : memref<1152x128xbf16, #tpu.memory_space<any>>) target(%arg35 : memref<1152x128xbf16, #tpu.memory_space<vmem>>) target_semaphore(%5 : memref<!tpu.dma_semaphore, #tpu.memory_space<semaphore_mem>>)
    %c3_i32 = arith.constant 3 : i32
    %6 = tpu.memref_slice %arg39[%c3_i32] : memref<6x!tpu.dma_semaphore, #tpu.memory_space<semaphore_mem>> -> memref<1x!tpu.dma_semaphore, #tpu.memory_space<semaphore_mem>>
    %7 = tpu.memref_squeeze %6 : memref<1x!tpu.dma_semaphore, #tpu.memory_space<semaphore_mem>> -> memref<!tpu.dma_semaphore, #tpu.memory_space<semaphore_mem>>
    tpu.enqueue_dma source(%arg24 : memref<1152x256xbf16, #tpu.memory_space<any>>) target(%arg36 : memref<1152x256xbf16, #tpu.memory_space<vmem>>) target_semaphore(%7 : memref<!tpu.dma_semaphore, #tpu.memory_space<semaphore_mem>>)
    %c4_i32 = arith.constant 4 : i32
    %8 = tpu.memref_slice %arg39[%c4_i32] : memref<6x!tpu.dma_semaphore, #tpu.memory_space<semaphore_mem>> -> memref<1x!tpu.dma_semaphore, #tpu.memory_space<semaphore_mem>>
    %9 = tpu.memref_squeeze %8 : memref<1x!tpu.dma_semaphore, #tpu.memory_space<semaphore_mem>> -> memref<!tpu.dma_semaphore, #tpu.memory_space<semaphore_mem>>
    tpu.enqueue_dma source(%arg25 : memref<256x384xbf16, #tpu.memory_space<any>>) target(%arg37 : memref<256x384xbf16, #tpu.memory_space<vmem>>) target_semaphore(%9 : memref<!tpu.dma_semaphore, #tpu.memory_space<semaphore_mem>>)
    %c5_i32 = arith.constant 5 : i32
    %10 = tpu.memref_slice %arg39[%c5_i32] : memref<6x!tpu.dma_semaphore, #tpu.memory_space<semaphore_mem>> -> memref<1x!tpu.dma_semaphore, #tpu.memory_space<semaphore_mem>>
    %11 = tpu.memref_squeeze %10 : memref<1x!tpu.dma_semaphore, #tpu.memory_space<semaphore_mem>> -> memref<!tpu.dma_semaphore, #tpu.memory_space<semaphore_mem>>
    tpu.enqueue_dma source(%arg26 : memref<384x128xbf16, #tpu.memory_space<any>>) target(%arg38 : memref<384x128xbf16, #tpu.memory_space<vmem>>) target_semaphore(%11 : memref<!tpu.dma_semaphore, #tpu.memory_space<semaphore_mem>>)
    %c0 = arith.constant 0 : index
    %c0_0 = arith.constant 0 : index
    %12 = vector.load %arg1[%c0, %c0_0] : memref<32x128xbf16, #tpu.memory_space<vmem>>, vector<32x128xbf16>
    %c0_1 = arith.constant 0 : index
    %c0_2 = arith.constant 0 : index
    %13 = vector.load %arg2[%c0_1, %c0_2] : memref<1x128xf32, #tpu.memory_space<vmem>>, vector<1x128xf32>
    %c0_3 = arith.constant 0 : index
    %c0_4 = arith.constant 0 : index
    %14 = vector.load %arg3[%c0_3, %c0_4] : memref<1x128xf32, #tpu.memory_space<vmem>>, vector<1x128xf32>
    %c0_5 = arith.constant 0 : index
    %c0_6 = arith.constant 0 : index
    %15 = vector.load %arg0[%c0_5, %c0_6] : memref<1024x32xbf16, #tpu.memory_space<vmem>>, vector<1024x32xbf16>
    %cst = arith.constant dense<0.000000e+00> : vector<1024x128xf32>
    %16 = tpu.matmul %15, %12, %cst {dimension_numbers = #tpu.dot_dimension_numbers<[1], [0], [0], [1], [0, 0, 1, 1], [], []>} : vector<1024x32xbf16>, vector<32x128xbf16>, vector<1024x128xf32> -> vector<1024x128xf32>
    %17 = vector.broadcast %13 : vector<1x128xf32> to vector<1024x128xf32>
    %18 = arith.mulf %16, %17 : vector<1024x128xf32>
    %19 = vector.broadcast %14 : vector<1x128xf32> to vector<1024x128xf32>
    %20 = arith.addf %18, %19 : vector<1024x128xf32>
    %cst_7 = arith.constant 0.000000e+00 : f32
    %21 = vector.broadcast %cst_7 : f32 to vector<1024x128xf32>
    %22 = arith.maximumf %20, %21 : vector<1024x128xf32>
    %23 = arith.truncf %22 : vector<1024x128xf32> to vector<1024x128xbf16>
    %c0_8 = arith.constant 0 : index
    %c0_9 = arith.constant 0 : index
    %24 = vector.load %arg4[%c0_8, %c0_9] : memref<192x512xbf16, #tpu.memory_space<vmem>>, vector<192x512xbf16>
    %25 = vector.extract_strided_slice %23 {offsets = [0, 0], sizes = [512, 128], strides = [1, 1]} : vector<1024x128xbf16> to vector<512x128xbf16>
    %cst_10 = arith.constant dense<0.000000e+00> : vector<192x128xf32>
    %26 = tpu.matmul %24, %25, %cst_10 {dimension_numbers = #tpu.dot_dimension_numbers<[1], [0], [0], [1], [0, 0, 1, 1], [], []>} : vector<192x512xbf16>, vector<512x128xbf16>, vector<192x128xf32> -> vector<192x128xf32>
    %27 = arith.truncf %26 : vector<192x128xf32> to vector<192x128xbf16>
    %c0_11 = arith.constant 0 : index
    %c0_12 = arith.constant 0 : index
    %28 = vector.load %arg28[%c0_11, %c0_12] : memref<384x128xbf16, #tpu.memory_space<vmem>>, vector<192x128xbf16>
    tpu.vector_store %arg28[%c0_11, %c0_12], %27 {strides = array<i32>} : memref<384x128xbf16, #tpu.memory_space<vmem>>, vector<192x128xbf16>,
    %29 = vector.extract_strided_slice %23 {offsets = [512, 0], sizes = [512, 128], strides = [1, 1]} : vector<1024x128xbf16> to vector<512x128xbf16>
    %cst_13 = arith.constant dense<0.000000e+00> : vector<192x128xf32>
    %30 = tpu.matmul %24, %29, %cst_13 {dimension_numbers = #tpu.dot_dimension_numbers<[1], [0], [0], [1], [0, 0, 1, 1], [], []>} : vector<192x512xbf16>, vector<512x128xbf16>, vector<192x128xf32> -> vector<192x128xf32>
    %31 = arith.truncf %30 : vector<192x128xf32> to vector<192x128xbf16>
    %c192 = arith.constant 192 : index
    %c0_14 = arith.constant 0 : index
    %32 = vector.load %arg28[%c192, %c0_14] : memref<384x128xbf16, #tpu.memory_space<vmem>>, vector<192x128xbf16>
    tpu.vector_store %arg28[%c192, %c0_14], %31 {strides = array<i32>} : memref<384x128xbf16, #tpu.memory_space<vmem>>, vector<192x128xbf16>,
    %c0_i32_15 = arith.constant 0 : i32
    %33 = tpu.memref_slice %arg39[%c0_i32_15] : memref<6x!tpu.dma_semaphore, #tpu.memory_space<semaphore_mem>> -> memref<1x!tpu.dma_semaphore, #tpu.memory_space<semaphore_mem>>
    %34 = tpu.memref_squeeze %33 : memref<1x!tpu.dma_semaphore, #tpu.memory_space<semaphore_mem>> -> memref<!tpu.dma_semaphore, #tpu.memory_space<semaphore_mem>>
    tpu.wait_dma2 semaphore(%34 : memref<!tpu.dma_semaphore, #tpu.memory_space<semaphore_mem>>) src(%arg21 : memref<1152x128xbf16, #tpu.memory_space<any>>) dst(%arg33 : memref<1152x128xbf16, #tpu.memory_space<vmem>>)
    %c0_16 = arith.constant 0 : index
    %c0_17 = arith.constant 0 : index
    %35 = vector.load %arg5[%c0_16, %c0_17] : memref<1x128xf32, #tpu.memory_space<vmem>>, vector<1x128xf32>
    %c0_18 = arith.constant 0 : index
    %c0_19 = arith.constant 0 : index
    %36 = vector.load %arg6[%c0_18, %c0_19] : memref<1x128xf32, #tpu.memory_space<vmem>>, vector<1x128xf32>
    %c0_20 = arith.constant 0 : index
    %c0_21 = arith.constant 0 : index
    %37 = vector.load %arg33[%c0_20, %c0_21] : memref<1152x128xbf16, #tpu.memory_space<vmem>>, vector<1152x128xbf16>
    %c0_22 = arith.constant 0 : index
    %c0_23 = arith.constant 0 : index
    %38 = vector.load %arg28[%c0_22, %c0_23] : memref<384x128xbf16, #tpu.memory_space<vmem>>, vector<350x128xbf16>
    %c1 = arith.constant 1 : index
    %c0_24 = arith.constant 0 : index
    %39 = vector.load %arg28[%c1, %c0_24] : memref<384x128xbf16, #tpu.memory_space<vmem>>, vector<350x128xbf16>
    %c2 = arith.constant 2 : index
    %c0_25 = arith.constant 0 : index
    %40 = vector.load %arg28[%c2, %c0_25] : memref<384x128xbf16, #tpu.memory_space<vmem>>, vector<350x128xbf16>
    %c10 = arith.constant 10 : index
    %c0_26 = arith.constant 0 : index
    %41 = vector.load %arg28[%c10, %c0_26] : memref<384x128xbf16, #tpu.memory_space<vmem>>, vector<350x128xbf16>
    %c11 = arith.constant 11 : index
    %c0_27 = arith.constant 0 : index
    %42 = vector.load %arg28[%c11, %c0_27] : memref<384x128xbf16, #tpu.memory_space<vmem>>, vector<350x128xbf16>
    %c12 = arith.constant 12 : index
    %c0_28 = arith.constant 0 : index
    %43 = vector.load %arg28[%c12, %c0_28] : memref<384x128xbf16, #tpu.memory_space<vmem>>, vector<350x128xbf16>
    %c20 = arith.constant 20 : index
    %c0_29 = arith.constant 0 : index
    %44 = vector.load %arg28[%c20, %c0_29] : memref<384x128xbf16, #tpu.memory_space<vmem>>, vector<350x128xbf16>
    %c21 = arith.constant 21 : index
    %c0_30 = arith.constant 0 : index
    %45 = vector.load %arg28[%c21, %c0_30] : memref<384x128xbf16, #tpu.memory_space<vmem>>, vector<350x128xbf16>
    %c22 = arith.constant 22 : index
    %c0_31 = arith.constant 0 : index
    %46 = vector.load %arg28[%c22, %c0_31] : memref<384x128xbf16, #tpu.memory_space<vmem>>, vector<350x128xbf16>
    %47 = tpu.concatenate %38, %39, %40, %41, %42, %43, %44, %45, %46 in 1 : vector<350x128xbf16>, vector<350x128xbf16>, vector<350x128xbf16>, vector<350x128xbf16>, vector<350x128xbf16>, vector<350x128xbf16>, vector<350x128xbf16>, vector<350x128xbf16>, vector<350x128xbf16> -> vector<350x1152xbf16>
    %cst_32 = arith.constant dense<0.000000e+00> : vector<350x128xf32>
    %48 = tpu.matmul %47, %37, %cst_32 {dimension_numbers = #tpu.dot_dimension_numbers<[1], [0], [0], [1], [0, 0, 1, 1], [], []>} : vector<350x1152xbf16>, vector<1152x128xbf16>, vector<350x128xf32> -> vector<350x128xf32>
    %49 = vector.broadcast %35 : vector<1x128xf32> to vector<350x128xf32>
    %50 = arith.mulf %48, %49 : vector<350x128xf32>
    %51 = vector.broadcast %36 : vector<1x128xf32> to vector<350x128xf32>
    %52 = arith.addf %50, %51 : vector<350x128xf32>
    %cst_33 = arith.constant 0.000000e+00 : f32
    %53 = vector.broadcast %cst_33 : f32 to vector<350x128xf32>
    %54 = arith.maximumf %52, %53 : vector<350x128xf32>
    %c0_34 = arith.constant 0 : index
    %c0_35 = arith.constant 0 : index
    %55 = vector.load %arg7[%c0_34, %c0_35] : memref<64x158xbf16, #tpu.memory_space<vmem>>, vector<64x158xbf16>
    %56 = arith.truncf %54 : vector<350x128xf32> to vector<350x128xbf16>
    %57 = vector.extract_strided_slice %56 {offsets = [0, 0], sizes = [158, 128], strides = [1, 1]} : vector<350x128xbf16> to vector<158x128xbf16>
    %cst_36 = arith.constant dense<0.000000e+00> : vector<64x128xf32>
    %58 = tpu.matmul %55, %57, %cst_36 {dimension_numbers = #tpu.dot_dimension_numbers<[1], [0], [0], [1], [0, 0, 1, 1], [], []>} : vector<64x158xbf16>, vector<158x128xbf16>, vector<64x128xf32> -> vector<64x128xf32>
    %59 = arith.truncf %58 : vector<64x128xf32> to vector<64x128xbf16>
    %c0_37 = arith.constant 0 : index
    %c0_38 = arith.constant 0 : index
    %60 = vector.load %arg29[%c0_37, %c0_38] : memref<128x128xbf16, #tpu.memory_space<vmem>>, vector<64x128xbf16>
    tpu.vector_store %arg29[%c0_37, %c0_38], %59 {strides = array<i32>} : memref<128x128xbf16, #tpu.memory_space<vmem>>, vector<64x128xbf16>,
    %61 = vector.extract_strided_slice %56 {offsets = [192, 0], sizes = [158, 128], strides = [1, 1]} : vector<350x128xbf16> to vector<158x128xbf16>
    %cst_39 = arith.constant dense<0.000000e+00> : vector<64x128xf32>
    %62 = tpu.matmul %55, %61, %cst_39 {dimension_numbers = #tpu.dot_dimension_numbers<[1], [0], [0], [1], [0, 0, 1, 1], [], []>} : vector<64x158xbf16>, vector<158x128xbf16>, vector<64x128xf32> -> vector<64x128xf32>
    %63 = arith.truncf %62 : vector<64x128xf32> to vector<64x128xbf16>
    %c64 = arith.constant 64 : index
    %c0_40 = arith.constant 0 : index
    %64 = vector.load %arg29[%c64, %c0_40] : memref<128x128xbf16, #tpu.memory_space<vmem>>, vector<64x128xbf16>
    tpu.vector_store %arg29[%c64, %c0_40], %63 {strides = array<i32>} : memref<128x128xbf16, #tpu.memory_space<vmem>>, vector<64x128xbf16>,
    %c1_i32_41 = arith.constant 1 : i32
    %65 = tpu.memref_slice %arg39[%c1_i32_41] : memref<6x!tpu.dma_semaphore, #tpu.memory_space<semaphore_mem>> -> memref<1x!tpu.dma_semaphore, #tpu.memory_space<semaphore_mem>>
    %66 = tpu.memref_squeeze %65 : memref<1x!tpu.dma_semaphore, #tpu.memory_space<semaphore_mem>> -> memref<!tpu.dma_semaphore, #tpu.memory_space<semaphore_mem>>
    tpu.wait_dma2 semaphore(%66 : memref<!tpu.dma_semaphore, #tpu.memory_space<semaphore_mem>>) src(%arg22 : memref<1152x128xbf16, #tpu.memory_space<any>>) dst(%arg34 : memref<1152x128xbf16, #tpu.memory_space<vmem>>)
    %c0_42 = arith.constant 0 : index
    %c0_43 = arith.constant 0 : index
    %67 = vector.load %arg8[%c0_42, %c0_43] : memref<1x128xf32, #tpu.memory_space<vmem>>, vector<1x128xf32>
    %c0_44 = arith.constant 0 : index
    %c0_45 = arith.constant 0 : index
    %68 = vector.load %arg9[%c0_44, %c0_45] : memref<1x128xf32, #tpu.memory_space<vmem>>, vector<1x128xf32>
    %c0_46 = arith.constant 0 : index
    %c0_47 = arith.constant 0 : index
    %69 = vector.load %arg34[%c0_46, %c0_47] : memref<1152x128xbf16, #tpu.memory_space<vmem>>, vector<1152x128xbf16>
    %c0_48 = arith.constant 0 : index
    %c0_49 = arith.constant 0 : index
    %70 = vector.load %arg29[%c0_48, %c0_49] : memref<128x128xbf16, #tpu.memory_space<vmem>>, vector<110x128xbf16>
    %c1_50 = arith.constant 1 : index
    %c0_51 = arith.constant 0 : index
    %71 = vector.load %arg29[%c1_50, %c0_51] : memref<128x128xbf16, #tpu.memory_space<vmem>>, vector<110x128xbf16>
    %c2_52 = arith.constant 2 : index
    %c0_53 = arith.constant 0 : index
    %72 = vector.load %arg29[%c2_52, %c0_53] : memref<128x128xbf16, #tpu.memory_space<vmem>>, vector<110x128xbf16>
    %c6 = arith.constant 6 : index
    %c0_54 = arith.constant 0 : index
    %73 = vector.load %arg29[%c6, %c0_54] : memref<128x128xbf16, #tpu.memory_space<vmem>>, vector<110x128xbf16>
    %c7 = arith.constant 7 : index
    %c0_55 = arith.constant 0 : index
    %74 = vector.load %arg29[%c7, %c0_55] : memref<128x128xbf16, #tpu.memory_space<vmem>>, vector<110x128xbf16>
    %c8 = arith.constant 8 : index
    %c0_56 = arith.constant 0 : index
    %75 = vector.load %arg29[%c8, %c0_56] : memref<128x128xbf16, #tpu.memory_space<vmem>>, vector<110x128xbf16>
    %c12_57 = arith.constant 12 : index
    %c0_58 = arith.constant 0 : index
    %76 = vector.load %arg29[%c12_57, %c0_58] : memref<128x128xbf16, #tpu.memory_space<vmem>>, vector<110x128xbf16>
    %c13 = arith.constant 13 : index
    %c0_59 = arith.constant 0 : index
    %77 = vector.load %arg29[%c13, %c0_59] : memref<128x128xbf16, #tpu.memory_space<vmem>>, vector<110x128xbf16>
    %c14 = arith.constant 14 : index
    %c0_60 = arith.constant 0 : index
    %78 = vector.load %arg29[%c14, %c0_60] : memref<128x128xbf16, #tpu.memory_space<vmem>>, vector<110x128xbf16>
    %79 = tpu.concatenate %70, %71, %72, %73, %74, %75, %76, %77, %78 in 1 : vector<110x128xbf16>, vector<110x128xbf16>, vector<110x128xbf16>, vector<110x128xbf16>, vector<110x128xbf16>, vector<110x128xbf16>, vector<110x128xbf16>, vector<110x128xbf16>, vector<110x128xbf16> -> vector<110x1152xbf16>
    %cst_61 = arith.constant dense<0.000000e+00> : vector<110x128xf32>
    %80 = tpu.matmul %79, %69, %cst_61 {dimension_numbers = #tpu.dot_dimension_numbers<[1], [0], [0], [1], [0, 0, 1, 1], [], []>} : vector<110x1152xbf16>, vector<1152x128xbf16>, vector<110x128xf32> -> vector<110x128xf32>
    %81 = vector.broadcast %67 : vector<1x128xf32> to vector<110x128xf32>
    %82 = arith.mulf %80, %81 : vector<110x128xf32>
    %83 = vector.broadcast %68 : vector<1x128xf32> to vector<110x128xf32>
    %84 = arith.addf %82, %83 : vector<110x128xf32>
    %cst_62 = arith.constant 0.000000e+00 : f32
    %85 = vector.broadcast %cst_62 : f32 to vector<110x128xf32>
    %86 = arith.maximumf %84, %85 : vector<110x128xf32>
    %c0_63 = arith.constant 0 : index
    %c0_64 = arith.constant 0 : index
    %87 = vector.load %arg10[%c0_63, %c0_64] : memref<32x46xbf16, #tpu.memory_space<vmem>>, vector<32x46xbf16>
    %88 = arith.truncf %86 : vector<110x128xf32> to vector<110x128xbf16>
    %89 = vector.extract_strided_slice %88 {offsets = [0, 0], sizes = [46, 128], strides = [1, 1]} : vector<110x128xbf16> to vector<46x128xbf16>
    %cst_65 = arith.constant dense<0.000000e+00> : vector<32x128xf32>
    %90 = tpu.matmul %87, %89, %cst_65 {dimension_numbers = #tpu.dot_dimension_numbers<[1], [0], [0], [1], [0, 0, 1, 1], [], []>} : vector<32x46xbf16>, vector<46x128xbf16>, vector<32x128xf32> -> vector<32x128xf32>
    %91 = arith.truncf %90 : vector<32x128xf32> to vector<32x128xbf16>
    %c0_66 = arith.constant 0 : index
    %c0_67 = arith.constant 0 : index
    %92 = vector.load %arg30[%c0_66, %c0_67] : memref<64x128xbf16, #tpu.memory_space<vmem>>, vector<32x128xbf16>
    tpu.vector_store %arg30[%c0_66, %c0_67], %91 {strides = array<i32>} : memref<64x128xbf16, #tpu.memory_space<vmem>>, vector<32x128xbf16>,
    %93 = vector.extract_strided_slice %88 {offsets = [64, 0], sizes = [46, 128], strides = [1, 1]} : vector<110x128xbf16> to vector<46x128xbf16>
    %cst_68 = arith.constant dense<0.000000e+00> : vector<32x128xf32>
    %94 = tpu.matmul %87, %93, %cst_68 {dimension_numbers = #tpu.dot_dimension_numbers<[1], [0], [0], [1], [0, 0, 1, 1], [], []>} : vector<32x46xbf16>, vector<46x128xbf16>, vector<32x128xf32> -> vector<32x128xf32>
    %95 = arith.truncf %94 : vector<32x128xf32> to vector<32x128xbf16>
    %c32 = arith.constant 32 : index
    %c0_69 = arith.constant 0 : index
    %96 = vector.load %arg30[%c32, %c0_69] : memref<64x128xbf16, #tpu.memory_space<vmem>>, vector<32x128xbf16>
    tpu.vector_store %arg30[%c32, %c0_69], %95 {strides = array<i32>} : memref<64x128xbf16, #tpu.memory_space<vmem>>, vector<32x128xbf16>,
    %c2_i32_70 = arith.constant 2 : i32
    %97 = tpu.memref_slice %arg39[%c2_i32_70] : memref<6x!tpu.dma_semaphore, #tpu.memory_space<semaphore_mem>> -> memref<1x!tpu.dma_semaphore, #tpu.memory_space<semaphore_mem>>
    %98 = tpu.memref_squeeze %97 : memref<1x!tpu.dma_semaphore, #tpu.memory_space<semaphore_mem>> -> memref<!tpu.dma_semaphore, #tpu.memory_space<semaphore_mem>>
    tpu.wait_dma2 semaphore(%98 : memref<!tpu.dma_semaphore, #tpu.memory_space<semaphore_mem>>) src(%arg23 : memref<1152x128xbf16, #tpu.memory_space<any>>) dst(%arg35 : memref<1152x128xbf16, #tpu.memory_space<vmem>>)
    %c0_71 = arith.constant 0 : index
    %c0_72 = arith.constant 0 : index
    %99 = vector.load %arg11[%c0_71, %c0_72] : memref<1x128xf32, #tpu.memory_space<vmem>>, vector<1x128xf32>
    %c0_73 = arith.constant 0 : index
    %c0_74 = arith.constant 0 : index
    %100 = vector.load %arg12[%c0_73, %c0_74] : memref<1x128xf32, #tpu.memory_space<vmem>>, vector<1x128xf32>
    %c0_75 = arith.constant 0 : index
    %c0_76 = arith.constant 0 : index
    %101 = vector.load %arg35[%c0_75, %c0_76] : memref<1152x128xbf16, #tpu.memory_space<vmem>>, vector<1152x128xbf16>
    %c0_77 = arith.constant 0 : index
    %c0_78 = arith.constant 0 : index
    %102 = vector.load %arg30[%c0_77, %c0_78] : memref<64x128xbf16, #tpu.memory_space<vmem>>, vector<46x128xbf16>
    %c1_79 = arith.constant 1 : index
    %c0_80 = arith.constant 0 : index
    %103 = vector.load %arg30[%c1_79, %c0_80] : memref<64x128xbf16, #tpu.memory_space<vmem>>, vector<46x128xbf16>
    %c2_81 = arith.constant 2 : index
    %c0_82 = arith.constant 0 : index
    %104 = vector.load %arg30[%c2_81, %c0_82] : memref<64x128xbf16, #tpu.memory_space<vmem>>, vector<46x128xbf16>
    %c4 = arith.constant 4 : index
    %c0_83 = arith.constant 0 : index
    %105 = vector.load %arg30[%c4, %c0_83] : memref<64x128xbf16, #tpu.memory_space<vmem>>, vector<46x128xbf16>
    %c5 = arith.constant 5 : index
    %c0_84 = arith.constant 0 : index
    %106 = vector.load %arg30[%c5, %c0_84] : memref<64x128xbf16, #tpu.memory_space<vmem>>, vector<46x128xbf16>
    %c6_85 = arith.constant 6 : index
    %c0_86 = arith.constant 0 : index
    %107 = vector.load %arg30[%c6_85, %c0_86] : memref<64x128xbf16, #tpu.memory_space<vmem>>, vector<46x128xbf16>
    %c8_87 = arith.constant 8 : index
    %c0_88 = arith.constant 0 : index
    %108 = vector.load %arg30[%c8_87, %c0_88] : memref<64x128xbf16, #tpu.memory_space<vmem>>, vector<46x128xbf16>
    %c9 = arith.constant 9 : index
    %c0_89 = arith.constant 0 : index
    %109 = vector.load %arg30[%c9, %c0_89] : memref<64x128xbf16, #tpu.memory_space<vmem>>, vector<46x128xbf16>
    %c10_90 = arith.constant 10 : index
    %c0_91 = arith.constant 0 : index
    %110 = vector.load %arg30[%c10_90, %c0_91] : memref<64x128xbf16, #tpu.memory_space<vmem>>, vector<46x128xbf16>
    %111 = tpu.concatenate %102, %103, %104, %105, %106, %107, %108, %109, %110 in 1 : vector<46x128xbf16>, vector<46x128xbf16>, vector<46x128xbf16>, vector<46x128xbf16>, vector<46x128xbf16>, vector<46x128xbf16>, vector<46x128xbf16>, vector<46x128xbf16>, vector<46x128xbf16> -> vector<46x1152xbf16>
    %cst_92 = arith.constant dense<0.000000e+00> : vector<46x128xf32>
    %112 = tpu.matmul %111, %101, %cst_92 {dimension_numbers = #tpu.dot_dimension_numbers<[1], [0], [0], [1], [0, 0, 1, 1], [], []>} : vector<46x1152xbf16>, vector<1152x128xbf16>, vector<46x128xf32> -> vector<46x128xf32>
    %113 = vector.broadcast %99 : vector<1x128xf32> to vector<46x128xf32>
    %114 = arith.mulf %112, %113 : vector<46x128xf32>
    %115 = vector.broadcast %100 : vector<1x128xf32> to vector<46x128xf32>
    %116 = arith.addf %114, %115 : vector<46x128xf32>
    %cst_93 = arith.constant 0.000000e+00 : f32
    %117 = vector.broadcast %cst_93 : f32 to vector<46x128xf32>
    %118 = arith.maximumf %116, %117 : vector<46x128xf32>
    %c0_94 = arith.constant 0 : index
    %c0_95 = arith.constant 0 : index
    %119 = vector.load %arg13[%c0_94, %c0_95] : memref<16x14xbf16, #tpu.memory_space<vmem>>, vector<16x14xbf16>
    %120 = arith.truncf %118 : vector<46x128xf32> to vector<46x128xbf16>
    %121 = vector.extract_strided_slice %120 {offsets = [0, 0], sizes = [14, 128], strides = [1, 1]} : vector<46x128xbf16> to vector<14x128xbf16>
    %cst_96 = arith.constant dense<0.000000e+00> : vector<16x128xf32>
    %122 = tpu.matmul %119, %121, %cst_96 {dimension_numbers = #tpu.dot_dimension_numbers<[1], [0], [0], [1], [0, 0, 1, 1], [], []>} : vector<16x14xbf16>, vector<14x128xbf16>, vector<16x128xf32> -> vector<16x128xf32>
    %123 = arith.truncf %122 : vector<16x128xf32> to vector<16x128xbf16>
    %c0_97 = arith.constant 0 : index
    %c0_98 = arith.constant 0 : index
    %124 = vector.load %arg31[%c0_97, %c0_98] : memref<32x128xbf16, #tpu.memory_space<vmem>>, vector<16x128xbf16>
    tpu.vector_store %arg31[%c0_97, %c0_98], %123 {strides = array<i32>} : memref<32x128xbf16, #tpu.memory_space<vmem>>, vector<16x128xbf16>,
    %125 = vector.extract_strided_slice %120 {offsets = [32, 0], sizes = [14, 128], strides = [1, 1]} : vector<46x128xbf16> to vector<14x128xbf16>
    %cst_99 = arith.constant dense<0.000000e+00> : vector<16x128xf32>
    %126 = tpu.matmul %119, %125, %cst_99 {dimension_numbers = #tpu.dot_dimension_numbers<[1], [0], [0], [1], [0, 0, 1, 1], [], []>} : vector<16x14xbf16>, vector<14x128xbf16>, vector<16x128xf32> -> vector<16x128xf32>
    %127 = arith.truncf %126 : vector<16x128xf32> to vector<16x128xbf16>
    %c16 = arith.constant 16 : index
    %c0_100 = arith.constant 0 : index
    %128 = vector.load %arg31[%c16, %c0_100] : memref<32x128xbf16, #tpu.memory_space<vmem>>, vector<16x128xbf16>
    tpu.vector_store %arg31[%c16, %c0_100], %127 {strides = array<i32>} : memref<32x128xbf16, #tpu.memory_space<vmem>>, vector<16x128xbf16>,
    %c3_i32_101 = arith.constant 3 : i32
    %129 = tpu.memref_slice %arg39[%c3_i32_101] : memref<6x!tpu.dma_semaphore, #tpu.memory_space<semaphore_mem>> -> memref<1x!tpu.dma_semaphore, #tpu.memory_space<semaphore_mem>>
    %130 = tpu.memref_squeeze %129 : memref<1x!tpu.dma_semaphore, #tpu.memory_space<semaphore_mem>> -> memref<!tpu.dma_semaphore, #tpu.memory_space<semaphore_mem>>
    tpu.wait_dma2 semaphore(%130 : memref<!tpu.dma_semaphore, #tpu.memory_space<semaphore_mem>>) src(%arg24 : memref<1152x256xbf16, #tpu.memory_space<any>>) dst(%arg36 : memref<1152x256xbf16, #tpu.memory_space<vmem>>)
    %c0_102 = arith.constant 0 : index
    %c0_103 = arith.constant 0 : index
    %131 = vector.load %arg14[%c0_102, %c0_103] : memref<1x256xf32, #tpu.memory_space<vmem>>, vector<1x256xf32>
    %c0_104 = arith.constant 0 : index
    %c0_105 = arith.constant 0 : index
    %132 = vector.load %arg15[%c0_104, %c0_105] : memref<1x256xf32, #tpu.memory_space<vmem>>, vector<1x256xf32>
    %c0_106 = arith.constant 0 : index
    %c0_107 = arith.constant 0 : index
    %133 = vector.load %arg36[%c0_106, %c0_107] : memref<1152x256xbf16, #tpu.memory_space<vmem>>, vector<1152x256xbf16>
    %c0_108 = arith.constant 0 : index
    %c0_109 = arith.constant 0 : index
    %134 = vector.load %arg31[%c0_108, %c0_109] : memref<32x128xbf16, #tpu.memory_space<vmem>>, vector<22x128xbf16>
    %c1_110 = arith.constant 1 : index
    %c0_111 = arith.constant 0 : index
    %135 = vector.load %arg31[%c1_110, %c0_111] : memref<32x128xbf16, #tpu.memory_space<vmem>>, vector<22x128xbf16>
    %c2_112 = arith.constant 2 : index
    %c0_113 = arith.constant 0 : index
    %136 = vector.load %arg31[%c2_112, %c0_113] : memref<32x128xbf16, #tpu.memory_space<vmem>>, vector<22x128xbf16>
    %c4_114 = arith.constant 4 : index
    %c0_115 = arith.constant 0 : index
    %137 = vector.load %arg31[%c4_114, %c0_115] : memref<32x128xbf16, #tpu.memory_space<vmem>>, vector<22x128xbf16>
    %c5_116 = arith.constant 5 : index
    %c0_117 = arith.constant 0 : index
    %138 = vector.load %arg31[%c5_116, %c0_117] : memref<32x128xbf16, #tpu.memory_space<vmem>>, vector<22x128xbf16>
    %c6_118 = arith.constant 6 : index
    %c0_119 = arith.constant 0 : index
    %139 = vector.load %arg31[%c6_118, %c0_119] : memref<32x128xbf16, #tpu.memory_space<vmem>>, vector<22x128xbf16>
    %c8_120 = arith.constant 8 : index
    %c0_121 = arith.constant 0 : index
    %140 = vector.load %arg31[%c8_120, %c0_121] : memref<32x128xbf16, #tpu.memory_space<vmem>>, vector<22x128xbf16>
    %c9_122 = arith.constant 9 : index
    %c0_123 = arith.constant 0 : index
    %141 = vector.load %arg31[%c9_122, %c0_123] : memref<32x128xbf16, #tpu.memory_space<vmem>>, vector<22x128xbf16>
    %c10_124 = arith.constant 10 : index
    %c0_125 = arith.constant 0 : index
    %142 = vector.load %arg31[%c10_124, %c0_125] : memref<32x128xbf16, #tpu.memory_space<vmem>>, vector<22x128xbf16>
    %143 = tpu.concatenate %134, %135, %136, %137, %138, %139, %140, %141, %142 in 1 : vector<22x128xbf16>, vector<22x128xbf16>, vector<22x128xbf16>, vector<22x128xbf16>, vector<22x128xbf16>, vector<22x128xbf16>, vector<22x128xbf16>, vector<22x128xbf16>, vector<22x128xbf16> -> vector<22x1152xbf16>
    %cst_126 = arith.constant dense<0.000000e+00> : vector<22x256xf32>
    %144 = tpu.matmul %143, %133, %cst_126 {dimension_numbers = #tpu.dot_dimension_numbers<[1], [0], [0], [1], [0, 0, 1, 1], [], []>} : vector<22x1152xbf16>, vector<1152x256xbf16>, vector<22x256xf32> -> vector<22x256xf32>
    %145 = vector.broadcast %131 : vector<1x256xf32> to vector<22x256xf32>
    %146 = arith.mulf %144, %145 : vector<22x256xf32>
    %147 = vector.broadcast %132 : vector<1x256xf32> to vector<22x256xf32>
    %148 = arith.addf %146, %147 : vector<22x256xf32>
    %cst_127 = arith.constant 0.000000e+00 : f32
    %149 = vector.broadcast %cst_127 : f32 to vector<22x256xf32>
    %150 = arith.maximumf %148, %149 : vector<22x256xf32>
    %c0_128 = arith.constant 0 : index
    %c0_129 = arith.constant 0 : index
    %151 = vector.load %arg16[%c0_128, %c0_129] : memref<16x6xbf16, #tpu.memory_space<vmem>>, vector<16x6xbf16>
    %152 = arith.truncf %150 : vector<22x256xf32> to vector<22x256xbf16>
    %153 = vector.extract_strided_slice %152 {offsets = [0, 0], sizes = [6, 256], strides = [1, 1]} : vector<22x256xbf16> to vector<6x256xbf16>
    %cst_130 = arith.constant dense<0.000000e+00> : vector<16x256xf32>
    %154 = tpu.matmul %151, %153, %cst_130 {dimension_numbers = #tpu.dot_dimension_numbers<[1], [0], [0], [1], [0, 0, 1, 1], [], []>} : vector<16x6xbf16>, vector<6x256xbf16>, vector<16x256xf32> -> vector<16x256xf32>
    %155 = arith.truncf %154 : vector<16x256xf32> to vector<16x256xbf16>
    %c0_131 = arith.constant 0 : index
    %c0_132 = arith.constant 0 : index
    %156 = vector.load %arg32[%c0_131, %c0_132] : memref<32x256xbf16, #tpu.memory_space<vmem>>, vector<16x256xbf16>
    tpu.vector_store %arg32[%c0_131, %c0_132], %155 {strides = array<i32>} : memref<32x256xbf16, #tpu.memory_space<vmem>>, vector<16x256xbf16>,
    %157 = vector.extract_strided_slice %152 {offsets = [16, 0], sizes = [6, 256], strides = [1, 1]} : vector<22x256xbf16> to vector<6x256xbf16>
    %cst_133 = arith.constant dense<0.000000e+00> : vector<16x256xf32>
    %158 = tpu.matmul %151, %157, %cst_133 {dimension_numbers = #tpu.dot_dimension_numbers<[1], [0], [0], [1], [0, 0, 1, 1], [], []>} : vector<16x6xbf16>, vector<6x256xbf16>, vector<16x256xf32> -> vector<16x256xf32>
    %159 = arith.truncf %158 : vector<16x256xf32> to vector<16x256xbf16>
    %c16_134 = arith.constant 16 : index
    %c0_135 = arith.constant 0 : index
    %160 = vector.load %arg32[%c16_134, %c0_135] : memref<32x256xbf16, #tpu.memory_space<vmem>>, vector<16x256xbf16>
    tpu.vector_store %arg32[%c16_134, %c0_135], %159 {strides = array<i32>} : memref<32x256xbf16, #tpu.memory_space<vmem>>, vector<16x256xbf16>,
    %c4_i32_136 = arith.constant 4 : i32
    %161 = tpu.memref_slice %arg39[%c4_i32_136] : memref<6x!tpu.dma_semaphore, #tpu.memory_space<semaphore_mem>> -> memref<1x!tpu.dma_semaphore, #tpu.memory_space<semaphore_mem>>
    %162 = tpu.memref_squeeze %161 : memref<1x!tpu.dma_semaphore, #tpu.memory_space<semaphore_mem>> -> memref<!tpu.dma_semaphore, #tpu.memory_space<semaphore_mem>>
    tpu.wait_dma2 semaphore(%162 : memref<!tpu.dma_semaphore, #tpu.memory_space<semaphore_mem>>) src(%arg25 : memref<256x384xbf16, #tpu.memory_space<any>>) dst(%arg37 : memref<256x384xbf16, #tpu.memory_space<vmem>>)
    %c0_137 = arith.constant 0 : index
    %c0_138 = arith.constant 0 : index
    %163 = vector.load %arg17[%c0_137, %c0_138] : memref<1x384xf32, #tpu.memory_space<vmem>>, vector<1x384xf32>
    %c0_139 = arith.constant 0 : index
    %c0_140 = arith.constant 0 : index
    %164 = vector.load %arg18[%c0_139, %c0_140] : memref<1x384xf32, #tpu.memory_space<vmem>>, vector<1x384xf32>
    %c0_141 = arith.constant 0 : index
    %c0_142 = arith.constant 0 : index
    %165 = vector.load %arg37[%c0_141, %c0_142] : memref<256x384xbf16, #tpu.memory_space<vmem>>, vector<256x384xbf16>
    %c0_143 = arith.constant 0 : index
    %c0_144 = arith.constant 0 : index
    %166 = vector.load %arg32[%c0_143, %c0_144] : memref<32x256xbf16, #tpu.memory_space<vmem>>, vector<18x256xbf16>
    %cst_145 = arith.constant dense<0.000000e+00> : vector<18x384xf32>
    %167 = tpu.matmul %166, %165, %cst_145 {dimension_numbers = #tpu.dot_dimension_numbers<[1], [0], [0], [1], [0, 0, 1, 1], [], []>} : vector<18x256xbf16>, vector<256x384xbf16>, vector<18x384xf32> -> vector<18x384xf32>
    %168 = vector.broadcast %163 : vector<1x384xf32> to vector<18x384xf32>
    %169 = arith.mulf %167, %168 : vector<18x384xf32>
    %170 = vector.broadcast %164 : vector<1x384xf32> to vector<18x384xf32>
    %171 = arith.addf %169, %170 : vector<18x384xf32>
    %cst_146 = arith.constant 0.000000e+00 : f32
    %172 = vector.broadcast %cst_146 : f32 to vector<18x384xf32>
    %173 = arith.maximumf %171, %172 : vector<18x384xf32>
    %c5_i32_147 = arith.constant 5 : i32
    %174 = tpu.memref_slice %arg39[%c5_i32_147] : memref<6x!tpu.dma_semaphore, #tpu.memory_space<semaphore_mem>> -> memref<1x!tpu.dma_semaphore, #tpu.memory_space<semaphore_mem>>
    %175 = tpu.memref_squeeze %174 : memref<1x!tpu.dma_semaphore, #tpu.memory_space<semaphore_mem>> -> memref<!tpu.dma_semaphore, #tpu.memory_space<semaphore_mem>>
    tpu.wait_dma2 semaphore(%175 : memref<!tpu.dma_semaphore, #tpu.memory_space<semaphore_mem>>) src(%arg26 : memref<384x128xbf16, #tpu.memory_space<any>>) dst(%arg38 : memref<384x128xbf16, #tpu.memory_space<vmem>>)
    %c0_148 = arith.constant 0 : index
    %c0_149 = arith.constant 0 : index
    %176 = vector.load %arg19[%c0_148, %c0_149] : memref<2x18xbf16, #tpu.memory_space<vmem>>, vector<2x18xbf16>
    %c0_150 = arith.constant 0 : index
    %c0_151 = arith.constant 0 : index
    %177 = vector.load %arg20[%c0_150, %c0_151] : memref<1x128xf32, #tpu.memory_space<vmem>>, vector<1x128xf32>
    %178 = arith.truncf %173 : vector<18x384xf32> to vector<18x384xbf16>
    %cst_152 = arith.constant dense<0.000000e+00> : vector<2x384xf32>
    %179 = tpu.matmul %176, %178, %cst_152 {dimension_numbers = #tpu.dot_dimension_numbers<[1], [0], [0], [1], [0, 0, 1, 1], [], []>} : vector<2x18xbf16>, vector<18x384xbf16>, vector<2x384xf32> -> vector<2x384xf32>
    %180 = arith.truncf %179 : vector<2x384xf32> to vector<2x384xbf16>
    %c0_153 = arith.constant 0 : index
    %c0_154 = arith.constant 0 : index
    %181 = vector.load %arg38[%c0_153, %c0_154] : memref<384x128xbf16, #tpu.memory_space<vmem>>, vector<384x128xbf16>
    %cst_155 = arith.constant dense<0.000000e+00> : vector<2x128xf32>
    %182 = tpu.matmul %180, %181, %cst_155 {dimension_numbers = #tpu.dot_dimension_numbers<[1], [0], [0], [1], [0, 0, 1, 1], [], []>} : vector<2x384xbf16>, vector<384x128xbf16>, vector<2x128xf32> -> vector<2x128xf32>
    %183 = vector.broadcast %177 : vector<1x128xf32> to vector<2x128xf32>
    %184 = arith.addf %182, %183 : vector<2x128xf32>
    %c0_156 = arith.constant 0 : index
    %c0_157 = arith.constant 0 : index
    %185 = vector.load %arg27[%c0_156, %c0_157] : memref<2x128xf32, #tpu.memory_space<vmem>>, vector<2x128xf32>
    tpu.vector_store %arg27[%c0_156, %c0_157], %184 {strides = array<i32>} : memref<2x128xf32, #tpu.memory_space<vmem>>, vector<2x128xf32>,
    return
  }
}

</mosaic_0001>

<bundles_post_ra>
// kernel: forward.1
= control target key start
LH: loop header
LB: loop body
LE: loop exit
PB: predicated region body
PF: predicated region fallthrough
CT: control target
= control target key end

     0   :  { %s20335_s0 = inlined_call_operand.vmem [shape: bf16[1024,32], index: 0, kind: input, shape index: {}]   ;;  %s20336_s1 = inlined_call_operand.vmem [shape: bf16[32,128], index: 1, kind: input, shape index: {}]   ;;  %s20337_s2 = inlined_call_operand.vmem [shape: f32[1,128], index: 2, kind: input, shape index: {}]   ;;  %s20338_s3 = inlined_call_operand.vmem [shape: f32[1,128], index: 3, kind: input, shape index: {}]   ;;  %s20339_s4 = inlined_call_operand.vmem [shape: bf16[192,512], index: 4, kind: input, shape index: {}]   ;;  %s20340_s5 = inlined_call_operand.vmem [shape: f32[1,128], index: 5, kind: input, shape index: {}]   ;;  %s20341_s6 = inlined_call_operand.vmem [shape: f32[1,128], index: 6, kind: input, shape index: {}]   ;;  %s20342_s7 = inlined_call_operand.vmem [shape: bf16[64,158], index: 7, kind: input, shape index: {}]   ;;  %s20343_s8 = inlined_call_operand.vmem [shape: f32[1,128], index: 8, kind: input, shape index: {}]   ;;  %s20344_s9 = inlined_call_operand.vmem [shape: f32[1,128], index: 9, kind: input, shape index: {}]   ;;  %s20345_s10 = inlined_call_operand.vmem [shape: bf16[32,46], index: 10, kind: input, shape index: {}]   ;;  %s20346_s11 = inlined_call_operand.vmem [shape: f32[1,128], index: 11, kind: input, shape index: {}]   ;;  %s20347_s12 = inlined_call_operand.vmem [shape: f32[1,128], index: 12, kind: input, shape index: {}]   ;;  %s20348_s13 = inlined_call_operand.vmem [shape: bf16[16,14], index: 13, kind: input, shape index: {}]   ;;  %s20349_s14 = inlined_call_operand.vmem [shape: f32[1,256], index: 14, kind: input, shape index: {}]   ;;  %s20350_s15 = inlined_call_operand.vmem [shape: f32[1,256], index: 15, kind: input, shape index: {}]   ;;  %s20351_s16 = inlined_call_operand.vmem [shape: bf16[16,6], index: 16, kind: input, shape index: {}]   ;;  %s20352_s17 = inlined_call_operand.vmem [shape: f32[1,384], index: 17, kind: input, shape index: {}]   ;;  %s20353_s18 = inlined_call_operand.vmem [shape: f32[1,384], index: 18, kind: input, shape index: {}]   ;;  %s20354_s19 = inlined_call_operand.vmem [shape: bf16[2,18], index: 19, kind: input, shape index: {}]   ;;  %s20355_s20 = inlined_call_operand.vmem [shape: f32[1,128], index: 20, kind: input, shape index: {}]   ;;  %s20356_s21 = inlined_call_operand.vmem [shape: bf16[1152,128], index: 21, kind: input, shape index: {}]   ;;  %s20357_s22 = inlined_call_operand.vmem [shape: bf16[1152,128], index: 22, kind: input, shape index: {}]   ;;  %s20358_s23 = inlined_call_operand.vmem [shape: bf16[1152,128], index: 23, kind: input, shape index: {}]   ;;  %s20359_s24 = inlined_call_operand.vmem [shape: bf16[1152,256], index: 24, kind: input, shape index: {}]   ;;  %s20360_s25 = inlined_call_operand.vmem [shape: bf16[256,384], index: 25, kind: input, shape index: {}]   ;;  %s20361_s26 = inlined_call_operand.vmem [shape: bf16[384,128], index: 26, kind: input, shape index: {}]   ;;  %s20362_s27 = inlined_call_operand.hbm [shape: f32[2,128], index: 27, kind: output, shape index: {}]  }
   0x1   :  { %20569 = sst [smem:[#allocation188_spill]] %s20335_s0 }
   0x2   :  { %20570 = sst [smem:[#allocation189_spill]] %s20336_s1 }
   0x3   :  { %20571 = sst [smem:[#allocation190_spill]] %s20337_s2 }
   0x4   :  { %20572 = sst [smem:[#allocation191_spill]] %s20338_s3 }
   0x5   :  { %20573 = sst [smem:[#allocation192_spill]] %s20339_s4 }
   0x6   :  { %20574 = sst [smem:[#allocation193_spill]] %s20340_s5 }
   0x7   :  { %20575 = sst [smem:[#allocation194_spill]] %s20341_s6 }
   0x8   :  { %20576 = sst [smem:[#allocation195_spill]] %s20342_s7 }
   0x9   :  { %20577 = sst [smem:[#allocation196_spill]] %s20343_s8 }
   0xa   :  { %20578 = sst [smem:[#allocation197_spill]] %s20344_s9 }
   0xb   :  { %20579 = sst [smem:[#allocation198_spill]] %s20345_s10 }
   0xc   :  { %20580 = sst [smem:[#allocation199_spill]] %s20346_s11 }
   0xd   :  { %32 = vsyncpa [#allocation15], 0  ;;  %v109_v0 = vld [vmem:[%s20356_s21] sm:$0xff]  ;;  %v111_v1 = vld [vmem:[%s20356_s21 + $0x8] sm:$0xff] }
   0xe   :  { %110 = vst [vmem:[#allocation7] sm:$0xff] %v109_v0  ;;  %112 = vst [vmem:[#allocation7 + $0x8] sm:$0xff] %v111_v1  ;;  %v113_v2 = vld [vmem:[%s20356_s21 + $0x10] sm:$0xff]  ;;  %v115_v3 = vld [vmem:[%s20356_s21 + $0x18] sm:$0xff] }
   0xf   :  { %v117_v4 = vld [vmem:[%s20356_s21 + $0x20] sm:$0xff]  ;;  %114 = vst [vmem:[#allocation7 + $0x10] sm:$0xff] %v113_v2  ;;  %116 = vst [vmem:[#allocation7 + $0x18] sm:$0xff] %v115_v3  ;;  %v119_v5 = vld [vmem:[%s20356_s21 + $0x28] sm:$0xff] }
  0x10   :  { %118 = vst [vmem:[#allocation7 + $0x20] sm:$0xff] %v117_v4  ;;  %v121_v6 = vld [vmem:[%s20356_s21 + $0x30] sm:$0xff]  ;;  %v123_v7 = vld [vmem:[%s20356_s21 + $0x38] sm:$0xff]  ;;  %120 = vst [vmem:[#allocation7 + $0x28] sm:$0xff] %v119_v5 }
  0x11   :  { %122 = vst [vmem:[#allocation7 + $0x30] sm:$0xff] %v121_v6  ;;  %124 = vst [vmem:[#allocation7 + $0x38] sm:$0xff] %v123_v7  ;;  %v125_v8 = vld [vmem:[%s20356_s21 + $0x40] sm:$0xff]  ;;  %v127_v9 = vld [vmem:[%s20356_s21 + $0x48] sm:$0xff] }
  0x12   :  { %v129_v10 = vld [vmem:[%s20356_s21 + $0x50] sm:$0xff]  ;;  %126 = vst [vmem:[#allocation7 + $0x40] sm:$0xff] %v125_v8  ;;  %128 = vst [vmem:[#allocation7 + $0x48] sm:$0xff] %v127_v9  ;;  %v131_v11 = vld [vmem:[%s20356_s21 + $0x58] sm:$0xff] }
  0x13   :  { %130 = vst [vmem:[#allocation7 + $0x50] sm:$0xff] %v129_v10  ;;  %v133_v12 = vld [vmem:[%s20356_s21 + $0x60] sm:$0xff]  ;;  %v135_v13 = vld [vmem:[%s20356_s21 + $0x68] sm:$0xff]  ;;  %132 = vst [vmem:[#allocation7 + $0x58] sm:$0xff] %v131_v11 }
  0x14   :  { %134 = vst [vmem:[#allocation7 + $0x60] sm:$0xff] %v133_v12  ;;  %136 = vst [vmem:[#allocation7 + $0x68] sm:$0xff] %v135_v13  ;;  %v137_v14 = vld [vmem:[%s20356_s21 + $0x70] sm:$0xff]  ;;  %v139_v15 = vld [vmem:[%s20356_s21 + $0x78] sm:$0xff] }
  0x15   :  { %v141_v16 = vld [vmem:[%s20356_s21 + $0x80] sm:$0xff]  ;;  %138 = vst [vmem:[#allocation7 + $0x70] sm:$0xff] %v137_v14  ;;  %140 = vst [vmem:[#allocation7 + $0x78] sm:$0xff] %v139_v15  ;;  %v143_v17 = vld [vmem:[%s20356_s21 + $0x88] sm:$0xff] }
  0x16   :  { %142 = vst [vmem:[#allocation7 + $0x80] sm:$0xff] %v141_v16  ;;  %v145_v18 = vld [vmem:[%s20356_s21 + $0x90] sm:$0xff]  ;;  %v147_v19 = vld [vmem:[%s20356_s21 + $0x98] sm:$0xff]  ;;  %144 = vst [vmem:[#allocation7 + $0x88] sm:$0xff] %v143_v17 }
  0x17   :  { %146 = vst [vmem:[#allocation7 + $0x90] sm:$0xff] %v145_v18  ;;  %148 = vst [vmem:[#allocation7 + $0x98] sm:$0xff] %v147_v19  ;;  %v149_v20 = vld [vmem:[%s20356_s21 + $0xa0] sm:$0xff]  ;;  %v151_v21 = vld [vmem:[%s20356_s21 + $0xa8] sm:$0xff] }
  0x18   :  { %v153_v22 = vld [vmem:[%s20356_s21 + $0xb0] sm:$0xff]  ;;  %150 = vst [vmem:[#allocation7 + $0xa0] sm:$0xff] %v149_v20  ;;  %152 = vst [vmem:[#allocation7 + $0xa8] sm:$0xff] %v151_v21  ;;  %v155_v23 = vld [vmem:[%s20356_s21 + $0xb8] sm:$0xff] }
  0x19   :  { %154 = vst [vmem:[#allocation7 + $0xb0] sm:$0xff] %v153_v22  ;;  %v157_v24 = vld [vmem:[%s20356_s21 + $0xc0] sm:$0xff]  ;;  %v159_v25 = vld [vmem:[%s20356_s21 + $0xc8] sm:$0xff]  ;;  %156 = vst [vmem:[#allocation7 + $0xb8] sm:$0xff] %v155_v23 }
  0x1a   :  { %158 = vst [vmem:[#allocation7 + $0xc0] sm:$0xff] %v157_v24  ;;  %160 = vst [vmem:[#allocation7 + $0xc8] sm:$0xff] %v159_v25  ;;  %v161_v26 = vld [vmem:[%s20356_s21 + $0xd0] sm:$0xff]  ;;  %v163_v27 = vld [vmem:[%s20356_s21 + $0xd8] sm:$0xff] }
  0x1b   :  { %v165_v28 = vld [vmem:[%s20356_s21 + $0xe0] sm:$0xff]  ;;  %162 = vst [vmem:[#allocation7 + $0xd0] sm:$0xff] %v161_v26  ;;  %164 = vst [vmem:[#allocation7 + $0xd8] sm:$0xff] %v163_v27  ;;  %v167_v29 = vld [vmem:[%s20356_s21 + $0xe8] sm:$0xff] }
  0x1c   :  { %166 = vst [vmem:[#allocation7 + $0xe0] sm:$0xff] %v165_v28  ;;  %v169_v30 = vld [vmem:[%s20356_s21 + $0xf0] sm:$0xff]  ;;  %v171_v31 = vld [vmem:[%s20356_s21 + $0xf8] sm:$0xff]  ;;  %168 = vst [vmem:[#allocation7 + $0xe8] sm:$0xff] %v167_v29 }
  0x1d   :  { %170 = vst [vmem:[#allocation7 + $0xf0] sm:$0xff] %v169_v30  ;;  %172 = vst [vmem:[#allocation7 + $0xf8] sm:$0xff] %v171_v31  ;;  %v173_v32 = vld [vmem:[%s20356_s21 + $0x100] sm:$0xff]  ;;  %v175_v33 = vld [vmem:[%s20356_s21 + $0x108] sm:$0xff] }
  0x1e   :  { %v177_v34 = vld [vmem:[%s20356_s21 + $0x110] sm:$0xff]  ;;  %174 = vst [vmem:[#allocation7 + $0x100] sm:$0xff] %v173_v32  ;;  %176 = vst [vmem:[#allocation7 + $0x108] sm:$0xff] %v175_v33  ;;  %v179_v35 = vld [vmem:[%s20356_s21 + $0x118] sm:$0xff] }
  0x1f   :  { %178 = vst [vmem:[#allocation7 + $0x110] sm:$0xff] %v177_v34  ;;  %v181_v36 = vld [vmem:[%s20356_s21 + $0x120] sm:$0xff]  ;;  %v183_v37 = vld [vmem:[%s20356_s21 + $0x128] sm:$0xff]  ;;  %180 = vst [vmem:[#allocation7 + $0x118] sm:$0xff] %v179_v35 }
  0x20   :  { %182 = vst [vmem:[#allocation7 + $0x120] sm:$0xff] %v181_v36  ;;  %184 = vst [vmem:[#allocation7 + $0x128] sm:$0xff] %v183_v37  ;;  %v185_v38 = vld [vmem:[%s20356_s21 + $0x130] sm:$0xff]  ;;  %v187_v39 = vld [vmem:[%s20356_s21 + $0x138] sm:$0xff] }
  0x21   :  { %v189_v40 = vld [vmem:[%s20356_s21 + $0x140] sm:$0xff]  ;;  %186 = vst [vmem:[#allocation7 + $0x130] sm:$0xff] %v185_v38  ;;  %188 = vst [vmem:[#allocation7 + $0x138] sm:$0xff] %v187_v39  ;;  %v191_v41 = vld [vmem:[%s20356_s21 + $0x148] sm:$0xff] }
  0x22   :  { %190 = vst [vmem:[#allocation7 + $0x140] sm:$0xff] %v189_v40  ;;  %v193_v42 = vld [vmem:[%s20356_s21 + $0x150] sm:$0xff]  ;;  %v195_v43 = vld [vmem:[%s20356_s21 + $0x158] sm:$0xff]  ;;  %192 = vst [vmem:[#allocation7 + $0x148] sm:$0xff] %v191_v41 }
  0x23   :  { %194 = vst [vmem:[#allocation7 + $0x150] sm:$0xff] %v193_v42  ;;  %196 = vst [vmem:[#allocation7 + $0x158] sm:$0xff] %v195_v43  ;;  %v197_v44 = vld [vmem:[%s20356_s21 + $0x160] sm:$0xff]  ;;  %v199_v45 = vld [vmem:[%s20356_s21 + $0x168] sm:$0xff] }
  0x24   :  { %v201_v46 = vld [vmem:[%s20356_s21 + $0x170] sm:$0xff]  ;;  %198 = vst [vmem:[#allocation7 + $0x160] sm:$0xff] %v197_v44  ;;  %200 = vst [vmem:[#allocation7 + $0x168] sm:$0xff] %v199_v45  ;;  %v203_v47 = vld [vmem:[%s20356_s21 + $0x178] sm:$0xff] }
  0x25   :  { %202 = vst [vmem:[#allocation7 + $0x170] sm:$0xff] %v201_v46  ;;  %v205_v48 = vld [vmem:[%s20356_s21 + $0x180] sm:$0xff]  ;;  %v207_v49 = vld [vmem:[%s20356_s21 + $0x188] sm:$0xff]  ;;  %204 = vst [vmem:[#allocation7 + $0x178] sm:$0xff] %v203_v47 }
  0x26   :  { %206 = vst [vmem:[#allocation7 + $0x180] sm:$0xff] %v205_v48  ;;  %208 = vst [vmem:[#allocation7 + $0x188] sm:$0xff] %v207_v49  ;;  %v209_v50 = vld [vmem:[%s20356_s21 + $0x190] sm:$0xff]  ;;  %v211_v51 = vld [vmem:[%s20356_s21 + $0x198] sm:$0xff] }
  0x27   :  { %v213_v52 = vld [vmem:[%s20356_s21 + $0x1a0] sm:$0xff]  ;;  %210 = vst [vmem:[#allocation7 + $0x190] sm:$0xff] %v209_v50  ;;  %212 = vst [vmem:[#allocation7 + $0x198] sm:$0xff] %v211_v51  ;;  %v215_v53 = vld [vmem:[%s20356_s21 + $0x1a8] sm:$0xff] }
  0x28   :  { %214 = vst [vmem:[#allocation7 + $0x1a0] sm:$0xff] %v213_v52  ;;  %v217_v54 = vld [vmem:[%s20356_s21 + $0x1b0] sm:$0xff]  ;;  %v219_v55 = vld [vmem:[%s20356_s21 + $0x1b8] sm:$0xff]  ;;  %216 = vst [vmem:[#allocation7 + $0x1a8] sm:$0xff] %v215_v53 }
  0x29   :  { %218 = vst [vmem:[#allocation7 + $0x1b0] sm:$0xff] %v217_v54  ;;  %220 = vst [vmem:[#allocation7 + $0x1b8] sm:$0xff] %v219_v55  ;;  %v221_v56 = vld [vmem:[%s20356_s21 + $0x1c0] sm:$0xff]  ;;  %v223_v57 = vld [vmem:[%s20356_s21 + $0x1c8] sm:$0xff] }
  0x2a   :  { %v225_v58 = vld [vmem:[%s20356_s21 + $0x1d0] sm:$0xff]  ;;  %222 = vst [vmem:[#allocation7 + $0x1c0] sm:$0xff] %v221_v56  ;;  %224 = vst [vmem:[#allocation7 + $0x1c8] sm:$0xff] %v223_v57  ;;  %v227_v59 = vld [vmem:[%s20356_s21 + $0x1d8] sm:$0xff] }
  0x2b   :  { %226 = vst [vmem:[#allocation7 + $0x1d0] sm:$0xff] %v225_v58  ;;  %v229_v60 = vld [vmem:[%s20356_s21 + $0x1e0] sm:$0xff]  ;;  %v231_v61 = vld [vmem:[%s20356_s21 + $0x1e8] sm:$0xff]  ;;  %228 = vst [vmem:[#allocation7 + $0x1d8] sm:$0xff] %v227_v59 }
  0x2c   :  { %230 = vst [vmem:[#allocation7 + $0x1e0] sm:$0xff] %v229_v60  ;;  %232 = vst [vmem:[#allocation7 + $0x1e8] sm:$0xff] %v231_v61  ;;  %v233_v62 = vld [vmem:[%s20356_s21 + $0x1f0] sm:$0xff]  ;;  %v235_v63 = vld [vmem:[%s20356_s21 + $0x1f8] sm:$0xff] }
  0x2d   :  { %v237_v0 = vld [vmem:[%s20356_s21 + $0x200] sm:$0xff]  ;;  %234 = vst [vmem:[#allocation7 + $0x1f0] sm:$0xff] %v233_v62  ;;  %236 = vst [vmem:[#allocation7 + $0x1f8] sm:$0xff] %v235_v63  ;;  %v239_v1 = vld [vmem:[%s20356_s21 + $0x208] sm:$0xff] }
  0x2e   :  { %238 = vst [vmem:[#allocation7 + $0x200] sm:$0xff] %v237_v0  ;;  %v241_v2 = vld [vmem:[%s20356_s21 + $0x210] sm:$0xff]  ;;  %v243_v3 = vld [vmem:[%s20356_s21 + $0x218] sm:$0xff]  ;;  %240 = vst [vmem:[#allocation7 + $0x208] sm:$0xff] %v239_v1 }
  0x2f   :  { %242 = vst [vmem:[#allocation7 + $0x210] sm:$0xff] %v241_v2  ;;  %244 = vst [vmem:[#allocation7 + $0x218] sm:$0xff] %v243_v3  ;;  %v245_v4 = vld [vmem:[%s20356_s21 + $0x220] sm:$0xff]  ;;  %v247_v5 = vld [vmem:[%s20356_s21 + $0x228] sm:$0xff] }
  0x30   :  { %v249_v6 = vld [vmem:[%s20356_s21 + $0x230] sm:$0xff]  ;;  %246 = vst [vmem:[#allocation7 + $0x220] sm:$0xff] %v245_v4  ;;  %248 = vst [vmem:[#allocation7 + $0x228] sm:$0xff] %v247_v5  ;;  %v251_v7 = vld [vmem:[%s20356_s21 + $0x238] sm:$0xff] }
  0x31   :  { %250 = vst [vmem:[#allocation7 + $0x230] sm:$0xff] %v249_v6  ;;  %252 = vst [vmem:[#allocation7 + $0x238] sm:$0xff] %v251_v7 }
  0x32   :  { %260 = vsyncadd [#allocation13], 9216  ;;  %v295_v8 = vld [vmem:[%s20357_s22] sm:$0xff]  ;;  %v297_v9 = vld [vmem:[%s20357_s22 + $0x8] sm:$0xff] }
  0x33   :  { %296 = vst [vmem:[#allocation8] sm:$0xff] %v295_v8  ;;  %298 = vst [vmem:[#allocation8 + $0x8] sm:$0xff] %v297_v9  ;;  %v299_v10 = vld [vmem:[%s20357_s22 + $0x10] sm:$0xff]  ;;  %v301_v11 = vld [vmem:[%s20357_s22 + $0x18] sm:$0xff] }
  0x34   :  { %v303_v12 = vld [vmem:[%s20357_s22 + $0x20] sm:$0xff]  ;;  %300 = vst [vmem:[#allocation8 + $0x10] sm:$0xff] %v299_v10  ;;  %302 = vst [vmem:[#allocation8 + $0x18] sm:$0xff] %v301_v11  ;;  %v305_v13 = vld [vmem:[%s20357_s22 + $0x28] sm:$0xff] }
  0x35   :  { %304 = vst [vmem:[#allocation8 + $0x20] sm:$0xff] %v303_v12  ;;  %v307_v14 = vld [vmem:[%s20357_s22 + $0x30] sm:$0xff]  ;;  %v309_v15 = vld [vmem:[%s20357_s22 + $0x38] sm:$0xff]  ;;  %306 = vst [vmem:[#allocation8 + $0x28] sm:$0xff] %v305_v13 }
  0x36   :  { %308 = vst [vmem:[#allocation8 + $0x30] sm:$0xff] %v307_v14  ;;  %310 = vst [vmem:[#allocation8 + $0x38] sm:$0xff] %v309_v15  ;;  %v311_v16 = vld [vmem:[%s20357_s22 + $0x40] sm:$0xff]  ;;  %v313_v17 = vld [vmem:[%s20357_s22 + $0x48] sm:$0xff] }
  0x37   :  { %v315_v18 = vld [vmem:[%s20357_s22 + $0x50] sm:$0xff]  ;;  %312 = vst [vmem:[#allocation8 + $0x40] sm:$0xff] %v311_v16  ;;  %314 = vst [vmem:[#allocation8 + $0x48] sm:$0xff] %v313_v17  ;;  %v317_v19 = vld [vmem:[%s20357_s22 + $0x58] sm:$0xff] }
  0x38   :  { %316 = vst [vmem:[#allocation8 + $0x50] sm:$0xff] %v315_v18  ;;  %v319_v20 = vld [vmem:[%s20357_s22 + $0x60] sm:$0xff]  ;;  %v321_v21 = vld [vmem:[%s20357_s22 + $0x68] sm:$0xff]  ;;  %318 = vst [vmem:[#allocation8 + $0x58] sm:$0xff] %v317_v19 }
  0x39   :  { %320 = vst [vmem:[#allocation8 + $0x60] sm:$0xff] %v319_v20  ;;  %322 = vst [vmem:[#allocation8 + $0x68] sm:$0xff] %v321_v21  ;;  %v323_v22 = vld [vmem:[%s20357_s22 + $0x70] sm:$0xff]  ;;  %v325_v23 = vld [vmem:[%s20357_s22 + $0x78] sm:$0xff] }
  0x3a   :  { %v327_v24 = vld [vmem:[%s20357_s22 + $0x80] sm:$0xff]  ;;  %324 = vst [vmem:[#allocation8 + $0x70] sm:$0xff] %v323_v22  ;;  %326 = vst [vmem:[#allocation8 + $0x78] sm:$0xff] %v325_v23  ;;  %v329_v25 = vld [vmem:[%s20357_s22 + $0x88] sm:$0xff] }
  0x3b   :  { %328 = vst [vmem:[#allocation8 + $0x80] sm:$0xff] %v327_v24  ;;  %v331_v26 = vld [vmem:[%s20357_s22 + $0x90] sm:$0xff]  ;;  %v333_v27 = vld [vmem:[%s20357_s22 + $0x98] sm:$0xff]  ;;  %330 = vst [vmem:[#allocation8 + $0x88] sm:$0xff] %v329_v25 }
  0x3c   :  { %332 = vst [vmem:[#allocation8 + $0x90] sm:$0xff] %v331_v26  ;;  %334 = vst [vmem:[#allocation8 + $0x98] sm:$0xff] %v333_v27  ;;  %v335_v28 = vld [vmem:[%s20357_s22 + $0xa0] sm:$0xff]  ;;  %v337_v29 = vld [vmem:[%s20357_s22 + $0xa8] sm:$0xff] }
  0x3d   :  { %v339_v30 = vld [vmem:[%s20357_s22 + $0xb0] sm:$0xff]  ;;  %336 = vst [vmem:[#allocation8 + $0xa0] sm:$0xff] %v335_v28  ;;  %338 = vst [vmem:[#allocation8 + $0xa8] sm:$0xff] %v337_v29  ;;  %v341_v31 = vld [vmem:[%s20357_s22 + $0xb8] sm:$0xff] }
  0x3e   :  { %340 = vst [vmem:[#allocation8 + $0xb0] sm:$0xff] %v339_v30  ;;  %v343_v32 = vld [vmem:[%s20357_s22 + $0xc0] sm:$0xff]  ;;  %v345_v33 = vld [vmem:[%s20357_s22 + $0xc8] sm:$0xff]  ;;  %342 = vst [vmem:[#allocation8 + $0xb8] sm:$0xff] %v341_v31 }
  0x3f   :  { %344 = vst [vmem:[#allocation8 + $0xc0] sm:$0xff] %v343_v32  ;;  %346 = vst [vmem:[#allocation8 + $0xc8] sm:$0xff] %v345_v33  ;;  %v347_v34 = vld [vmem:[%s20357_s22 + $0xd0] sm:$0xff]  ;;  %v349_v35 = vld [vmem:[%s20357_s22 + $0xd8] sm:$0xff] }
  0x40   :  { %v351_v36 = vld [vmem:[%s20357_s22 + $0xe0] sm:$0xff]  ;;  %348 = vst [vmem:[#allocation8 + $0xd0] sm:$0xff] %v347_v34  ;;  %350 = vst [vmem:[#allocation8 + $0xd8] sm:$0xff] %v349_v35  ;;  %v353_v37 = vld [vmem:[%s20357_s22 + $0xe8] sm:$0xff] }
  0x41   :  { %352 = vst [vmem:[#allocation8 + $0xe0] sm:$0xff] %v351_v36  ;;  %v355_v38 = vld [vmem:[%s20357_s22 + $0xf0] sm:$0xff]  ;;  %v357_v39 = vld [vmem:[%s20357_s22 + $0xf8] sm:$0xff]  ;;  %354 = vst [vmem:[#allocation8 + $0xe8] sm:$0xff] %v353_v37 }
  0x42   :  { %356 = vst [vmem:[#allocation8 + $0xf0] sm:$0xff] %v355_v38  ;;  %358 = vst [vmem:[#allocation8 + $0xf8] sm:$0xff] %v357_v39  ;;  %v359_v40 = vld [vmem:[%s20357_s22 + $0x100] sm:$0xff]  ;;  %v361_v41 = vld [vmem:[%s20357_s22 + $0x108] sm:$0xff] }
  0x43   :  { %v363_v42 = vld [vmem:[%s20357_s22 + $0x110] sm:$0xff]  ;;  %360 = vst [vmem:[#allocation8 + $0x100] sm:$0xff] %v359_v40  ;;  %362 = vst [vmem:[#allocation8 + $0x108] sm:$0xff] %v361_v41  ;;  %v365_v43 = vld [vmem:[%s20357_s22 + $0x118] sm:$0xff] }
  0x44   :  { %364 = vst [vmem:[#allocation8 + $0x110] sm:$0xff] %v363_v42  ;;  %v367_v44 = vld [vmem:[%s20357_s22 + $0x120] sm:$0xff]  ;;  %v369_v45 = vld [vmem:[%s20357_s22 + $0x128] sm:$0xff]  ;;  %366 = vst [vmem:[#allocation8 + $0x118] sm:$0xff] %v365_v43 }
  0x45   :  { %368 = vst [vmem:[#allocation8 + $0x120] sm:$0xff] %v367_v44  ;;  %370 = vst [vmem:[#allocation8 + $0x128] sm:$0xff] %v369_v45  ;;  %v371_v46 = vld [vmem:[%s20357_s22 + $0x130] sm:$0xff]  ;;  %v373_v47 = vld [vmem:[%s20357_s22 + $0x138] sm:$0xff] }
  0x46   :  { %v375_v48 = vld [vmem:[%s20357_s22 + $0x140] sm:$0xff]  ;;  %372 = vst [vmem:[#allocation8 + $0x130] sm:$0xff] %v371_v46  ;;  %374 = vst [vmem:[#allocation8 + $0x138] sm:$0xff] %v373_v47  ;;  %v377_v49 = vld [vmem:[%s20357_s22 + $0x148] sm:$0xff] }
  0x47   :  { %376 = vst [vmem:[#allocation8 + $0x140] sm:$0xff] %v375_v48  ;;  %v379_v50 = vld [vmem:[%s20357_s22 + $0x150] sm:$0xff]  ;;  %v381_v51 = vld [vmem:[%s20357_s22 + $0x158] sm:$0xff]  ;;  %378 = vst [vmem:[#allocation8 + $0x148] sm:$0xff] %v377_v49 }
  0x48   :  { %380 = vst [vmem:[#allocation8 + $0x150] sm:$0xff] %v379_v50  ;;  %382 = vst [vmem:[#allocation8 + $0x158] sm:$0xff] %v381_v51  ;;  %v383_v52 = vld [vmem:[%s20357_s22 + $0x160] sm:$0xff]  ;;  %v385_v53 = vld [vmem:[%s20357_s22 + $0x168] sm:$0xff] }
  0x49   :  { %v387_v54 = vld [vmem:[%s20357_s22 + $0x170] sm:$0xff]  ;;  %384 = vst [vmem:[#allocation8 + $0x160] sm:$0xff] %v383_v52  ;;  %386 = vst [vmem:[#allocation8 + $0x168] sm:$0xff] %v385_v53  ;;  %v389_v55 = vld [vmem:[%s20357_s22 + $0x178] sm:$0xff] }
  0x4a   :  { %388 = vst [vmem:[#allocation8 + $0x170] sm:$0xff] %v387_v54  ;;  %v391_v56 = vld [vmem:[%s20357_s22 + $0x180] sm:$0xff]  ;;  %v393_v57 = vld [vmem:[%s20357_s22 + $0x188] sm:$0xff]  ;;  %390 = vst [vmem:[#allocation8 + $0x178] sm:$0xff] %v389_v55 }
  0x4b   :  { %392 = vst [vmem:[#allocation8 + $0x180] sm:$0xff] %v391_v56  ;;  %394 = vst [vmem:[#allocation8 + $0x188] sm:$0xff] %v393_v57  ;;  %v395_v58 = vld [vmem:[%s20357_s22 + $0x190] sm:$0xff]  ;;  %v397_v59 = vld [vmem:[%s20357_s22 + $0x198] sm:$0xff] }
  0x4c   :  { %v399_v60 = vld [vmem:[%s20357_s22 + $0x1a0] sm:$0xff]  ;;  %396 = vst [vmem:[#allocation8 + $0x190] sm:$0xff] %v395_v58  ;;  %398 = vst [vmem:[#allocation8 + $0x198] sm:$0xff] %v397_v59  ;;  %v401_v61 = vld [vmem:[%s20357_s22 + $0x1a8] sm:$0xff] }
  0x4d   :  { %400 = vst [vmem:[#allocation8 + $0x1a0] sm:$0xff] %v399_v60  ;;  %v403_v62 = vld [vmem:[%s20357_s22 + $0x1b0] sm:$0xff]  ;;  %v405_v63 = vld [vmem:[%s20357_s22 + $0x1b8] sm:$0xff]  ;;  %402 = vst [vmem:[#allocation8 + $0x1a8] sm:$0xff] %v401_v61 }
  0x4e   :  { %404 = vst [vmem:[#allocation8 + $0x1b0] sm:$0xff] %v403_v62  ;;  %406 = vst [vmem:[#allocation8 + $0x1b8] sm:$0xff] %v405_v63  ;;  %v407_v0 = vld [vmem:[%s20357_s22 + $0x1c0] sm:$0xff]  ;;  %v409_v1 = vld [vmem:[%s20357_s22 + $0x1c8] sm:$0xff] }
  0x4f   :  { %v411_v2 = vld [vmem:[%s20357_s22 + $0x1d0] sm:$0xff]  ;;  %408 = vst [vmem:[#allocation8 + $0x1c0] sm:$0xff] %v407_v0  ;;  %410 = vst [vmem:[#allocation8 + $0x1c8] sm:$0xff] %v409_v1  ;;  %v413_v3 = vld [vmem:[%s20357_s22 + $0x1d8] sm:$0xff] }
  0x50   :  { %412 = vst [vmem:[#allocation8 + $0x1d0] sm:$0xff] %v411_v2  ;;  %v415_v4 = vld [vmem:[%s20357_s22 + $0x1e0] sm:$0xff]  ;;  %v417_v5 = vld [vmem:[%s20357_s22 + $0x1e8] sm:$0xff]  ;;  %414 = vst [vmem:[#allocation8 + $0x1d8] sm:$0xff] %v413_v3 }
  0x51   :  { %416 = vst [vmem:[#allocation8 + $0x1e0] sm:$0xff] %v415_v4  ;;  %418 = vst [vmem:[#allocation8 + $0x1e8] sm:$0xff] %v417_v5  ;;  %v419_v6 = vld [vmem:[%s20357_s22 + $0x1f0] sm:$0xff]  ;;  %v421_v7 = vld [vmem:[%s20357_s22 + $0x1f8] sm:$0xff] }
  0x52   :  { %v423_v8 = vld [vmem:[%s20357_s22 + $0x200] sm:$0xff]  ;;  %420 = vst [vmem:[#allocation8 + $0x1f0] sm:$0xff] %v419_v6  ;;  %422 = vst [vmem:[#allocation8 + $0x1f8] sm:$0xff] %v421_v7  ;;  %v425_v9 = vld [vmem:[%s20357_s22 + $0x208] sm:$0xff] }
  0x53   :  { %424 = vst [vmem:[#allocation8 + $0x200] sm:$0xff] %v423_v8  ;;  %v427_v10 = vld [vmem:[%s20357_s22 + $0x210] sm:$0xff]  ;;  %v429_v11 = vld [vmem:[%s20357_s22 + $0x218] sm:$0xff]  ;;  %426 = vst [vmem:[#allocation8 + $0x208] sm:$0xff] %v425_v9 }
  0x54   :  { %428 = vst [vmem:[#allocation8 + $0x210] sm:$0xff] %v427_v10  ;;  %430 = vst [vmem:[#allocation8 + $0x218] sm:$0xff] %v429_v11  ;;  %v431_v12 = vld [vmem:[%s20357_s22 + $0x220] sm:$0xff]  ;;  %v433_v13 = vld [vmem:[%s20357_s22 + $0x228] sm:$0xff] }
  0x55   :  { %v435_v14 = vld [vmem:[%s20357_s22 + $0x230] sm:$0xff]  ;;  %432 = vst [vmem:[#allocation8 + $0x220] sm:$0xff] %v431_v12  ;;  %434 = vst [vmem:[#allocation8 + $0x228] sm:$0xff] %v433_v13  ;;  %v437_v15 = vld [vmem:[%s20357_s22 + $0x238] sm:$0xff] }
  0x56   :  { %436 = vst [vmem:[#allocation8 + $0x230] sm:$0xff] %v435_v14  ;;  %438 = vst [vmem:[#allocation8 + $0x238] sm:$0xff] %v437_v15 }
  0x57   :  { %446 = vsyncadd [#allocation13 + $0x1], 9216  ;;  %v481_v16 = vld [vmem:[%s20358_s23] sm:$0xff]  ;;  %v483_v17 = vld [vmem:[%s20358_s23 + $0x8] sm:$0xff] }
  0x58   :  { %482 = vst [vmem:[#allocation9] sm:$0xff] %v481_v16  ;;  %484 = vst [vmem:[#allocation9 + $0x8] sm:$0xff] %v483_v17  ;;  %v485_v18 = vld [vmem:[%s20358_s23 + $0x10] sm:$0xff]  ;;  %v487_v19 = vld [vmem:[%s20358_s23 + $0x18] sm:$0xff] }
  0x59   :  { %v489_v20 = vld [vmem:[%s20358_s23 + $0x20] sm:$0xff]  ;;  %486 = vst [vmem:[#allocation9 + $0x10] sm:$0xff] %v485_v18  ;;  %488 = vst [vmem:[#allocation9 + $0x18] sm:$0xff] %v487_v19  ;;  %v491_v21 = vld [vmem:[%s20358_s23 + $0x28] sm:$0xff] }
  0x5a   :  { %490 = vst [vmem:[#allocation9 + $0x20] sm:$0xff] %v489_v20  ;;  %v493_v22 = vld [vmem:[%s20358_s23 + $0x30] sm:$0xff]  ;;  %v495_v23 = vld [vmem:[%s20358_s23 + $0x38] sm:$0xff]  ;;  %492 = vst [vmem:[#allocation9 + $0x28] sm:$0xff] %v491_v21 }
  0x5b   :  { %494 = vst [vmem:[#allocation9 + $0x30] sm:$0xff] %v493_v22  ;;  %496 = vst [vmem:[#allocation9 + $0x38] sm:$0xff] %v495_v23  ;;  %v497_v24 = vld [vmem:[%s20358_s23 + $0x40] sm:$0xff]  ;;  %v499_v25 = vld [vmem:[%s20358_s23 + $0x48] sm:$0xff] }
  0x5c   :  { %v501_v26 = vld [vmem:[%s20358_s23 + $0x50] sm:$0xff]  ;;  %498 = vst [vmem:[#allocation9 + $0x40] sm:$0xff] %v497_v24  ;;  %500 = vst [vmem:[#allocation9 + $0x48] sm:$0xff] %v499_v25  ;;  %v503_v27 = vld [vmem:[%s20358_s23 + $0x58] sm:$0xff] }
  0x5d   :  { %502 = vst [vmem:[#allocation9 + $0x50] sm:$0xff] %v501_v26  ;;  %v505_v28 = vld [vmem:[%s20358_s23 + $0x60] sm:$0xff]  ;;  %v507_v29 = vld [vmem:[%s20358_s23 + $0x68] sm:$0xff]  ;;  %504 = vst [vmem:[#allocation9 + $0x58] sm:$0xff] %v503_v27 }
  0x5e   :  { %506 = vst [vmem:[#allocation9 + $0x60] sm:$0xff] %v505_v28  ;;  %508 = vst [vmem:[#allocation9 + $0x68] sm:$0xff] %v507_v29  ;;  %v509_v30 = vld [vmem:[%s20358_s23 + $0x70] sm:$0xff]  ;;  %v511_v31 = vld [vmem:[%s20358_s23 + $0x78] sm:$0xff] }
  0x5f   :  { %v513_v32 = vld [vmem:[%s20358_s23 + $0x80] sm:$0xff]  ;;  %510 = vst [vmem:[#allocation9 + $0x70] sm:$0xff] %v509_v30  ;;  %512 = vst [vmem:[#allocation9 + $0x78] sm:$0xff] %v511_v31  ;;  %v515_v33 = vld [vmem:[%s20358_s23 + $0x88] sm:$0xff] }
  0x60   :  { %514 = vst [vmem:[#allocation9 + $0x80] sm:$0xff] %v513_v32  ;;  %v517_v34 = vld [vmem:[%s20358_s23 + $0x90] sm:$0xff]  ;;  %v519_v35 = vld [vmem:[%s20358_s23 + $0x98] sm:$0xff]  ;;  %516 = vst [vmem:[#allocation9 + $0x88] sm:$0xff] %v515_v33 }
  0x61   :  { %518 = vst [vmem:[#allocation9 + $0x90] sm:$0xff] %v517_v34  ;;  %520 = vst [vmem:[#allocation9 + $0x98] sm:$0xff] %v519_v35  ;;  %v521_v36 = vld [vmem:[%s20358_s23 + $0xa0] sm:$0xff]  ;;  %v523_v37 = vld [vmem:[%s20358_s23 + $0xa8] sm:$0xff] }
  0x62   :  { %v525_v38 = vld [vmem:[%s20358_s23 + $0xb0] sm:$0xff]  ;;  %522 = vst [vmem:[#allocation9 + $0xa0] sm:$0xff] %v521_v36  ;;  %524 = vst [vmem:[#allocation9 + $0xa8] sm:$0xff] %v523_v37  ;;  %v527_v39 = vld [vmem:[%s20358_s23 + $0xb8] sm:$0xff] }
  0x63   :  { %526 = vst [vmem:[#allocation9 + $0xb0] sm:$0xff] %v525_v38  ;;  %v529_v40 = vld [vmem:[%s20358_s23 + $0xc0] sm:$0xff]  ;;  %v531_v41 = vld [vmem:[%s20358_s23 + $0xc8] sm:$0xff]  ;;  %528 = vst [vmem:[#allocation9 + $0xb8] sm:$0xff] %v527_v39 }
  0x64   :  { %530 = vst [vmem:[#allocation9 + $0xc0] sm:$0xff] %v529_v40  ;;  %532 = vst [vmem:[#allocation9 + $0xc8] sm:$0xff] %v531_v41  ;;  %v533_v42 = vld [vmem:[%s20358_s23 + $0xd0] sm:$0xff]  ;;  %v535_v43 = vld [vmem:[%s20358_s23 + $0xd8] sm:$0xff] }
  0x65   :  { %v537_v44 = vld [vmem:[%s20358_s23 + $0xe0] sm:$0xff]  ;;  %534 = vst [vmem:[#allocation9 + $0xd0] sm:$0xff] %v533_v42  ;;  %536 = vst [vmem:[#allocation9 + $0xd8] sm:$0xff] %v535_v43  ;;  %v539_v45 = vld [vmem:[%s20358_s23 + $0xe8] sm:$0xff] }
  0x66   :  { %538 = vst [vmem:[#allocation9 + $0xe0] sm:$0xff] %v537_v44  ;;  %v541_v46 = vld [vmem:[%s20358_s23 + $0xf0] sm:$0xff]  ;;  %v543_v47 = vld [vmem:[%s20358_s23 + $0xf8] sm:$0xff]  ;;  %540 = vst [vmem:[#allocation9 + $0xe8] sm:$0xff] %v539_v45 }
  0x67   :  { %542 = vst [vmem:[#allocation9 + $0xf0] sm:$0xff] %v541_v46  ;;  %544 = vst [vmem:[#allocation9 + $0xf8] sm:$0xff] %v543_v47  ;;  %v545_v48 = vld [vmem:[%s20358_s23 + $0x100] sm:$0xff]  ;;  %v547_v49 = vld [vmem:[%s20358_s23 + $0x108] sm:$0xff] }
  0x68   :  { %v549_v50 = vld [vmem:[%s20358_s23 + $0x110] sm:$0xff]  ;;  %546 = vst [vmem:[#allocation9 + $0x100] sm:$0xff] %v545_v48  ;;  %548 = vst [vmem:[#allocation9 + $0x108] sm:$0xff] %v547_v49  ;;  %v551_v51 = vld [vmem:[%s20358_s23 + $0x118] sm:$0xff] }
  0x69   :  { %550 = vst [vmem:[#allocation9 + $0x110] sm:$0xff] %v549_v50  ;;  %v553_v52 = vld [vmem:[%s20358_s23 + $0x120] sm:$0xff]  ;;  %v555_v53 = vld [vmem:[%s20358_s23 + $0x128] sm:$0xff]  ;;  %552 = vst [vmem:[#allocation9 + $0x118] sm:$0xff] %v551_v51 }
  0x6a   :  { %554 = vst [vmem:[#allocation9 + $0x120] sm:$0xff] %v553_v52  ;;  %556 = vst [vmem:[#allocation9 + $0x128] sm:$0xff] %v555_v53  ;;  %v557_v54 = vld [vmem:[%s20358_s23 + $0x130] sm:$0xff]  ;;  %v559_v55 = vld [vmem:[%s20358_s23 + $0x138] sm:$0xff] }
  0x6b   :  { %v561_v56 = vld [vmem:[%s20358_s23 + $0x140] sm:$0xff]  ;;  %558 = vst [vmem:[#allocation9 + $0x130] sm:$0xff] %v557_v54  ;;  %560 = vst [vmem:[#allocation9 + $0x138] sm:$0xff] %v559_v55  ;;  %v563_v57 = vld [vmem:[%s20358_s23 + $0x148] sm:$0xff] }
  0x6c   :  { %562 = vst [vmem:[#allocation9 + $0x140] sm:$0xff] %v561_v56  ;;  %v565_v58 = vld [vmem:[%s20358_s23 + $0x150] sm:$0xff]  ;;  %v567_v59 = vld [vmem:[%s20358_s23 + $0x158] sm:$0xff]  ;;  %564 = vst [vmem:[#allocation9 + $0x148] sm:$0xff] %v563_v57 }
  0x6d   :  { %566 = vst [vmem:[#allocation9 + $0x150] sm:$0xff] %v565_v58  ;;  %568 = vst [vmem:[#allocation9 + $0x158] sm:$0xff] %v567_v59  ;;  %v569_v60 = vld [vmem:[%s20358_s23 + $0x160] sm:$0xff]  ;;  %v571_v61 = vld [vmem:[%s20358_s23 + $0x168] sm:$0xff] }
  0x6e   :  { %v573_v62 = vld [vmem:[%s20358_s23 + $0x170] sm:$0xff]  ;;  %570 = vst [vmem:[#allocation9 + $0x160] sm:$0xff] %v569_v60  ;;  %572 = vst [vmem:[#allocation9 + $0x168] sm:$0xff] %v571_v61  ;;  %v575_v63 = vld [vmem:[%s20358_s23 + $0x178] sm:$0xff] }
  0x6f   :  { %574 = vst [vmem:[#allocation9 + $0x170] sm:$0xff] %v573_v62  ;;  %v577_v0 = vld [vmem:[%s20358_s23 + $0x180] sm:$0xff]  ;;  %v579_v1 = vld [vmem:[%s20358_s23 + $0x188] sm:$0xff]  ;;  %576 = vst [vmem:[#allocation9 + $0x178] sm:$0xff] %v575_v63 }
  0x70   :  { %578 = vst [vmem:[#allocation9 + $0x180] sm:$0xff] %v577_v0  ;;  %580 = vst [vmem:[#allocation9 + $0x188] sm:$0xff] %v579_v1  ;;  %v581_v2 = vld [vmem:[%s20358_s23 + $0x190] sm:$0xff]  ;;  %v583_v3 = vld [vmem:[%s20358_s23 + $0x198] sm:$0xff] }
  0x71   :  { %v585_v4 = vld [vmem:[%s20358_s23 + $0x1a0] sm:$0xff]  ;;  %582 = vst [vmem:[#allocation9 + $0x190] sm:$0xff] %v581_v2  ;;  %584 = vst [vmem:[#allocation9 + $0x198] sm:$0xff] %v583_v3  ;;  %v587_v5 = vld [vmem:[%s20358_s23 + $0x1a8] sm:$0xff] }
  0x72   :  { %586 = vst [vmem:[#allocation9 + $0x1a0] sm:$0xff] %v585_v4  ;;  %v589_v6 = vld [vmem:[%s20358_s23 + $0x1b0] sm:$0xff]  ;;  %v591_v7 = vld [vmem:[%s20358_s23 + $0x1b8] sm:$0xff]  ;;  %588 = vst [vmem:[#allocation9 + $0x1a8] sm:$0xff] %v587_v5 }
  0x73   :  { %590 = vst [vmem:[#allocation9 + $0x1b0] sm:$0xff] %v589_v6  ;;  %592 = vst [vmem:[#allocation9 + $0x1b8] sm:$0xff] %v591_v7  ;;  %v593_v8 = vld [vmem:[%s20358_s23 + $0x1c0] sm:$0xff]  ;;  %v595_v9 = vld [vmem:[%s20358_s23 + $0x1c8] sm:$0xff] }
  0x74   :  { %v597_v10 = vld [vmem:[%s20358_s23 + $0x1d0] sm:$0xff]  ;;  %594 = vst [vmem:[#allocation9 + $0x1c0] sm:$0xff] %v593_v8  ;;  %596 = vst [vmem:[#allocation9 + $0x1c8] sm:$0xff] %v595_v9  ;;  %v599_v11 = vld [vmem:[%s20358_s23 + $0x1d8] sm:$0xff] }
  0x75   :  { %598 = vst [vmem:[#allocation9 + $0x1d0] sm:$0xff] %v597_v10  ;;  %v601_v12 = vld [vmem:[%s20358_s23 + $0x1e0] sm:$0xff]  ;;  %v603_v13 = vld [vmem:[%s20358_s23 + $0x1e8] sm:$0xff]  ;;  %600 = vst [vmem:[#allocation9 + $0x1d8] sm:$0xff] %v599_v11 }
  0x76   :  { %602 = vst [vmem:[#allocation9 + $0x1e0] sm:$0xff] %v601_v12  ;;  %604 = vst [vmem:[#allocation9 + $0x1e8] sm:$0xff] %v603_v13  ;;  %v605_v14 = vld [vmem:[%s20358_s23 + $0x1f0] sm:$0xff]  ;;  %v607_v15 = vld [vmem:[%s20358_s23 + $0x1f8] sm:$0xff] }
  0x77   :  { %v609_v16 = vld [vmem:[%s20358_s23 + $0x200] sm:$0xff]  ;;  %606 = vst [vmem:[#allocation9 + $0x1f0] sm:$0xff] %v605_v14  ;;  %608 = vst [vmem:[#allocation9 + $0x1f8] sm:$0xff] %v607_v15  ;;  %v611_v17 = vld [vmem:[%s20358_s23 + $0x208] sm:$0xff] }
  0x78   :  { %610 = vst [vmem:[#allocation9 + $0x200] sm:$0xff] %v609_v16  ;;  %v613_v18 = vld [vmem:[%s20358_s23 + $0x210] sm:$0xff]  ;;  %v615_v19 = vld [vmem:[%s20358_s23 + $0x218] sm:$0xff]  ;;  %612 = vst [vmem:[#allocation9 + $0x208] sm:$0xff] %v611_v17 }
  0x79   :  { %614 = vst [vmem:[#allocation9 + $0x210] sm:$0xff] %v613_v18  ;;  %616 = vst [vmem:[#allocation9 + $0x218] sm:$0xff] %v615_v19  ;;  %v617_v20 = vld [vmem:[%s20358_s23 + $0x220] sm:$0xff]  ;;  %v619_v21 = vld [vmem:[%s20358_s23 + $0x228] sm:$0xff] }
  0x7a   :  { %v621_v22 = vld [vmem:[%s20358_s23 + $0x230] sm:$0xff]  ;;  %618 = vst [vmem:[#allocation9 + $0x220] sm:$0xff] %v617_v20  ;;  %620 = vst [vmem:[#allocation9 + $0x228] sm:$0xff] %v619_v21  ;;  %v623_v23 = vld [vmem:[%s20358_s23 + $0x238] sm:$0xff] }
  0x7b   :  { %622 = vst [vmem:[#allocation9 + $0x230] sm:$0xff] %v621_v22  ;;  %624 = vst [vmem:[#allocation9 + $0x238] sm:$0xff] %v623_v23 }
  0x7c   :  { %632 = vsyncadd [#allocation13 + $0x2], 9216  ;;  %v16151_v24 = vld [vmem:[%s20359_s24] sm:$0xff]  ;;  %v16156_v25 = vld [vmem:[%s20359_s24 + $0x8] sm:$0xff] }
  0x7d   :  { %20581 = vst [vmem:[#allocation29_spill] sm:$0xff] %v16151_v24  ;;  %20582 = vst [vmem:[#allocation30_spill] sm:$0xff] %v16156_v25  ;;  %v16161_v26 = vld [vmem:[%s20359_s24 + $0x10] sm:$0xff]  ;;  %v16166_v27 = vld [vmem:[%s20359_s24 + $0x18] sm:$0xff] }
  0x7e   :  { %20583 = vst [vmem:[#allocation31_spill] sm:$0xff] %v16161_v26  ;;  %20584 = vst [vmem:[#allocation32_spill] sm:$0xff] %v16166_v27  ;;  %v16171_v28 = vld [vmem:[%s20359_s24 + $0x20] sm:$0xff]  ;;  %v16176_v29 = vld [vmem:[%s20359_s24 + $0x28] sm:$0xff] }
  0x7f   :  { %20585 = vst [vmem:[#allocation33_spill] sm:$0xff] %v16171_v28  ;;  %20586 = vst [vmem:[#allocation34_spill] sm:$0xff] %v16176_v29  ;;  %v16181_v30 = vld [vmem:[%s20359_s24 + $0x30] sm:$0xff]  ;;  %v16186_v31 = vld [vmem:[%s20359_s24 + $0x38] sm:$0xff] }
  0x80   :  { %20587 = vst [vmem:[#allocation35_spill] sm:$0xff] %v16181_v30  ;;  %20588 = vst [vmem:[#allocation36_spill] sm:$0xff] %v16186_v31  ;;  %v16191_v32 = vld [vmem:[%s20359_s24 + $0x40] sm:$0xff]  ;;  %v16196_v33 = vld [vmem:[%s20359_s24 + $0x48] sm:$0xff] }
  0x81   :  { %20589 = vst [vmem:[#allocation37_spill] sm:$0xff] %v16191_v32  ;;  %20590 = vst [vmem:[#allocation38_spill] sm:$0xff] %v16196_v33  ;;  %v16201_v34 = vld [vmem:[%s20359_s24 + $0x50] sm:$0xff]  ;;  %v16206_v35 = vld [vmem:[%s20359_s24 + $0x58] sm:$0xff] }
  0x82   :  { %20591 = vst [vmem:[#allocation39_spill] sm:$0xff] %v16201_v34  ;;  %20592 = vst [vmem:[#allocation40_spill] sm:$0xff] %v16206_v35  ;;  %v16211_v36 = vld [vmem:[%s20359_s24 + $0x60] sm:$0xff]  ;;  %v16216_v37 = vld [vmem:[%s20359_s24 + $0x68] sm:$0xff] }
  0x83   :  { %20593 = vst [vmem:[#allocation41_spill] sm:$0xff] %v16211_v36  ;;  %20594 = vst [vmem:[#allocation42_spill] sm:$0xff] %v16216_v37  ;;  %v16221_v38 = vld [vmem:[%s20359_s24 + $0x70] sm:$0xff]  ;;  %v16226_v39 = vld [vmem:[%s20359_s24 + $0x78] sm:$0xff] }
  0x84   :  { %20595 = vst [vmem:[#allocation43_spill] sm:$0xff] %v16221_v38  ;;  %20596 = vst [vmem:[#allocation44_spill] sm:$0xff] %v16226_v39  ;;  %v16231_v40 = vld [vmem:[%s20359_s24 + $0x80] sm:$0xff]  ;;  %v16236_v41 = vld [vmem:[%s20359_s24 + $0x88] sm:$0xff] }
  0x85   :  { %20597 = vst [vmem:[#allocation45_spill] sm:$0xff] %v16231_v40  ;;  %20598 = vst [vmem:[#allocation46_spill] sm:$0xff] %v16236_v41  ;;  %v16241_v42 = vld [vmem:[%s20359_s24 + $0x90] sm:$0xff]  ;;  %v16246_v43 = vld [vmem:[%s20359_s24 + $0x98] sm:$0xff] }
  0x86   :  { %20599 = vst [vmem:[#allocation47_spill] sm:$0xff] %v16241_v42  ;;  %20600 = vst [vmem:[#allocation48_spill] sm:$0xff] %v16246_v43  ;;  %v16251_v44 = vld [vmem:[%s20359_s24 + $0xa0] sm:$0xff]  ;;  %v16256_v45 = vld [vmem:[%s20359_s24 + $0xa8] sm:$0xff] }
  0x87   :  { %20601 = vst [vmem:[#allocation49_spill] sm:$0xff] %v16251_v44  ;;  %20602 = vst [vmem:[#allocation50_spill] sm:$0xff] %v16256_v45  ;;  %v16261_v46 = vld [vmem:[%s20359_s24 + $0xb0] sm:$0xff]  ;;  %v16266_v47 = vld [vmem:[%s20359_s24 + $0xb8] sm:$0xff] }
  0x88   :  { %20603 = vst [vmem:[#allocation51_spill] sm:$0xff] %v16261_v46  ;;  %20604 = vst [vmem:[#allocation52_spill] sm:$0xff] %v16266_v47  ;;  %v16271_v48 = vld [vmem:[%s20359_s24 + $0xc0] sm:$0xff]  ;;  %v16276_v49 = vld [vmem:[%s20359_s24 + $0xc8] sm:$0xff] }
  0x89   :  { %20605 = vst [vmem:[#allocation53_spill] sm:$0xff] %v16271_v48  ;;  %20606 = vst [vmem:[#allocation54_spill] sm:$0xff] %v16276_v49  ;;  %v16281_v50 = vld [vmem:[%s20359_s24 + $0xd0] sm:$0xff]  ;;  %v16286_v51 = vld [vmem:[%s20359_s24 + $0xd8] sm:$0xff] }
  0x8a   :  { %20607 = vst [vmem:[#allocation55_spill] sm:$0xff] %v16281_v50  ;;  %20608 = vst [vmem:[#allocation56_spill] sm:$0xff] %v16286_v51  ;;  %v16291_v52 = vld [vmem:[%s20359_s24 + $0xe0] sm:$0xff]  ;;  %v16296_v53 = vld [vmem:[%s20359_s24 + $0xe8] sm:$0xff] }
  0x8b   :  { %20609 = vst [vmem:[#allocation57_spill] sm:$0xff] %v16291_v52  ;;  %20610 = vst [vmem:[#allocation58_spill] sm:$0xff] %v16296_v53  ;;  %v16301_v54 = vld [vmem:[%s20359_s24 + $0xf0] sm:$0xff]  ;;  %v16306_v55 = vld [vmem:[%s20359_s24 + $0xf8] sm:$0xff] }
  0x8c   :  { %20611 = vst [vmem:[#allocation59_spill] sm:$0xff] %v16301_v54  ;;  %20612 = vst [vmem:[#allocation60_spill] sm:$0xff] %v16306_v55  ;;  %v16311_v56 = vld [vmem:[%s20359_s24 + $0x100] sm:$0xff]  ;;  %v16316_v57 = vld [vmem:[%s20359_s24 + $0x108] sm:$0xff] }
  0x8d   :  { %20613 = vst [vmem:[#allocation61_spill] sm:$0xff] %v16311_v56  ;;  %20614 = vst [vmem:[#allocation62_spill] sm:$0xff] %v16316_v57  ;;  %v16321_v58 = vld [vmem:[%s20359_s24 + $0x110] sm:$0xff]  ;;  %v16326_v59 = vld [vmem:[%s20359_s24 + $0x118] sm:$0xff] }
  0x8e   :  { %20615 = vst [vmem:[#allocation63_spill] sm:$0xff] %v16321_v58  ;;  %20616 = vst [vmem:[#allocation64_spill] sm:$0xff] %v16326_v59  ;;  %v16331_v60 = vld [vmem:[%s20359_s24 + $0x120] sm:$0xff]  ;;  %v16336_v61 = vld [vmem:[%s20359_s24 + $0x128] sm:$0xff] }
  0x8f   :  { %20617 = vst [vmem:[#allocation65_spill] sm:$0xff] %v16331_v60  ;;  %20618 = vst [vmem:[#allocation66_spill] sm:$0xff] %v16336_v61  ;;  %v16341_v62 = vld [vmem:[%s20359_s24 + $0x130] sm:$0xff]  ;;  %v16346_v63 = vld [vmem:[%s20359_s24 + $0x138] sm:$0xff] }
  0x90   :  { %20619 = vst [vmem:[#allocation67_spill] sm:$0xff] %v16341_v62  ;;  %20620 = vst [vmem:[#allocation68_spill] sm:$0xff] %v16346_v63  ;;  %v16351_v0 = vld [vmem:[%s20359_s24 + $0x140] sm:$0xff]  ;;  %v16356_v1 = vld [vmem:[%s20359_s24 + $0x148] sm:$0xff] }
  0x91   :  { %20621 = vst [vmem:[#allocation69_spill] sm:$0xff] %v16351_v0  ;;  %20622 = vst [vmem:[#allocation70_spill] sm:$0xff] %v16356_v1  ;;  %v16361_v2 = vld [vmem:[%s20359_s24 + $0x150] sm:$0xff]  ;;  %v16366_v3 = vld [vmem:[%s20359_s24 + $0x158] sm:$0xff] }
  0x92   :  { %20623 = vst [vmem:[#allocation71_spill] sm:$0xff] %v16361_v2  ;;  %20624 = vst [vmem:[#allocation72_spill] sm:$0xff] %v16366_v3  ;;  %v16371_v4 = vld [vmem:[%s20359_s24 + $0x160] sm:$0xff]  ;;  %v16376_v5 = vld [vmem:[%s20359_s24 + $0x168] sm:$0xff] }
  0x93   :  { %20625 = vst [vmem:[#allocation73_spill] sm:$0xff] %v16371_v4  ;;  %20626 = vst [vmem:[#allocation74_spill] sm:$0xff] %v16376_v5  ;;  %v16381_v6 = vld [vmem:[%s20359_s24 + $0x170] sm:$0xff]  ;;  %v16386_v7 = vld [vmem:[%s20359_s24 + $0x178] sm:$0xff] }
  0x94   :  { %20627 = vst [vmem:[#allocation75_spill] sm:$0xff] %v16381_v6  ;;  %20628 = vst [vmem:[#allocation76_spill] sm:$0xff] %v16386_v7  ;;  %v16391_v8 = vld [vmem:[%s20359_s24 + $0x180] sm:$0xff]  ;;  %v16396_v9 = vld [vmem:[%s20359_s24 + $0x188] sm:$0xff] }
  0x95   :  { %20629 = vst [vmem:[#allocation77_spill] sm:$0xff] %v16391_v8  ;;  %20630 = vst [vmem:[#allocation78_spill] sm:$0xff] %v16396_v9  ;;  %v16401_v10 = vld [vmem:[%s20359_s24 + $0x190] sm:$0xff]  ;;  %v16406_v11 = vld [vmem:[%s20359_s24 + $0x198] sm:$0xff] }
  0x96   :  { %20631 = vst [vmem:[#allocation79_spill] sm:$0xff] %v16401_v10  ;;  %20632 = vst [vmem:[#allocation80_spill] sm:$0xff] %v16406_v11  ;;  %v16411_v12 = vld [vmem:[%s20359_s24 + $0x1a0] sm:$0xff]  ;;  %v16416_v13 = vld [vmem:[%s20359_s24 + $0x1a8] sm:$0xff] }
  0x97   :  { %20633 = vst [vmem:[#allocation81_spill] sm:$0xff] %v16411_v12  ;;  %20634 = vst [vmem:[#allocation82_spill] sm:$0xff] %v16416_v13  ;;  %v16421_v14 = vld [vmem:[%s20359_s24 + $0x1b0] sm:$0xff]  ;;  %v16426_v15 = vld [vmem:[%s20359_s24 + $0x1b8] sm:$0xff] }
  0x98   :  { %20635 = vst [vmem:[#allocation83_spill] sm:$0xff] %v16421_v14  ;;  %20636 = vst [vmem:[#allocation84_spill] sm:$0xff] %v16426_v15  ;;  %v16431_v16 = vld [vmem:[%s20359_s24 + $0x1c0] sm:$0xff]  ;;  %v16436_v17 = vld [vmem:[%s20359_s24 + $0x1c8] sm:$0xff] }
  0x99   :  { %20637 = vst [vmem:[#allocation85_spill] sm:$0xff] %v16431_v16  ;;  %20638 = vst [vmem:[#allocation86_spill] sm:$0xff] %v16436_v17  ;;  %v16441_v18 = vld [vmem:[%s20359_s24 + $0x1d0] sm:$0xff]  ;;  %v16446_v19 = vld [vmem:[%s20359_s24 + $0x1d8] sm:$0xff] }
  0x9a   :  { %20639 = vst [vmem:[#allocation87_spill] sm:$0xff] %v16441_v18  ;;  %20640 = vst [vmem:[#allocation88_spill] sm:$0xff] %v16446_v19  ;;  %v16451_v20 = vld [vmem:[%s20359_s24 + $0x1e0] sm:$0xff]  ;;  %v16456_v21 = vld [vmem:[%s20359_s24 + $0x1e8] sm:$0xff] }
  0x9b   :  { %20641 = vst [vmem:[#allocation89_spill] sm:$0xff] %v16451_v20  ;;  %20642 = vst [vmem:[#allocation90_spill] sm:$0xff] %v16456_v21  ;;  %v16461_v22 = vld [vmem:[%s20359_s24 + $0x1f0] sm:$0xff]  ;;  %v16466_v23 = vld [vmem:[%s20359_s24 + $0x1f8] sm:$0xff] }
  0x9c   :  { %20643 = vst [vmem:[#allocation91_spill] sm:$0xff] %v16461_v22  ;;  %20644 = vst [vmem:[#allocation92_spill] sm:$0xff] %v16466_v23  ;;  %v16471_v8 = vld [vmem:[%s20359_s24 + $0x200] sm:$0xff]  ;;  %v16476_v9 = vld [vmem:[%s20359_s24 + $0x208] sm:$0xff] }
  0x9d   :  { %20645 = vst [vmem:[#allocation93_spill] sm:$0xff] %v16471_v8  ;;  %20646 = vst [vmem:[#allocation94_spill] sm:$0xff] %v16476_v9  ;;  %v16481_v40 = vld [vmem:[%s20359_s24 + $0x210] sm:$0xff]  ;;  %v16486_v41 = vld [vmem:[%s20359_s24 + $0x218] sm:$0xff] }
  0x9e   :  { %20647 = vst [vmem:[#allocation95_spill] sm:$0xff] %v16481_v40  ;;  %20648 = vst [vmem:[#allocation96_spill] sm:$0xff] %v16486_v41  ;;  %v16491_v10 = vld [vmem:[%s20359_s24 + $0x220] sm:$0xff]  ;;  %v16496_v8 = vld [vmem:[%s20359_s24 + $0x228] sm:$0xff] }
  0x9f   :  { %20649 = vst [vmem:[#allocation97_spill] sm:$0xff] %v16491_v10  ;;  %20650 = vst [vmem:[#allocation98_spill] sm:$0xff] %v16496_v8  ;;  %v16501_v9 = vld [vmem:[%s20359_s24 + $0x230] sm:$0xff]  ;;  %v16506_v40 = vld [vmem:[%s20359_s24 + $0x238] sm:$0xff] }
  0xa0   :  { %20651 = vst [vmem:[#allocation99_spill] sm:$0xff] %v16501_v9  ;;  %20652 = vst [vmem:[#allocation100_spill] sm:$0xff] %v16506_v40  ;;  %v16511_v41 = vld [vmem:[%s20359_s24 + $0x240] sm:$0xff]  ;;  %v16516_v10 = vld [vmem:[%s20359_s24 + $0x248] sm:$0xff] }
  0xa1   :  { %20653 = vst [vmem:[#allocation101_spill] sm:$0xff] %v16511_v41  ;;  %20654 = vst [vmem:[#allocation102_spill] sm:$0xff] %v16516_v10  ;;  %v16521_v8 = vld [vmem:[%s20359_s24 + $0x250] sm:$0xff]  ;;  %v16526_v9 = vld [vmem:[%s20359_s24 + $0x258] sm:$0xff] }
  0xa2   :  { %20655 = vst [vmem:[#allocation103_spill] sm:$0xff] %v16521_v8  ;;  %20656 = vst [vmem:[#allocation104_spill] sm:$0xff] %v16526_v9  ;;  %v16531_v40 = vld [vmem:[%s20359_s24 + $0x260] sm:$0xff]  ;;  %v16536_v41 = vld [vmem:[%s20359_s24 + $0x268] sm:$0xff] }
  0xa3   :  { %20657 = vst [vmem:[#allocation105_spill] sm:$0xff] %v16531_v40  ;;  %20658 = vst [vmem:[#allocation106_spill] sm:$0xff] %v16536_v41  ;;  %v16541_v10 = vld [vmem:[%s20359_s24 + $0x270] sm:$0xff]  ;;  %v16546_v8 = vld [vmem:[%s20359_s24 + $0x278] sm:$0xff] }
  0xa4   :  { %20659 = vst [vmem:[#allocation107_spill] sm:$0xff] %v16541_v10  ;;  %20660 = vst [vmem:[#allocation108_spill] sm:$0xff] %v16546_v8  ;;  %v16551_v9 = vld [vmem:[%s20359_s24 + $0x280] sm:$0xff]  ;;  %v16556_v40 = vld [vmem:[%s20359_s24 + $0x288] sm:$0xff] }
  0xa5   :  { %20661 = vst [vmem:[#allocation109_spill] sm:$0xff] %v16551_v9  ;;  %20662 = vst [vmem:[#allocation110_spill] sm:$0xff] %v16556_v40  ;;  %v16561_v41 = vld [vmem:[%s20359_s24 + $0x290] sm:$0xff]  ;;  %v16566_v10 = vld [vmem:[%s20359_s24 + $0x298] sm:$0xff] }
  0xa6   :  { %20663 = vst [vmem:[#allocation111_spill] sm:$0xff] %v16561_v41  ;;  %20664 = vst [vmem:[#allocation112_spill] sm:$0xff] %v16566_v10  ;;  %v16571_v8 = vld [vmem:[%s20359_s24 + $0x2a0] sm:$0xff]  ;;  %v16576_v9 = vld [vmem:[%s20359_s24 + $0x2a8] sm:$0xff] }
  0xa7   :  { %20665 = vst [vmem:[#allocation113_spill] sm:$0xff] %v16571_v8  ;;  %20666 = vst [vmem:[#allocation114_spill] sm:$0xff] %v16576_v9  ;;  %v16581_v40 = vld [vmem:[%s20359_s24 + $0x2b0] sm:$0xff]  ;;  %v16586_v41 = vld [vmem:[%s20359_s24 + $0x2b8] sm:$0xff] }
  0xa8   :  { %20667 = vst [vmem:[#allocation115_spill] sm:$0xff] %v16581_v40  ;;  %20668 = vst [vmem:[#allocation116_spill] sm:$0xff] %v16586_v41  ;;  %v16591_v10 = vld [vmem:[%s20359_s24 + $0x2c0] sm:$0xff]  ;;  %v16596_v8 = vld [vmem:[%s20359_s24 + $0x2c8] sm:$0xff] }
  0xa9   :  { %20669 = vst [vmem:[#allocation117_spill] sm:$0xff] %v16591_v10  ;;  %20670 = vst [vmem:[#allocation118_spill] sm:$0xff] %v16596_v8  ;;  %v16601_v9 = vld [vmem:[%s20359_s24 + $0x2d0] sm:$0xff]  ;;  %v16606_v40 = vld [vmem:[%s20359_s24 + $0x2d8] sm:$0xff] }
  0xaa   :  { %20671 = vst [vmem:[#allocation119_spill] sm:$0xff] %v16601_v9  ;;  %20672 = vst [vmem:[#allocation120_spill] sm:$0xff] %v16606_v40  ;;  %v16611_v41 = vld [vmem:[%s20359_s24 + $0x2e0] sm:$0xff]  ;;  %v16616_v10 = vld [vmem:[%s20359_s24 + $0x2e8] sm:$0xff] }
  0xab   :  { %20673 = vst [vmem:[#allocation121_spill] sm:$0xff] %v16611_v41  ;;  %20674 = vst [vmem:[#allocation122_spill] sm:$0xff] %v16616_v10  ;;  %v16621_v8 = vld [vmem:[%s20359_s24 + $0x2f0] sm:$0xff]  ;;  %v16626_v9 = vld [vmem:[%s20359_s24 + $0x2f8] sm:$0xff] }
  0xac   :  { %20675 = vst [vmem:[#allocation123_spill] sm:$0xff] %v16621_v8  ;;  %20676 = vst [vmem:[#allocation124_spill] sm:$0xff] %v16626_v9  ;;  %v16631_v40 = vld [vmem:[%s20359_s24 + $0x300] sm:$0xff]  ;;  %v16636_v41 = vld [vmem:[%s20359_s24 + $0x308] sm:$0xff] }
  0xad   :  { %20677 = vst [vmem:[#allocation125_spill] sm:$0xff] %v16631_v40  ;;  %20678 = vst [vmem:[#allocation126_spill] sm:$0xff] %v16636_v41  ;;  %v16641_v10 = vld [vmem:[%s20359_s24 + $0x310] sm:$0xff]  ;;  %v16646_v8 = vld [vmem:[%s20359_s24 + $0x318] sm:$0xff] }
  0xae   :  { %20679 = vst [vmem:[#allocation127_spill] sm:$0xff] %v16641_v10  ;;  %20680 = vst [vmem:[#allocation128_spill] sm:$0xff] %v16646_v8  ;;  %v16651_v9 = vld [vmem:[%s20359_s24 + $0x320] sm:$0xff]  ;;  %v16656_v40 = vld [vmem:[%s20359_s24 + $0x328] sm:$0xff] }
  0xaf   :  { %20681 = vst [vmem:[#allocation129_spill] sm:$0xff] %v16651_v9  ;;  %20682 = vst [vmem:[#allocation130_spill] sm:$0xff] %v16656_v40  ;;  %v16661_v41 = vld [vmem:[%s20359_s24 + $0x330] sm:$0xff]  ;;  %v16666_v10 = vld [vmem:[%s20359_s24 + $0x338] sm:$0xff] }
  0xb0   :  { %20683 = vst [vmem:[#allocation131_spill] sm:$0xff] %v16661_v41  ;;  %20684 = vst [vmem:[#allocation132_spill] sm:$0xff] %v16666_v10  ;;  %v16671_v8 = vld [vmem:[%s20359_s24 + $0x340] sm:$0xff]  ;;  %v16676_v9 = vld [vmem:[%s20359_s24 + $0x348] sm:$0xff] }
  0xb1   :  { %20685 = vst [vmem:[#allocation133_spill] sm:$0xff] %v16671_v8  ;;  %20686 = vst [vmem:[#allocation134_spill] sm:$0xff] %v16676_v9  ;;  %v16681_v40 = vld [vmem:[%s20359_s24 + $0x350] sm:$0xff]  ;;  %v16686_v41 = vld [vmem:[%s20359_s24 + $0x358] sm:$0xff] }
  0xb2   :  { %20687 = vst [vmem:[#allocation135_spill] sm:$0xff] %v16681_v40  ;;  %20688 = vst [vmem:[#allocation136_spill] sm:$0xff] %v16686_v41  ;;  %v16691_v10 = vld [vmem:[%s20359_s24 + $0x360] sm:$0xff]  ;;  %v16696_v8 = vld [vmem:[%s20359_s24 + $0x368] sm:$0xff] }
  0xb3   :  { %20689 = vst [vmem:[#allocation137_spill] sm:$0xff] %v16691_v10  ;;  %20690 = vst [vmem:[#allocation138_spill] sm:$0xff] %v16696_v8  ;;  %v16701_v9 = vld [vmem:[%s20359_s24 + $0x370] sm:$0xff]  ;;  %v16706_v40 = vld [vmem:[%s20359_s24 + $0x378] sm:$0xff] }
  0xb4   :  { %20691 = vst [vmem:[#allocation139_spill] sm:$0xff] %v16701_v9  ;;  %20692 = vst [vmem:[#allocation140_spill] sm:$0xff] %v16706_v40  ;;  %v16711_v41 = vld [vmem:[%s20359_s24 + $0x380] sm:$0xff]  ;;  %v16716_v10 = vld [vmem:[%s20359_s24 + $0x388] sm:$0xff] }
  0xb5   :  { %20693 = vst [vmem:[#allocation141_spill] sm:$0xff] %v16711_v41  ;;  %20694 = vst [vmem:[#allocation142_spill] sm:$0xff] %v16716_v10  ;;  %v16721_v8 = vld [vmem:[%s20359_s24 + $0x390] sm:$0xff]  ;;  %v16726_v9 = vld [vmem:[%s20359_s24 + $0x398] sm:$0xff] }
  0xb6   :  { %20695 = vst [vmem:[#allocation143_spill] sm:$0xff] %v16721_v8  ;;  %20696 = vst [vmem:[#allocation144_spill] sm:$0xff] %v16726_v9  ;;  %v16731_v40 = vld [vmem:[%s20359_s24 + $0x3a0] sm:$0xff]  ;;  %v16736_v41 = vld [vmem:[%s20359_s24 + $0x3a8] sm:$0xff] }
  0xb7   :  { %20697 = vst [vmem:[#allocation145_spill] sm:$0xff] %v16731_v40  ;;  %20698 = vst [vmem:[#allocation146_spill] sm:$0xff] %v16736_v41  ;;  %v16741_v10 = vld [vmem:[%s20359_s24 + $0x3b0] sm:$0xff]  ;;  %v16746_v8 = vld [vmem:[%s20359_s24 + $0x3b8] sm:$0xff] }
  0xb8   :  { %20699 = vst [vmem:[#allocation147_spill] sm:$0xff] %v16741_v10  ;;  %20700 = vst [vmem:[#allocation148_spill] sm:$0xff] %v16746_v8  ;;  %v16751_v9 = vld [vmem:[%s20359_s24 + $0x3c0] sm:$0xff]  ;;  %v16756_v40 = vld [vmem:[%s20359_s24 + $0x3c8] sm:$0xff] }
  0xb9   :  { %20701 = vst [vmem:[#allocation149_spill] sm:$0xff] %v16751_v9  ;;  %20702 = vst [vmem:[#allocation150_spill] sm:$0xff] %v16756_v40  ;;  %v16761_v41 = vld [vmem:[%s20359_s24 + $0x3d0] sm:$0xff]  ;;  %v16766_v10 = vld [vmem:[%s20359_s24 + $0x3d8] sm:$0xff] }
  0xba   :  { %20703 = vst [vmem:[#allocation151_spill] sm:$0xff] %v16761_v41  ;;  %20704 = vst [vmem:[#allocation152_spill] sm:$0xff] %v16766_v10  ;;  %v16771_v8 = vld [vmem:[%s20359_s24 + $0x3e0] sm:$0xff]  ;;  %v16776_v9 = vld [vmem:[%s20359_s24 + $0x3e8] sm:$0xff] }
  0xbb   :  { %20705 = vst [vmem:[#allocation153_spill] sm:$0xff] %v16771_v8  ;;  %20706 = vst [vmem:[#allocation154_spill] sm:$0xff] %v16776_v9  ;;  %v16781_v40 = vld [vmem:[%s20359_s24 + $0x3f0] sm:$0xff]  ;;  %v16786_v41 = vld [vmem:[%s20359_s24 + $0x3f8] sm:$0xff] }
  0xbc   :  { %20707 = vst [vmem:[#allocation155_spill] sm:$0xff] %v16781_v40  ;;  %20708 = vst [vmem:[#allocation156_spill] sm:$0xff] %v16786_v41  ;;  %v16791_v10 = vld [vmem:[%s20359_s24 + $0x400] sm:$0xff]  ;;  %v16796_v8 = vld [vmem:[%s20359_s24 + $0x408] sm:$0xff] }
  0xbd   :  { %20709 = vst [vmem:[#allocation157_spill] sm:$0xff] %v16791_v10  ;;  %20710 = vst [vmem:[#allocation158_spill] sm:$0xff] %v16796_v8  ;;  %v16801_v9 = vld [vmem:[%s20359_s24 + $0x410] sm:$0xff]  ;;  %v16806_v40 = vld [vmem:[%s20359_s24 + $0x418] sm:$0xff] }
  0xbe   :  { %20711 = vst [vmem:[#allocation159_spill] sm:$0xff] %v16801_v9  ;;  %20712 = vst [vmem:[#allocation160_spill] sm:$0xff] %v16806_v40  ;;  %v16811_v41 = vld [vmem:[%s20359_s24 + $0x420] sm:$0xff]  ;;  %v16816_v10 = vld [vmem:[%s20359_s24 + $0x428] sm:$0xff] }
  0xbf   :  { %20713 = vst [vmem:[#allocation161_spill] sm:$0xff] %v16811_v41  ;;  %20714 = vst [vmem:[#allocation162_spill] sm:$0xff] %v16816_v10  ;;  %v16821_v8 = vld [vmem:[%s20359_s24 + $0x430] sm:$0xff]  ;;  %v16826_v9 = vld [vmem:[%s20359_s24 + $0x438] sm:$0xff] }
  0xc0   :  { %20715 = vst [vmem:[#allocation163_spill] sm:$0xff] %v16821_v8  ;;  %20716 = vst [vmem:[#allocation164_spill] sm:$0xff] %v16826_v9  ;;  %v16831_v40 = vld [vmem:[%s20359_s24 + $0x440] sm:$0xff]  ;;  %v16836_v41 = vld [vmem:[%s20359_s24 + $0x448] sm:$0xff] }
  0xc1   :  { %20717 = vst [vmem:[#allocation165_spill] sm:$0xff] %v16831_v40  ;;  %20718 = vst [vmem:[#allocation166_spill] sm:$0xff] %v16836_v41  ;;  %v16841_v10 = vld [vmem:[%s20359_s24 + $0x450] sm:$0xff]  ;;  %v16846_v8 = vld [vmem:[%s20359_s24 + $0x458] sm:$0xff] }
  0xc2   :  { %20719 = vst [vmem:[#allocation167_spill] sm:$0xff] %v16841_v10  ;;  %20720 = vst [vmem:[#allocation168_spill] sm:$0xff] %v16846_v8  ;;  %v16851_v9 = vld [vmem:[%s20359_s24 + $0x460] sm:$0xff]  ;;  %v16856_v40 = vld [vmem:[%s20359_s24 + $0x468] sm:$0xff] }
  0xc3   :  { %20721 = vst [vmem:[#allocation169_spill] sm:$0xff] %v16851_v9  ;;  %20722 = vst [vmem:[#allocation170_spill] sm:$0xff] %v16856_v40  ;;  %v16861_v41 = vld [vmem:[%s20359_s24 + $0x470] sm:$0xff]  ;;  %v16866_v10 = vld [vmem:[%s20359_s24 + $0x478] sm:$0xff] }
  0xc4   :  { %20723 = vst [vmem:[#allocation171_spill] sm:$0xff] %v16861_v41  ;;  %20724 = vst [vmem:[#allocation172_spill] sm:$0xff] %v16866_v10 }
  0xc5   :  { %962 = vsyncadd [#allocation13 + $0x3], 18432  ;;  %v997_v8 = vld [vmem:[%s20360_s25] sm:$0xff]  ;;  %v999_v9 = vld [vmem:[%s20360_s25 + $0x8] sm:$0xff] }
  0xc6   :  { %998 = vst [vmem:[#allocation11] sm:$0xff] %v997_v8  ;;  %1000 = vst [vmem:[#allocation11 + $0x8] sm:$0xff] %v999_v9  ;;  %v1001_v40 = vld [vmem:[%s20360_s25 + $0x10] sm:$0xff]  ;;  %v1003_v41 = vld [vmem:[%s20360_s25 + $0x18] sm:$0xff] }
  0xc7   :  { %v1005_v10 = vld [vmem:[%s20360_s25 + $0x20] sm:$0xff]  ;;  %1002 = vst [vmem:[#allocation11 + $0x10] sm:$0xff] %v1001_v40  ;;  %1004 = vst [vmem:[#allocation11 + $0x18] sm:$0xff] %v1003_v41  ;;  %v1007_v8 = vld [vmem:[%s20360_s25 + $0x28] sm:$0xff] }
  0xc8   :  { %1006 = vst [vmem:[#allocation11 + $0x20] sm:$0xff] %v1005_v10  ;;  %v1009_v9 = vld [vmem:[%s20360_s25 + $0x30] sm:$0xff]  ;;  %v1011_v11 = vld [vmem:[%s20360_s25 + $0x38] sm:$0xff]  ;;  %1008 = vst [vmem:[#allocation11 + $0x28] sm:$0xff] %v1007_v8 }
  0xc9   :  { %1010 = vst [vmem:[#allocation11 + $0x30] sm:$0xff] %v1009_v9  ;;  %1012 = vst [vmem:[#allocation11 + $0x38] sm:$0xff] %v1011_v11  ;;  %v1013_v40 = vld [vmem:[%s20360_s25 + $0x40] sm:$0xff]  ;;  %v1015_v41 = vld [vmem:[%s20360_s25 + $0x48] sm:$0xff] }
  0xca   :  { %v1017_v10 = vld [vmem:[%s20360_s25 + $0x50] sm:$0xff]  ;;  %1014 = vst [vmem:[#allocation11 + $0x40] sm:$0xff] %v1013_v40  ;;  %1016 = vst [vmem:[#allocation11 + $0x48] sm:$0xff] %v1015_v41  ;;  %v1019_v8 = vld [vmem:[%s20360_s25 + $0x58] sm:$0xff] }
  0xcb   :  { %1018 = vst [vmem:[#allocation11 + $0x50] sm:$0xff] %v1017_v10  ;;  %v1021_v11 = vld [vmem:[%s20360_s25 + $0x60] sm:$0xff]  ;;  %v1023_v9 = vld [vmem:[%s20360_s25 + $0x68] sm:$0xff]  ;;  %1020 = vst [vmem:[#allocation11 + $0x58] sm:$0xff] %v1019_v8 }
  0xcc   :  { %1022 = vst [vmem:[#allocation11 + $0x60] sm:$0xff] %v1021_v11  ;;  %1024 = vst [vmem:[#allocation11 + $0x68] sm:$0xff] %v1023_v9  ;;  %v1025_v40 = vld [vmem:[%s20360_s25 + $0x70] sm:$0xff]  ;;  %v1027_v41 = vld [vmem:[%s20360_s25 + $0x78] sm:$0xff] }
  0xcd   :  { %v1029_v10 = vld [vmem:[%s20360_s25 + $0x80] sm:$0xff]  ;;  %1026 = vst [vmem:[#allocation11 + $0x70] sm:$0xff] %v1025_v40  ;;  %1028 = vst [vmem:[#allocation11 + $0x78] sm:$0xff] %v1027_v41  ;;  %v1031_v8 = vld [vmem:[%s20360_s25 + $0x88] sm:$0xff] }
  0xce   :  { %1030 = vst [vmem:[#allocation11 + $0x80] sm:$0xff] %v1029_v10  ;;  %v1033_v11 = vld [vmem:[%s20360_s25 + $0x90] sm:$0xff]  ;;  %v1035_v9 = vld [vmem:[%s20360_s25 + $0x98] sm:$0xff]  ;;  %1032 = vst [vmem:[#allocation11 + $0x88] sm:$0xff] %v1031_v8 }
  0xcf   :  { %1034 = vst [vmem:[#allocation11 + $0x90] sm:$0xff] %v1033_v11  ;;  %1036 = vst [vmem:[#allocation11 + $0x98] sm:$0xff] %v1035_v9  ;;  %v1037_v40 = vld [vmem:[%s20360_s25 + $0xa0] sm:$0xff]  ;;  %v1039_v41 = vld [vmem:[%s20360_s25 + $0xa8] sm:$0xff] }
  0xd0   :  { %v1041_v10 = vld [vmem:[%s20360_s25 + $0xb0] sm:$0xff]  ;;  %1038 = vst [vmem:[#allocation11 + $0xa0] sm:$0xff] %v1037_v40  ;;  %1040 = vst [vmem:[#allocation11 + $0xa8] sm:$0xff] %v1039_v41  ;;  %v1043_v8 = vld [vmem:[%s20360_s25 + $0xb8] sm:$0xff] }
  0xd1   :  { %1042 = vst [vmem:[#allocation11 + $0xb0] sm:$0xff] %v1041_v10  ;;  %v1045_v11 = vld [vmem:[%s20360_s25 + $0xc0] sm:$0xff]  ;;  %v1047_v9 = vld [vmem:[%s20360_s25 + $0xc8] sm:$0xff]  ;;  %1044 = vst [vmem:[#allocation11 + $0xb8] sm:$0xff] %v1043_v8 }
  0xd2   :  { %1046 = vst [vmem:[#allocation11 + $0xc0] sm:$0xff] %v1045_v11  ;;  %1048 = vst [vmem:[#allocation11 + $0xc8] sm:$0xff] %v1047_v9  ;;  %v1049_v40 = vld [vmem:[%s20360_s25 + $0xd0] sm:$0xff]  ;;  %v1051_v41 = vld [vmem:[%s20360_s25 + $0xd8] sm:$0xff] }
  0xd3   :  { %v1053_v10 = vld [vmem:[%s20360_s25 + $0xe0] sm:$0xff]  ;;  %1050 = vst [vmem:[#allocation11 + $0xd0] sm:$0xff] %v1049_v40  ;;  %1052 = vst [vmem:[#allocation11 + $0xd8] sm:$0xff] %v1051_v41  ;;  %v1055_v8 = vld [vmem:[%s20360_s25 + $0xe8] sm:$0xff] }
  0xd4   :  { %1054 = vst [vmem:[#allocation11 + $0xe0] sm:$0xff] %v1053_v10  ;;  %v1057_v11 = vld [vmem:[%s20360_s25 + $0xf0] sm:$0xff]  ;;  %v1059_v9 = vld [vmem:[%s20360_s25 + $0xf8] sm:$0xff]  ;;  %1056 = vst [vmem:[#allocation11 + $0xe8] sm:$0xff] %v1055_v8 }
  0xd5   :  { %1058 = vst [vmem:[#allocation11 + $0xf0] sm:$0xff] %v1057_v11  ;;  %1060 = vst [vmem:[#allocation11 + $0xf8] sm:$0xff] %v1059_v9  ;;  %v1061_v40 = vld [vmem:[%s20360_s25 + $0x100] sm:$0xff]  ;;  %v1063_v41 = vld [vmem:[%s20360_s25 + $0x108] sm:$0xff] }
  0xd6   :  { %v1065_v10 = vld [vmem:[%s20360_s25 + $0x110] sm:$0xff]  ;;  %1062 = vst [vmem:[#allocation11 + $0x100] sm:$0xff] %v1061_v40  ;;  %1064 = vst [vmem:[#allocation11 + $0x108] sm:$0xff] %v1063_v41  ;;  %v1067_v8 = vld [vmem:[%s20360_s25 + $0x118] sm:$0xff] }
  0xd7   :  { %1066 = vst [vmem:[#allocation11 + $0x110] sm:$0xff] %v1065_v10  ;;  %v1069_v11 = vld [vmem:[%s20360_s25 + $0x120] sm:$0xff]  ;;  %v1071_v9 = vld [vmem:[%s20360_s25 + $0x128] sm:$0xff]  ;;  %1068 = vst [vmem:[#allocation11 + $0x118] sm:$0xff] %v1067_v8 }
  0xd8   :  { %1070 = vst [vmem:[#allocation11 + $0x120] sm:$0xff] %v1069_v11  ;;  %1072 = vst [vmem:[#allocation11 + $0x128] sm:$0xff] %v1071_v9  ;;  %v1073_v40 = vld [vmem:[%s20360_s25 + $0x130] sm:$0xff]  ;;  %v1075_v41 = vld [vmem:[%s20360_s25 + $0x138] sm:$0xff] }
  0xd9   :  { %v1077_v10 = vld [vmem:[%s20360_s25 + $0x140] sm:$0xff]  ;;  %1074 = vst [vmem:[#allocation11 + $0x130] sm:$0xff] %v1073_v40  ;;  %1076 = vst [vmem:[#allocation11 + $0x138] sm:$0xff] %v1075_v41  ;;  %v1079_v8 = vld [vmem:[%s20360_s25 + $0x148] sm:$0xff] }
  0xda   :  { %1078 = vst [vmem:[#allocation11 + $0x140] sm:$0xff] %v1077_v10  ;;  %v1081_v11 = vld [vmem:[%s20360_s25 + $0x150] sm:$0xff]  ;;  %v1083_v9 = vld [vmem:[%s20360_s25 + $0x158] sm:$0xff]  ;;  %1080 = vst [vmem:[#allocation11 + $0x148] sm:$0xff] %v1079_v8 }
  0xdb   :  { %1082 = vst [vmem:[#allocation11 + $0x150] sm:$0xff] %v1081_v11  ;;  %1084 = vst [vmem:[#allocation11 + $0x158] sm:$0xff] %v1083_v9  ;;  %v1085_v40 = vld [vmem:[%s20360_s25 + $0x160] sm:$0xff]  ;;  %v1087_v41 = vld [vmem:[%s20360_s25 + $0x168] sm:$0xff] }
  0xdc   :  { %v1089_v10 = vld [vmem:[%s20360_s25 + $0x170] sm:$0xff]  ;;  %1086 = vst [vmem:[#allocation11 + $0x160] sm:$0xff] %v1085_v40  ;;  %1088 = vst [vmem:[#allocation11 + $0x168] sm:$0xff] %v1087_v41  ;;  %v1091_v8 = vld [vmem:[%s20360_s25 + $0x178] sm:$0xff] }
  0xdd   :  { %1090 = vst [vmem:[#allocation11 + $0x170] sm:$0xff] %v1089_v10  ;;  %1092 = vst [vmem:[#allocation11 + $0x178] sm:$0xff] %v1091_v8 }
  0xde   :  { %1100 = vsyncadd [#allocation13 + $0x4], 6144  ;;  %v1135_v11 = vld [vmem:[%s20361_s26] sm:$0xff]  ;;  %v1137_v9 = vld [vmem:[%s20361_s26 + $0x8] sm:$0xff] }
  0xdf   :  { %1136 = vst [vmem:[#allocation12] sm:$0xff] %v1135_v11  ;;  %1138 = vst [vmem:[#allocation12 + $0x8] sm:$0xff] %v1137_v9  ;;  %v1139_v40 = vld [vmem:[%s20361_s26 + $0x10] sm:$0xff]  ;;  %v1141_v41 = vld [vmem:[%s20361_s26 + $0x18] sm:$0xff] }
  0xe0   :  { %v1143_v10 = vld [vmem:[%s20361_s26 + $0x20] sm:$0xff]  ;;  %1140 = vst [vmem:[#allocation12 + $0x10] sm:$0xff] %v1139_v40  ;;  %1142 = vst [vmem:[#allocation12 + $0x18] sm:$0xff] %v1141_v41  ;;  %v1145_v8 = vld [vmem:[%s20361_s26 + $0x28] sm:$0xff] }
  0xe1   :  { %1144 = vst [vmem:[#allocation12 + $0x20] sm:$0xff] %v1143_v10  ;;  %v1147_v11 = vld [vmem:[%s20361_s26 + $0x30] sm:$0xff]  ;;  %v1149_v9 = vld [vmem:[%s20361_s26 + $0x38] sm:$0xff]  ;;  %1146 = vst [vmem:[#allocation12 + $0x28] sm:$0xff] %v1145_v8 }
  0xe2   :  { %1148 = vst [vmem:[#allocation12 + $0x30] sm:$0xff] %v1147_v11  ;;  %1150 = vst [vmem:[#allocation12 + $0x38] sm:$0xff] %v1149_v9  ;;  %v1151_v40 = vld [vmem:[%s20361_s26 + $0x40] sm:$0xff]  ;;  %v1153_v41 = vld [vmem:[%s20361_s26 + $0x48] sm:$0xff] }
  0xe3   :  { %v1155_v10 = vld [vmem:[%s20361_s26 + $0x50] sm:$0xff]  ;;  %1152 = vst [vmem:[#allocation12 + $0x40] sm:$0xff] %v1151_v40  ;;  %1154 = vst [vmem:[#allocation12 + $0x48] sm:$0xff] %v1153_v41  ;;  %v1157_v8 = vld [vmem:[%s20361_s26 + $0x58] sm:$0xff] }
  0xe4   :  { %1156 = vst [vmem:[#allocation12 + $0x50] sm:$0xff] %v1155_v10  ;;  %v1159_v11 = vld [vmem:[%s20361_s26 + $0x60] sm:$0xff]  ;;  %v1161_v9 = vld [vmem:[%s20361_s26 + $0x68] sm:$0xff]  ;;  %1158 = vst [vmem:[#allocation12 + $0x58] sm:$0xff] %v1157_v8 }
  0xe5   :  { %1160 = vst [vmem:[#allocation12 + $0x60] sm:$0xff] %v1159_v11  ;;  %1162 = vst [vmem:[#allocation12 + $0x68] sm:$0xff] %v1161_v9  ;;  %v1163_v40 = vld [vmem:[%s20361_s26 + $0x70] sm:$0xff]  ;;  %v1165_v41 = vld [vmem:[%s20361_s26 + $0x78] sm:$0xff] }
  0xe6   :  { %v1167_v10 = vld [vmem:[%s20361_s26 + $0x80] sm:$0xff]  ;;  %1164 = vst [vmem:[#allocation12 + $0x70] sm:$0xff] %v1163_v40  ;;  %1166 = vst [vmem:[#allocation12 + $0x78] sm:$0xff] %v1165_v41  ;;  %v1169_v8 = vld [vmem:[%s20361_s26 + $0x88] sm:$0xff] }
  0xe7   :  { %1168 = vst [vmem:[#allocation12 + $0x80] sm:$0xff] %v1167_v10  ;;  %v1171_v11 = vld [vmem:[%s20361_s26 + $0x90] sm:$0xff]  ;;  %v1173_v9 = vld [vmem:[%s20361_s26 + $0x98] sm:$0xff]  ;;  %1170 = vst [vmem:[#allocation12 + $0x88] sm:$0xff] %v1169_v8 }
  0xe8   :  { %1172 = vst [vmem:[#allocation12 + $0x90] sm:$0xff] %v1171_v11  ;;  %1174 = vst [vmem:[#allocation12 + $0x98] sm:$0xff] %v1173_v9  ;;  %v1175_v40 = vld [vmem:[%s20361_s26 + $0xa0] sm:$0xff]  ;;  %v1177_v41 = vld [vmem:[%s20361_s26 + $0xa8] sm:$0xff] }
  0xe9   :  { %v1179_v10 = vld [vmem:[%s20361_s26 + $0xb0] sm:$0xff]  ;;  %1176 = vst [vmem:[#allocation12 + $0xa0] sm:$0xff] %v1175_v40  ;;  %1178 = vst [vmem:[#allocation12 + $0xa8] sm:$0xff] %v1177_v41  ;;  %v1181_v8 = vld [vmem:[%s20361_s26 + $0xb8] sm:$0xff] }
  0xea   :  { %1180 = vst [vmem:[#allocation12 + $0xb0] sm:$0xff] %v1179_v10  ;;  %1182 = vst [vmem:[#allocation12 + $0xb8] sm:$0xff] %v1181_v8 }
  0xeb   :  { %1190 = vsyncadd [#allocation13 + $0x5], 3072  ;;  %s20725_s10 = sld [smem:[#allocation189_spill]]  ;;  %vm1657_vm0 = vcmask 261120  }
  0xec   :  { %s20726_s2 = sld [smem:[#allocation188_spill]] }
  0xed   :  { %s20727_s8 = sld [smem:[#allocation192_spill]] }
  0xee   :  { %s20728_s21 = sld [smem:[#allocation190_spill]] }
  0xef   :  { %s20729_s5 = sld [smem:[#allocation191_spill]] }
  0xf1   :  { %v14734_v11 = vld [vmem:[%s20725_s10 + $0x8] sm:$0xff]   ;;  %v14735_v9 = vld [vmem:[%s20725_s10] sm:$0xff]  }
  0xf2   :  { %14404 = vmatprep.subr.bf16.mxu0 %v14734_v11  ;;  %v14736_v40 = vld [vmem:[%s20726_s2] sm:$0xff]   ;;  %v14737_v41 = vld [vmem:[%s20726_s2 + $0x8] sm:$0xff]   ;;  %v14738_v10 = vld [vmem:[%s20726_s2 + $0x10] sm:$0xff]  }
  0xf3   :  { %14405 = vmatpush3.bf16.msra.mxu0 %v14734_v11  ;;  %14408 = vmatprep.mubr.msk.bf16.mxu0 %vm1657_vm0, %v14736_v40  ;;  %v14739_v8 = vld [vmem:[%s20726_s2 + $0x18] sm:$0xff]   ;;  %v14740_v11 = vld [vmem:[%s20726_s2 + $0x20] sm:$0xff]   ;;  %v14742_v40 = vld [vmem:[%s20726_s2 + $0x30] sm:$0xff]  }
  0xf4   :  { %14406 = vmatprep.subr.bf16.mxu0 %v14735_v9  ;;  %v14787_v13 = vld [vmem:[%s20726_s2 + $0x198] sm:$0xff]   ;;  %v14797_v51 = vld [vmem:[%s20726_s2 + $0x1e8] sm:$0xff]   ;;  %v14798_v20 = vld [vmem:[%s20726_s2 + $0x1f0] sm:$0xff]  }
  0xf5   :  { %v14799_v53 = vld [vmem:[%s20726_s2 + $0x1f8] sm:$0xff]  }
  0xf6   :  { %v17980_v37 = vld [vmem:[%s20727_s8 + $0x10c] ss:$16 sps:$4 sm:$0xff]  }
  0xf7   :  { %14407 = vmatpush3.bf16.msra.mxu0 %v14735_v9  ;;  %v14741_v9 = vld [vmem:[%s20726_s2 + $0x28] sm:$0xff]   ;;  %20740 = vst [vmem:[#allocation181_spill] sm:$0xff] %v17980_v37 }
  0xfa   :  { %14409 = vmatmul.mubr.msk.bf16.vlgmr.msra.gmra.mxu0 %vm1657_vm0, %v14737_v41  ;;  %v14743_v41 = vld [vmem:[%s20726_s2 + $0x38] sm:$0xff]  }
  0xfb   :  { %14412 = vmatprep.mubr.msk.bf16.mxu0 %vm1657_vm0, %v14738_v10  ;;  %v14744_v10 = vld [vmem:[%s20726_s2 + $0x40] sm:$0xff]  }
 0x102   :  { %14413 = vmatmul.mubr.msk.bf16.gmra.mxu0 %vm1657_vm0, %v14739_v8  ;;  %v14745_v8 = vld [vmem:[%s20726_s2 + $0x48] sm:$0xff]  }
 0x103   :  { %14416 = vmatprep.mubr.msk.bf16.mxu0 %vm1657_vm0, %v14740_v11  ;;  %v14746_v11 = vld [vmem:[%s20726_s2 + $0x50] sm:$0xff]  }
 0x10a   :  { %14417 = vmatmul.mubr.msk.bf16.gmra.mxu0 %vm1657_vm0, %v14741_v9  ;;  %v14747_v9 = vld [vmem:[%s20726_s2 + $0x58] sm:$0xff]  }
 0x10b   :  { %14420 = vmatprep.mubr.msk.bf16.mxu0 %vm1657_vm0, %v14742_v40  ;;  %v14748_v40 = vld [vmem:[%s20726_s2 + $0x60] sm:$0xff]  }
 0x112   :  { %14421 = vmatmul.mubr.msk.bf16.gmra.mxu0 %vm1657_vm0, %v14743_v41  ;;  %v14749_v41 = vld [vmem:[%s20726_s2 + $0x68] sm:$0xff]  }
 0x113   :  { %14424 = vmatprep.mubr.msk.bf16.mxu0 %vm1657_vm0, %v14744_v10  ;;  %v14750_v10 = vld [vmem:[%s20726_s2 + $0x70] sm:$0xff]  }
 0x11a   :  { %14425 = vmatmul.mubr.msk.bf16.gmra.mxu0 %vm1657_vm0, %v14745_v8  ;;  %v14751_v8 = vld [vmem:[%s20726_s2 + $0x78] sm:$0xff]  }
 0x11b   :  { %14428 = vmatprep.mubr.msk.bf16.mxu0 %vm1657_vm0, %v14746_v11  ;;  %v14752_v11 = vld [vmem:[%s20726_s2 + $0x80] sm:$0xff]  }
 0x122   :  { %14429 = vmatmul.mubr.msk.bf16.gmra.mxu0 %vm1657_vm0, %v14747_v9  ;;  %v14753_v9 = vld [vmem:[%s20726_s2 + $0x88] sm:$0xff]  }
 0x123   :  { %14432 = vmatprep.mubr.msk.bf16.mxu0 %vm1657_vm0, %v14748_v40  ;;  %v14754_v40 = vld [vmem:[%s20726_s2 + $0x90] sm:$0xff]  }
 0x12a   :  { %14433 = vmatmul.mubr.msk.bf16.gmra.mxu0 %vm1657_vm0, %v14749_v41  ;;  %v14755_v41 = vld [vmem:[%s20726_s2 + $0x98] sm:$0xff]  }
 0x12b   :  { %14436 = vmatprep.mubr.msk.bf16.mxu0 %vm1657_vm0, %v14750_v10  ;;  %v14756_v10 = vld [vmem:[%s20726_s2 + $0xa0] sm:$0xff]  }
 0x132   :  { %14437 = vmatmul.mubr.msk.bf16.gmra.mxu0 %vm1657_vm0, %v14751_v8  ;;  %v14757_v8 = vld [vmem:[%s20726_s2 + $0xa8] sm:$0xff]  }
 0x133   :  { %14440 = vmatprep.mubr.msk.bf16.mxu0 %vm1657_vm0, %v14752_v11  ;;  %v14758_v11 = vld [vmem:[%s20726_s2 + $0xb0] sm:$0xff]  }
 0x13a   :  { %14441 = vmatmul.mubr.msk.bf16.gmra.mxu0 %vm1657_vm0, %v14753_v9  ;;  %v14759_v9 = vld [vmem:[%s20726_s2 + $0xb8] sm:$0xff]  }
 0x13b   :  { %14444 = vmatprep.mubr.msk.bf16.mxu0 %vm1657_vm0, %v14754_v40  ;;  %v14760_v40 = vld [vmem:[%s20726_s2 + $0xc0] sm:$0xff]  }
 0x142   :  { %14445 = vmatmul.mubr.msk.bf16.gmra.mxu0 %vm1657_vm0, %v14755_v41  ;;  %v14761_v41 = vld [vmem:[%s20726_s2 + $0xc8] sm:$0xff]  }
 0x143   :  { %14448 = vmatprep.mubr.msk.bf16.mxu0 %vm1657_vm0, %v14756_v10  ;;  %v14762_v10 = vld [vmem:[%s20726_s2 + $0xd0] sm:$0xff]  }
 0x14a   :  { %14449 = vmatmul.mubr.msk.bf16.gmra.mxu0 %vm1657_vm0, %v14757_v8  ;;  %v14763_v8 = vld [vmem:[%s20726_s2 + $0xd8] sm:$0xff]  }
 0x14b   :  { %14452 = vmatprep.mubr.msk.bf16.mxu0 %vm1657_vm0, %v14758_v11  ;;  %v14764_v11 = vld [vmem:[%s20726_s2 + $0xe0] sm:$0xff]  }
 0x152   :  { %14453 = vmatmul.mubr.msk.bf16.gmra.mxu0 %vm1657_vm0, %v14759_v9  ;;  %v14765_v9 = vld [vmem:[%s20726_s2 + $0xe8] sm:$0xff]  }
 0x153   :  { %14456 = vmatprep.mubr.msk.bf16.mxu0 %vm1657_vm0, %v14760_v40  ;;  %v14766_v40 = vld [vmem:[%s20726_s2 + $0xf0] sm:$0xff]  }
 0x15a   :  { %14457 = vmatmul.mubr.msk.bf16.gmra.mxu0 %vm1657_vm0, %v14761_v41  ;;  %v14767_v41 = vld [vmem:[%s20726_s2 + $0xf8] sm:$0xff]  }
 0x15b   :  { %14460 = vmatprep.mubr.msk.bf16.mxu0 %vm1657_vm0, %v14762_v10  ;;  %v14768_v10 = vld [vmem:[%s20726_s2 + $0x100] sm:$0xff]  }
 0x162   :  { %14461 = vmatmul.mubr.msk.bf16.gmra.mxu0 %vm1657_vm0, %v14763_v8  ;;  %v14769_v8 = vld [vmem:[%s20726_s2 + $0x108] sm:$0xff]  }
 0x163   :  { %14464 = vmatprep.mubr.msk.bf16.mxu0 %vm1657_vm0, %v14764_v11  ;;  %v14770_v11 = vld [vmem:[%s20726_s2 + $0x110] sm:$0xff]  }
 0x16a   :  { %14465 = vmatmul.mubr.msk.bf16.gmra.mxu0 %vm1657_vm0, %v14765_v9  ;;  %v14771_v9 = vld [vmem:[%s20726_s2 + $0x118] sm:$0xff]  }
 0x16b   :  { %14468 = vmatprep.mubr.msk.bf16.mxu0 %vm1657_vm0, %v14766_v40  ;;  %v14772_v40 = vld [vmem:[%s20726_s2 + $0x120] sm:$0xff]  }
 0x172   :  { %14469 = vmatmul.mubr.msk.bf16.gmra.mxu0 %vm1657_vm0, %v14767_v41  ;;  %v14773_v41 = vld [vmem:[%s20726_s2 + $0x128] sm:$0xff]  }
 0x173   :  { %14472 = vmatprep.mubr.msk.bf16.mxu0 %vm1657_vm0, %v14768_v10  ;;  %v14774_v10 = vld [vmem:[%s20726_s2 + $0x130] sm:$0xff]  }
 0x17a   :  { %14473 = vmatmul.mubr.msk.bf16.gmra.mxu0 %vm1657_vm0, %v14769_v8  ;;  %v14775_v8 = vld [vmem:[%s20726_s2 + $0x138] sm:$0xff]  }
 0x17b   :  { %14476 = vmatprep.mubr.msk.bf16.mxu0 %vm1657_vm0, %v14770_v11  ;;  %v14776_v11 = vld [vmem:[%s20726_s2 + $0x140] sm:$0xff]  }
 0x182   :  { %14477 = vmatmul.mubr.msk.bf16.gmra.mxu0 %vm1657_vm0, %v14771_v9  ;;  %v14777_v9 = vld [vmem:[%s20726_s2 + $0x148] sm:$0xff]  }
 0x183   :  { %14480 = vmatprep.mubr.msk.bf16.mxu0 %vm1657_vm0, %v14772_v40  ;;  %v14778_v40 = vld [vmem:[%s20726_s2 + $0x150] sm:$0xff]  }
 0x18a   :  { %14481 = vmatmul.mubr.msk.bf16.gmra.mxu0 %vm1657_vm0, %v14773_v41  ;;  %v14802_v41 = vld [vmem:[%s20727_s8 + $0x4] ss:$16 sps:$4 sm:$0xff]  }
 0x18b   :  { %14484 = vmatprep.mubr.msk.bf16.mxu0 %vm1657_vm0, %v14774_v10  ;;  %v14779_v10 = vld [vmem:[%s20726_s2 + $0x158] sm:$0xff]   ;;  %3175 = vmatprep.mubr.bf16.mxu1 %v14802_v41  ;;  %v14784_v41 = vld [vmem:[%s20726_s2 + $0x180] sm:$0xff]  }
 0x192   :  { %14485 = vmatmul.mubr.msk.bf16.gmra.mxu0 %vm1657_vm0, %v14775_v8  ;;  %v14780_v8 = vld [vmem:[%s20726_s2 + $0x160] sm:$0xff]  }
 0x193   :  { %14488 = vmatprep.mubr.msk.bf16.mxu0 %vm1657_vm0, %v14776_v11  ;;  %v14781_v11 = vld [vmem:[%s20726_s2 + $0x168] sm:$0xff]  }
 0x19a   :  { %14489 = vmatmul.mubr.msk.bf16.gmra.mxu0 %vm1657_vm0, %v14777_v9  ;;  %v14782_v9 = vld [vmem:[%s20726_s2 + $0x170] sm:$0xff]  }
 0x19b   :  { %14492 = vmatprep.mubr.msk.bf16.mxu0 %vm1657_vm0, %v14778_v40  ;;  %v14783_v40 = vld [vmem:[%s20726_s2 + $0x178] sm:$0xff]  }
 0x1a2   :  { %14493 = vmatmul.mubr.msk.bf16.gmra.mxu0 %vm1657_vm0, %v14779_v10  ;;  %v14785_v10 = vld [vmem:[%s20726_s2 + $0x188] sm:$0xff]  }
 0x1a3   :  { %14496 = vmatprep.mubr.msk.bf16.mxu0 %vm1657_vm0, %v14780_v8  ;;  %v14786_v8 = vld [vmem:[%s20726_s2 + $0x190] sm:$0xff]  }
 0x1aa   :  { %14497 = vmatmul.mubr.msk.bf16.gmra.mxu0 %vm1657_vm0, %v14781_v11  ;;  %v17298_v11 = vld [vmem:[%s20728_s21] ss:$0 sm:$0xff] }
 0x1ab   :  { %14500 = vmatprep.mubr.msk.bf16.mxu0 %vm1657_vm0, %v14782_v9 }
 0x1b2   :  { %14501 = vmatmul.mubr.msk.bf16.gmra.mxu0 %vm1657_vm0, %v14783_v40 }
 0x1b3   :  { %14504 = vmatprep.mubr.msk.bf16.mxu0 %vm1657_vm0, %v14784_v41  ;;  %v17306_v41 = vld [vmem:[%s20729_s5] ss:$0 sm:$0xff] }
 0x1ba   :  { %v14410_v9 = vpop.f32.mrf.mxu0  ;;  %14505 = vmatmul.mubr.msk.bf16.gmra.mxu0 %vm1657_vm0, %v14785_v10 }
 0x1bb   :  { %v2403_v40 = vmul.f32 %v14410_v9, %v17298_v11  ;;  %14508 = vmatprep.mubr.msk.bf16.mxu0 %vm1657_vm0, %v14786_v8  ;;  %v14788_v8 = vld [vmem:[%s20726_s2 + $0x1a0] sm:$0xff]  }
 0x1bc   :  { %v1884_v42 = vpop.f32.mrf.mxu0 }
 0x1bd   :  { %v2401_v43 = vmul.f32 %v17298_v11, %v1884_v42  ;;  %v2537_v44 = vadd.f32 %v17306_v41, %v2403_v40 }
 0x1be   :  { %v14411_v12 = vpop.f32.mrf.mxu0 }
 0x1bf   :  { %v2404_v10 = vmul.f32 %v14411_v12, %v17298_v11  ;;  %v2535_v45 = vadd.f32 %v17306_v41, %v2401_v43  ;;  %v2665_v46 = vmax.f32 %v2537_v44, 0.0 }
 0x1c0   :  { %v1887_v9 = vpop.f32.mrf.mxu0 }
 0x1c1   :  { %v2538_v14 = vadd.f32 %v17306_v41, %v2404_v10  ;;  %v2402_v42 = vmul.f32 %v17298_v11, %v1887_v9  ;;  %v2663_v17 = vmax.f32 %v2535_v45, 0.0 }
 0x1c2   :  { %v14414_v15 = vpop.f32.mrf.mxu0  ;;  %14509 = vmatmul.mubr.msk.bf16.gmra.mxu0 %vm1657_vm0, %v14787_v13  ;;  %v14789_v13 = vld [vmem:[%s20726_s2 + $0x1a8] sm:$0xff]  }
 0x1c3   :  { %v2666_v47 = vmax.f32 %v2538_v14, 0.0  ;;  %v2536_v40 = vadd.f32 %v17306_v41, %v2402_v42  ;;  %v2407_v12 = vmul.f32 %v14414_v15, %v17298_v11  ;;  %14512 = vmatprep.mubr.msk.bf16.mxu0 %vm1657_vm0, %v14788_v8  ;;  %v14790_v15 = vld [vmem:[%s20726_s2 + $0x1b0] sm:$0xff]  }
 0x1c4   :  { %v1900_v16 = vpop.f32.mrf.mxu0 }
 0x1c5   :  { %v2664_v48 = vmax.f32 %v2536_v40, 0.0  ;;  %v2405_v43 = vmul.f32 %v17298_v11, %v1900_v16  ;;  %v17325_v49 = vpack.c.bf16 %v2666_v47, %v2665_v46  ;;  %v2541_v44 = vadd.f32 %v17306_v41, %v2407_v12 }
 0x1c6   :  { %v14415_v10 = vpop.f32.mrf.mxu0 }
 0x1c7   :  { %v2408_v14 = vmul.f32 %v14415_v10, %v17298_v11  ;;  %v17335_v8 = vpack.c.bf16 %v2664_v48, %v2663_v17  ;;  %v2539_v16 = vadd.f32 %v17306_v41, %v2405_v43  ;;  %v2669_v42 = vmax.f32 %v2541_v44, 0.0 }
 0x1c8   :  { %v1903_v45 = vpop.f32.mrf.mxu0 }
 0x1c9   :  { %v2542_v46 = vadd.f32 %v17306_v41, %v2408_v14  ;;  %v2406_v47 = vmul.f32 %v17298_v11, %v1903_v45  ;;  %v2667_v48 = vmax.f32 %v2539_v16, 0.0  ;;  %v14791_v14 = vld [vmem:[%s20726_s2 + $0x1b8] sm:$0xff]  }
 0x1ca   :  { %v14418_v9 = vpop.f32.mrf.mxu0  ;;  %14513 = vmatmul.mubr.msk.bf16.gmra.mxu0 %vm1657_vm0, %v14789_v13  ;;  %v14792_v13 = vld [vmem:[%s20726_s2 + $0x1c0] sm:$0xff]  }
 0x1cb   :  { %v2670_v40 = vmax.f32 %v2542_v46, 0.0  ;;  %v2540_v12 = vadd.f32 %v17306_v41, %v2406_v47  ;;  %14516 = vmatprep.mubr.msk.bf16.mxu0 %vm1657_vm0, %v14790_v15  ;;  %v14793_v47 = vld [vmem:[%s20726_s2 + $0x1c8] sm:$0xff]   ;;  %v2411_v56 = vmul.f32 %v14418_v9, %v17298_v11 }
 0x1cc   :  { %v17343_v10 = vpop.f32.mrf.mxu0 }
 0x1cd   :  { %v2668_v17 = vmax.f32 %v2540_v12, 0.0  ;;  %v17345_v18 = vpack.c.bf16 %v2670_v40, %v2669_v42  ;;  %v14794_v42 = vld [vmem:[%s20726_s2 + $0x1d0] sm:$0xff]   ;;  %v17413_v9 = vadd.f32 %v17306_v41, %v2411_v56 }
 0x1ce   :  { %v14419_v43 = vpop.f32.mrf.mxu0 }
 0x1cf   :  { %v17353_v44 = vpack.c.bf16 %v2668_v17, %v2667_v48 }
 0x1d0   :  { %v17355_v45 = vpop.f32.mrf.mxu0 }
 0x1d2   :  { %v14422_v15 = vpop.f32.mrf.mxu0  ;;  %14517 = vmatmul.mubr.msk.bf16.gmra.mxu0 %vm1657_vm0, %v14791_v14  ;;  %v14795_v14 = vld [vmem:[%s20726_s2 + $0x1d8] sm:$0xff]  }
 0x1d3   :  { %14520 = vmatprep.mubr.msk.bf16.mxu0 %vm1657_vm0, %v14792_v13  ;;  %v14796_v13 = vld [vmem:[%s20726_s2 + $0x1e0] sm:$0xff]  }
 0x1d4   :  { %v1932_v16 = vpop.f32.mrf.mxu0 }
 0x1d6   :  { %v14423_v46 = vpop.f32.mrf.mxu0 }
 0x1d7   :  { %v2416_v23 = vmul.f32 %v14423_v46, %v17298_v11 }
 0x1d8   :  { %v1935_v40 = vpop.f32.mrf.mxu0 }
 0x1d9   :  { %v2550_v25 = vadd.f32 %v17306_v41, %v2416_v23  ;;  %v2414_v58 = vmul.f32 %v17298_v11, %v1935_v40 }
 0x1da   :  { %v17365_v12 = vpop.f32.mrf.mxu0  ;;  %14521 = vmatmul.mubr.msk.bf16.gmra.mxu0 %vm1657_vm0, %v14793_v47 }
 0x1db   :  { %14524 = vmatprep.mubr.msk.bf16.mxu0 %vm1657_vm0, %v14794_v42  ;;  %v2548_v56 = vadd.f32 %v17306_v41, %v2414_v58 }
 0x1dc   :  { %v17369_v48 = vpop.f32.mrf.mxu0 }
 0x1de   :  { %v17371_v17 = vpop.f32.mrf.mxu0 }
 0x1e0   :  { %v17379_v19 = vpop.f32.mrf.mxu0 }
 0x1e2   :  { %v17381_v50 = vpop.f32.mrf.mxu0  ;;  %14525 = vmatmul.mubr.msk.bf16.gmra.mxu0 %vm1657_vm0, %v14795_v14 }
 0x1e3   :  { %14528 = vmatprep.mubr.msk.bf16.mxu0 %vm1657_vm0, %v14796_v13 }
 0x1e4   :  { %v17385_v47 = vpop.f32.mrf.mxu0 }
 0x1e6   :  { %v14431_v42 = vpop.f32.mrf.mxu0 }
 0x1e8   :  { %v17393_v21 = vpop.f32.mrf.mxu0 }
 0x1ea   :  { %v14434_v52 = vpop.f32.mrf.mxu0  ;;  %14529 = vmatmul.mubr.msk.bf16.gmra.mxu0 %vm1657_vm0, %v14797_v51  ;;  %v2415_v51 = vmul.f32 %v14422_v15, %v17298_v11 }
 0x1eb   :  { %14532 = vmatprep.mubr.msk.bf16.mxu0 %vm1657_vm0, %v14798_v20  ;;  %v2412_v20 = vmul.f32 %v14419_v43, %v17298_v11  ;;  %v2413_v43 = vmul.f32 %v17298_v11, %v1932_v16 }
 0x1ec   :  { %v1980_v14 = vpop.f32.mrf.mxu0  ;;  %v2549_v15 = vadd.f32 %v17306_v41, %v2415_v51 }
 0x1ed   :  { %v17419_v23 = vadd.f32 %v17306_v41, %v2412_v20 }
 0x1ee   :  { %v14435_v13 = vpop.f32.mrf.mxu0 }
 0x1ef   :  { %v2428_v46 = vmul.f32 %v14435_v13, %v17298_v11 }
 0x1f0   :  { %v1983_v22 = vpop.f32.mrf.mxu0 }
 0x1f1   :  { %v2562_v27 = vadd.f32 %v17306_v41, %v2428_v46  ;;  %v2426_v51 = vmul.f32 %v17298_v11, %v1983_v22  ;;  %v17438_v22 = vld [vmem:[%s20727_s8 + $0xc] ss:$16 sps:$4 sm:$0xff]   ;;  %v2425_v46 = vmul.f32 %v17298_v11, %v1980_v14  ;;  %v2409_v14 = vmul.f32 %v17298_v11, %v17343_v10 }
 0x1f2   :  { %v14438_v54 = vpop.f32.mrf.mxu0  ;;  %14533 = vmatmul.mubr.msk.bf16.gmra.mxu0 %vm1657_vm0, %v14799_v53  ;;  %v2422_v10 = vmul.f32 %v17298_v11, %v17393_v21 }
 0x1f3   :  { %v2431_v55 = vmul.f32 %v14438_v54, %v17298_v11  ;;  %3682 = vmatprep.mubr.bf16.mxu0 %v17438_v22 }
 0x1f4   :  { %v1996_v57 = vpop.f32.mrf.mxu0 }
 0x1f5   :  { %v2429_v24 = vmul.f32 %v17298_v11, %v1996_v57  ;;  %v2565_v54 = vadd.f32 %v17306_v41, %v2431_v55  ;;  %v2427_v57 = vmul.f32 %v14434_v52, %v17298_v11  ;;  %v2678_v55 = vmax.f32 %v2550_v25, 0.0 }
 0x1f6   :  { %v14439_v59 = vpop.f32.mrf.mxu0 }
 0x1f7   :  { %v2432_v53 = vmul.f32 %v14439_v59, %v17298_v11  ;;  %v2563_v40 = vadd.f32 %v17306_v41, %v2429_v24  ;;  %v2693_v20 = vmax.f32 %v2565_v54, 0.0  ;;  %v2410_v24 = vmul.f32 %v17298_v11, %v17355_v45 }
 0x1f8   :  { %v1999_v26 = vpop.f32.mrf.mxu0  ;;  %v2561_v25 = vadd.f32 %v17306_v41, %v2427_v57  ;;  %v2424_v45 = vmul.f32 %v14431_v42, %v17298_v11  ;;  %v2690_v57 = vmax.f32 %v2562_v27, 0.0  ;;  %v2423_v27 = vmul.f32 %v17381_v50, %v17298_v11 }
 0x1f9   :  { %v2430_v13 = vmul.f32 %v17298_v11, %v1999_v26  ;;  %v2566_v59 = vadd.f32 %v17306_v41, %v2432_v53  ;;  %v2677_v26 = vmax.f32 %v2549_v15, 0.0  ;;  %v2547_v53 = vadd.f32 %v17306_v41, %v2413_v43 }
 0x1fa   :  { %v14442_v16 = vpop.f32.mrf.mxu0  ;;  %v2560_v15 = vadd.f32 %v17306_v41, %v2426_v51  ;;  %v2544_v42 = vadd.f32 %v17306_v41, %v2410_v24  ;;  %v2673_v50 = vmax.f32 %v17413_v9, 0.0 }
 0x1fb   :  { %v2564_v52 = vadd.f32 %v17306_v41, %v2430_v13  ;;  %v2435_v60 = vmul.f32 %v14442_v16, %v17298_v11  ;;  %v2694_v61 = vmax.f32 %v2566_v59, 0.0  ;;  %v2691_v13 = vmax.f32 %v2563_v40, 0.0 }
 0x1fc   :  { %v17433_v58 = vpop.f32.mrf.mxu0  ;;  %v2676_v16 = vmax.f32 %v2548_v56, 0.0  ;;  %v2798_v28 = vpack.c.bf16 %v2678_v55, %v2677_v26  ;;  %v2675_v40 = vmax.f32 %v2547_v53, 0.0  ;;  %v2689_v55 = vmax.f32 %v2561_v25, 0.0 }
 0x1fd   :  { %v2692_v54 = vmax.f32 %v2564_v52, 0.0  ;;  %v2806_v59 = vpack.c.bf16 %v2694_v61, %v2693_v20  ;;  %v2569_v29 = vadd.f32 %v17306_v41, %v2435_v60  ;;  %v2674_v61 = vmax.f32 %v17419_v23, 0.0 }
 0x1fe   :  { %v14443_v43 = vpop.f32.mrf.mxu0  ;;  %v2559_v60 = vadd.f32 %v17306_v41, %v2425_v46  ;;  %v2558_v52 = vadd.f32 %v17306_v41, %v2424_v45  ;;  %v2688_v23 = vmax.f32 %v2560_v15, 0.0  ;;  %v2797_v24 = vpack.c.bf16 %v2676_v16, %v2675_v40 }
 0x1ff   :  { %v2436_v62 = vmul.f32 %v14443_v43, %v17298_v11  ;;  %13552 = vmatprep.subr.bf16.mxu1 %v2806_v59  ;;  %v2805_v63 = vpack.c.bf16 %v2692_v54, %v2691_v13  ;;  %v2697_v26 = vmax.f32 %v2569_v29, 0.0  ;;  %v2804_v13 = vpack.c.bf16 %v2690_v57, %v2689_v55 }
 0x200   :  { %v17450_v56 = vpop.f32.mrf.mxu0  ;;  %13553 = vmatpush3.bf16.msra.mxu1 %v2798_v28  ;;  %v2543_v25 = vadd.f32 %v17306_v41, %v2409_v14  ;;  %v2687_v21 = vmax.f32 %v2559_v60, 0.0  ;;  %v2672_v29 = vmax.f32 %v2544_v42, 0.0  ;;  %v2420_v59 = vmul.f32 %v17371_v17, %v17298_v11 }
 0x201   :  { %v2570_v51 = vadd.f32 %v17306_v41, %v2436_v62  ;;  %13554 = vmatprep.subr.bf16.mxu1 %v2805_v63  ;;  %v2557_v62 = vadd.f32 %v17306_v41, %v2423_v27  ;;  %v2421_v63 = vmul.f32 %v17298_v11, %v17385_v47  ;;  %v2686_v16 = vmax.f32 %v2558_v52, 0.0 }
 0x202   :  { %v14446_v20 = vpop.f32.mrf.mxu0  ;;  %v2796_v45 = vpack.c.bf16 %v2674_v61, %v2673_v50  ;;  %v2556_v15 = vadd.f32 %v17306_v41, %v2422_v10  ;;  %v2803_v14 = vpack.c.bf16 %v2688_v23, %v2687_v21  ;;  %v2671_v40 = vmax.f32 %v2543_v25, 0.0 }
 0x203   :  { %v2698_v53 = vmax.f32 %v2570_v51, 0.0  ;;  %v2439_v28 = vmul.f32 %v14446_v20, %v17298_v11  ;;  %v2419_v42 = vmul.f32 %v17365_v12, %v17298_v11  ;;  %v2685_v27 = vmax.f32 %v2557_v62, 0.0 }
 0x204   :  { %v17462_v46 = vpop.f32.mrf.mxu0  ;;  %13555 = vmatpush3.bf16.msra.mxu1 %v2797_v24  ;;  %v2555_v17 = vadd.f32 %v17306_v41, %v2421_v63  ;;  %v2554_v61 = vadd.f32 %v17306_v41, %v2420_v59  ;;  %v2418_v60 = vmul.f32 %v17298_v11, %v17379_v19  ;;  %v2795_v52 = vpack.c.bf16 %v2672_v29, %v2671_v40 }
 0x205   :  { %v17467_v54 = vpack.c.bf16 %v2698_v53, %v2697_v26  ;;  %13556 = vmatprep.subr.bf16.mxu1 %v2804_v13  ;;  %v2573_v43 = vadd.f32 %v17306_v41, %v2439_v28  ;;  %v2684_v10 = vmax.f32 %v2556_v15, 0.0  ;;  %v2802_v24 = vpack.c.bf16 %v2686_v16, %v2685_v27 }
 0x206   :  { %v14447_v9 = vpop.f32.mrf.mxu0  ;;  %v2553_v12 = vadd.f32 %v17306_v41, %v2419_v42  ;;  %v2417_v53 = vmul.f32 %v17298_v11, %v17369_v48  ;;  %v2683_v28 = vmax.f32 %v2555_v17, 0.0  ;;  %v2682_v25 = vmax.f32 %v2554_v61, 0.0  ;;  %v14805_v17 = vld [vmem:[%s20727_s8 + $0x20] ss:$16 sps:$4 sm:$0xff]  }
 0x207   :  { %v2440_v57 = vmul.f32 %v14447_v9, %v17298_v11  ;;  %v2701_v23 = vmax.f32 %v2573_v43, 0.0  ;;  %v2552_v19 = vadd.f32 %v17306_v41, %v2418_v60 }
 0x208   :  { %v17474_v47 = vpop.f32.mrf.mxu0  ;;  %13557 = vmatpush3.bf16.msra.mxu1 %v2796_v45  ;;  %v2801_v62 = vpack.c.bf16 %v2684_v10, %v2683_v28  ;;  %v2681_v21 = vmax.f32 %v2553_v12, 0.0  ;;  %v2551_v29 = vadd.f32 %v17306_v41, %v2417_v53  ;;  %v14808_v10 = vld [vmem:[%s20727_s8 + $0x40] ss:$16 sps:$4 sm:$0xff]  }
 0x209   :  { %v2574_v55 = vadd.f32 %v17306_v41, %v2440_v57  ;;  %13558 = vmatprep.subr.bf16.mxu1 %v2803_v14  ;;  %v2680_v16 = vmax.f32 %v2552_v19, 0.0 }
 0x20a   :  { %v14450_v51 = vpop.f32.mrf.mxu0  ;;  %v2800_v48 = vpack.c.bf16 %v2682_v25, %v2681_v21  ;;  %v2679_v45 = vmax.f32 %v2551_v29, 0.0 }
 0x20b   :  { %v2702_v20 = vmax.f32 %v2574_v55, 0.0  ;;  %v2443_v12 = vmul.f32 %v14450_v51, %v17298_v11 }
 0x20c   :  { %v2044_v26 = vpop.f32.mrf.mxu0  ;;  %13559 = vmatpush3.bf16.msra.mxu1 %v2795_v52  ;;  %v2799_v43 = vpack.c.bf16 %v2680_v16, %v2679_v45  ;;  %v14811_v16 = vld [vmem:[%s20727_s8 + $0x60] ss:$16 sps:$4 sm:$0xff]  }
 0x20d   :  { %v17486_v13 = vpack.c.bf16 %v2702_v20, %v2701_v23  ;;  %13560 = vmatprep.subr.bf16.mxu1 %v2802_v24  ;;  %v14809_v20 = vld [vmem:[%s20727_s8 + $0x64] ss:$16 sps:$4 sm:$0xff]   ;;  %v2441_v21 = vmul.f32 %v17298_v11, %v2044_v26 }
 0x20e   :  { %v14451_v50 = vpop.f32.mrf.mxu0 }
 0x20f   :  { %v2444_v28 = vmul.f32 %v14451_v50, %v17298_v11  ;;  %v14812_v50 = vld [vmem:[%s20727_s8 + $0x84] ss:$16 sps:$4 sm:$0xff]  }
 0x210   :  { %v17489_v63 = vpop.f32.mrf.mxu0  ;;  %13561 = vmatpush3.bf16.msra.mxu1 %v17345_v18  ;;  %v14800_v18 = vld [vmem:[%s20727_s8] ss:$16 sps:$4 sm:$0xff]  }
 0x211   :  { %13562 = vmatprep.subr.bf16.mxu1 %v2801_v62  ;;  %v17534_v62 = vadd.f32 %v17306_v41, %v2443_v12  ;;  %v17551_v26 = vadd.f32 %v17306_v41, %v2444_v28 }
 0x212   :  { %v14454_v59 = vpop.f32.mrf.mxu0 }
 0x213   :  { %v2447_v51 = vmul.f32 %v14454_v59, %v17298_v11 }
 0x214   :  { %v2060_v9 = vpop.f32.mrf.mxu0  ;;  %13563 = vmatpush3.bf16.msra.mxu1 %v17353_v44  ;;  %v14803_v44 = vld [vmem:[%s20727_s8 + $0x24] ss:$16 sps:$4 sm:$0xff]  }
 0x215   :  { %13564 = vmatprep.subr.bf16.mxu1 %v2800_v48  ;;  %v2445_v59 = vmul.f32 %v17298_v11, %v2060_v9  ;;  %v2581_v9 = vadd.f32 %v17306_v41, %v2447_v51 }
 0x216   :  { %v14455_v15 = vpop.f32.mrf.mxu0 }
 0x217   :  { %v2448_v25 = vmul.f32 %v14455_v15, %v17298_v11  ;;  %v17548_v15 = vmul.f32 %v17298_v11, %v17462_v46  ;;  %v17563_v46 = vadd.f32 %v17306_v41, %v2441_v21 }
 0x218   :  { %v2063_v57 = vpop.f32.mrf.mxu0  ;;  %13565 = vmatpush3.bf16.msra.mxu1 %v17325_v49 }
 0x219   :  { %13566 = vmatprep.subr.bf16.mxu1 %v2799_v43  ;;  %v2446_v48 = vmul.f32 %v17298_v11, %v2063_v57  ;;  %v2582_v57 = vadd.f32 %v17306_v41, %v2448_v25  ;;  %v2706_v25 = vmax.f32 %v17551_v26, 0.0 }
 0x21a   :  { %v17495_v14 = vpop.f32.mrf.mxu0 }
 0x21b   :  { %v2580_v12 = vadd.f32 %v17306_v41, %v2446_v48 }
 0x21c   :  { %v17500_v40 = vpop.f32.mrf.mxu0  ;;  %13567 = vmatpush3.bf16.msra.mxu1 %v17335_v8  ;;  %v14806_v8 = vld [vmem:[%s20727_s8 + $0x44] ss:$16 sps:$4 sm:$0xff]  }
 0x21e   :  { %v17506_v42 = vpop.f32.mrf.mxu0 }
 0x21f   :  { %3176 = vmatmul.mubr.bf16.vlgmr.msra.gmra.mxu1 %v14800_v18  ;;  %v17556_v18 = vmul.f32 %v17298_v11, %v17474_v47  ;;  %v2442_v47 = vmul.f32 %v17298_v11, %v17489_v63 }
 0x220   :  { %v17508_v27 = vpop.f32.mrf.mxu0  ;;  %3183 = vmatprep.mubr.bf16.mxu1 %v14803_v44 }
 0x222   :  { %v17510_v49 = vpop.f32.mrf.mxu0 }
 0x224   :  { %v17515_v55 = vpop.f32.mrf.mxu0 }
 0x226   :  { %v17520_v61 = vpop.f32.mrf.mxu0 }
 0x227   :  { %3184 = vmatmul.mubr.bf16.gmra.mxu1 %v14805_v17  ;;  %v2456_v30 = vmul.f32 %v17520_v61, %v17298_v11 }
 0x228   :  { %v17522_v60 = vpop.f32.mrf.mxu0  ;;  %3191 = vmatprep.mubr.bf16.mxu1 %v14806_v8 }
 0x22a   :  { %v14466_v52 = vpop.f32.mrf.mxu0 }
 0x22c   :  { %v2108_v23 = vpop.f32.mrf.mxu0 }
 0x22e   :  { %v14467_v24 = vpop.f32.mrf.mxu0 }
 0x22f   :  { %3192 = vmatmul.mubr.bf16.gmra.mxu1 %v14808_v10  ;;  %v2460_v44 = vmul.f32 %v14467_v24, %v17298_v11  ;;  %v2459_v24 = vmul.f32 %v14466_v52, %v17298_v11 }
 0x230   :  { %v2111_v53 = vpop.f32.mrf.mxu0  ;;  %3199 = vmatprep.mubr.bf16.mxu1 %v14809_v20 }
 0x231   :  { %v2594_v63 = vadd.f32 %v17306_v41, %v2460_v44  ;;  %v2458_v51 = vmul.f32 %v17298_v11, %v2111_v53  ;;  %v14815_v53 = vld [vmem:[%s20727_s8 + $0xa4] ss:$16 sps:$4 sm:$0xff]  }
 0x232   :  { %v14470_v19 = vpop.f32.mrf.mxu0 }
 0x233   :  { %v2463_v29 = vmul.f32 %v14470_v19, %v17298_v11 }
 0x234   :  { %v2124_v45 = vpop.f32.mrf.mxu0 }
 0x235   :  { %v2461_v43 = vmul.f32 %v17298_v11, %v2124_v45  ;;  %v2597_v10 = vadd.f32 %v17306_v41, %v2463_v29  ;;  %v2710_v45 = vmax.f32 %v2582_v57, 0.0  ;;  %v2457_v57 = vmul.f32 %v17298_v11, %v2108_v23 }
 0x236   :  { %v14471_v17 = vpop.f32.mrf.mxu0 }
 0x237   :  { %v2464_v20 = vmul.f32 %v14471_v17, %v17298_v11  ;;  %3200 = vmatmul.mubr.bf16.gmra.mxu1 %v14811_v16  ;;  %v2595_v19 = vadd.f32 %v17306_v41, %v2461_v43  ;;  %v2579_v16 = vadd.f32 %v17306_v41, %v2445_v59  ;;  %v2725_v17 = vmax.f32 %v2597_v10, 0.0  ;;  %v14814_v43 = vld [vmem:[%s20727_s8 + $0x80] ss:$16 sps:$4 sm:$0xff]  }
 0x238   :  { %v2127_v28 = vpop.f32.mrf.mxu0  ;;  %3207 = vmatprep.mubr.bf16.mxu1 %v14812_v50  ;;  %v2593_v59 = vadd.f32 %v17306_v41, %v2459_v24  ;;  %v2591_v61 = vadd.f32 %v17306_v41, %v2457_v57 }
 0x239   :  { %v2598_v21 = vadd.f32 %v17306_v41, %v2464_v20  ;;  %v2462_v29 = vmul.f32 %v17298_v11, %v2127_v28  ;;  %v2709_v20 = vmax.f32 %v2581_v9, 0.0  ;;  %v2708_v28 = vmax.f32 %v2580_v12, 0.0 }
 0x23a   :  { %v14474_v48 = vpop.f32.mrf.mxu0  ;;  %v2723_v10 = vmax.f32 %v2595_v19, 0.0  ;;  %v2722_v9 = vmax.f32 %v2594_v63, 0.0  ;;  %v2592_v12 = vadd.f32 %v17306_v41, %v2458_v51  ;;  %v2707_v31 = vmax.f32 %v2579_v16, 0.0 }
 0x23b   :  { %v2726_v52 = vmax.f32 %v2598_v21, 0.0  ;;  %v2596_v50 = vadd.f32 %v17306_v41, %v2462_v29  ;;  %v2467_v26 = vmul.f32 %v14474_v48, %v17298_v11  ;;  %v2814_v8 = vpack.c.bf16 %v2710_v45, %v2709_v20 }
 0x23c   :  { %v2140_v44 = vpop.f32.mrf.mxu0  ;;  %v2455_v45 = vmul.f32 %v17510_v49, %v17298_v11  ;;  %v2813_v51 = vpack.c.bf16 %v2708_v28, %v2707_v31  ;;  %v2720_v49 = vmax.f32 %v2592_v12, 0.0  ;;  %v20730_v28 = vmax.f32 %v17534_v62, 0.0 }
 0x23d   :  { %v2724_v21 = vmax.f32 %v2596_v50, 0.0  ;;  %v2465_v29 = vmul.f32 %v17298_v11, %v2140_v44  ;;  %v2822_v48 = vpack.c.bf16 %v2726_v52, %v2725_v17  ;;  %v2601_v23 = vadd.f32 %v17306_v41, %v2467_v26 }
 0x23e   :  { %v14475_v24 = vpop.f32.mrf.mxu0  ;;  %v2576_v50 = vadd.f32 %v17306_v41, %v2442_v47  ;;  %v2721_v17 = vmax.f32 %v2593_v59, 0.0  ;;  %v2454_v47 = vmul.f32 %v17298_v11, %v17522_v60  ;;  %v2453_v60 = vmul.f32 %v17298_v11, %v17515_v55 }
 0x23f   :  { %v2468_v0 = vmul.f32 %v14475_v24, %v17298_v11  ;;  %13640 = vmatprep.subr.bf16.mxu1 %v2822_v48  ;;  %3208 = vmatmul.mubr.bf16.gmra.mxu1 %v14814_v43  ;;  %v2821_v19 = vpack.c.bf16 %v2724_v21, %v2723_v10  ;;  %v2599_v16 = vadd.f32 %v17306_v41, %v2465_v29  ;;  %v2729_v57 = vmax.f32 %v2601_v23, 0.0  ;;  %v17620_v29 = vld [vmem:[%s20727_s8 + $0xc4] ss:$16 sps:$4 sm:$0xff]  }
 0x240   :  { %v2143_v63 = vpop.f32.mrf.mxu0  ;;  %13641 = vmatpush3.bf16.msra.mxu1 %v2814_v8  ;;  %3215 = vmatprep.mubr.bf16.mxu1 %v14815_v53  ;;  %v2590_v43 = vadd.f32 %v17306_v41, %v2456_v30  ;;  %v2820_v59 = vpack.c.bf16 %v2722_v9, %v2721_v17  ;;  %v2812_v30 = vpack.c.bf16 %v2706_v25, %v20730_v28  ;;  %v2719_v10 = vmax.f32 %v2591_v61, 0.0  ;;  %v17652_v28 = vld [vmem:[%s20727_s8 + $0xc0] ss:$16 sps:$4 sm:$0xff]  }
 0x241   :  { %v2602_v52 = vadd.f32 %v17306_v41, %v2468_v0  ;;  %v2466_v26 = vmul.f32 %v17298_v11, %v2143_v63  ;;  %13642 = vmatprep.subr.bf16.mxu1 %v2821_v19  ;;  %v17610_v0 = vld [vmem:[%s20727_s8 + $0xa0] ss:$16 sps:$4 sm:$0xff]   ;;  %v2589_v53 = vadd.f32 %v17306_v41, %v2455_v45  ;;  %v2727_v48 = vmax.f32 %v2599_v16, 0.0 }
 0x242   :  { %v14478_v20 = vpop.f32.mrf.mxu0  ;;  %v2704_v25 = vmax.f32 %v2576_v50, 0.0  ;;  %v2452_v24 = vmul.f32 %v17506_v42, %v17298_v11  ;;  %v2718_v55 = vmax.f32 %v2590_v43, 0.0  ;;  %v2588_v23 = vadd.f32 %v17306_v41, %v2454_v47 }
 0x243   :  { %v2730_v44 = vmax.f32 %v2602_v52, 0.0  ;;  %v2600_v8 = vadd.f32 %v17306_v41, %v2466_v26  ;;  %v2471_v31 = vmul.f32 %v14478_v20, %v17298_v11  ;;  %v2819_v63 = vpack.c.bf16 %v2720_v49, %v2719_v10  ;;  %v17664_v10 = vld [vmem:[%s20727_s8 + $0xe4] ss:$16 sps:$4 sm:$0xff]  }
 0x244   :  { %v2156_v21 = vpop.f32.mrf.mxu0  ;;  %13643 = vmatpush3.bf16.msra.mxu1 %v2813_v51  ;;  %v2572_v51 = vadd.f32 %v17306_v41, %v17556_v18  ;;  %v2703_v50 = vmax.f32 %v17563_v46, 0.0  ;;  %v2451_v42 = vmul.f32 %v17495_v14, %v17298_v11  ;;  %v2717_v16 = vmax.f32 %v2589_v53, 0.0 }
 0x245   :  { %v17622_v9 = vpack.c.bf16 %v2730_v44, %v2729_v57  ;;  %v2728_v12 = vmax.f32 %v2600_v8, 0.0  ;;  %v2469_v62 = vmul.f32 %v17298_v11, %v2156_v21  ;;  %13644 = vmatprep.subr.bf16.mxu1 %v2820_v59  ;;  %v2605_v17 = vadd.f32 %v17306_v41, %v2471_v31 }
 0x246   :  { %v14479_v19 = vpop.f32.mrf.mxu0  ;;  %v2587_v26 = vadd.f32 %v17306_v41, %v2453_v60  ;;  %v2811_v18 = vpack.c.bf16 %v2704_v25, %v2703_v50  ;;  %v2586_v46 = vadd.f32 %v17306_v41, %v2452_v24  ;;  %v2450_v14 = vmul.f32 %v17298_v11, %v17508_v27 }
 0x247   :  { %v17628_v45 = vpack.c.bf16 %v2728_v12, %v2727_v48  ;;  %v2472_v61 = vmul.f32 %v14479_v19, %v17298_v11  ;;  %3216 = vmatmul.mubr.bf16.gmra.mxu1 %v17610_v0  ;;  %v2603_v43 = vadd.f32 %v17306_v41, %v2469_v62  ;;  %v2716_v20 = vmax.f32 %v2588_v23, 0.0 }
 0x248   :  { %v2159_v52 = vpop.f32.mrf.mxu0  ;;  %13645 = vmatpush3.bf16.msra.mxu1 %v2812_v30  ;;  %3223 = vmatprep.mubr.bf16.mxu1 %v17620_v29  ;;  %v2733_v57 = vmax.f32 %v2605_v17, 0.0  ;;  %v2818_v31 = vpack.c.bf16 %v2718_v55, %v2717_v16  ;;  %v2571_v30 = vadd.f32 %v17306_v41, %v17548_v15  ;;  %v2585_v53 = vadd.f32 %v17306_v41, %v2451_v42 }
 0x249   :  { %v2606_v47 = vadd.f32 %v17306_v41, %v2472_v61  ;;  %v2470_v49 = vmul.f32 %v17298_v11, %v2159_v52  ;;  %13646 = vmatprep.subr.bf16.mxu1 %v2819_v63  ;;  %v2449_v27 = vmul.f32 %v17298_v11, %v17500_v40  ;;  %v2715_v21 = vmax.f32 %v2587_v26, 0.0 }
 0x24a   :  { %v17646_v59 = vpop.f32.mrf.mxu0  ;;  %v2731_v48 = vmax.f32 %v2603_v43, 0.0  ;;  %v2434_v15 = vmul.f32 %v17298_v11, %v17450_v56  ;;  %v2700_v25 = vmax.f32 %v2572_v51, 0.0  ;;  %v2714_v40 = vmax.f32 %v2586_v46, 0.0 }
 0x24b   :  { %v2734_v44 = vmax.f32 %v2606_v47, 0.0  ;;  %v2604_v8 = vadd.f32 %v17306_v41, %v2470_v49  ;;  %v2584_v55 = vadd.f32 %v17306_v41, %v2450_v14  ;;  %v2817_v19 = vpack.c.bf16 %v2716_v20, %v2715_v21  ;;  %v17691_v47 = vld [vmem:[%s20727_s8 + $0x104] ss:$16 sps:$4 sm:$0xff]  }
 0x24c   :  { %v17659_v60 = vpop.f32.mrf.mxu0  ;;  %13647 = vmatpush3.bf16.msra.mxu1 %v2811_v18  ;;  %v2433_v17 = vmul.f32 %v17298_v11, %v17433_v58  ;;  %v2699_v61 = vmax.f32 %v2571_v30, 0.0  ;;  %v2713_v56 = vmax.f32 %v2585_v53, 0.0  ;;  %v2583_v51 = vadd.f32 %v17306_v41, %v2449_v27  ;;  %v17685_v58 = vld [vmem:[%s20727_s8 + $0xe0] ss:$16 sps:$4 sm:$0xff]   ;;  %20731 = vst [vmem:[#allocation173_spill] sm:$0xff] %v17691_v47 }
 0x24d   :  { %v17666_v12 = vpack.c.bf16 %v2734_v44, %v2733_v57  ;;  %v2732_v62 = vmax.f32 %v2604_v8, 0.0  ;;  %13648 = vmatprep.subr.bf16.mxu1 %v2818_v31  ;;  %v2568_v50 = vadd.f32 %v17306_v41, %v2434_v15  ;;  %v2712_v52 = vmax.f32 %v2584_v55, 0.0  ;;  %v17701_v31 = vld [vmem:[%s20727_s8 + $0x100] ss:$16 sps:$4 sm:$0xff]   ;;  %v17708_v53 = vld [vmem:[%s20727_s8 + $0x124] ss:$16 sps:$4 sm:$0xff]  }
 0x24e   :  { %v14483_v24 = vpop.f32.mrf.mxu0  ;;  %v2809_v42 = vpack.c.bf16 %v2700_v25, %v2699_v61  ;;  %v2816_v26 = vpack.c.bf16 %v2714_v40, %v2713_v56  ;;  %v2567_v43 = vadd.f32 %v17306_v41, %v2433_v17  ;;  %v2711_v49 = vmax.f32 %v2583_v51, 0.0  ;;  %20732 = vst [vmem:[#allocation174_spill] sm:$0xff] %v17701_v31  ;;  %20733 = vst [vmem:[#allocation175_spill] sm:$0xff] %v17708_v53  ;;  %v17728_v15 = vld [vmem:[%s20727_s8 + $0x144] ss:$16 sps:$4 sm:$0xff]  }
 0x24f   :  { %v17671_v23 = vpack.c.bf16 %v2732_v62, %v2731_v48  ;;  %3224 = vmatmul.mubr.bf16.gmra.mxu1 %v17652_v28  ;;  %v2696_v18 = vmax.f32 %v2568_v50, 0.0  ;;  %v17721_v48 = vld [vmem:[%s20727_s8 + $0x120] ss:$16 sps:$4 sm:$0xff]   ;;  %20735 = vst [vmem:[#allocation177_spill] sm:$0xff] %v17728_v15  ;;  %v17744_v61 = vld [vmem:[%s20727_s8 + $0x164] ss:$16 sps:$4 sm:$0xff]   ;;  %v2475_v51 = vmul.f32 %v17646_v59, %v17298_v11 }
 0x250   :  { %v17676_v63 = vpop.f32.mrf.mxu0  ;;  %13649 = vmatpush3.bf16.msra.mxu1 %v17486_v13  ;;  %3231 = vmatprep.mubr.bf16.mxu1 %v17664_v10  ;;  %v2815_v14 = vpack.c.bf16 %v2712_v52, %v2711_v49  ;;  %v2695_v20 = vmax.f32 %v2567_v43, 0.0  ;;  %20734 = vst [vmem:[#allocation176_spill] sm:$0xff] %v17721_v48  ;;  %20737 = vst [vmem:[#allocation179_spill] sm:$0xff] %v17744_v61  ;;  %v2473_v49 = vmul.f32 %v17298_v11, %v17659_v60  ;;  %v17761_v59 = vld [vmem:[%s20727_s8 + $0x160] ss:$16 sps:$4 sm:$0xff]  }
 0x251   :  { %13650 = vmatprep.subr.bf16.mxu1 %v2817_v19  ;;  %v17739_v19 = vld [vmem:[%s20727_s8 + $0x140] ss:$16 sps:$4 sm:$0xff]   ;;  %v17753_v43 = vadd.f32 %v17306_v41, %v2475_v51  ;;  %20738 = vst [vmem:[#allocation180_spill] sm:$0xff] %v17761_v59 }
 0x252   :  { %v14486_v16 = vpop.f32.mrf.mxu0  ;;  %v2807_v44 = vpack.c.bf16 %v2696_v18, %v2695_v20  ;;  %20736 = vst [vmem:[#allocation178_spill] sm:$0xff] %v17739_v19  ;;  %v17774_v33 = vadd.f32 %v17306_v41, %v2473_v49 }
 0x254   :  { %v2188_v13 = vpop.f32.mrf.mxu0  ;;  %13651 = vmatpush3.bf16.msra.mxu1 %v2809_v42  ;;  %v2476_v42 = vmul.f32 %v14483_v24, %v17298_v11 }
 0x255   :  { %13652 = vmatprep.subr.bf16.mxu1 %v2816_v26  ;;  %v2477_v51 = vmul.f32 %v17298_v11, %v2188_v13 }
 0x256   :  { %v14487_v46 = vpop.f32.mrf.mxu0 }
 0x257   :  { %3232 = vmatmul.mubr.bf16.gmra.mxu1 %v17685_v58  ;;  %v2480_v52 = vmul.f32 %v14487_v46, %v17298_v11  ;;  %v17766_v46 = vadd.f32 %v17306_v41, %v2476_v42  ;;  %v2474_v42 = vmul.f32 %v17298_v11, %v17676_v63  ;;  %v2611_v2 = vadd.f32 %v17306_v41, %v2477_v51 }
 0x258   :  { %v2191_v57 = vpop.f32.mrf.mxu0  ;;  %13653 = vmatpush3.bf16.msra.mxu1 %v17467_v54  ;;  %3239 = vmatprep.mubr.bf16.mxu1 %v17691_v47 }
 0x259   :  { %13654 = vmatprep.subr.bf16.mxu1 %v2815_v14  ;;  %v2479_v14 = vmul.f32 %v14486_v16, %v17298_v11  ;;  %v2478_v24 = vmul.f32 %v17298_v11, %v2191_v57  ;;  %v2614_v60 = vadd.f32 %v17306_v41, %v2480_v52  ;;  %v2738_v49 = vmax.f32 %v17766_v46, 0.0 }
 0x25a   :  { %v17696_v8 = vpop.f32.mrf.mxu0 }
 0x25b   :  { %v2613_v13 = vadd.f32 %v17306_v41, %v2479_v14  ;;  %v2612_v52 = vadd.f32 %v17306_v41, %v2478_v24  ;;  %v2742_v63 = vmax.f32 %v2614_v60, 0.0 }
 0x25c   :  { %v17703_v30 = vpop.f32.mrf.mxu0  ;;  %13655 = vmatpush3.bf16.msra.mxu1 %v2807_v44 }
 0x25e   :  { %v17710_v54 = vpop.f32.mrf.mxu0 }
 0x25f   :  { %3240 = vmatmul.mubr.bf16.gmra.mxu1 %v17701_v31 }
 0x260   :  { %v17713_v27 = vpop.f32.mrf.mxu0  ;;  %3247 = vmatprep.mubr.bf16.mxu1 %v17708_v53 }
 0x262   :  { %v17716_v21 = vpop.f32.mrf.mxu0 }
 0x264   :  { %v17723_v62 = vpop.f32.mrf.mxu0 }
 0x266   :  { %v17730_v25 = vpop.f32.mrf.mxu0 }
 0x267   :  { %3248 = vmatmul.mubr.bf16.gmra.mxu1 %v17721_v48 }
 0x268   :  { %v17733_v40 = vpop.f32.mrf.mxu0  ;;  %3255 = vmatprep.mubr.bf16.mxu1 %v17728_v15 }
 0x26a   :  { %v14498_v55 = vpop.f32.mrf.mxu0 }
 0x26c   :  { %v2236_v17 = vpop.f32.mrf.mxu0 }
 0x26d   :  { %v2489_v60 = vmul.f32 %v17298_v11, %v2236_v17  ;;  %v2739_v17 = vmax.f32 %v2611_v2, 0.0  ;;  %v17824_v2 = vld [vmem:[%s20729_s5] ss:$0 sm:$0xff] }
 0x26e   :  { %v14499_v56 = vpop.f32.mrf.mxu0 }
 0x26f   :  { %3256 = vmatmul.mubr.bf16.gmra.mxu1 %v17739_v19 }
 0x270   :  { %v2239_v50 = vpop.f32.mrf.mxu0  ;;  %3263 = vmatprep.mubr.bf16.mxu1 %v17744_v61 }
 0x271   :  { %v2490_v24 = vmul.f32 %v17298_v11, %v2239_v50  ;;  %v17804_v50 = vld [vmem:[%s20727_s8 + $0x2c] ss:$16 sps:$4 sm:$0xff]  }
 0x272   :  { %v14502_v26 = vpop.f32.mrf.mxu0 }
 0x273   :  { %v2495_v18 = vmul.f32 %v14502_v26, %v17298_v11  ;;  %v2492_v26 = vmul.f32 %v14499_v56, %v17298_v11  ;;  %v2491_v56 = vmul.f32 %v14498_v55, %v17298_v11 }
 0x274   :  { %v2252_v20 = vpop.f32.mrf.mxu0 }
 0x275   :  { %v2493_v44 = vmul.f32 %v17298_v11, %v2252_v20  ;;  %v2629_v16 = vadd.f32 %v17306_v41, %v2495_v18  ;;  %v2626_v14 = vadd.f32 %v17306_v41, %v2492_v26  ;;  %v2625_v51 = vadd.f32 %v17306_v41, %v2491_v56 }
 0x276   :  { %v14503_v1 = vpop.f32.mrf.mxu0  ;;  %v2624_v56 = vadd.f32 %v17306_v41, %v2490_v24 }
 0x277   :  { %v2496_v57 = vmul.f32 %v14503_v1, %v17298_v11  ;;  %3264 = vmatmul.mubr.bf16.gmra.mxu1 %v17761_v59  ;;  %v2627_v18 = vadd.f32 %v17306_v41, %v2493_v44  ;;  %v2757_v55 = vmax.f32 %v2629_v16, 0.0  ;;  %v17797_v44 = vld [vmem:[%s20727_s8 + $0x8] ss:$16 sps:$4 sm:$0xff]  }
 0x278   :  { %v2255_v20 = vpop.f32.mrf.mxu0  ;;  %3304 = vmatprep.mubr.bf16.mxu1 %v17438_v22 }
 0x279   :  { %v2630_v1 = vadd.f32 %v17306_v41, %v2496_v57  ;;  %v2494_v32 = vmul.f32 %v17298_v11, %v2255_v20  ;;  %v2741_v57 = vmax.f32 %v2613_v13, 0.0  ;;  %v2740_v20 = vmax.f32 %v2612_v52, 0.0 }
 0x27a   :  { %v14506_v3 = vpop.f32.mrf.mxu0  ;;  %v2488_v13 = vmul.f32 %v17730_v25, %v17298_v11  ;;  %v2754_v52 = vmax.f32 %v2626_v14, 0.0 }
 0x27b   :  { %v2758_v34 = vmax.f32 %v2630_v1, 0.0  ;;  %v2628_v22 = vadd.f32 %v17306_v41, %v2494_v32  ;;  %v2499_v46 = vmul.f32 %v14506_v3, %v17298_v11  ;;  %v2755_v32 = vmax.f32 %v2627_v18, 0.0 }
 0x27c   :  { %v2268_v26 = vpop.f32.mrf.mxu0  ;;  %v2830_v35 = vpack.c.bf16 %v2742_v63, %v2741_v57  ;;  %v2753_v63 = vmax.f32 %v2625_v51, 0.0 }
 0x27d   :  { %v2756_v16 = vmax.f32 %v2628_v22, 0.0  ;;  %v2497_v3 = vmul.f32 %v17298_v11, %v2268_v26  ;;  %v2838_v1 = vpack.c.bf16 %v2758_v34, %v2757_v55  ;;  %v2633_v5 = vadd.f32 %v17306_v41, %v2499_v46  ;;  %v17817_v34 = vld [vmem:[%s20728_s21] ss:$0 sm:$0xff] }
 0x27e   :  { %v14507_v4 = vpop.f32.mrf.mxu0  ;;  %v2608_v22 = vadd.f32 %v17306_v41, %v2474_v42  ;;  %v2487_v25 = vmul.f32 %v17817_v34, %v17716_v21  ;;  %v2829_v41 = vpack.c.bf16 %v2740_v20, %v2739_v17  ;;  %v2622_v21 = vadd.f32 %v17824_v2, %v2488_v13  ;;  %v17849_v13 = vld [vmem:[%s20727_s8 + $0x4c] ss:$16 sps:$4 sm:$0xff]  }
 0x27f   :  { %v2500_v36 = vmul.f32 %v14507_v4, %v17298_v11  ;;  %13728 = vmatprep.subr.bf16.mxu1 %v2838_v1  ;;  %3305 = vmatmul.mubr.bf16.vlgmr.msra.gmra.mxu1 %v17797_v44  ;;  %v2837_v18 = vpack.c.bf16 %v2756_v16, %v2755_v32  ;;  %v2623_v4 = vadd.f32 %v17824_v2, %v2489_v60  ;;  %v2752_v46 = vmax.f32 %v2624_v56, 0.0 }
 0x280   :  { %v2271_v11 = vpop.f32.mrf.mxu0  ;;  %13729 = vmatpush3.bf16.msra.mxu1 %v2830_v35  ;;  %3312 = vmatprep.mubr.bf16.mxu1 %v17804_v50  ;;  %v2631_v42 = vadd.f32 %v17824_v2, %v2497_v3  ;;  %v2486_v55 = vmul.f32 %v17817_v34, %v17733_v40  ;;  %v2836_v51 = vpack.c.bf16 %v2754_v52, %v2753_v63  ;;  %v2761_v60 = vmax.f32 %v2633_v5, 0.0 }
 0x281   :  { %v2634_v14 = vadd.f32 %v17824_v2, %v2500_v36  ;;  %v2498_v24 = vmul.f32 %v17817_v34, %v2271_v11  ;;  %13730 = vmatprep.subr.bf16.mxu1 %v2837_v18  ;;  %v17839_v36 = vld [vmem:[%s20727_s8 + $0x28] ss:$16 sps:$4 sm:$0xff]   ;;  %v20739_v32 = vmax.f32 %v17753_v43, 0.0  ;;  %v2621_v3 = vadd.f32 %v17824_v2, %v2487_v25 }
 0x282   :  { %v14510_v57 = vpop.f32.mrf.mxu0  ;;  %v2485_v40 = vmul.f32 %v17817_v34, %v17723_v62  ;;  %v2751_v1 = vmax.f32 %v2623_v4, 0.0  ;;  %v2759_v52 = vmax.f32 %v2631_v42, 0.0  ;;  %v2484_v18 = vmul.f32 %v17817_v34, %v17710_v54 }
 0x283   :  { %v2762_v35 = vmax.f32 %v2634_v14, 0.0  ;;  %v2632_v26 = vadd.f32 %v17824_v2, %v2498_v24  ;;  %v2503_v20 = vmul.f32 %v17817_v34, %v14510_v57  ;;  %v2828_v16 = vpack.c.bf16 %v2738_v49, %v20739_v32 }
 0x284   :  { %v2284_v5 = vpop.f32.mrf.mxu0  ;;  %13731 = vmatpush3.bf16.msra.mxu1 %v2829_v41  ;;  %v2736_v49 = vmax.f32 %v2608_v22, 0.0  ;;  %v2750_v62 = vmax.f32 %v2622_v21, 0.0  ;;  %v2620_v25 = vadd.f32 %v17824_v2, %v2486_v55  ;;  %v2835_v42 = vpack.c.bf16 %v2752_v46, %v2751_v1 }
 0x285   :  { %v17851_v56 = vpack.c.bf16 %v2762_v35, %v2761_v60  ;;  %v2760_v17 = vmax.f32 %v2632_v26, 0.0  ;;  %v2501_v43 = vmul.f32 %v17817_v34, %v2284_v5  ;;  %13732 = vmatprep.subr.bf16.mxu1 %v2836_v51  ;;  %v2637_v11 = vadd.f32 %v17824_v2, %v2503_v20 }
 0x286   :  { %v14511_v63 = vpop.f32.mrf.mxu0  ;;  %v2735_v14 = vmax.f32 %v17774_v33, 0.0  ;;  %v2483_v22 = vmul.f32 %v17817_v34, %v17696_v8  ;;  %v2749_v24 = vmax.f32 %v2621_v3, 0.0  ;;  %v2619_v21 = vadd.f32 %v17824_v2, %v2485_v40  ;;  %v17879_v3 = vld [vmem:[%s20727_s8 + $0x48] ss:$16 sps:$4 sm:$0xff]  }
 0x287   :  { %v17857_v4 = vpack.c.bf16 %v2760_v17, %v2759_v52  ;;  %v2504_v41 = vmul.f32 %v17817_v34, %v14511_v63  ;;  %3313 = vmatmul.mubr.bf16.gmra.mxu1 %v17839_v36  ;;  %v2635_v55 = vadd.f32 %v17824_v2, %v2501_v43  ;;  %v2618_v33 = vadd.f32 %v17824_v2, %v2484_v18 }
 0x288   :  { %v2287_v54 = vpop.f32.mrf.mxu0  ;;  %13733 = vmatpush3.bf16.msra.mxu1 %v2828_v16  ;;  %3320 = vmatprep.mubr.bf16.mxu1 %v17849_v13  ;;  %v2827_v51 = vpack.c.bf16 %v2736_v49, %v2735_v14  ;;  %v2482_v8 = vmul.f32 %v17817_v34, %v17713_v27  ;;  %v2748_v60 = vmax.f32 %v2620_v25, 0.0  ;;  %v2765_v26 = vmax.f32 %v2637_v11, 0.0  ;;  %v17889_v27 = vld [vmem:[%s20727_s8 + $0x6c] ss:$16 sps:$4 sm:$0xff]  }
 0x289   :  { %v2638_v57 = vadd.f32 %v17824_v2, %v2504_v41  ;;  %v2502_v46 = vmul.f32 %v17817_v34, %v2287_v54  ;;  %13734 = vmatprep.subr.bf16.mxu1 %v2835_v42  ;;  %v2834_v16 = vpack.c.bf16 %v2750_v62, %v2749_v24  ;;  %v2617_v40 = vadd.f32 %v17824_v2, %v2483_v22  ;;  %v17907_v54 = vld [vmem:[%s20727_s8 + $0x68] ss:$16 sps:$4 sm:$0xff]  }
 0x28a   :  { %v17873_v35 = vpop.f32.mrf.mxu0  ;;  %v2481_v1 = vmul.f32 %v17817_v34, %v17703_v30  ;;  %v2747_v52 = vmax.f32 %v2619_v21, 0.0  ;;  %v2763_v17 = vmax.f32 %v2635_v55, 0.0  ;;  %v2746_v62 = vmax.f32 %v2618_v33, 0.0 }
 0x28b   :  { %v2766_v20 = vmax.f32 %v2638_v57, 0.0  ;;  %v2636_v32 = vadd.f32 %v17824_v2, %v2502_v46  ;;  %v2616_v25 = vadd.f32 %v17824_v2, %v2482_v8  ;;  %v2745_v41 = vmax.f32 %v2617_v40, 0.0 }
 0x28c   :  { %v17884_v5 = vpop.f32.mrf.mxu0  ;;  %13735 = vmatpush3.bf16.msra.mxu1 %v2827_v51  ;;  %v2833_v63 = vpack.c.bf16 %v2748_v60, %v2747_v52  ;;  %v2615_v42 = vadd.f32 %v17824_v2, %v2481_v1  ;;  %v17931_v60 = vld [vmem:[%s20727_s8 + $0xac] ss:$16 sps:$4 sm:$0xff]  }
 0x28d   :  { %v17891_v43 = vpack.c.bf16 %v2766_v20, %v2765_v26  ;;  %v2764_v49 = vmax.f32 %v2636_v32, 0.0  ;;  %13736 = vmatprep.subr.bf16.mxu1 %v2834_v16  ;;  %v2744_v22 = vmax.f32 %v2616_v25, 0.0  ;;  %v2832_v24 = vpack.c.bf16 %v2746_v62, %v2745_v41  ;;  %v17944_v32 = vld [vmem:[%s20727_s8 + $0xa8] ss:$16 sps:$4 sm:$0xff]   ;;  %v17951_v16 = vld [vmem:[%s20727_s8 + $0xcc] ss:$16 sps:$4 sm:$0xff]  }
 0x28e   :  { %v17893_v18 = vpop.f32.mrf.mxu0  ;;  %v2743_v55 = vmax.f32 %v2615_v42, 0.0  ;;  %v17965_v62 = vld [vmem:[%s20727_s8 + $0xec] ss:$16 sps:$4 sm:$0xff]  }
 0x28f   :  { %v17896_v30 = vpack.c.bf16 %v2764_v49, %v2763_v17  ;;  %3321 = vmatmul.mubr.bf16.gmra.mxu1 %v17879_v3  ;;  %v17960_v17 = vld [vmem:[%s20727_s8 + $0xc8] ss:$16 sps:$4 sm:$0xff]  }
 0x290   :  { %v17899_v11 = vpop.f32.mrf.mxu0  ;;  %13737 = vmatpush3.bf16.msra.mxu1 %v17666_v12  ;;  %3328 = vmatprep.mubr.bf16.mxu1 %v17889_v27  ;;  %v17913_v12 = vld [vmem:[%s20727_s8 + $0x8c] ss:$16 sps:$4 sm:$0xff]   ;;  %v2831_v46 = vpack.c.bf16 %v2744_v22, %v2743_v55 }
 0x291   :  { %13738 = vmatprep.subr.bf16.mxu1 %v2833_v63 }
 0x292   :  { %v14518_v14 = vpop.f32.mrf.mxu0 }
 0x293   :  { %v2511_v55 = vmul.f32 %v17817_v34, %v14518_v14 }
 0x294   :  { %v2316_v21 = vpop.f32.mrf.mxu0  ;;  %13739 = vmatpush3.bf16.msra.mxu1 %v17671_v23  ;;  %v17923_v23 = vld [vmem:[%s20727_s8 + $0x88] ss:$16 sps:$4 sm:$0xff]  }
 0x295   :  { %13740 = vmatprep.subr.bf16.mxu1 %v2832_v24  ;;  %v17974_v24 = vld [vmem:[%s20727_s8 + $0xe8] ss:$16 sps:$4 sm:$0xff]   ;;  %v2645_v14 = vadd.f32 %v17824_v2, %v2511_v55  ;;  %v2509_v61 = vmul.f32 %v17817_v34, %v2316_v21 }
 0x296   :  { %v14519_v57 = vpop.f32.mrf.mxu0 }
 0x297   :  { %3329 = vmatmul.mubr.bf16.gmra.mxu1 %v17907_v54  ;;  %v2512_v41 = vmul.f32 %v17817_v34, %v14519_v57 }
 0x298   :  { %v2319_v51 = vpop.f32.mrf.mxu0  ;;  %13741 = vmatpush3.bf16.msra.mxu1 %v17622_v9  ;;  %3336 = vmatprep.mubr.bf16.mxu1 %v17913_v12 }
 0x299   :  { %13742 = vmatprep.subr.bf16.mxu1 %v2831_v46  ;;  %v2646_v57 = vadd.f32 %v17824_v2, %v2512_v41  ;;  %v2510_v7 = vmul.f32 %v17817_v34, %v2319_v51 }
 0x29a   :  { %v17918_v33 = vpop.f32.mrf.mxu0 }
 0x29b   :  { %v2644_v15 = vadd.f32 %v17824_v2, %v2510_v7 }
 0x29c   :  { %v17925_v8 = vpop.f32.mrf.mxu0  ;;  %13743 = vmatpush3.bf16.msra.mxu1 %v17628_v45 }
 0x29d   :  { %v2772_v31 = vmax.f32 %v2644_v15, 0.0 }
 0x29e   :  { %v17933_v9 = vpop.f32.mrf.mxu0 }
 0x29f   :  { %3337 = vmatmul.mubr.bf16.gmra.mxu1 %v17923_v23 }
 0x2a0   :  { %v17936_v26 = vpop.f32.mrf.mxu0  ;;  %3344 = vmatprep.mubr.bf16.mxu1 %v17931_v60 }
 0x2a2   :  { %v17939_v20 = vpop.f32.mrf.mxu0 }
 0x2a3   :  { %v2519_v15 = vmul.f32 %v17817_v34, %v17939_v20 }
 0x2a4   :  { %v17946_v45 = vpop.f32.mrf.mxu0 }
 0x2a6   :  { %v14527_v40 = vpop.f32.mrf.mxu0 }
 0x2a7   :  { %3345 = vmatmul.mubr.bf16.gmra.mxu1 %v17944_v32 }
 0x2a8   :  { %v17954_v1 = vpop.f32.mrf.mxu0  ;;  %3352 = vmatprep.mubr.bf16.mxu1 %v17951_v16 }
 0x2aa   :  { %v14530_v52 = vpop.f32.mrf.mxu0 }
 0x2ab   :  { %v2523_v19 = vmul.f32 %v17817_v34, %v14530_v52 }
 0x2ac   :  { %v2364_v49 = vpop.f32.mrf.mxu0 }
 0x2ad   :  { %v2657_v7 = vadd.f32 %v17824_v2, %v2523_v19 }
 0x2ae   :  { %v14531_v25 = vpop.f32.mrf.mxu0 }
 0x2af   :  { %3353 = vmatmul.mubr.bf16.gmra.mxu1 %v17960_v17 }
 0x2b0   :  { %v2367_v63 = vpop.f32.mrf.mxu0  ;;  %3360 = vmatprep.mubr.bf16.mxu1 %v17965_v62 }
 0x2b1   :  { %v2522_v21 = vmul.f32 %v17817_v34, %v2367_v63  ;;  %v2521_v63 = vmul.f32 %v17817_v34, %v2364_v49 }
 0x2b2   :  { %v14534_v42 = vpop.f32.mrf.mxu0 }
 0x2b3   :  { %v2527_v22 = vmul.f32 %v17817_v34, %v14534_v42  ;;  %v2524_v42 = vmul.f32 %v17817_v34, %v14531_v25 }
 0x2b4   :  { %v2380_v46 = vpop.f32.mrf.mxu0 }
 0x2b5   :  { %v2525_v6 = vmul.f32 %v17817_v34, %v2380_v46  ;;  %v2661_v39 = vadd.f32 %v17824_v2, %v2527_v22  ;;  %v2774_v22 = vmax.f32 %v2646_v57, 0.0  ;;  %v2658_v55 = vadd.f32 %v17824_v2, %v2524_v42 }
 0x2b6   :  { %v14535_v38 = vpop.f32.mrf.mxu0  ;;  %v2643_v57 = vadd.f32 %v17824_v2, %v2509_v61  ;;  %v2520_v61 = vmul.f32 %v17817_v34, %v14527_v40  ;;  %v2655_v40 = vadd.f32 %v17824_v2, %v2521_v63  ;;  %v2516_v63 = vmul.f32 %v17817_v34, %v17933_v9 }
 0x2b7   :  { %v2528_v59 = vmul.f32 %v17817_v34, %v14535_v38  ;;  %3361 = vmatmul.mubr.bf16.gmra.mxu1 %v17974_v24  ;;  %v2659_v51 = vadd.f32 %v17824_v2, %v2525_v6  ;;  %v2508_v38 = vmul.f32 %v17817_v34, %v17893_v18  ;;  %v2789_v52 = vmax.f32 %v2661_v39, 0.0  ;;  %v18005_v6 = vld [vmem:[%s20727_s8 + $0x108] ss:$16 sps:$4 sm:$0xff]   ;;  %v18014_v39 = vld [vmem:[%s20727_s8 + $0x12c] ss:$16 sps:$4 sm:$0xff]  }
 0x2b8   :  { %v2383_v46 = vpop.f32.mrf.mxu0  ;;  %3368 = vmatprep.mubr.bf16.mxu1 %v17980_v37  ;;  %v2773_v18 = vmax.f32 %v2645_v14, 0.0  ;;  %v2786_v19 = vmax.f32 %v2658_v55, 0.0  ;;  %v2656_v37 = vadd.f32 %v17824_v2, %v2522_v21  ;;  %v2654_v55 = vadd.f32 %v17824_v2, %v2520_v61 }
 0x2b9   :  { %v2662_v25 = vadd.f32 %v17824_v2, %v2528_v59  ;;  %v2526_v41 = vmul.f32 %v17817_v34, %v2383_v46  ;;  %v2507_v59 = vmul.f32 %v17817_v34, %v17873_v35  ;;  %v2787_v42 = vmax.f32 %v2659_v51, 0.0 }
 0x2ba   :  { %v2506_v35 = vmul.f32 %v17817_v34, %v17899_v11  ;;  %v2846_v14 = vpack.c.bf16 %v2774_v22, %v2773_v18  ;;  %v2785_v11 = vmax.f32 %v2657_v7, 0.0  ;;  %v2784_v21 = vmax.f32 %v2656_v37, 0.0 }
 0x2bb   :  { %v2790_v48 = vmax.f32 %v2662_v25, 0.0  ;;  %v2660_v53 = vadd.f32 %v17824_v2, %v2526_v41  ;;  %v2642_v41 = vadd.f32 %v17824_v2, %v2508_v38  ;;  %v2641_v49 = vadd.f32 %v17824_v2, %v2507_v59  ;;  %v18037_v59 = vld [vmem:[%s20727_s8 + $0x128] ss:$16 sps:$4 sm:$0xff]  }
 0x2bc   :  { %v2640_v38 = vadd.f32 %v17824_v2, %v2506_v35  ;;  %v2517_v37 = vmul.f32 %v17817_v34, %v17946_v45  ;;  %v2515_v45 = vmul.f32 %v17817_v34, %v17918_v33  ;;  %v2650_v9 = vadd.f32 %v17824_v2, %v2516_v63  ;;  %v18067_v33 = vld [vmem:[%s20727_s8 + $0x16c] ss:$16 sps:$4 sm:$0xff]  }
 0x2bd   :  { %v2788_v46 = vmax.f32 %v2660_v53, 0.0  ;;  %v2854_v25 = vpack.c.bf16 %v2790_v48, %v2789_v52  ;;  %v2505_v53 = vmul.f32 %v17817_v34, %v17884_v5  ;;  %v2771_v48 = vmax.f32 %v2643_v57, 0.0 }
 0x2be   :  { %v2770_v51 = vmax.f32 %v2642_v41, 0.0  ;;  %v2518_v5 = vmul.f32 %v17817_v34, %v17954_v1  ;;  %v2852_v52 = vpack.c.bf16 %v2786_v19, %v2785_v11  ;;  %v2769_v20 = vmax.f32 %v2641_v49, 0.0 }
 0x2bf   :  { %13816 = vmatprep.subr.bf16.mxu0 %v2854_v25  ;;  %v2853_v47 = vpack.c.bf16 %v2788_v46, %v2787_v42  ;;  %3369 = vmatmul.mubr.bf16.gmra.mxu1 %v18005_v6  ;;  %v2845_v22 = vpack.c.bf16 %v2772_v31, %v2771_v48  ;;  %v2639_v18 = vadd.f32 %v17824_v2, %v2505_v53  ;;  %v2783_v1 = vmax.f32 %v2655_v40, 0.0  ;;  %v18062_v48 = vld [vmem:[%s20727_s8 + $0x148] ss:$16 sps:$4 sm:$0xff]  }
 0x2c0   :  { %13817 = vmatpush3.bf16.msra.mxu0 %v2846_v14  ;;  %3376 = vmatprep.mubr.bf16.mxu1 %v18014_v39  ;;  %v2653_v31 = vadd.f32 %v17824_v2, %v2519_v15  ;;  %v2844_v57 = vpack.c.bf16 %v2770_v51, %v2769_v20  ;;  %v2768_v7 = vmax.f32 %v2640_v38, 0.0  ;;  %v2782_v42 = vmax.f32 %v2654_v55, 0.0 }
 0x2c1   :  { %13818 = vmatprep.subr.bf16.mxu0 %v2853_v47  ;;  %v18043_v47 = vld [vmem:[%s20727_s8 + $0x14c] ss:$16 sps:$4 sm:$0xff]   ;;  %v2652_v46 = vadd.f32 %v17824_v2, %v2518_v5  ;;  %v2851_v25 = vpack.c.bf16 %v2784_v21, %v2783_v1  ;;  %v2767_v41 = vmax.f32 %v2639_v18, 0.0  ;;  %v2651_v14 = vadd.f32 %v17824_v2, %v2517_v37 }
 0x2c2   :  { %v2781_v35 = vmax.f32 %v2653_v31, 0.0  ;;  %v2514_v19 = vmul.f32 %v17817_v34, %v17936_v26  ;;  %v2649_v15 = vadd.f32 %v17824_v2, %v2515_v45  ;;  %v2513_v11 = vmul.f32 %v17817_v34, %v17925_v8  ;;  %v18080_v34 = vld [vmem:[%s20727_s8 + $0x168] ss:$16 sps:$4 sm:$0xff]  }
 0x2c3   :  { %v2843_v61 = vpack.c.bf16 %v2768_v7, %v2767_v41  ;;  %v2780_v49 = vmax.f32 %v2652_v46, 0.0  ;;  %v2779_v40 = vmax.f32 %v2651_v14, 0.0  ;;  %v2778_v26 = vmax.f32 %v2650_v9, 0.0  ;;  %v14879_v41 = vld [vmem:[%s20727_s8 + $0x40] ss:$16 sps:$4 sm:$0xff]  }
 0x2c4   :  { %13819 = vmatpush3.bf16.msra.mxu0 %v2845_v22  ;;  %v2850_v53 = vpack.c.bf16 %v2782_v42, %v2781_v35  ;;  %v2648_v51 = vadd.f32 %v17824_v2, %v2514_v19  ;;  %v2777_v22 = vmax.f32 %v2649_v15, 0.0  ;;  %v2647_v55 = vadd.f32 %v17824_v2, %v2513_v11  ;;  %v14874_v2 = vld [vmem:[%s20727_s8 + $0x4] ss:$16 sps:$4 sm:$0xff]   ;;  %v14881_v19 = vld [vmem:[%s20727_s8 + $0x60] ss:$16 sps:$4 sm:$0xff]  }
 0x2c5   :  { %13820 = vmatprep.subr.bf16.mxu0 %v2852_v52  ;;  %v2849_v38 = vpack.c.bf16 %v2780_v49, %v2779_v40 }
 0x2c6   :  { %v2776_v5 = vmax.f32 %v2648_v51, 0.0  ;;  %v2848_v21 = vpack.c.bf16 %v2778_v26, %v2777_v22  ;;  %v2775_v8 = vmax.f32 %v2647_v55, 0.0  ;;  %v14883_v26 = vld [vmem:[%s20727_s8 + $0x80] ss:$16 sps:$4 sm:$0xff]  }
 0x2c7   :  { %3377 = vmatmul.mubr.bf16.gmra.mxu1 %v18037_v59 }
 0x2c8   :  { %13821 = vmatpush3.bf16.msra.mxu0 %v2844_v57  ;;  %3384 = vmatprep.mubr.bf16.mxu1 %v18043_v47  ;;  %v2847_v52 = vpack.c.bf16 %v2776_v5, %v2775_v8  ;;  %v14877_v57 = vld [vmem:[%s20727_s8 + $0x20] ss:$16 sps:$4 sm:$0xff]  }
 0x2c9   :  { %13822 = vmatprep.subr.bf16.mxu0 %v2851_v25 }
 0x2cc   :  { %13823 = vmatpush3.bf16.msra.mxu0 %v2843_v61 }
 0x2cd   :  { %13824 = vmatprep.subr.bf16.mxu0 %v2850_v53 }
 0x2cf   :  { %3385 = vmatmul.mubr.bf16.gmra.mxu1 %v18062_v48 }
 0x2d0   :  { %13825 = vmatpush3.bf16.msra.mxu0 %v17891_v43  ;;  %3392 = vmatprep.mubr.bf16.mxu1 %v18067_v33 }
 0x2d1   :  { %13826 = vmatprep.subr.bf16.mxu0 %v2849_v38 }
 0x2d4   :  { %13827 = vmatpush3.bf16.msra.mxu0 %v17896_v30  ;;  %v14875_v30 = vld [vmem:[%s20727_s8] ss:$16 sps:$4 sm:$0xff]  }
 0x2d5   :  { %13828 = vmatprep.subr.bf16.mxu0 %v2848_v21 }
 0x2d7   :  { %3393 = vmatmul.mubr.bf16.gmra.mxu1 %v18080_v34 }
 0x2d8   :  { %13829 = vmatpush3.bf16.msra.mxu0 %v17851_v56  ;;  %3553 = vmatprep.mubr.bf16.mxu1 %v14874_v2  ;;  %v14876_v56 = vld [vmem:[%s20727_s8 + $0x24] ss:$16 sps:$4 sm:$0xff]  }
 0x2d9   :  { %13830 = vmatprep.subr.bf16.mxu0 %v2847_v52 }
 0x2dc   :  { %13831 = vmatpush3.bf16.msra.mxu0 %v17857_v4 }
 0x2df   :  { %v13568_v43 = vpop.f32.mrf.mxu1  ;;  %3554 = vmatmul.mubr.bf16.vlgmr.msra.gmra.mxu1 %v14875_v30  ;;  %3683 = vmatmul.mubr.bf16.vlgmr.msra.gmra.mxu0 %v17797_v44  ;;  %v14878_v44 = vld [vmem:[%s20727_s8 + $0x44] ss:$16 sps:$4 sm:$0xff]  }
 0x2e0   :  { %3561 = vmatprep.mubr.bf16.mxu1 %v14876_v56  ;;  %3690 = vmatprep.mubr.bf16.mxu0 %v17804_v50  ;;  %v20741_v56 = vld [vmem:[#allocation173_spill] sm:$0xff] }
 0x2e1   :  { %v13569_v20 = vpop.f32.mrf.mxu1 }
 0x2e2   :  { %v18097_v18 = vadd.f32 %v13569_v20, %v13568_v43 }
 0x2e3   :  { %v13571_v31 = vpop.f32.mrf.mxu1 }
 0x2e5   :  { %v13572_v4 = vpop.f32.mrf.mxu1 }
 0x2e6   :  { %v18099_v37 = vadd.f32 %v13572_v4, %v13571_v31 }
 0x2e7   :  { %v13574_v1 = vpop.f32.mrf.mxu1  ;;  %3562 = vmatmul.mubr.bf16.gmra.mxu1 %v14877_v57  ;;  %3691 = vmatmul.mubr.bf16.gmra.mxu0 %v17839_v36  ;;  %v14880_v36 = vld [vmem:[%s20727_s8 + $0x64] ss:$16 sps:$4 sm:$0xff]  }
 0x2e8   :  { %3569 = vmatprep.mubr.bf16.mxu1 %v14878_v44  ;;  %3698 = vmatprep.mubr.bf16.mxu0 %v17849_v13  ;;  %v20744_v57 = vld [vmem:[#allocation175_spill] sm:$0xff] }
 0x2e9   :  { %v13575_v50 = vpop.f32.mrf.mxu1 }
 0x2ea   :  { %v18109_v7 = vadd.f32 %v13575_v50, %v13574_v1  ;;  %v20743_v1 = vld [vmem:[#allocation174_spill] sm:$0xff] }
 0x2eb   :  { %v13577_v63 = vpop.f32.mrf.mxu1 }
 0x2ed   :  { %v13578_v42 = vpop.f32.mrf.mxu1 }
 0x2ee   :  { %v18111_v46 = vadd.f32 %v13578_v42, %v13577_v63 }
 0x2ef   :  { %v13580_v25 = vpop.f32.mrf.mxu1  ;;  %3570 = vmatmul.mubr.bf16.gmra.mxu1 %v14879_v41  ;;  %3699 = vmatmul.mubr.bf16.gmra.mxu0 %v17879_v3  ;;  %v14882_v3 = vld [vmem:[%s20727_s8 + $0x84] ss:$16 sps:$4 sm:$0xff]  }
 0x2f0   :  { %3577 = vmatprep.mubr.bf16.mxu1 %v14880_v36  ;;  %3706 = vmatprep.mubr.bf16.mxu0 %v17889_v27  ;;  %v20746_v41 = vld [vmem:[#allocation177_spill] sm:$0xff] }
 0x2f1   :  { %v13581_v13 = vpop.f32.mrf.mxu1 }
 0x2f2   :  { %v18121_v45 = vadd.f32 %v13581_v13, %v13580_v25  ;;  %v20745_v25 = vld [vmem:[#allocation176_spill] sm:$0xff] }
 0x2f3   :  { %v13583_v35 = vpop.f32.mrf.mxu1 }
 0x2f5   :  { %v13584_v14 = vpop.f32.mrf.mxu1 }
 0x2f6   :  { %v18123_v61 = vadd.f32 %v13584_v14, %v13583_v35 }
 0x2f7   :  { %v13586_v9 = vpop.f32.mrf.mxu1  ;;  %3578 = vmatmul.mubr.bf16.gmra.mxu1 %v14881_v19  ;;  %3707 = vmatmul.mubr.bf16.gmra.mxu0 %v17907_v54  ;;  %v14884_v54 = vld [vmem:[%s20727_s8 + $0xa4] ss:$16 sps:$4 sm:$0xff]  }
 0x2f8   :  { %3585 = vmatprep.mubr.bf16.mxu1 %v14882_v3  ;;  %3714 = vmatprep.mubr.bf16.mxu0 %v17913_v12  ;;  %v20748_v19 = vld [vmem:[#allocation179_spill] sm:$0xff] }
 0x2f9   :  { %v13587_v27 = vpop.f32.mrf.mxu1 }
 0x2fa   :  { %v18133_v49 = vadd.f32 %v13587_v27, %v13586_v9  ;;  %v20747_v9 = vld [vmem:[#allocation178_spill] sm:$0xff] }
 0x2fb   :  { %v13589_v53 = vpop.f32.mrf.mxu1 }
 0x2fd   :  { %v13590_v15 = vpop.f32.mrf.mxu1 }
 0x2fe   :  { %v18135_v11 = vadd.f32 %v13590_v15, %v13589_v53 }
 0x2ff   :  { %v13592_v40 = vpop.f32.mrf.mxu1  ;;  %3586 = vmatmul.mubr.bf16.gmra.mxu1 %v14883_v26  ;;  %3715 = vmatmul.mubr.bf16.gmra.mxu0 %v17923_v23 }
 0x300   :  { %3593 = vmatprep.mubr.bf16.mxu1 %v14884_v54  ;;  %3722 = vmatprep.mubr.bf16.mxu0 %v17931_v60 }
 0x301   :  { %v13593_v12 = vpop.f32.mrf.mxu1 }
 0x302   :  { %v18145_v51 = vadd.f32 %v13593_v12, %v13592_v40  ;;  %v20749_v40 = vld [vmem:[#allocation180_spill] sm:$0xff] }
 0x303   :  { %v13595_v38 = vpop.f32.mrf.mxu1 }
 0x305   :  { %v13596_v22 = vpop.f32.mrf.mxu1 }
 0x306   :  { %v18147_v55 = vadd.f32 %v13596_v22, %v13595_v38 }
 0x307   :  { %v13598_v5 = vpop.f32.mrf.mxu1  ;;  %3594 = vmatmul.mubr.bf16.gmra.mxu1 %v17610_v0  ;;  %3723 = vmatmul.mubr.bf16.gmra.mxu0 %v17944_v32 }
 0x308   :  { %3601 = vmatprep.mubr.bf16.mxu1 %v17620_v29  ;;  %3730 = vmatprep.mubr.bf16.mxu0 %v17951_v16 }
 0x309   :  { %v13599_v23 = vpop.f32.mrf.mxu1 }
 0x30a   :  { %v18153_v21 = vadd.f32 %v13599_v23, %v13598_v5 }
 0x30b   :  { %v13601_v60 = vpop.f32.mrf.mxu1 }
 0x30d   :  { %v13602_v8 = vpop.f32.mrf.mxu1 }
 0x30e   :  { %v18155_v52 = vadd.f32 %v13602_v8, %v13601_v60 }
 0x30f   :  { %v13604_v2 = vpop.f32.mrf.mxu1  ;;  %3602 = vmatmul.mubr.bf16.gmra.mxu1 %v17652_v28  ;;  %3731 = vmatmul.mubr.bf16.gmra.mxu0 %v17960_v17  ;;  %v20742_v28 = vld [vmem:[#allocation181_spill] sm:$0xff] }
 0x310   :  { %3609 = vmatprep.mubr.bf16.mxu1 %v17664_v10  ;;  %3738 = vmatprep.mubr.bf16.mxu0 %v17965_v62 }
 0x311   :  { %v13605_v0 = vpop.f32.mrf.mxu1 }
 0x312   :  { %v18161_v29 = vadd.f32 %v13605_v0, %v13604_v2 }
 0x313   :  { %v13607_v32 = vpop.f32.mrf.mxu1 }
 0x315   :  { %v13608_v16 = vpop.f32.mrf.mxu1 }
 0x316   :  { %v18163_v43 = vadd.f32 %v13608_v16, %v13607_v32 }
 0x317   :  { %v13610_v30 = vpop.f32.mrf.mxu1  ;;  %3610 = vmatmul.mubr.bf16.gmra.mxu1 %v17685_v58  ;;  %3739 = vmatmul.mubr.bf16.gmra.mxu0 %v17974_v24 }
 0x318   :  { %3617 = vmatprep.mubr.bf16.mxu1 %v20741_v56  ;;  %3746 = vmatprep.mubr.bf16.mxu0 %v20742_v28 }
 0x319   :  { %v13611_v17 = vpop.f32.mrf.mxu1 }
 0x31a   :  { %v18169_v10 = vadd.f32 %v13611_v17, %v13610_v30 }
 0x31b   :  { %v13613_v62 = vpop.f32.mrf.mxu1 }
 0x31d   :  { %v13614_v20 = vpop.f32.mrf.mxu1 }
 0x31e   :  { %v18171_v31 = vadd.f32 %v13614_v20, %v13613_v62 }
 0x31f   :  { %v13616_v4 = vpop.f32.mrf.mxu1  ;;  %3618 = vmatmul.mubr.bf16.gmra.mxu1 %v20743_v1  ;;  %3747 = vmatmul.mubr.bf16.gmra.mxu0 %v18005_v6 }
 0x320   :  { %3625 = vmatprep.mubr.bf16.mxu1 %v20744_v57  ;;  %3754 = vmatprep.mubr.bf16.mxu0 %v18014_v39 }
 0x321   :  { %v13617_v58 = vpop.f32.mrf.mxu1 }
 0x322   :  { %v18177_v24 = vadd.f32 %v13617_v58, %v13616_v4 }
 0x323   :  { %v13619_v44 = vpop.f32.mrf.mxu1 }
 0x325   :  { %v13620_v50 = vpop.f32.mrf.mxu1 }
 0x326   :  { %v18179_v63 = vadd.f32 %v13620_v50, %v13619_v44 }
 0x327   :  { %v13622_v42 = vpop.f32.mrf.mxu1  ;;  %3626 = vmatmul.mubr.bf16.gmra.mxu1 %v20745_v25  ;;  %3755 = vmatmul.mubr.bf16.gmra.mxu0 %v18037_v59 }
 0x328   :  { %3633 = vmatprep.mubr.bf16.mxu1 %v20746_v41  ;;  %3762 = vmatprep.mubr.bf16.mxu0 %v18043_v47 }
 0x329   :  { %v13623_v6 = vpop.f32.mrf.mxu1 }
 0x32a   :  { %v18185_v36 = vadd.f32 %v13623_v6, %v13622_v42 }
 0x32b   :  { %v13625_v39 = vpop.f32.mrf.mxu1 }
 0x32d   :  { %v13626_v13 = vpop.f32.mrf.mxu1 }
 0x32e   :  { %v18187_v35 = vadd.f32 %v13626_v13, %v13625_v39 }
 0x32f   :  { %v13628_v14 = vpop.f32.mrf.mxu1  ;;  %3634 = vmatmul.mubr.bf16.gmra.mxu1 %v20747_v9  ;;  %3763 = vmatmul.mubr.bf16.gmra.mxu0 %v18062_v48 }
 0x330   :  { %3641 = vmatprep.mubr.bf16.mxu1 %v20748_v19  ;;  %3770 = vmatprep.mubr.bf16.mxu0 %v18067_v33 }
 0x331   :  { %v13629_v59 = vpop.f32.mrf.mxu1 }
 0x332   :  { %v18193_v3 = vadd.f32 %v13629_v59, %v13628_v14 }
 0x333   :  { %v13631_v47 = vpop.f32.mrf.mxu1 }
 0x335   :  { %v13632_v27 = vpop.f32.mrf.mxu1 }
 0x336   :  { %v18195_v53 = vadd.f32 %v13632_v27, %v13631_v47 }
 0x337   :  { %v13634_v15 = vpop.f32.mrf.mxu1  ;;  %3642 = vmatmul.mubr.bf16.gmra.mxu1 %v20749_v40  ;;  %3771 = vmatmul.mubr.bf16.gmra.mxu0 %v18080_v34 }
 0x339   :  { %v13635_v26 = vpop.f32.mrf.mxu1 }
 0x33a   :  { %v18199_v54 = vadd.f32 %v13635_v26, %v13634_v15 }
 0x33b   :  { %v13637_v48 = vpop.f32.mrf.mxu1 }
 0x33d   :  { %v13638_v12 = vpop.f32.mrf.mxu1 }
 0x33e   :  { %v18201_v38 = vadd.f32 %v13638_v12, %v13637_v48 }
 0x33f   :  { %v13656_v33 = vpop.f32.mrf.mxu1 }
 0x341   :  { %v13657_v22 = vpop.f32.mrf.mxu1 }
 0x342   :  { %v13658_v23 = vadd.f32 %v13657_v22, %v13656_v33 }
 0x343   :  { %v13659_v5 = vpop.f32.mrf.mxu1 }
 0x344   :  { %v3307_v0 = vadd.f32 %v13658_v23, %v18097_v18 }
 0x345   :  { %v13660_v60 = vpop.f32.mrf.mxu1 }
 0x346   :  { %v13661_v8 = vadd.f32 %v13660_v60, %v13659_v5 }
 0x347   :  { %v13662_v2 = vpop.f32.mrf.mxu1 }
 0x348   :  { %v3310_v32 = vadd.f32 %v13661_v8, %v18099_v37 }
 0x349   :  { %v13663_v16 = vpop.f32.mrf.mxu1 }
 0x34a   :  { %v13265_v34 = vpack.c.bf16 %v3310_v32, %v3307_v0  ;;  %v13664_v56 = vadd.f32 %v13663_v16, %v13662_v2 }
 0x34b   :  { %v13665_v30 = vpop.f32.mrf.mxu1 }
 0x34c   :  { %13266 = vst [vmem:[#allocation2] sm:$0xff] %v13265_v34   ;;  %v3315_v20 = vadd.f32 %v13664_v56, %v18109_v7 }
 0x34d   :  { %v13666_v28 = vpop.f32.mrf.mxu1 }
 0x34e   :  { %v13667_v17 = vadd.f32 %v13666_v28, %v13665_v30 }
 0x34f   :  { %v13668_v62 = vpop.f32.mrf.mxu1 }
 0x350   :  { %v3318_v4 = vadd.f32 %v13667_v17, %v18111_v46 }
 0x351   :  { %v13669_v1 = vpop.f32.mrf.mxu1 }
 0x352   :  { %v13270_v57 = vpack.c.bf16 %v3318_v4, %v3315_v20  ;;  %v13670_v44 = vadd.f32 %v13669_v1, %v13668_v62 }
 0x353   :  { %v13671_v58 = vpop.f32.mrf.mxu1 }
 0x354   :  { %13452 = vst [vmem:[#allocation2 + $0x8] sm:$0xff] %v13270_v57   ;;  %v3323_v42 = vadd.f32 %v13670_v44, %v18121_v45 }
 0x355   :  { %v13672_v18 = vpop.f32.mrf.mxu1 }
 0x356   :  { %v13673_v50 = vadd.f32 %v13672_v18, %v13671_v58 }
 0x357   :  { %v13674_v37 = vpop.f32.mrf.mxu1 }
 0x358   :  { %v3326_v25 = vadd.f32 %v13673_v50, %v18123_v61 }
 0x359   :  { %v13675_v41 = vpop.f32.mrf.mxu1 }
 0x35a   :  { %v13275_v6 = vpack.c.bf16 %v3326_v25, %v3323_v42  ;;  %v13676_v13 = vadd.f32 %v13675_v41, %v13674_v37 }
 0x35b   :  { %v13677_v39 = vpop.f32.mrf.mxu1 }
 0x35c   :  { %13453 = vst [vmem:[#allocation2 + $0x10] sm:$0xff] %v13275_v6   ;;  %v3331_v9 = vadd.f32 %v13676_v13, %v18133_v49 }
 0x35d   :  { %v13678_v7 = vpop.f32.mrf.mxu1 }
 0x35e   :  { %v13679_v14 = vadd.f32 %v13678_v7, %v13677_v39 }
 0x35f   :  { %v13680_v46 = vpop.f32.mrf.mxu1 }
 0x360   :  { %v3334_v19 = vadd.f32 %v13679_v14, %v18135_v11 }
 0x361   :  { %v13681_v59 = vpop.f32.mrf.mxu1 }
 0x362   :  { %v13280_v47 = vpack.c.bf16 %v3334_v19, %v3331_v9  ;;  %v13682_v15 = vadd.f32 %v13681_v59, %v13680_v46 }
 0x363   :  { %v13683_v27 = vpop.f32.mrf.mxu1 }
 0x364   :  { %13454 = vst [vmem:[#allocation2 + $0x18] sm:$0xff] %v13280_v47   ;;  %v3339_v26 = vadd.f32 %v13682_v15, %v18145_v51 }
 0x365   :  { %v13684_v45 = vpop.f32.mrf.mxu1 }
 0x366   :  { %v13685_v40 = vadd.f32 %v13684_v45, %v13683_v27 }
 0x367   :  { %v13686_v61 = vpop.f32.mrf.mxu1 }
 0x368   :  { %v3342_v48 = vadd.f32 %v13685_v40, %v18147_v55 }
 0x369   :  { %v13687_v12 = vpop.f32.mrf.mxu1 }
 0x36a   :  { %v13285_v33 = vpack.c.bf16 %v3342_v48, %v3339_v26  ;;  %v13688_v5 = vadd.f32 %v13687_v12, %v13686_v61 }
 0x36b   :  { %v13689_v22 = vpop.f32.mrf.mxu1 }
 0x36c   :  { %13455 = vst [vmem:[#allocation2 + $0x20] sm:$0xff] %v13285_v33   ;;  %v3347_v60 = vadd.f32 %v13688_v5, %v18153_v21 }
 0x36d   :  { %v13690_v49 = vpop.f32.mrf.mxu1 }
 0x36e   :  { %v13691_v23 = vadd.f32 %v13690_v49, %v13689_v22 }
 0x36f   :  { %v13692_v11 = vpop.f32.mrf.mxu1 }
 0x370   :  { %v3350_v8 = vadd.f32 %v13691_v23, %v18155_v52 }
 0x371   :  { %v13693_v2 = vpop.f32.mrf.mxu1 }
 0x372   :  { %v13290_v0 = vpack.c.bf16 %v3350_v8, %v3347_v60  ;;  %v13694_v16 = vadd.f32 %v13693_v2, %v13692_v11 }
 0x373   :  { %v13695_v32 = vpop.f32.mrf.mxu1 }
 0x374   :  { %13456 = vst [vmem:[#allocation2 + $0x28] sm:$0xff] %v13290_v0   ;;  %v3355_v30 = vadd.f32 %v13694_v16, %v18161_v29 }
 0x375   :  { %v13696_v51 = vpop.f32.mrf.mxu1 }
 0x376   :  { %v13697_v34 = vadd.f32 %v13696_v51, %v13695_v32 }
 0x377   :  { %v13698_v55 = vpop.f32.mrf.mxu1 }
 0x378   :  { %v3358_v56 = vadd.f32 %v13697_v34, %v18163_v43 }
 0x379   :  { %v13699_v28 = vpop.f32.mrf.mxu1 }
 0x37a   :  { %v13295_v17 = vpack.c.bf16 %v3358_v56, %v3355_v30  ;;  %v13700_v20 = vadd.f32 %v13699_v28, %v13698_v55 }
 0x37b   :  { %v13701_v62 = vpop.f32.mrf.mxu1 }
 0x37c   :  { %13457 = vst [vmem:[#allocation2 + $0x30] sm:$0xff] %v13295_v17   ;;  %v3363_v1 = vadd.f32 %v13700_v20, %v18169_v10 }
 0x37d   :  { %v13702_v21 = vpop.f32.mrf.mxu1 }
 0x37e   :  { %v13703_v4 = vadd.f32 %v13702_v21, %v13701_v62 }
 0x37f   :  { %v13704_v52 = vpop.f32.mrf.mxu1 }
 0x380   :  { %v3366_v57 = vadd.f32 %v13703_v4, %v18171_v31 }
 0x381   :  { %v13705_v58 = vpop.f32.mrf.mxu1 }
 0x382   :  { %v13300_v44 = vpack.c.bf16 %v3366_v57, %v3363_v1  ;;  %v13706_v50 = vadd.f32 %v13705_v58, %v13704_v52 }
 0x383   :  { %v13707_v18 = vpop.f32.mrf.mxu1 }
 0x384   :  { %13458 = vst [vmem:[#allocation2 + $0x38] sm:$0xff] %v13300_v44   ;;  %v3371_v42 = vadd.f32 %v13706_v50, %v18177_v24 }
 0x385   :  { %v13708_v29 = vpop.f32.mrf.mxu1 }
 0x386   :  { %v13709_v37 = vadd.f32 %v13708_v29, %v13707_v18 }
 0x387   :  { %v13710_v43 = vpop.f32.mrf.mxu1 }
 0x388   :  { %v3374_v25 = vadd.f32 %v13709_v37, %v18179_v63 }
 0x389   :  { %v13711_v41 = vpop.f32.mrf.mxu1 }
 0x38a   :  { %v13305_v6 = vpack.c.bf16 %v3374_v25, %v3371_v42  ;;  %v13712_v13 = vadd.f32 %v13711_v41, %v13710_v43 }
 0x38b   :  { %v13713_v39 = vpop.f32.mrf.mxu1 }
 0x38c   :  { %13459 = vst [vmem:[#allocation2 + $0x40] sm:$0xff] %v13305_v6   ;;  %v3379_v14 = vadd.f32 %v13712_v13, %v18185_v36 }
 0x38d   :  { %v13714_v10 = vpop.f32.mrf.mxu1 }
 0x38e   :  { %v13715_v7 = vadd.f32 %v13714_v10, %v13713_v39 }
 0x38f   :  { %v13716_v31 = vpop.f32.mrf.mxu1 }
 0x390   :  { %v3382_v46 = vadd.f32 %v13715_v7, %v18187_v35 }
 0x391   :  { %v13717_v9 = vpop.f32.mrf.mxu1 }
 0x392   :  { %v13310_v19 = vpack.c.bf16 %v3382_v46, %v3379_v14  ;;  %v13718_v47 = vadd.f32 %v13717_v9, %v13716_v31 }
 0x393   :  { %v13719_v59 = vpop.f32.mrf.mxu1 }
 0x394   :  { %13460 = vst [vmem:[#allocation2 + $0x48] sm:$0xff] %v13310_v19   ;;  %v3387_v15 = vadd.f32 %v13718_v47, %v18193_v3 }
 0x395   :  { %v13720_v24 = vpop.f32.mrf.mxu1 }
 0x396   :  { %v13721_v27 = vadd.f32 %v13720_v24, %v13719_v59 }
 0x397   :  { %v13722_v63 = vpop.f32.mrf.mxu1 }
 0x398   :  { %v3390_v45 = vadd.f32 %v13721_v27, %v18195_v53 }
 0x399   :  { %v13723_v40 = vpop.f32.mrf.mxu1 }
 0x39a   :  { %v13315_v61 = vpack.c.bf16 %v3390_v45, %v3387_v15  ;;  %v13724_v48 = vadd.f32 %v13723_v40, %v13722_v63 }
 0x39b   :  { %v13725_v26 = vpop.f32.mrf.mxu1 }
 0x39c   :  { %13461 = vst [vmem:[#allocation2 + $0x50] sm:$0xff] %v13315_v61   ;;  %v3395_v22 = vadd.f32 %v13724_v48, %v18199_v54 }
 0x39d   :  { %v13726_v36 = vpop.f32.mrf.mxu1 }
 0x39e   :  { %v13727_v12 = vadd.f32 %v13726_v36, %v13725_v26 }
 0x39f   :  { %v13744_v35 = vpop.f32.mrf.mxu1  ;;  %v13832_v33 = vpop.f32.mrf.mxu0 }
 0x3a0   :  { %v3398_v5 = vadd.f32 %v13727_v12, %v18201_v38 }
 0x3a1   :  { %v13745_v49 = vpop.f32.mrf.mxu1  ;;  %v13833_v23 = vpop.f32.mrf.mxu0 }
 0x3a2   :  { %v13320_v11 = vpack.c.bf16 %v3398_v5, %v3395_v22  ;;  %v13746_v53 = vadd.f32 %v13745_v49, %v13744_v35  ;;  %v13834_v8 = vadd.f32 %v13833_v23, %v13832_v33 }
 0x3a3   :  { %v13747_v60 = vpop.f32.mrf.mxu1  ;;  %v13835_v3 = vpop.f32.mrf.mxu0 }
 0x3a4   :  { %13462 = vst [vmem:[#allocation2 + $0x58] sm:$0xff] %v13320_v11   ;;  %v3685_v55 = vadd.f32 %v13834_v8, %v13746_v53 }
 0x3a5   :  { %v13748_v2 = vpop.f32.mrf.mxu1  ;;  %v13836_v0 = vpop.f32.mrf.mxu0 }
 0x3a6   :  { %v13749_v32 = vadd.f32 %v13748_v2, %v13747_v60  ;;  %v13837_v16 = vadd.f32 %v13836_v0, %v13835_v3 }
 0x3a7   :  { %v13750_v51 = vpop.f32.mrf.mxu1  ;;  %v13838_v34 = vpop.f32.mrf.mxu0 }
 0x3a8   :  { %v3688_v30 = vadd.f32 %v13837_v16, %v13749_v32 }
 0x3a9   :  { %v13751_v56 = vpop.f32.mrf.mxu1  ;;  %v13839_v54 = vpop.f32.mrf.mxu0 }
 0x3aa   :  { %v13325_v28 = vpack.c.bf16 %v3688_v30, %v3685_v55  ;;  %v13752_v62 = vadd.f32 %v13751_v56, %v13750_v51  ;;  %v13840_v20 = vadd.f32 %v13839_v54, %v13838_v34 }
 0x3ab   :  { %v13753_v38 = vpop.f32.mrf.mxu1  ;;  %v13841_v17 = vpop.f32.mrf.mxu0 }
 0x3ac   :  { %13463 = vst [vmem:[#allocation2 + $0x60] sm:$0xff] %v13325_v28   ;;  %v3693_v44 = vadd.f32 %v13840_v20, %v13752_v62 }
 0x3ad   :  { %v13754_v21 = vpop.f32.mrf.mxu1  ;;  %v13842_v4 = vpop.f32.mrf.mxu0 }
 0x3ae   :  { %v13755_v52 = vadd.f32 %v13754_v21, %v13753_v38  ;;  %v13843_v1 = vadd.f32 %v13842_v4, %v13841_v17 }
 0x3af   :  { %v13756_v57 = vpop.f32.mrf.mxu1  ;;  %v13844_v58 = vpop.f32.mrf.mxu0 }
 0x3b0   :  { %v3696_v18 = vadd.f32 %v13843_v1, %v13755_v52 }
 0x3b1   :  { %v13757_v50 = vpop.f32.mrf.mxu1  ;;  %v13845_v29 = vpop.f32.mrf.mxu0 }
 0x3b2   :  { %v13330_v37 = vpack.c.bf16 %v3696_v18, %v3693_v44  ;;  %v13758_v25 = vadd.f32 %v13757_v50, %v13756_v57  ;;  %v13846_v41 = vadd.f32 %v13845_v29, %v13844_v58 }
 0x3b3   :  { %v13759_v43 = vpop.f32.mrf.mxu1  ;;  %v13847_v42 = vpop.f32.mrf.mxu0 }
 0x3b4   :  { %13464 = vst [vmem:[#allocation2 + $0x68] sm:$0xff] %v13330_v37   ;;  %v3701_v14 = vadd.f32 %v13846_v41, %v13758_v25 }
 0x3b5   :  { %v13760_v6 = vpop.f32.mrf.mxu1  ;;  %v13848_v39 = vpop.f32.mrf.mxu0 }
 0x3b6   :  { %v13761_v13 = vadd.f32 %v13760_v6, %v13759_v43  ;;  %v13849_v10 = vadd.f32 %v13848_v39, %v13847_v42 }
 0x3b7   :  { %v13762_v7 = vpop.f32.mrf.mxu1  ;;  %v13850_v31 = vpop.f32.mrf.mxu0 }
 0x3b8   :  { %v3704_v46 = vadd.f32 %v13849_v10, %v13761_v13 }
 0x3b9   :  { %v13763_v9 = vpop.f32.mrf.mxu1  ;;  %v13851_v19 = vpop.f32.mrf.mxu0 }
 0x3ba   :  { %v13335_v59 = vpack.c.bf16 %v3704_v46, %v3701_v14  ;;  %v13764_v27 = vadd.f32 %v13763_v9, %v13762_v7  ;;  %v13852_v63 = vadd.f32 %v13851_v19, %v13850_v31 }
 0x3bb   :  { %v13765_v47 = vpop.f32.mrf.mxu1  ;;  %v13853_v24 = vpop.f32.mrf.mxu0 }
 0x3bc   :  { %13465 = vst [vmem:[#allocation2 + $0x70] sm:$0xff] %v13335_v59   ;;  %v3709_v36 = vadd.f32 %v13852_v63, %v13764_v27 }
 0x3bd   :  { %v13766_v15 = vpop.f32.mrf.mxu1  ;;  %v13854_v45 = vpop.f32.mrf.mxu0 }
 0x3be   :  { %v13767_v40 = vadd.f32 %v13766_v15, %v13765_v47  ;;  %v13855_v61 = vadd.f32 %v13854_v45, %v13853_v24 }
 0x3bf   :  { %v13768_v26 = vpop.f32.mrf.mxu1  ;;  %v13856_v48 = vpop.f32.mrf.mxu0 }
 0x3c0   :  { %v3712_v12 = vadd.f32 %v13855_v61, %v13767_v40 }
 0x3c1   :  { %v13769_v35 = vpop.f32.mrf.mxu1  ;;  %v13857_v33 = vpop.f32.mrf.mxu0 }
 0x3c2   :  { %v13340_v22 = vpack.c.bf16 %v3712_v12, %v3709_v36  ;;  %v13770_v23 = vadd.f32 %v13769_v35, %v13768_v26  ;;  %v13858_v11 = vadd.f32 %v13857_v33, %v13856_v48 }
 0x3c3   :  { %v13771_v5 = vpop.f32.mrf.mxu1  ;;  %v13859_v49 = vpop.f32.mrf.mxu0 }
 0x3c4   :  { %13466 = vst [vmem:[#allocation2 + $0x78] sm:$0xff] %v13340_v22   ;;  %v3717_v32 = vadd.f32 %v13858_v11, %v13770_v23 }
 0x3c5   :  { %v13772_v60 = vpop.f32.mrf.mxu1  ;;  %v13860_v3 = vpop.f32.mrf.mxu0 }
 0x3c6   :  { %v13773_v53 = vadd.f32 %v13772_v60, %v13771_v5  ;;  %v13861_v8 = vadd.f32 %v13860_v3, %v13859_v49 }
 0x3c7   :  { %v13774_v2 = vpop.f32.mrf.mxu1  ;;  %v13862_v0 = vpop.f32.mrf.mxu0 }
 0x3c8   :  { %v3720_v16 = vadd.f32 %v13861_v8, %v13773_v53 }
 0x3c9   :  { %v13775_v51 = vpop.f32.mrf.mxu1  ;;  %v13863_v34 = vpop.f32.mrf.mxu0 }
 0x3ca   :  { %v13345_v55 = vpack.c.bf16 %v3720_v16, %v3717_v32  ;;  %v13776_v54 = vadd.f32 %v13775_v51, %v13774_v2  ;;  %v13864_v28 = vadd.f32 %v13863_v34, %v13862_v0 }
 0x3cb   :  { %v13777_v30 = vpop.f32.mrf.mxu1  ;;  %v13865_v56 = vpop.f32.mrf.mxu0 }
 0x3cc   :  { %13467 = vst [vmem:[#allocation2 + $0x80] sm:$0xff] %v13345_v55   ;;  %v3725_v52 = vadd.f32 %v13864_v28, %v13776_v54 }
 0x3cd   :  { %v13778_v38 = vpop.f32.mrf.mxu1  ;;  %v13866_v17 = vpop.f32.mrf.mxu0 }
 0x3ce   :  { %v13779_v62 = vadd.f32 %v13778_v38, %v13777_v30  ;;  %v13867_v20 = vadd.f32 %v13866_v17, %v13865_v56 }
 0x3cf   :  { %v13780_v21 = vpop.f32.mrf.mxu1  ;;  %v13868_v4 = vpop.f32.mrf.mxu0 }
 0x3d0   :  { %v3728_v1 = vadd.f32 %v13867_v20, %v13779_v62 }
 0x3d1   :  { %v13781_v57 = vpop.f32.mrf.mxu1  ;;  %v13869_v58 = vpop.f32.mrf.mxu0 }
 0x3d2   :  { %v13350_v44 = vpack.c.bf16 %v3728_v1, %v3725_v52  ;;  %v13782_v29 = vadd.f32 %v13781_v57, %v13780_v21  ;;  %v13870_v37 = vadd.f32 %v13869_v58, %v13868_v4 }
 0x3d3   :  { %v13783_v18 = vpop.f32.mrf.mxu1  ;;  %v13871_v50 = vpop.f32.mrf.mxu0 }
 0x3d4   :  { %13468 = vst [vmem:[#allocation2 + $0x88] sm:$0xff] %v13350_v44   ;;  %v3733_v13 = vadd.f32 %v13870_v37, %v13782_v29 }
 0x3d5   :  { %v13784_v43 = vpop.f32.mrf.mxu1  ;;  %v13872_v42 = vpop.f32.mrf.mxu0 }
 0x3d6   :  { %v13785_v25 = vadd.f32 %v13784_v43, %v13783_v18  ;;  %v13873_v41 = vadd.f32 %v13872_v42, %v13871_v50 }
 0x3d7   :  { %v13786_v6 = vpop.f32.mrf.mxu1  ;;  %v13874_v39 = vpop.f32.mrf.mxu0 }
 0x3d8   :  { %v3736_v10 = vadd.f32 %v13873_v41, %v13785_v25 }
 0x3d9   :  { %v13787_v7 = vpop.f32.mrf.mxu1  ;;  %v13875_v31 = vpop.f32.mrf.mxu0 }
 0x3da   :  { %v13355_v14 = vpack.c.bf16 %v3736_v10, %v3733_v13  ;;  %v13788_v19 = vadd.f32 %v13787_v7, %v13786_v6  ;;  %v13876_v59 = vadd.f32 %v13875_v31, %v13874_v39 }
 0x3db   :  { %v13789_v46 = vpop.f32.mrf.mxu1  ;;  %v13877_v9 = vpop.f32.mrf.mxu0 }
 0x3dc   :  { %13469 = vst [vmem:[#allocation2 + $0x90] sm:$0xff] %v13355_v14   ;;  %v3741_v40 = vadd.f32 %v13876_v59, %v13788_v19 }
 0x3dd   :  { %v13790_v47 = vpop.f32.mrf.mxu1  ;;  %v13878_v24 = vpop.f32.mrf.mxu0 }
 0x3de   :  { %v13791_v27 = vadd.f32 %v13790_v47, %v13789_v46  ;;  %v13879_v63 = vadd.f32 %v13878_v24, %v13877_v9 }
 0x3df   :  { %v13792_v15 = vpop.f32.mrf.mxu1  ;;  %v13880_v45 = vpop.f32.mrf.mxu0 }
 0x3e0   :  { %v3744_v61 = vadd.f32 %v13879_v63, %v13791_v27 }
 0x3e1   :  { %v13793_v26 = vpop.f32.mrf.mxu1  ;;  %v13881_v48 = vpop.f32.mrf.mxu0 }
 0x3e2   :  { %v13360_v36 = vpack.c.bf16 %v3744_v61, %v3741_v40  ;;  %v13794_v33 = vadd.f32 %v13793_v26, %v13792_v15  ;;  %v13882_v22 = vadd.f32 %v13881_v48, %v13880_v45 }
 0x3e3   :  { %v13795_v12 = vpop.f32.mrf.mxu1  ;;  %v13883_v35 = vpop.f32.mrf.mxu0 }
 0x3e4   :  { %13470 = vst [vmem:[#allocation2 + $0x98] sm:$0xff] %v13360_v36   ;;  %v3749_v53 = vadd.f32 %v13882_v22, %v13794_v33 }
 0x3e5   :  { %v13796_v5 = vpop.f32.mrf.mxu1  ;;  %v13884_v49 = vpop.f32.mrf.mxu0 }
 0x3e6   :  { %v13797_v23 = vadd.f32 %v13796_v5, %v13795_v12  ;;  %v13885_v11 = vadd.f32 %v13884_v49, %v13883_v35 }
 0x3e7   :  { %v13798_v60 = vpop.f32.mrf.mxu1  ;;  %v13886_v3 = vpop.f32.mrf.mxu0 }
 0x3e8   :  { %v3752_v8 = vadd.f32 %v13885_v11, %v13797_v23 }
 0x3e9   :  { %v13799_v2 = vpop.f32.mrf.mxu1  ;;  %v13887_v0 = vpop.f32.mrf.mxu0 }
 0x3ea   :  { %v13365_v32 = vpack.c.bf16 %v3752_v8, %v3749_v53  ;;  %v13800_v34 = vadd.f32 %v13799_v2, %v13798_v60  ;;  %v13888_v55 = vadd.f32 %v13887_v0, %v13886_v3 }
 0x3eb   :  { %v13801_v16 = vpop.f32.mrf.mxu1  ;;  %v13889_v51 = vpop.f32.mrf.mxu0 }
 0x3ec   :  { %13471 = vst [vmem:[#allocation2 + $0xa0] sm:$0xff] %v13365_v32   ;;  %v3757_v62 = vadd.f32 %v13888_v55, %v13800_v34 }
 0x3ed   :  { %v13802_v30 = vpop.f32.mrf.mxu1  ;;  %v13890_v56 = vpop.f32.mrf.mxu0 }
 0x3ee   :  { %v13803_v54 = vadd.f32 %v13802_v30, %v13801_v16  ;;  %v13891_v28 = vadd.f32 %v13890_v56, %v13889_v51 }
 0x3ef   :  { %v13804_v38 = vpop.f32.mrf.mxu1  ;;  %v13892_v17 = vpop.f32.mrf.mxu0 }
 0x3f0   :  { %v3760_v20 = vadd.f32 %v13891_v28, %v13803_v54 }
 0x3f1   :  { %v13805_v21 = vpop.f32.mrf.mxu1  ;;  %v13893_v4 = vpop.f32.mrf.mxu0 }
 0x3f2   :  { %v13370_v52 = vpack.c.bf16 %v3760_v20, %v3757_v62  ;;  %v13806_v58 = vadd.f32 %v13805_v21, %v13804_v38  ;;  %v13894_v44 = vadd.f32 %v13893_v4, %v13892_v17 }
 0x3f3   :  { %v13807_v1 = vpop.f32.mrf.mxu1  ;;  %v13895_v57 = vpop.f32.mrf.mxu0 }
 0x3f4   :  { %13472 = vst [vmem:[#allocation2 + $0xa8] sm:$0xff] %v13370_v52   ;;  %v3765_v25 = vadd.f32 %v13894_v44, %v13806_v58 }
 0x3f5   :  { %v13808_v18 = vpop.f32.mrf.mxu1  ;;  %v13896_v50 = vpop.f32.mrf.mxu0 }
 0x3f6   :  { %v13809_v29 = vadd.f32 %v13808_v18, %v13807_v1  ;;  %v13897_v37 = vadd.f32 %v13896_v50, %v13895_v57 }
 0x3f7   :  { %v13810_v43 = vpop.f32.mrf.mxu1  ;;  %v13898_v42 = vpop.f32.mrf.mxu0 }
 0x3f8   :  { %v3768_v41 = vadd.f32 %v13897_v37, %v13809_v29 }
 0x3f9   :  { %v13811_v6 = vpop.f32.mrf.mxu1  ;;  %v13899_v39 = vpop.f32.mrf.mxu0 }
 0x3fa   :  { %v13375_v13 = vpack.c.bf16 %v3768_v41, %v3765_v25  ;;  %v13812_v31 = vadd.f32 %v13811_v6, %v13810_v43  ;;  %v13900_v14 = vadd.f32 %v13899_v39, %v13898_v42 }
 0x3fb   :  { %v13813_v10 = vpop.f32.mrf.mxu1  ;;  %v13901_v7 = vpop.f32.mrf.mxu0 }
 0x3fc   :  { %13473 = vst [vmem:[#allocation2 + $0xb0] sm:$0xff] %v13375_v13   ;;  %v3773_v47 = vadd.f32 %v13900_v14, %v13812_v31 }
 0x3fd   :  { %v13814_v46 = vpop.f32.mrf.mxu1  ;;  %v13902_v9 = vpop.f32.mrf.mxu0 }
 0x3fe   :  { %v13815_v19 = vadd.f32 %v13814_v46, %v13813_v10  ;;  %v13903_v59 = vadd.f32 %v13902_v9, %v13901_v7 }
 0x400   :  { %v3776_v24 = vadd.f32 %v13903_v59, %v13815_v19 }
 0x402   :  { %v13380_v27 = vpack.c.bf16 %v3776_v24, %v3773_v47 }
 0x404   :  { %13474 = vst [vmem:[#allocation2 + $0xb8] sm:$0xff] %v13380_v27  }
 0x405   :  { %15342 = dma.done.wait [#allocation13], 9216 }
 0x406   :  { %15343 = vsyncadd [#allocation13], 4294958080  ;;  %v20523_v63 = vmov 0   ;;  %v14885_v15 = vld [vmem:[#allocation7 + $0x38] sm:$0xff]   ;;  %v14887_v40 = vld [vmem:[#allocation7 + $0x30] sm:$0xff]   ;;  %vm4440_vm1 = vcmask 1046528  }
 0x407   :  { %5607 = vmatprep.subr.bf16.mxu1 %v20523_v63  ;;  %5812 = vmatprep.subr.bf16.mxu0 %v20523_v63  ;;  %v14886_v45 = vld [vmem:[#allocation7 + $0xb8] sm:$0xff]   ;;  %v14888_v61 = vld [vmem:[#allocation7 + $0xb0] sm:$0xff]   ;;  %v14889_v26 = vld [vmem:[#allocation7 + $0x28] sm:$0xff]   ;;  %vm4239_vm2 = vsmask.f32 7424  ;;  %vm4828_vm3 = vcmask 1045504  }
 0x408   :  { %5608 = vmatpush1.bf16.msra.mxu1 %v14885_v15  ;;  %5813 = vmatpush1.bf16.msra.mxu0 %v14886_v45  ;;  %v14890_v48 = vld [vmem:[#allocation7 + $0xa8] sm:$0xff]   ;;  %v14891_v36 = vld [vmem:[#allocation7 + $0x20] sm:$0xff]   ;;  %v14893_v35 = vld [vmem:[#allocation7 + $0x18] sm:$0xff]   ;;  %vm4975_vm4 = vsmask.f32 5376  ;;  %vm5107_vm6 = vcmask 1044480  }
 0x409   :  { %5609 = vmatprep.subr.bf16.mxu1 %v20523_v63  ;;  %5814 = vmatprep.subr.bf16.mxu0 %v20523_v63  ;;  %v14892_v12 = vld [vmem:[#allocation7 + $0xa0] sm:$0xff]   ;;  %v14894_v33 = vld [vmem:[#allocation7 + $0x98] sm:$0xff]   ;;  %v14895_v22 = vld [vmem:[#allocation7 + $0x10] sm:$0xff]   ;;  %vm4600_vm5 = vsmask.f32 6400  ;;  %s20823_s4 = sld [smem:[#allocation195_spill]] }
 0x40a   :  { %v14896_v5 = vld [vmem:[#allocation7 + $0x90] sm:$0xff]   ;;  %v14897_v49 = vld [vmem:[#allocation7 + $0x8] sm:$0xff]   ;;  %v14899_v11 = vld [vmem:[#allocation7] sm:$0xff]   ;;  %vm6828_vm7 = vcmask 244736   ;;  %s20825_s9 = sld [smem:[#allocation193_spill]] }
 0x40b   :  { %v14898_v23 = vld [vmem:[#allocation7 + $0x88] sm:$0xff]   ;;  %v14900_v60 = vld [vmem:[#allocation7 + $0x80] sm:$0xff]   ;;  %v14901_v3 = vld [vmem:[#allocation7 + $0x78] sm:$0xff]   ;;  %s20826_s24 = sld [smem:[#allocation194_spill]] }
 0x40c   :  { %5610 = vmatpush1.bf16.msra.mxu1 %v14887_v40  ;;  %5815 = vmatpush1.bf16.msra.mxu0 %v14888_v61  ;;  %v14902_v53 = vld [vmem:[#allocation7 + $0xf8] sm:$0xff]   ;;  %v4049_v8 = vld [vmem:[#allocation2] sm:$0xf]  ;;  %v18245_v2 = vld [vmem:[#allocation2 + $0x4] sm:$0xf] }
 0x40d   :  { %5611 = vmatprep.subr.bf16.mxu1 %v20523_v63  ;;  %5816 = vmatprep.subr.bf16.mxu0 %v20523_v63  ;;  %v4051_v0 = vld [vmem:[#allocation2 + $0x8] sm:$0xf]  ;;  %v4052_v32 = vld [vmem:[#allocation2 + $0xc] sm:$0xf]  ;;  %v18248_v16 = vcombine.low %v4049_v8, %v18245_v2  ;;  %v4053_v51 = vld [vmem:[#allocation2 + $0x10] sm:$0xf] }
 0x40e   :  { %v14903_v34 = vld [vmem:[#allocation7 + $0x70] sm:$0xff]   ;;  %v18250_v55 = vcombine.low %v4051_v0, %v4052_v32  ;;  %v18252_v56 = vcombine.low %v4052_v32, %v4053_v51  ;;  %v14905_v52 = vld [vmem:[#allocation7 + $0x68] sm:$0xff]   ;;  %v14907_v50 = vld [vmem:[#allocation7 + $0x60] sm:$0xff]  }
 0x40f   :  { %v4095_v30 = vld [vmem:[#allocation2 + $0x4] sm:$0xe]  ;;  %v4241_v28 = vshrl.u32 %v18248_v16, 16  ;;  %v4243_v38 = vshll.u32 %v18248_v16, 16  ;;  %v14906_v57 = vld [vmem:[#allocation7 + $0xe8] sm:$0xff]   ;;  %v14908_v29 = vld [vmem:[#allocation7 + $0xe0] sm:$0xff]  }
 0x410   :  { %5612 = vmatpush1.bf16.msra.mxu1 %v14889_v26  ;;  %5817 = vmatpush1.bf16.msra.mxu0 %v14890_v48  ;;  %v14904_v54 = vld [vmem:[#allocation7 + $0xf0] sm:$0xff]   ;;  %v18257_v17 = vcombine.low %v4095_v30, %v4051_v0  ;;  %v4248_v62 = vshll.u32 %v18250_v55, 16  ;;  %v4533_v20 = vrot.slane %v18252_v56, 1  ;;  %v14909_v37 = vld [vmem:[#allocation7 + $0x58] sm:$0xff]   ;;  %v4054_v42 = vld [vmem:[#allocation2 + $0x14] sm:$0xf] }
 0x411   :  { %5613 = vmatprep.subr.bf16.mxu1 %v20523_v63  ;;  %5818 = vmatprep.subr.bf16.mxu0 %v20523_v63  ;;  %v4245_v21 = vrot.slane %v4243_v38, 1  ;;  %v14910_v43 = vld [vmem:[#allocation7 + $0xd8] sm:$0xff]   ;;  %v14911_v25 = vld [vmem:[#allocation7 + $0x50] sm:$0xff]   ;;  %v18274_v6 = vcombine.low %v4053_v51, %v4054_v42  ;;  %v4055_v13 = vld [vmem:[#allocation2 + $0x18] sm:$0xf]  ;;  %v4252_v14 = vshrl.u32 %v18250_v55, 16 }
 0x412   :  { %v4532_v4 = vrot.slane %v18257_v17, 1  ;;  %v4250_v1 = vrot.slane %v4248_v62, 1  ;;  %v14912_v41 = vld [vmem:[#allocation7 + $0xd0] sm:$0xff]   ;;  %v14913_v10 = vld [vmem:[#allocation7 + $0x48] sm:$0xff]   ;;  %v18282_v19 = vcombine.low %v4054_v42, %v4055_v13  ;;  %v14915_v59 = vld [vmem:[#allocation7 + $0x40] sm:$0xff]   ;;  %v4442_v47 = vrot.slane %v18250_v55, 1 }
 0x413   :  { %v4246_v58 = vor.u32 %v4245_v21, %v4241_v28  ;;  %v4094_v39 = vld [vmem:[#allocation2] sm:$0xe]  ;;  %v14914_v7 = vld [vmem:[#allocation7 + $0xc8] sm:$0xff]   ;;  %v4256_v46 = vshll.u32 %v18274_v6, 16  ;;  %v14916_v24 = vld [vmem:[#allocation7 + $0xc0] sm:$0xff]   ;;  %v4260_v48 = vshrl.u32 %v18274_v6, 16 }
 0x414   :  { %5614 = vmatpush1.bf16.msra.mxu1 %v14891_v36  ;;  %5819 = vmatpush1.bf16.msra.mxu0 %v14892_v12  ;;  %v4534_v44 = vsel %vm4440_vm1, %v4532_v4, %v4533_v20  ;;  %v12583_v31 = vcombine.low %v4094_v39, %v18245_v2  ;;  %v4056_v9 = vld [vmem:[#allocation2 + $0x1c] sm:$0xf]  ;;  %v4254_v15 = vor.u32 %v4252_v14, %v4250_v1  ;;  %v4535_v61 = vrot.slane %v18282_v19, 1  ;;  %v4057_v26 = vld [vmem:[#allocation2 + $0x20] sm:$0xf]  ;;  %v14963_v42 = vld [vmem:[#allocation7 + $0x118] sm:$0xff]  }
 0x415   :  { %5615 = vmatprep.subr.bf16.mxu1 %v20523_v63  ;;  %5820 = vmatprep.subr.bf16.mxu0 %v20523_v63  ;;  %v4251_v18 = vsel %vm4239_vm2, %v4246_v58, %v4250_v1  ;;  %v4258_v45 = vrot.slane %v4256_v46, 1  ;;  %v18288_v40 = vcombine.low %v4055_v13, %v4056_v9  ;;  %v4058_v36 = vld [vmem:[#allocation2 + $0x24] sm:$0xf]  ;;  %v4059_v32 = vld [vmem:[#allocation2 + $0x28] sm:$0xf]  ;;  %v14957_v28 = vld [vmem:[#allocation7 + $0x128] sm:$0xff]  }
 0x416   :  { %5844 = vmatprep.mubr.bf16.mxu0 %v4534_v44  ;;  %5639 = vmatprep.mubr.bf16.mxu1 %v4251_v18  ;;  %v4441_v27 = vrot.slane %v12583_v31, 1  ;;  %v14953_v8 = vld [vmem:[#allocation7 + $0x130] sm:$0xff]   ;;  %v4060_v51 = vld [vmem:[#allocation2 + $0x2c] sm:$0xf]  ;;  %v18319_v62 = vcombine.low %v4058_v36, %v4059_v32  ;;  %v14962_v44 = vld [vmem:[#allocation7 + $0x1a0] sm:$0xff]  }
 0x417   :  { %v14956_v0 = vld [vmem:[#allocation7 + $0x1b0] sm:$0xff]   ;;  %v4446_v21 = vrot.slane %v18288_v40, 1  ;;  %v18329_v1 = vcombine.low %v4059_v32, %v4060_v51  ;;  %v4062_v18 = vld [vmem:[#allocation2 + $0x34] sm:$0xf]  ;;  %v14964_v39 = vld [vmem:[#allocation7 + $0x198] sm:$0xff]  }
 0x418   :  { %5616 = vmatpush1.bf16.msra.mxu1 %v14893_v35  ;;  %5821 = vmatpush1.bf16.msra.mxu0 %v14894_v33  ;;  %v4443_v12 = vsel %vm4440_vm1, %v4441_v27, %v4442_v47  ;;  %v4259_v35 = vsel %vm4239_vm2, %v4254_v15, %v4258_v45  ;;  %v20560_v33 = vshll.u32 %v18288_v40, 16  ;;  %v4539_v58 = vrot.slane %v18319_v62, 1  ;;  %v14965_v14 = vld [vmem:[#allocation7 + $0x110] sm:$0xff]  }
 0x419   :  { %5617 = vmatprep.subr.bf16.mxu1 %v20523_v63  ;;  %5822 = vmatprep.subr.bf16.mxu0 %v20523_v63 }
 0x41c   :  { %5618 = vmatpush1.bf16.msra.mxu1 %v14895_v22  ;;  %5823 = vmatpush1.bf16.msra.mxu0 %v14896_v5  ;;  %v14951_v22 = vld [vmem:[#allocation7 + $0x138] sm:$0xff]   ;;  %v4536_v5 = vsel %vm4440_vm1, %v4533_v20, %v4535_v61  ;;  %v14958_v20 = vld [vmem:[#allocation7 + $0x1a8] sm:$0xff]  }
 0x41d   :  { %5619 = vmatprep.subr.bf16.mxu1 %v20523_v63  ;;  %5824 = vmatprep.subr.bf16.mxu0 %v20523_v63 }
 0x420   :  { %5620 = vmatpush1.bf16.msra.mxu1 %v14897_v49  ;;  %5825 = vmatpush1.bf16.msra.mxu0 %v14898_v23  ;;  %v18300_v49 = vcombine.low %v4056_v9, %v4057_v26  ;;  %v14952_v23 = vld [vmem:[#allocation7 + $0x1b8] sm:$0xff]  }
 0x421   :  { %5621 = vmatprep.subr.bf16.mxu1 %v20523_v63  ;;  %5826 = vmatprep.subr.bf16.mxu0 %v20523_v63 }
 0x422   :  { %v4537_v2 = vrot.slane %v18300_v49, 1 }
 0x424   :  { %5622 = vmatpush1.bf16.msra.mxu1 %v14899_v11  ;;  %5827 = vmatpush1.bf16.msra.mxu0 %v14900_v60  ;;  %v4444_v11 = vrot.slane %v18274_v6, 1  ;;  %v4262_v60 = vor.u32 %v4260_v48, %v4258_v45  ;;  %v4538_v38 = vsel %vm4440_vm1, %v4535_v61, %v4537_v2  ;;  %v20553_v45 = vshrl.u32 %v18329_v1, 16 }
 0x425   :  { %5623 = vmatprep.subr.bf16.mxu1 %v20523_v63  ;;  %5828 = vmatprep.subr.bf16.mxu0 %v20523_v63 }
 0x428   :  { %5624 = vmatpush2.bf16.msra.mxu1 %v14901_v3  ;;  %5829 = vmatpush2.bf16.msra.mxu0 %v14902_v53  ;;  %v4266_v3 = vrot.slane %v20560_v33, 1  ;;  %v18309_v53 = vcombine.low %v4057_v26, %v4058_v36  ;;  %v14969_v26 = vld [vmem:[#allocation7 + $0x108] sm:$0xff]  }
 0x429   :  { %5625 = vmatprep.subr.bf16.mxu1 %v20523_v63  ;;  %5830 = vmatprep.subr.bf16.mxu0 %v20523_v63 }
 0x42a   :  { %v4267_v30 = vsel %vm4239_vm2, %v4262_v60, %v4266_v3  ;;  %v4448_v13 = vrot.slane %v18309_v53, 1 }
 0x42c   :  { %5626 = vmatpush2.bf16.msra.mxu1 %v14903_v34  ;;  %5831 = vmatpush2.bf16.msra.mxu0 %v14904_v54  ;;  %v4445_v34 = vsel %vm4440_vm1, %v4442_v47, %v4444_v11  ;;  %v20556_v54 = vshll.u32 %v18309_v53, 16  ;;  %v4063_v47 = vld [vmem:[#allocation2 + $0x38] sm:$0xf]  ;;  %v4449_v27 = vsel %vm4440_vm1, %v4446_v21, %v4448_v13 }
 0x42d   :  { %5627 = vmatprep.subr.bf16.mxu1 %v20523_v63  ;;  %5832 = vmatprep.subr.bf16.mxu0 %v20523_v63 }
 0x430   :  { %5628 = vmatpush2.bf16.msra.mxu1 %v14905_v52  ;;  %5833 = vmatpush2.bf16.msra.mxu0 %v14906_v57  ;;  %v4274_v52 = vrot.slane %v20556_v54, 1  ;;  %v14959_v57 = vld [vmem:[#allocation7 + $0x120] sm:$0xff]   ;;  %v4099_v54 = vld [vmem:[#allocation2 + $0x8] sm:$0xc] }
 0x431   :  { %5629 = vmatprep.subr.bf16.mxu1 %v20523_v63  ;;  %5834 = vmatprep.subr.bf16.mxu0 %v20523_v63 }
 0x434   :  { %5630 = vmatpush2.bf16.msra.mxu1 %v14907_v50  ;;  %5835 = vmatpush2.bf16.msra.mxu0 %v14908_v29  ;;  %v4447_v50 = vsel %vm4440_vm1, %v4444_v11, %v4446_v21 }
 0x435   :  { %5631 = vmatprep.subr.bf16.mxu1 %v20523_v63  ;;  %5836 = vmatprep.subr.bf16.mxu0 %v20523_v63 }
 0x438   :  { %5632 = vmatpush2.bf16.msra.mxu1 %v14909_v37  ;;  %5837 = vmatpush2.bf16.msra.mxu0 %v14910_v43  ;;  %v20559_v37 = vshrl.u32 %v18309_v53, 16  ;;  %v20552_v43 = vshll.u32 %v18329_v1, 16 }
 0x439   :  { %5633 = vmatprep.subr.bf16.mxu1 %v20523_v63  ;;  %5838 = vmatprep.subr.bf16.mxu0 %v20523_v63 }
 0x43c   :  { %5634 = vmatpush2.bf16.msra.mxu1 %v14911_v25  ;;  %5839 = vmatpush2.bf16.msra.mxu0 %v14912_v41  ;;  %v4540_v25 = vsel %vm4440_vm1, %v4537_v2, %v4539_v58 }
 0x43d   :  { %5635 = vmatprep.subr.bf16.mxu1 %v20523_v63  ;;  %5840 = vmatprep.subr.bf16.mxu0 %v20523_v63 }
 0x440   :  { %5636 = vmatpush2.bf16.msra.mxu1 %v14913_v10  ;;  %5841 = vmatpush2.bf16.msra.mxu0 %v14914_v7  ;;  %v4278_v10 = vor.u32 %v20559_v37, %v4274_v52  ;;  %v4282_v7 = vrot.slane %v20552_v43, 1 }
 0x441   :  { %5637 = vmatprep.subr.bf16.mxu1 %v20523_v63  ;;  %5842 = vmatprep.subr.bf16.mxu0 %v20523_v63 }
 0x442   :  { %v4283_v15 = vsel %vm4239_vm2, %v4278_v10, %v4282_v7 }
 0x444   :  { %5638 = vmatpush2.bf16.msra.mxu1 %v14915_v59  ;;  %5843 = vmatpush2.bf16.msra.mxu0 %v14916_v24  ;;  %v14968_v59 = vld [vmem:[#allocation7 + $0x190] sm:$0xff]   ;;  %v4064_v24 = vld [vmem:[#allocation2 + $0x3c] sm:$0xf] }
 0x445   :  { %6017 = vmatprep.subr.bf16.mxu1 %v20523_v63  ;;  %6222 = vmatprep.subr.bf16.mxu0 %v20523_v63  ;;  %v18369_v60 = vcombine.low %v4063_v47, %v4064_v24 }
 0x447   :  { %5640 = vmatmul.mubr.bf16.vlgmr.msra.gmra.mxu1 %v18248_v16  ;;  %5845 = vmatmul.mubr.bf16.vlgmr.msra.gmra.mxu0 %v4443_v12  ;;  %v20561_v16 = vshrl.u32 %v18288_v40, 16  ;;  %v18359_v12 = vcombine.low %v4062_v18, %v4063_v47 }
 0x448   :  { %5647 = vmatprep.mubr.bf16.mxu1 %v4259_v35  ;;  %5852 = vmatprep.mubr.bf16.mxu0 %v4536_v5  ;;  %v14970_v35 = vld [vmem:[#allocation7 + $0x188] sm:$0xff]   ;;  %v4450_v5 = vrot.slane %v18329_v1, 1 }
 0x449   :  { %6018 = vmatpush1.bf16.msra.mxu1 %v14951_v22  ;;  %6223 = vmatpush1.bf16.msra.mxu0 %v14952_v23  ;;  %v4270_v4 = vor.u32 %v20561_v16, %v4266_v3  ;;  %v4065_v22 = vld [vmem:[#allocation2 + $0x40] sm:$0xf]  ;;  %v4286_v23 = vor.u32 %v20553_v45, %v4282_v7  ;;  %v4066_v3 = vld [vmem:[#allocation2 + $0x44] sm:$0xf]  ;;  %v4543_v2 = vrot.slane %v18359_v12, 1  ;;  %v4602_v16 = vshrl.u32 %v18257_v17, 16 }
 0x44a   :  { %6019 = vmatprep.subr.bf16.mxu1 %v20523_v63  ;;  %6224 = vmatprep.subr.bf16.mxu0 %v20523_v63 }
 0x44b   :  { %v4275_v29 = vsel %vm4239_vm2, %v4270_v4, %v4274_v52  ;;  %v18381_v4 = vcombine.low %v4065_v22, %v4066_v3 }
 0x44d   :  { %6020 = vmatpush1.bf16.msra.mxu1 %v14953_v8  ;;  %6225 = vmatpush1.bf16.msra.mxu0 %v14956_v0  ;;  %v14971_v8 = vld [vmem:[#allocation7 + $0x100] sm:$0xff]  }
 0x44e   :  { %6021 = vmatprep.subr.bf16.mxu1 %v20523_v63  ;;  %6226 = vmatprep.subr.bf16.mxu0 %v20523_v63  ;;  %v14974_v0 = vld [vmem:[#allocation7 + $0x180] sm:$0xff]  }
 0x44f   :  { %5648 = vmatmul.mubr.bf16.gmra.mxu1 %v18250_v55  ;;  %5853 = vmatmul.mubr.bf16.gmra.mxu0 %v4445_v34  ;;  %v4061_v55 = vld [vmem:[#allocation2 + $0x30] sm:$0xf]  ;;  %v4451_v34 = vsel %vm4440_vm1, %v4448_v13, %v4450_v5 }
 0x450   :  { %5655 = vmatprep.mubr.bf16.mxu1 %v4267_v30  ;;  %5860 = vmatprep.mubr.bf16.mxu0 %v4538_v38  ;;  %v18339_v41 = vcombine.low %v4060_v51, %v4061_v55  ;;  %v18349_v31 = vcombine.low %v4061_v55, %v4062_v18  ;;  %v14975_v51 = vld [vmem:[#allocation7 + $0x178] sm:$0xff]   ;;  %v18378_v38 = vcombine.low %v4064_v24, %v4065_v22 }
 0x451   :  { %6022 = vmatpush1.bf16.msra.mxu1 %v14957_v28  ;;  %6227 = vmatpush1.bf16.msra.mxu0 %v14958_v20  ;;  %v20542_v28 = vshll.u32 %v18369_v60, 16  ;;  %v14976_v20 = vld [vmem:[#allocation7 + $0x1f8] sm:$0xff]  }
 0x452   :  { %6023 = vmatprep.subr.bf16.mxu1 %v20523_v63  ;;  %6228 = vmatprep.subr.bf16.mxu0 %v20523_v63  ;;  %v4541_v9 = vrot.slane %v18339_v41, 1  ;;  %v20546_v61 = vshll.u32 %v18349_v31, 16  ;;  %v20549_v32 = vshrl.u32 %v18349_v31, 16  ;;  %v4452_v52 = vrot.slane %v18349_v31, 1  ;;  %v4067_v18 = vld [vmem:[#allocation2 + $0x48] sm:$0xf] }
 0x453   :  { %v4545_v55 = vrot.slane %v18378_v38, 1 }
 0x454   :  { %v4542_v36 = vsel %vm4440_vm1, %v4539_v58, %v4541_v9  ;;  %v4290_v11 = vrot.slane %v20546_v61, 1  ;;  %v4544_v21 = vsel %vm4440_vm1, %v4541_v9, %v4543_v2  ;;  %v4298_v58 = vrot.slane %v20542_v28, 1  ;;  %v14982_v9 = vld [vmem:[#allocation7 + $0x1e8] sm:$0xff]   ;;  %v4090_v61 = vld [vmem:[#allocation2 + $0xa4] sm:$0xf] }
 0x455   :  { %6024 = vmatpush1.bf16.msra.mxu1 %v14959_v57  ;;  %6229 = vmatpush1.bf16.msra.mxu0 %v14962_v44  ;;  %v20545_v44 = vshrl.u32 %v18369_v60, 16  ;;  %v4453_v13 = vsel %vm4440_vm1, %v4450_v5, %v4452_v52  ;;  %v4546_v7 = vsel %vm4440_vm1, %v4543_v2, %v4545_v55  ;;  %v4070_v2 = vld [vmem:[#allocation2 + $0x54] sm:$0xf]  ;;  %v4088_v28 = vld [vmem:[#allocation2 + $0x9c] sm:$0xf] }
 0x456   :  { %6025 = vmatprep.subr.bf16.mxu1 %v20523_v63  ;;  %6230 = vmatprep.subr.bf16.mxu0 %v20523_v63  ;;  %v4291_v30 = vsel %vm4239_vm2, %v4286_v23, %v4290_v11  ;;  %v4294_v57 = vor.u32 %v20549_v32, %v4290_v11  ;;  %v20541_v23 = vshrl.u32 %v18381_v4, 16 }
 0x457   :  { %5656 = vmatmul.mubr.bf16.gmra.mxu1 %v18274_v6  ;;  %5861 = vmatmul.mubr.bf16.gmra.mxu0 %v4447_v50  ;;  %v14977_v50 = vld [vmem:[#allocation7 + $0x170] sm:$0xff]   ;;  %v4302_v47 = vor.u32 %v20545_v44, %v4298_v58 }
 0x458   :  { %5663 = vmatprep.mubr.bf16.mxu1 %v4275_v29  ;;  %5868 = vmatprep.mubr.bf16.mxu0 %v4540_v25  ;;  %v20538_v29 = vshll.u32 %v18381_v4, 16  ;;  %v14981_v25 = vld [vmem:[#allocation7 + $0x168] sm:$0xff]   ;;  %v4299_v10 = vsel %vm4239_vm2, %v4294_v57, %v4298_v58  ;;  %v14990_v58 = vld [vmem:[#allocation7 + $0x1d0] sm:$0xff]  }
 0x459   :  { %6026 = vmatpush1.bf16.msra.mxu1 %v14963_v42  ;;  %6231 = vmatpush1.bf16.msra.mxu0 %v14964_v39  ;;  %v14980_v42 = vld [vmem:[#allocation7 + $0x1f0] sm:$0xff]   ;;  %v4068_v39 = vld [vmem:[#allocation2 + $0x4c] sm:$0xf] }
 0x45a   :  { %6027 = vmatprep.subr.bf16.mxu1 %v20523_v63  ;;  %6232 = vmatprep.subr.bf16.mxu0 %v20523_v63  ;;  %v4306_v24 = vrot.slane %v20538_v29, 1  ;;  %v4086_v29 = vld [vmem:[#allocation2 + $0x94] sm:$0xf] }
 0x45c   :  { %v4307_v5 = vsel %vm4239_vm2, %v4302_v47, %v4306_v24 }
 0x45d   :  { %6028 = vmatpush1.bf16.msra.mxu1 %v14965_v14  ;;  %6233 = vmatpush1.bf16.msra.mxu0 %v14968_v59  ;;  %v18399_v14 = vcombine.low %v4066_v3, %v4067_v18  ;;  %v4454_v59 = vrot.slane %v18369_v60, 1  ;;  %v14987_v3 = vld [vmem:[#allocation7 + $0x158] sm:$0xff]  }
 0x45e   :  { %6029 = vmatprep.subr.bf16.mxu1 %v20523_v63  ;;  %6234 = vmatprep.subr.bf16.mxu0 %v20523_v63 }
 0x45f   :  { %5664 = vmatmul.mubr.bf16.gmra.mxu1 %v18288_v40  ;;  %5869 = vmatmul.mubr.bf16.gmra.mxu0 %v4449_v27  ;;  %v18409_v27 = vcombine.low %v4067_v18, %v4068_v39  ;;  %v4455_v22 = vsel %vm4440_vm1, %v4452_v52, %v4454_v59  ;;  %v14989_v52 = vld [vmem:[#allocation7 + $0x150] sm:$0xff]  }
 0x460   :  { %5671 = vmatprep.mubr.bf16.mxu1 %v4283_v15  ;;  %5876 = vmatprep.mubr.bf16.mxu0 %v4542_v36  ;;  %v14983_v15 = vld [vmem:[#allocation7 + $0x160] sm:$0xff]  }
 0x461   :  { %6030 = vmatpush1.bf16.msra.mxu1 %v14969_v26  ;;  %6235 = vmatpush1.bf16.msra.mxu0 %v14970_v35  ;;  %v4547_v26 = vrot.slane %v18399_v14, 1  ;;  %v14986_v36 = vld [vmem:[#allocation7 + $0x1e0] sm:$0xff]   ;;  %v20534_v11 = vshll.u32 %v18409_v27, 16 }
 0x462   :  { %6031 = vmatprep.subr.bf16.mxu1 %v20523_v63  ;;  %6236 = vmatprep.subr.bf16.mxu0 %v20523_v63  ;;  %v4069_v35 = vld [vmem:[#allocation2 + $0x50] sm:$0xf] }
 0x465   :  { %6032 = vmatpush1.bf16.msra.mxu1 %v14971_v8  ;;  %6237 = vmatpush1.bf16.msra.mxu0 %v14974_v0  ;;  %v4548_v8 = vsel %vm4440_vm1, %v4545_v55, %v4547_v26  ;;  %v18419_v0 = vcombine.low %v4068_v39, %v4069_v35  ;;  %v4071_v55 = vld [vmem:[#allocation2 + $0x58] sm:$0xf] }
 0x466   :  { %6033 = vmatprep.subr.bf16.mxu1 %v20523_v63  ;;  %6238 = vmatprep.subr.bf16.mxu0 %v20523_v63  ;;  %v14992_v39 = vld [vmem:[#allocation7 + $0x148] sm:$0xff]  }
 0x467   :  { %5672 = vmatmul.mubr.bf16.gmra.mxu1 %v18309_v53  ;;  %5877 = vmatmul.mubr.bf16.gmra.mxu0 %v4451_v34  ;;  %v4456_v34 = vrot.slane %v18381_v4, 1  ;;  %v4549_v57 = vrot.slane %v18419_v0, 1 }
 0x468   :  { %5679 = vmatprep.mubr.bf16.mxu1 %v4291_v30  ;;  %5884 = vmatprep.mubr.bf16.mxu0 %v4544_v21  ;;  %v4310_v30 = vor.u32 %v20541_v23, %v4306_v24  ;;  %v18429_v21 = vcombine.low %v4069_v35, %v4070_v2  ;;  %v14996_v35 = vld [vmem:[#allocation7 + $0x1c0] sm:$0xff]  }
 0x469   :  { %6034 = vmatpush2.bf16.msra.mxu1 %v14975_v51  ;;  %6239 = vmatpush2.bf16.msra.mxu0 %v14976_v20  ;;  %v14988_v51 = vld [vmem:[#allocation7 + $0x1d8] sm:$0xff]   ;;  %v4314_v20 = vrot.slane %v20534_v11, 1  ;;  %v4457_v18 = vsel %vm4440_vm1, %v4454_v59, %v4456_v34  ;;  %v4458_v59 = vrot.slane %v18409_v27, 1 }
 0x46a   :  { %6035 = vmatprep.subr.bf16.mxu1 %v20523_v63  ;;  %6240 = vmatprep.subr.bf16.mxu0 %v20523_v63  ;;  %v4084_v11 = vld [vmem:[#allocation2 + $0x8c] sm:$0xf] }
 0x46d   :  { %6036 = vmatpush2.bf16.msra.mxu1 %v14977_v50  ;;  %6241 = vmatpush2.bf16.msra.mxu0 %v14980_v42  ;;  %v4315_v50 = vsel %vm4239_vm2, %v4310_v30, %v4314_v20  ;;  %v20537_v42 = vshrl.u32 %v18409_v27, 16  ;;  %v4074_v30 = vld [vmem:[#allocation2 + $0x64] sm:$0xf] }
 0x46e   :  { %6037 = vmatprep.subr.bf16.mxu1 %v20523_v63  ;;  %6242 = vmatprep.subr.bf16.mxu0 %v20523_v63 }
 0x46f   :  { %5680 = vmatmul.mubr.bf16.gmra.mxu1 %v18329_v1  ;;  %5885 = vmatmul.mubr.bf16.gmra.mxu0 %v4453_v13  ;;  %v4550_v13 = vsel %vm4440_vm1, %v4547_v26, %v4549_v57  ;;  %v4318_v47 = vor.u32 %v20537_v42, %v4314_v20  ;;  %v14994_v26 = vld [vmem:[#allocation7 + $0x140] sm:$0xff]  }
 0x470   :  { %5687 = vmatprep.mubr.bf16.mxu1 %v4299_v10  ;;  %5892 = vmatprep.mubr.bf16.mxu0 %v4546_v7  ;;  %v4072_v10 = vld [vmem:[#allocation2 + $0x5c] sm:$0xf]  ;;  %v18439_v7 = vcombine.low %v4070_v2, %v4071_v55 }
 0x471   :  { %6038 = vmatpush2.bf16.msra.mxu1 %v14981_v25  ;;  %6243 = vmatpush2.bf16.msra.mxu0 %v14982_v9  ;;  %v20530_v25 = vshll.u32 %v18429_v21, 16  ;;  %v14993_v9 = vld [vmem:[#allocation7 + $0x1c8] sm:$0xff]  }
 0x472   :  { %6039 = vmatprep.subr.bf16.mxu1 %v20523_v63  ;;  %6244 = vmatprep.subr.bf16.mxu0 %v20523_v63 }
 0x473   :  { %v4322_v24 = vrot.slane %v20530_v25, 1  ;;  %v4082_v25 = vld [vmem:[#allocation2 + $0x84] sm:$0xf] }
 0x475   :  { %6040 = vmatpush2.bf16.msra.mxu1 %v14983_v15  ;;  %6245 = vmatpush2.bf16.msra.mxu0 %v14986_v36  ;;  %v18449_v15 = vcombine.low %v4071_v55, %v4072_v10  ;;  %v4551_v36 = vrot.slane %v18439_v7, 1 }
 0x476   :  { %6041 = vmatprep.subr.bf16.mxu1 %v20523_v63  ;;  %6246 = vmatprep.subr.bf16.mxu0 %v20523_v63 }
 0x477   :  { %5688 = vmatmul.mubr.bf16.gmra.mxu1 %v18349_v31  ;;  %5893 = vmatmul.mubr.bf16.gmra.mxu0 %v4455_v22  ;;  %v4073_v22 = vld [vmem:[#allocation2 + $0x60] sm:$0xf]  ;;  %v20526_v2 = vshll.u32 %v18449_v15, 16 }
 0x478   :  { %5695 = vmatprep.mubr.bf16.mxu1 %v4307_v5  ;;  %5900 = vmatprep.mubr.bf16.mxu0 %v4548_v8  ;;  %v4459_v5 = vsel %vm4440_vm1, %v4456_v34, %v4458_v59  ;;  %v20533_v8 = vshrl.u32 %v18429_v21, 16  ;;  %v18459_v20 = vcombine.low %v4072_v10, %v4073_v22  ;;  %v4460_v34 = vrot.slane %v18429_v21, 1 }
 0x479   :  { %6042 = vmatpush2.bf16.msra.mxu1 %v14987_v3  ;;  %6247 = vmatpush2.bf16.msra.mxu0 %v14988_v51  ;;  %v4323_v3 = vsel %vm4239_vm2, %v4318_v47, %v4322_v24  ;;  %v4552_v51 = vsel %vm4440_vm1, %v4549_v57, %v4551_v36  ;;  %v18468_v57 = vcombine.low %v4073_v22, %v4074_v30  ;;  %v4076_v47 = vld [vmem:[#allocation2 + $0x6c] sm:$0xf] }
 0x47a   :  { %6043 = vmatprep.subr.bf16.mxu1 %v20523_v63  ;;  %6248 = vmatprep.subr.bf16.mxu0 %v20523_v63  ;;  %v4553_v55 = vrot.slane %v18459_v20, 1 }
 0x47b   :  { %v20525_v10 = vshll.u32 %v18468_v57, 16 }
 0x47d   :  { %6044 = vmatpush2.bf16.msra.mxu1 %v14989_v52  ;;  %6249 = vmatpush2.bf16.msra.mxu0 %v14990_v58  ;;  %v4326_v52 = vor.u32 %v20533_v8, %v4322_v24  ;;  %v4330_v58 = vrot.slane %v20526_v2, 1  ;;  %v4080_v2 = vld [vmem:[#allocation2 + $0x7c] sm:$0xf] }
 0x47e   :  { %6045 = vmatprep.subr.bf16.mxu1 %v20523_v63  ;;  %6250 = vmatprep.subr.bf16.mxu0 %v20523_v63 }
 0x47f   :  { %5696 = vmatmul.mubr.bf16.gmra.mxu1 %v18369_v60  ;;  %5901 = vmatmul.mubr.bf16.gmra.mxu0 %v4457_v18  ;;  %v4075_v18 = vld [vmem:[#allocation2 + $0x68] sm:$0xf] }
 0x480   :  { %5703 = vmatprep.mubr.bf16.mxu1 %v4315_v50  ;;  %5908 = vmatprep.mubr.bf16.mxu0 %v4550_v13  ;;  %v4461_v50 = vsel %vm4440_vm1, %v4458_v59, %v4460_v34  ;;  %v20529_v13 = vshrl.u32 %v18449_v15, 16  ;;  %v18476_v24 = vcombine.low %v4074_v30, %v4075_v18  ;;  %v18484_v22 = vcombine.low %v4075_v18, %v4076_v47 }
 0x481   :  { %6046 = vmatpush2.bf16.msra.mxu1 %v14992_v39  ;;  %6251 = vmatpush2.bf16.msra.mxu0 %v14993_v9  ;;  %v4331_v39 = vsel %vm4239_vm2, %v4326_v52, %v4330_v58  ;;  %v4554_v9 = vsel %vm4440_vm1, %v4551_v36, %v4553_v55  ;;  %v20528_v30 = vshrl.u32 %v18468_v57, 16  ;;  %v4464_v18 = vrot.slane %v18468_v57, 1 }
 0x482   :  { %6047 = vmatprep.subr.bf16.mxu1 %v20523_v63  ;;  %6252 = vmatprep.subr.bf16.mxu0 %v20523_v63  ;;  %v4334_v59 = vor.u32 %v20529_v13, %v4330_v58  ;;  %v4555_v36 = vrot.slane %v18476_v24, 1  ;;  %v20527_v52 = vshll.u32 %v18484_v22, 16 }
 0x485   :  { %6048 = vmatpush2.bf16.msra.mxu1 %v14994_v26  ;;  %6253 = vmatpush2.bf16.msra.mxu0 %v14996_v35  ;;  %v4462_v26 = vrot.slane %v18449_v15, 1  ;;  %v4338_v35 = vrot.slane %v20525_v10, 1 }
 0x486   :  { %6845 = vmatprep.subr.bf16.mxu0 %v20523_v63  ;;  %v4079_v63 = vld [vmem:[#allocation2 + $0x78] sm:$0xf] }
 0x487   :  { %5704 = vmatmul.mubr.bf16.gmra.mxu1 %v18381_v4  ;;  %5909 = vmatmul.mubr.bf16.gmra.mxu0 %v4459_v5  ;;  %v4077_v5 = vld [vmem:[#allocation2 + $0x70] sm:$0xf] }
 0x488   :  { %5711 = vmatprep.mubr.bf16.mxu1 %v4323_v3  ;;  %5916 = vmatprep.mubr.bf16.mxu0 %v4552_v51  ;;  %v4463_v3 = vsel %vm4440_vm1, %v4460_v34, %v4462_v26  ;;  %v4339_v51 = vsel %vm4239_vm2, %v4334_v59, %v4338_v35  ;;  %v18492_v58 = vcombine.low %v4076_v47, %v4077_v5 }
 0x489   :  { %v4342_v34 = vor.u32 %v20528_v30, %v4338_v35  ;;  %v4465_v47 = vsel %vm4440_vm1, %v4462_v26, %v4464_v18  ;;  %v4081_v30 = vld [vmem:[#allocation2 + $0x80] sm:$0xf] }
 0x48f   :  { %5712 = vmatmul.mubr.bf16.gmra.mxu1 %v18409_v27  ;;  %5917 = vmatmul.mubr.bf16.gmra.mxu0 %v4461_v50  ;;  %v4556_v50 = vsel %vm4440_vm1, %v4553_v55, %v4555_v36  ;;  %v4557_v55 = vrot.slane %v18492_v58, 1 }
 0x490   :  { %5719 = vmatprep.mubr.bf16.mxu1 %v4331_v39  ;;  %5924 = vmatprep.mubr.bf16.mxu0 %v4554_v9  ;;  %v4078_v39 = vld [vmem:[#allocation2 + $0x74] sm:$0xf]  ;;  %v4346_v9 = vrot.slane %v20527_v52, 1  ;;  %v18516_v52 = vcombine.low %v4079_v63, %v4080_v2 }
 0x491   :  { %v18500_v59 = vcombine.low %v4077_v5, %v4078_v39  ;;  %v18508_v35 = vcombine.low %v4078_v39, %v4079_v63  ;;  %v4466_v5 = vrot.slane %v18484_v22, 1 }
 0x492   :  { %v4347_v10 = vsel %vm4239_vm2, %v4342_v34, %v4346_v9 }
 0x493   :  { %v4467_v39 = vsel %vm4440_vm1, %v4464_v18, %v4466_v5  ;;  %v4468_v63 = vrot.slane %v18500_v59, 1 }
 0x497   :  { %5720 = vmatmul.mubr.bf16.gmra.mxu1 %v18429_v21  ;;  %5925 = vmatmul.mubr.bf16.gmra.mxu0 %v4463_v3  ;;  %v20532_v3 = vshrl.u32 %v18484_v22, 16 }
 0x498   :  { %5725 = vmatprep.mubr.bf16.mxu1 %v4339_v51  ;;  %5930 = vmatprep.mubr.bf16.mxu0 %v4556_v50  ;;  %v20531_v51 = vshll.u32 %v18500_v59, 16  ;;  %v4558_v50 = vsel %vm4440_vm1, %v4555_v36, %v4557_v55  ;;  %v4559_v36 = vrot.slane %v18508_v35, 1 }
 0x499   :  { %v4350_v26 = vor.u32 %v20532_v3, %v4346_v9  ;;  %v18524_v9 = vcombine.low %v4080_v2, %v4081_v30  ;;  %v4083_v3 = vld [vmem:[#allocation2 + $0x88] sm:$0xf]  ;;  %v4469_v2 = vsel %vm4440_vm1, %v4466_v5, %v4468_v63 }
 0x49a   :  { %v4354_v34 = vrot.slane %v20531_v51, 1  ;;  %v18532_v51 = vcombine.low %v4081_v30, %v4082_v25  ;;  %v4470_v30 = vrot.slane %v18516_v52, 1 }
 0x49c   :  { %v4355_v13 = vsel %vm4239_vm2, %v4350_v26, %v4354_v34 }
 0x49f   :  { %5726 = vmatmul.mubr.bf16.gmra.mxu1 %v18449_v15  ;;  %5931 = vmatmul.mubr.bf16.gmra.mxu0 %v4465_v47  ;;  %v20535_v47 = vshll.u32 %v18516_v52, 16 }
 0x4a0   :  { %5731 = vmatprep.mubr.bf16.mxu1 %v4347_v10  ;;  %5936 = vmatprep.mubr.bf16.mxu0 %v4558_v50  ;;  %v20536_v10 = vshrl.u32 %v18500_v59, 16  ;;  %v4560_v50 = vsel %vm4440_vm1, %v4557_v55, %v4559_v36  ;;  %v4561_v55 = vrot.slane %v18524_v9, 1 }
 0x4a1   :  { %v4362_v26 = vrot.slane %v20535_v47, 1  ;;  %v18548_v47 = vcombine.low %v4083_v3, %v4084_v11 }
 0x4a2   :  { %v4358_v18 = vor.u32 %v20536_v10, %v4354_v34  ;;  %v18540_v34 = vcombine.low %v4082_v25, %v4083_v3  ;;  %v4085_v10 = vld [vmem:[#allocation2 + $0x90] sm:$0xf]  ;;  %v4471_v25 = vsel %vm4440_vm1, %v4468_v63, %v4470_v30  ;;  %v4472_v3 = vrot.slane %v18532_v51, 1 }
 0x4a4   :  { %v4363_v8 = vsel %vm4239_vm2, %v4358_v18, %v4362_v26 }
 0x4a7   :  { %5732 = vmatmul.mubr.bf16.gmra.mxu1 %v18468_v57  ;;  %5937 = vmatmul.mubr.bf16.gmra.mxu0 %v4467_v39  ;;  %v20539_v39 = vshll.u32 %v18532_v51, 16 }
 0x4a8   :  { %5739 = vmatprep.mubr.bf16.mxu1 %v4355_v13  ;;  %5944 = vmatprep.mubr.bf16.mxu0 %v4560_v50  ;;  %v20540_v13 = vshrl.u32 %v18516_v52, 16  ;;  %v4562_v50 = vsel %vm4440_vm1, %v4559_v36, %v4561_v55  ;;  %v4563_v36 = vrot.slane %v18540_v34, 1 }
 0x4a9   :  { %v4370_v18 = vrot.slane %v20539_v39, 1  ;;  %v18564_v39 = vcombine.low %v4085_v10, %v4086_v29 }
 0x4aa   :  { %v4366_v5 = vor.u32 %v20540_v13, %v4362_v26  ;;  %v18556_v26 = vcombine.low %v4084_v11, %v4085_v10  ;;  %v4087_v13 = vld [vmem:[#allocation2 + $0x98] sm:$0xf]  ;;  %v4473_v11 = vsel %vm4440_vm1, %v4470_v30, %v4472_v3  ;;  %v4474_v10 = vrot.slane %v18548_v47, 1 }
 0x4ac   :  { %v4371_v42 = vsel %vm4239_vm2, %v4366_v5, %v4370_v18 }
 0x4af   :  { %5740 = vmatmul.mubr.bf16.gmra.mxu1 %v18484_v22  ;;  %5945 = vmatmul.mubr.bf16.gmra.mxu0 %v4469_v2  ;;  %v20543_v2 = vshll.u32 %v18548_v47, 16 }
 0x4b0   :  { %5747 = vmatprep.mubr.bf16.mxu1 %v4363_v8  ;;  %5952 = vmatprep.mubr.bf16.mxu0 %v4562_v50  ;;  %v20544_v8 = vshrl.u32 %v18532_v51, 16  ;;  %v4564_v50 = vsel %vm4440_vm1, %v4561_v55, %v4563_v36  ;;  %v4565_v55 = vrot.slane %v18556_v26, 1 }
 0x4b1   :  { %v4378_v5 = vrot.slane %v20543_v2, 1  ;;  %v18580_v2 = vcombine.low %v4087_v13, %v4088_v28 }
 0x4b2   :  { %v4374_v63 = vor.u32 %v20544_v8, %v4370_v18  ;;  %v18572_v18 = vcombine.low %v4086_v29, %v4087_v13  ;;  %v4089_v8 = vld [vmem:[#allocation2 + $0xa0] sm:$0xf]  ;;  %v4475_v29 = vsel %vm4440_vm1, %v4472_v3, %v4474_v10  ;;  %v4476_v13 = vrot.slane %v18564_v39, 1 }
 0x4b4   :  { %v4379_v23 = vsel %vm4239_vm2, %v4374_v63, %v4378_v5 }
 0x4b7   :  { %5748 = vmatmul.mubr.bf16.gmra.mxu1 %v18500_v59  ;;  %5953 = vmatmul.mubr.bf16.gmra.mxu0 %v4471_v25  ;;  %v20547_v25 = vshll.u32 %v18564_v39, 16 }
 0x4b8   :  { %5755 = vmatprep.mubr.bf16.mxu1 %v4371_v42  ;;  %5960 = vmatprep.mubr.bf16.mxu0 %v4564_v50  ;;  %v20548_v42 = vshrl.u32 %v18548_v47, 16  ;;  %v4566_v50 = vsel %vm4440_vm1, %v4563_v36, %v4565_v55  ;;  %v4567_v36 = vrot.slane %v18572_v18, 1 }
 0x4b9   :  { %v4386_v63 = vrot.slane %v20547_v25, 1  ;;  %v18596_v25 = vcombine.low %v4089_v8, %v4090_v61 }
 0x4ba   :  { %v4382_v30 = vor.u32 %v20548_v42, %v4378_v5  ;;  %v18588_v5 = vcombine.low %v4088_v28, %v4089_v8  ;;  %v18599_v42 = vld [vmem:[#allocation2 + $0xa8] sm:$0xf]  ;;  %v4477_v28 = vsel %vm4440_vm1, %v4474_v10, %v4476_v13  ;;  %v4478_v8 = vrot.slane %v18580_v2, 1 }
 0x4bc   :  { %v4387_v44 = vsel %vm4239_vm2, %v4382_v30, %v4386_v63  ;;  %v4479_v43 = vsel %vm4440_vm1, %v4476_v13, %v4478_v8 }
 0x4bf   :  { %5756 = vmatmul.mubr.bf16.gmra.mxu1 %v18516_v52  ;;  %5961 = vmatmul.mubr.bf16.gmra.mxu0 %v4473_v11  ;;  %v20551_v11 = vshll.u32 %v18580_v2, 16 }
 0x4c0   :  { %5763 = vmatprep.mubr.bf16.mxu1 %v4379_v23  ;;  %5968 = vmatprep.mubr.bf16.mxu0 %v4566_v50  ;;  %v20550_v23 = vshrl.u32 %v18564_v39, 16  ;;  %v4568_v50 = vsel %vm4440_vm1, %v4565_v55, %v4567_v36  ;;  %v4569_v55 = vrot.slane %v18588_v5, 1 }
 0x4c1   :  { %v4394_v30 = vrot.slane %v20551_v11, 1 }
 0x4c2   :  { %v4390_v3 = vor.u32 %v20550_v23, %v4386_v63  ;;  %v4570_v32 = vsel %vm4440_vm1, %v4567_v36, %v4569_v55  ;;  %v4093_v63 = vld [vmem:[#allocation2 + $0xac] sm:$0xf]  ;;  %v18607_v23 = vcombine.low %v4090_v61, %v18599_v42  ;;  %v4096_v61 = vld [vmem:[#allocation2 + $0xb0] sm:$0xf] }
 0x4c3   :  { %v18616_v11 = vcombine.low %v18599_v42, %v4093_v63 }
 0x4c4   :  { %20750 = vst [vmem:[#allocation173_spill] sm:$0xff] %v18607_v23  ;;  %v4571_v36 = vrot.slane %v18607_v23, 1 }
 0x4c5   :  { %20751 = vst [vmem:[#allocation181_spill] sm:$0xff] %v18616_v11 }
 0x4c6   :  { %v4572_v45 = vsel %vm4440_vm1, %v4569_v55, %v4571_v36 }
 0x4c7   :  { %5764 = vmatmul.mubr.bf16.gmra.mxu1 %v18532_v51  ;;  %5969 = vmatmul.mubr.bf16.gmra.mxu0 %v4475_v29  ;;  %v4395_v29 = vsel %vm4239_vm2, %v4390_v3, %v4394_v30 }
 0x4c8   :  { %5771 = vmatprep.mubr.bf16.mxu1 %v4387_v44  ;;  %5976 = vmatprep.mubr.bf16.mxu0 %v4568_v50  ;;  %v20555_v44 = vshrl.u32 %v18580_v2, 16  ;;  %v20554_v50 = vshll.u32 %v18596_v25, 16 }
 0x4ca   :  { %v4398_v10 = vor.u32 %v20555_v44, %v4394_v30  ;;  %v4402_v3 = vrot.slane %v20554_v50, 1  ;;  %v18624_v30 = vcombine.low %v4093_v63, %v4096_v61  ;;  %v4480_v50 = vrot.slane %v18596_v25, 1 }
 0x4cc   :  { %20752 = vst [vmem:[#allocation174_spill] sm:$0xff] %v18624_v30  ;;  %v4573_v44 = vrot.slane %v18624_v30, 1  ;;  %v4481_v55 = vsel %vm4440_vm1, %v4478_v8, %v4480_v50 }
 0x4ce   :  { %v4574_v61 = vsel %vm4440_vm1, %v4571_v36, %v4573_v44  ;;  %v15023_v36 = vld [vmem:[#allocation2 + $0x8] sm:$0xf] }
 0x4cf   :  { %5772 = vmatmul.mubr.bf16.gmra.mxu1 %v18548_v47  ;;  %5977 = vmatmul.mubr.bf16.gmra.mxu0 %v4477_v28  ;;  %v4403_v28 = vsel %vm4239_vm2, %v4398_v10, %v4402_v3 }
 0x4d0   :  { %5779 = vmatprep.mubr.bf16.mxu1 %v4395_v29  ;;  %5984 = vmatprep.mubr.bf16.mxu0 %v4570_v32  ;;  %v20558_v32 = vshrl.u32 %v18596_v25, 16  ;;  %v20557_v29 = vshll.u32 %v18616_v11, 16 }
 0x4d2   :  { %v4406_v13 = vor.u32 %v20558_v32, %v4402_v3  ;;  %v4410_v10 = vrot.slane %v20557_v29, 1  ;;  %v4482_v3 = vrot.slane %v18616_v11, 1  ;;  %v4098_v29 = vld [vmem:[#allocation2 + $0x4] sm:$0xc] }
 0x4d3   :  { %v12607_v33 = vcombine.low %v4098_v29, %v15023_v36 }
 0x4d4   :  { %v4411_v63 = vsel %vm4239_vm2, %v4406_v13, %v4410_v10  ;;  %v4483_v13 = vsel %vm4440_vm1, %v4480_v50, %v4482_v3  ;;  %v4610_v50 = vshrl.u32 %v18252_v56, 16 }
 0x4d7   :  { %5780 = vmatmul.mubr.bf16.gmra.mxu1 %v18564_v39  ;;  %5985 = vmatmul.mubr.bf16.gmra.mxu0 %v4479_v43  ;;  %v15022_v43 = vld [vmem:[#allocation2 + $0xc] sm:$0xf] }
 0x4d8   :  { %5787 = vmatprep.mubr.bf16.mxu1 %v4403_v28  ;;  %5992 = vmatprep.mubr.bf16.mxu0 %v4572_v45  ;;  %v12608_v28 = vcombine.low %v4099_v54, %v15022_v43  ;;  %v20562_v45 = vshrl.u32 %v18616_v11, 16  ;;  %v20753_v11 = vshrl.u32 %v18288_v40, 16 }
 0x4da   :  { %v4977_v32 = vshrl.u32 %v12608_v28, 16  ;;  %v4980_v37 = vshll.u32 %v12608_v28, 16  ;;  %v4414_v8 = vor.u32 %v20562_v45, %v4410_v10  ;;  %v4605_v10 = vshll.u32 %v18257_v17, 16 }
 0x4db   :  { %v4612_v45 = vrot.slane %v4610_v50, 1 }
 0x4dc   :  { %v4979_v54 = vrot.slane %v4977_v32, 2  ;;  %v4982_v43 = vrot.slane %v4980_v37, 3  ;;  %v4613_v32 = vshll.u32 %v18252_v56, 16  ;;  %v4829_v37 = vrot.slane %v12607_v33, 2 }
 0x4dd   :  { %v20754_v33 = vshll.u32 %v18288_v40, 16 }
 0x4de   :  { %v4983_v29 = vor.u32 %v4982_v43, %v4979_v54  ;;  %v4615_v30 = vrot.slane %v4613_v32, 2  ;;  %v4622_v43 = vshll.u32 %v18282_v19, 16 }
 0x4df   :  { %5788 = vmatmul.mubr.bf16.gmra.mxu1 %v18580_v2  ;;  %5993 = vmatmul.mubr.bf16.gmra.mxu0 %v4481_v55  ;;  %v4984_v55 = vrot.slane %v4260_v48, 2  ;;  %v4830_v48 = vrot.slane %v18252_v56, 2  ;;  %v4989_v56 = vrot.slane %v20754_v33, 3 }
 0x4e0   :  { %5795 = vmatprep.mubr.bf16.mxu1 %v4411_v63  ;;  %6000 = vmatprep.mubr.bf16.mxu0 %v4574_v61  ;;  %v4985_v63 = vrot.slane %v4256_v46, 3  ;;  %v4092_v61 = vld [vmem:[#allocation2 + $0xac] sm:$0x7]  ;;  %v4624_v32 = vrot.slane %v4622_v43, 2 }
 0x4e1   :  { %v12581_v36 = vcombine.low %v18599_v42, %v4092_v61  ;;  %v4831_v17 = vsel %vm4828_vm3, %v4829_v37, %v4830_v48  ;;  %v4616_v42 = vor.u32 %v4615_v30, %v4612_v45  ;;  %v4832_v61 = vrot.slane %v18282_v19, 2 }
 0x4e2   :  { %v4986_v46 = vor.u32 %v4985_v63, %v4984_v55  ;;  %v4905_v55 = vrot.slane %v12608_v28, 2  ;;  %v4906_v63 = vrot.slane %v18274_v6, 2  ;;  %v20755_v37 = vshrl.u32 %v18309_v53, 16 }
 0x4e3   :  { %v4833_v30 = vsel %vm4828_vm3, %v4830_v48, %v4832_v61  ;;  %v4908_v48 = vrot.slane %v18288_v40, 2 }
 0x4e4   :  { %v4987_v23 = vsel %vm4975_vm4, %v4983_v29, %v4986_v46  ;;  %v4992_v29 = vrot.slane %v20755_v37, 2 }
 0x4e7   :  { %5796 = vmatmul.mubr.bf16.gmra.mxu1 %v18596_v25  ;;  %6001 = vmatmul.mubr.bf16.gmra.mxu0 %v4483_v13  ;;  %v4607_v13 = vrot.slane %v4605_v10, 2 }
 0x4e8   :  { %5803 = vmatprep.mubr.bf16.mxu1 %v4414_v8  ;;  %6008 = vmatprep.mubr.bf16.mxu0 %v4573_v44  ;;  %v4604_v8 = vrot.slane %v4602_v16, 1  ;;  %v4988_v44 = vrot.slane %v20753_v11, 2  ;;  %v4619_v16 = vshrl.u32 %v18282_v19, 16 }
 0x4ea   :  { %v4608_v54 = vor.u32 %v4607_v13, %v4604_v8  ;;  %v4990_v11 = vor.u32 %v4989_v56, %v4988_v44  ;;  %v4621_v50 = vrot.slane %v4619_v16, 1  ;;  %v4628_v8 = vshrl.u32 %v18300_v49, 16 }
 0x4eb   :  { %v4631_v13 = vshll.u32 %v18300_v49, 16 }
 0x4ec   :  { %v4617_v10 = vsel %vm4600_vm5, %v4608_v54, %v4616_v42  ;;  %v4991_v45 = vsel %vm4975_vm4, %v4986_v46, %v4990_v11  ;;  %v4625_v19 = vor.u32 %v4624_v32, %v4621_v50  ;;  %v4834_v46 = vrot.slane %v18300_v49, 2 }
 0x4ed   :  { %v4630_v33 = vrot.slane %v4628_v8, 1  ;;  %v4633_v56 = vrot.slane %v4631_v13, 2  ;;  %v4909_v54 = vsel %vm4828_vm3, %v4906_v63, %v4908_v48  ;;  %v20758_v50 = vshll.u32 %v18329_v1, 16 }
 0x4ee   :  { %v4626_v44 = vsel %vm4600_vm5, %v4616_v42, %v4625_v19  ;;  %v4835_v16 = vsel %vm4828_vm3, %v4832_v61, %v4834_v46  ;;  %v4637_v42 = vshrl.u32 %v18319_v62, 16  ;;  %v4836_v61 = vrot.slane %v18319_v62, 2 }
 0x4ef   :  { %5804 = vmatmul.mubr.bf16.gmra.mxu1 %v12581_v36  ;;  %6009 = vmatmul.mubr.bf16.gmra.mxu0 %v4482_v3  ;;  %v4907_v3 = vsel %vm4828_vm3, %v4905_v55, %v4906_v63  ;;  %v14998_v36 = vld [vmem:[#allocation7 + $0x238] sm:$0xff]   ;;  %v20757_v55 = vshrl.u32 %v18329_v1, 16  ;;  %v4997_v32 = vrot.slane %v20758_v50, 3  ;;  %v4634_v49 = vor.u32 %v4633_v56, %v4630_v33 }
 0x4f0   :  { %6049 = vmatprep.mubr.bf16.mxu1 %v4831_v17  ;;  %6254 = vmatprep.mubr.bf16.mxu0 %v4987_v23  ;;  %v20756_v23 = vshll.u32 %v18309_v53, 16  ;;  %v4910_v63 = vrot.slane %v18309_v53, 2  ;;  %v20760_v13 = vshll.u32 %v18349_v31, 16  ;;  %v4646_v56 = vshrl.u32 %v18339_v41, 16 }
 0x4f1   :  { %14536 = vmatprep.subr.bf16.mxu1 %v14998_v36 }
 0x4f2   :  { %v4993_v28 = vrot.slane %v20756_v23, 3  ;;  %v4837_v23 = vsel %vm4828_vm3, %v4834_v46, %v4836_v61 }
 0x4f4   :  { %v4994_v17 = vor.u32 %v4993_v28, %v4992_v29  ;;  %v4911_v29 = vsel %vm4828_vm3, %v4908_v48, %v4910_v63  ;;  %v4649_v48 = vshll.u32 %v18339_v41, 16 }
 0x4f6   :  { %v4995_v43 = vsel %vm4975_vm4, %v4990_v11, %v4994_v17 }
 0x4f7   :  { %6050 = vmatmul.mubr.bf16.vlgmr.msra.gmra.mxu1 %v4617_v10  ;;  %6255 = vmatmul.mubr.bf16.vlgmr.msra.gmra.mxu0 %v4907_v3  ;;  %v4996_v10 = vrot.slane %v20757_v55, 2  ;;  %v4640_v3 = vshll.u32 %v18319_v62, 16 }
 0x4f8   :  { %6057 = vmatprep.mubr.bf16.mxu1 %v4833_v30  ;;  %6262 = vmatprep.mubr.bf16.mxu0 %v4991_v45  ;;  %v4635_v30 = vsel %vm4600_vm5, %v4625_v19, %v4634_v49  ;;  %v4639_v45 = vrot.slane %v4637_v42, 1 }
 0x4f9   :  { %14537 = vmatpush3.bf16.msra.mxu1 %v14998_v36  ;;  %v4998_v11 = vor.u32 %v4997_v32, %v4996_v10  ;;  %v4642_v37 = vrot.slane %v4640_v3, 2  ;;  %v20759_v36 = vshrl.u32 %v18349_v31, 16  ;;  %v14999_v10 = vld [vmem:[#allocation7 + $0x230] sm:$0xff]   ;;  %v4648_v3 = vrot.slane %v4646_v56, 1 }
 0x4fa   :  { %14538 = vmatprep.subr.bf16.mxu1 %v14999_v10 }
 0x4fb   :  { %v4999_v28 = vsel %vm4975_vm4, %v4994_v17, %v4998_v11  ;;  %v5000_v8 = vrot.slane %v20759_v36, 2  ;;  %v4643_v19 = vor.u32 %v4642_v37, %v4639_v45  ;;  %v4912_v17 = vrot.slane %v18329_v1, 2 }
 0x4fc   :  { %v20761_v36 = vshrl.u32 %v18369_v60, 16 }
 0x4fd   :  { %v4644_v42 = vsel %vm4600_vm5, %v4634_v49, %v4643_v19  ;;  %14539 = vmatpush3.bf16.msra.mxu1 %v14999_v10 }
 0x4ff   :  { %6058 = vmatmul.mubr.bf16.gmra.mxu1 %v4626_v44  ;;  %6263 = vmatmul.mubr.bf16.gmra.mxu0 %v4909_v54  ;;  %v5001_v44 = vrot.slane %v20760_v13, 3  ;;  %v20762_v13 = vshll.u32 %v18369_v60, 16 }
 0x500   :  { %6065 = vmatprep.mubr.bf16.mxu1 %v4835_v16  ;;  %6270 = vmatprep.mubr.bf16.mxu0 %v4995_v43  ;;  %v4838_v16 = vrot.slane %v18339_v41, 2 }
 0x501   :  { %v5002_v55 = vor.u32 %v5001_v44, %v5000_v8  ;;  %v5004_v8 = vrot.slane %v20761_v36, 2  ;;  %v5005_v49 = vrot.slane %v20762_v13, 3  ;;  %v15000_v44 = vld [vmem:[#allocation7 + $0x228] sm:$0xff]  }
 0x502   :  { %14540 = vmatprep.subr.bf16.mxu1 %v15000_v44 }
 0x503   :  { %v5003_v41 = vsel %vm4975_vm4, %v4998_v11, %v5002_v55  ;;  %14541 = vmatpush3.bf16.msra.mxu1 %v15000_v44  ;;  %v20764_v44 = vshll.u32 %v18381_v4, 16 }
 0x507   :  { %v5641_v33 = vpop.f32.mrf.mxu1  ;;  %6066 = vmatmul.mubr.bf16.gmra.mxu1 %v4635_v30  ;;  %v5846_v62 = vpop.f32.mrf.mxu0  ;;  %6271 = vmatmul.mubr.bf16.gmra.mxu0 %v4911_v29  ;;  %v4651_v30 = vrot.slane %v4649_v48, 2  ;;  %v4913_v29 = vsel %vm4828_vm3, %v4910_v63, %v4912_v17  ;;  %v4655_v63 = vshrl.u32 %v18359_v12, 16 }
 0x508   :  { %6073 = vmatprep.mubr.bf16.mxu1 %v4837_v23  ;;  %v18697_v54 = vadd.f32 %v5846_v62, %v5641_v33  ;;  %6278 = vmatprep.mubr.bf16.mxu0 %v4999_v28  ;;  %v4839_v23 = vsel %vm4828_vm3, %v4836_v61, %v4838_v16  ;;  %v4658_v61 = vshll.u32 %v18359_v12, 16 }
 0x509   :  { %v5643_v46 = vpop.f32.mrf.mxu1  ;;  %v5848_v43 = vpop.f32.mrf.mxu0  ;;  %v4652_v56 = vor.u32 %v4651_v30, %v4648_v3  ;;  %v4657_v30 = vrot.slane %v4655_v63, 1 }
 0x50a   :  { %v4914_v46 = vrot.slane %v18349_v31, 2  ;;  %v4840_v43 = vrot.slane %v18359_v12, 2 }
 0x50b   :  { %v5644_v50 = vpop.f32.mrf.mxu1  ;;  %v5849_v32 = vpop.f32.mrf.mxu0  ;;  %v4653_v3 = vsel %vm4600_vm5, %v4643_v19, %v4652_v56  ;;  %v15002_v19 = vld [vmem:[#allocation7 + $0x218] sm:$0xff]  }
 0x50c   :  { %v18702_v45 = vadd.f32 %v5849_v32, %v5644_v50  ;;  %v5006_v50 = vor.u32 %v5005_v49, %v5004_v8  ;;  %v15001_v32 = vld [vmem:[#allocation7 + $0x220] sm:$0xff]   ;;  %v4841_v36 = vsel %vm4828_vm3, %v4838_v16, %v4840_v43  ;;  %v20763_v8 = vshrl.u32 %v18381_v4, 16 }
 0x50d   :  { %v5646_v37 = vpop.f32.mrf.mxu1  ;;  %v5851_v28 = vpop.f32.mrf.mxu0  ;;  %14542 = vmatprep.subr.bf16.mxu1 %v15001_v32  ;;  %v4667_v16 = vshll.u32 %v18378_v38, 16 }
 0x50e   :  { %v5007_v13 = vsel %vm4975_vm4, %v5002_v55, %v5006_v50  ;;  %v5008_v49 = vrot.slane %v20763_v8, 2  ;;  %14543 = vmatpush3.bf16.msra.mxu1 %v15001_v32 }
 0x50f   :  { %v5649_v33 = vpop.f32.mrf.mxu1  ;;  %6074 = vmatmul.mubr.bf16.gmra.mxu1 %v4644_v42  ;;  %v5854_v62 = vpop.f32.mrf.mxu0  ;;  %6279 = vmatmul.mubr.bf16.gmra.mxu0 %v4913_v29  ;;  %v4660_v29 = vrot.slane %v4658_v61, 2 }
 0x510   :  { %6081 = vmatprep.mubr.bf16.mxu1 %v4839_v23  ;;  %v18713_v48 = vadd.f32 %v5854_v62, %v5649_v33  ;;  %6286 = vmatprep.mubr.bf16.mxu0 %v5003_v41  ;;  %v4915_v41 = vsel %vm4828_vm3, %v4912_v17, %v4914_v46  ;;  %v5009_v33 = vrot.slane %v20764_v44, 3  ;;  %v4664_v17 = vshrl.u32 %v18378_v38, 16 }
 0x511   :  { %v5651_v11 = vpop.f32.mrf.mxu1  ;;  %v5856_v10 = vpop.f32.mrf.mxu0  ;;  %v4661_v61 = vor.u32 %v4660_v29, %v4657_v30  ;;  %14544 = vmatprep.subr.bf16.mxu1 %v15002_v19 }
 0x512   :  { %v4916_v10 = vrot.slane %v18369_v60, 2  ;;  %14545 = vmatpush3.bf16.msra.mxu1 %v15002_v19  ;;  %v4666_v29 = vrot.slane %v4664_v17, 1  ;;  %v20766_v19 = vshll.u32 %v18409_v27, 16 }
 0x513   :  { %v5652_v42 = vpop.f32.mrf.mxu1  ;;  %v5857_v37 = vpop.f32.mrf.mxu0  ;;  %v4662_v30 = vsel %vm4600_vm5, %v4652_v56, %v4661_v61  ;;  %v15005_v56 = vld [vmem:[#allocation7 + $0x208] sm:$0xff]  }
 0x514   :  { %v18718_v23 = vadd.f32 %v5857_v37, %v5652_v42  ;;  %v4842_v42 = vrot.slane %v18378_v38, 2  ;;  %v5010_v37 = vor.u32 %v5009_v33, %v5008_v49  ;;  %v20765_v49 = vshrl.u32 %v18409_v27, 16 }
 0x515   :  { %v5654_v28 = vpop.f32.mrf.mxu1  ;;  %v5859_v12 = vpop.f32.mrf.mxu0 }
 0x516   :  { %v4843_v44 = vsel %vm4828_vm3, %v4840_v43, %v4842_v42  ;;  %v5012_v33 = vrot.slane %v20765_v49, 2  ;;  %v4676_v43 = vshll.u32 %v18399_v14, 16 }
 0x517   :  { %v5657_v62 = vpop.f32.mrf.mxu1  ;;  %6082 = vmatmul.mubr.bf16.gmra.mxu1 %v4653_v3  ;;  %v5862_v63 = vpop.f32.mrf.mxu0  ;;  %6287 = vmatmul.mubr.bf16.gmra.mxu0 %v4915_v41  ;;  %v15003_v3 = vld [vmem:[#allocation7 + $0x210] sm:$0xff]  }
 0x518   :  { %6089 = vmatprep.mubr.bf16.mxu1 %v4841_v36  ;;  %v18729_v11 = vadd.f32 %v5862_v63, %v5657_v62  ;;  %6294 = vmatprep.mubr.bf16.mxu0 %v5007_v13  ;;  %v4669_v36 = vrot.slane %v4667_v16, 2  ;;  %v4917_v13 = vsel %vm4828_vm3, %v4914_v46, %v4916_v10  ;;  %v5011_v62 = vsel %vm4975_vm4, %v5006_v50, %v5010_v37 }
 0x519   :  { %v5659_v55 = vpop.f32.mrf.mxu1  ;;  %v5864_v32 = vpop.f32.mrf.mxu0  ;;  %14546 = vmatprep.subr.bf16.mxu1 %v15003_v3  ;;  %v5013_v63 = vrot.slane %v20766_v19, 3  ;;  %v4673_v46 = vshrl.u32 %v18399_v14, 16 }
 0x51a   :  { %14547 = vmatpush3.bf16.msra.mxu1 %v15003_v3  ;;  %v4670_v55 = vor.u32 %v4669_v36, %v4666_v29 }
 0x51b   :  { %v5660_v28 = vpop.f32.mrf.mxu1  ;;  %v5865_v41 = vpop.f32.mrf.mxu0  ;;  %14548 = vmatprep.subr.bf16.mxu1 %v15005_v56  ;;  %v4675_v36 = vrot.slane %v4673_v46, 1 }
 0x51c   :  { %v18734_v12 = vadd.f32 %v5865_v41, %v5660_v28  ;;  %v4918_v28 = vrot.slane %v18381_v4, 2  ;;  %v4844_v41 = vrot.slane %v18399_v14, 2  ;;  %v4671_v29 = vsel %vm4600_vm5, %v4661_v61, %v4670_v55 }
 0x51d   :  { %v5662_v8 = vpop.f32.mrf.mxu1  ;;  %v5867_v38 = vpop.f32.mrf.mxu0 }
 0x51e   :  { %v5014_v8 = vor.u32 %v5013_v63, %v5012_v33  ;;  %14549 = vmatpush3.bf16.msra.mxu1 %v15005_v56  ;;  %v4678_v38 = vrot.slane %v4676_v43, 2  ;;  %v20767_v33 = vshrl.u32 %v18429_v21, 16  ;;  %v20768_v56 = vshll.u32 %v18429_v21, 16 }
 0x51f   :  { %v5665_v17 = vpop.f32.mrf.mxu1  ;;  %6090 = vmatmul.mubr.bf16.gmra.mxu1 %v4662_v30  ;;  %v5870_v16 = vpop.f32.mrf.mxu0  ;;  %6295 = vmatmul.mubr.bf16.gmra.mxu0 %v4917_v13  ;;  %v15008_v30 = vld [vmem:[#allocation7 + $0x200] sm:$0xff]  }
 0x520   :  { %6097 = vmatprep.mubr.bf16.mxu1 %v4843_v44  ;;  %v18745_v32 = vadd.f32 %v5870_v16, %v5665_v17  ;;  %6302 = vmatprep.mubr.bf16.mxu0 %v5011_v62  ;;  %v4919_v62 = vsel %vm4828_vm3, %v4916_v10, %v4918_v28  ;;  %v4845_v17 = vsel %vm4828_vm3, %v4842_v42, %v4844_v41  ;;  %v5016_v63 = vrot.slane %v20767_v33, 2 }
 0x521   :  { %v5667_v50 = vpop.f32.mrf.mxu1  ;;  %v5872_v3 = vpop.f32.mrf.mxu0  ;;  %14550 = vmatprep.subr.bf16.mxu1 %v15008_v30  ;;  %v5015_v16 = vsel %vm4975_vm4, %v5010_v37, %v5014_v8  ;;  %v4679_v43 = vor.u32 %v4678_v38, %v4675_v36  ;;  %v4682_v10 = vshrl.u32 %v18419_v0, 16  ;;  %v4685_v42 = vshll.u32 %v18419_v0, 16 }
 0x522   :  { %v5017_v50 = vrot.slane %v20768_v56, 3  ;;  %14551 = vmatpush3.bf16.msra.mxu1 %v15008_v30 }
 0x523   :  { %v5668_v13 = vpop.f32.mrf.mxu1  ;;  %v5873_v44 = vpop.f32.mrf.mxu0  ;;  %v4687_v36 = vrot.slane %v4685_v42, 2  ;;  %v4691_v42 = vshrl.u32 %v18439_v7, 16 }
 0x524   :  { %v18750_v49 = vadd.f32 %v5873_v44, %v5668_v13  ;;  %v4920_v13 = vrot.slane %v18409_v27, 2  ;;  %v4846_v44 = vrot.slane %v18419_v0, 2  ;;  %v5018_v30 = vor.u32 %v5017_v50, %v5016_v63 }
 0x525   :  { %v5670_v19 = vpop.f32.mrf.mxu1  ;;  %v5875_v14 = vpop.f32.mrf.mxu0  ;;  %v20769_v0 = vshrl.u32 %v18449_v15, 16  ;;  %v20770_v63 = vshll.u32 %v18449_v15, 16 }
 0x526   :  { %v4921_v56 = vsel %vm4828_vm3, %v4918_v28, %v4920_v13  ;;  %v4694_v28 = vshll.u32 %v18439_v7, 16 }
 0x527   :  { %v5673_v61 = vpop.f32.mrf.mxu1  ;;  %6098 = vmatmul.mubr.bf16.gmra.mxu1 %v4671_v29  ;;  %v5878_v46 = vpop.f32.mrf.mxu0  ;;  %6303 = vmatmul.mubr.bf16.gmra.mxu0 %v4919_v62  ;;  %v4680_v62 = vsel %vm4600_vm5, %v4670_v55, %v4679_v43  ;;  %v5021_v50 = vrot.slane %v20770_v63, 3 }
 0x528   :  { %6105 = vmatprep.mubr.bf16.mxu1 %v4845_v17  ;;  %v18761_v3 = vadd.f32 %v5878_v46, %v5673_v61  ;;  %6310 = vmatprep.mubr.bf16.mxu0 %v5015_v16  ;;  %v4684_v17 = vrot.slane %v4682_v10, 1  ;;  %v4847_v61 = vsel %vm4828_vm3, %v4844_v41, %v4846_v44  ;;  %v5019_v46 = vsel %vm4975_vm4, %v5014_v8, %v5018_v30 }
 0x529   :  { %v5675_v37 = vpop.f32.mrf.mxu1  ;;  %v5880_v19 = vpop.f32.mrf.mxu0  ;;  %v4922_v8 = vrot.slane %v18429_v21, 2 }
 0x52a   :  { %v5020_v37 = vrot.slane %v20769_v0, 2  ;;  %v4688_v10 = vor.u32 %v4687_v36, %v4684_v17  ;;  %v4696_v17 = vrot.slane %v4694_v28, 2  ;;  %v4700_v28 = vshrl.u32 %v18459_v20, 16 }
 0x52b   :  { %v5676_v14 = vpop.f32.mrf.mxu1  ;;  %v5881_v29 = vpop.f32.mrf.mxu0 }
 0x52c   :  { %v18766_v38 = vadd.f32 %v5881_v29, %v5676_v14  ;;  %v4848_v29 = vrot.slane %v18439_v7, 2  ;;  %v20772_v7 = vshrl.u32 %v18468_v57, 16 }
 0x52d   :  { %v5678_v33 = vpop.f32.mrf.mxu1  ;;  %v5883_v16 = vpop.f32.mrf.mxu0 }
 0x52e   :  { %v5022_v16 = vor.u32 %v5021_v50, %v5020_v37  ;;  %v20773_v37 = vshll.u32 %v18468_v57, 16 }
 0x52f   :  { %v5681_v19 = vpop.f32.mrf.mxu1  ;;  %6106 = vmatmul.mubr.bf16.gmra.mxu1 %v4680_v62  ;;  %v5886_v55 = vpop.f32.mrf.mxu0  ;;  %6311 = vmatmul.mubr.bf16.gmra.mxu0 %v4921_v56  ;;  %v4689_v56 = vsel %vm4600_vm5, %v4679_v43, %v4688_v10 }
 0x530   :  { %6113 = vmatprep.mubr.bf16.mxu1 %v4847_v61  ;;  %v18777_v41 = vadd.f32 %v5886_v55, %v5681_v19  ;;  %6318 = vmatprep.mubr.bf16.mxu0 %v5019_v46  ;;  %v4693_v61 = vrot.slane %v4691_v42, 1  ;;  %v4923_v19 = vsel %vm4828_vm3, %v4920_v13, %v4922_v8  ;;  %v4849_v55 = vsel %vm4828_vm3, %v4846_v44, %v4848_v29 }
 0x531   :  { %v5683_v14 = vpop.f32.mrf.mxu1  ;;  %v5888_v33 = vpop.f32.mrf.mxu0  ;;  %v5025_v50 = vrot.slane %v20773_v37, 3  ;;  %v4703_v13 = vshll.u32 %v18459_v20, 16 }
 0x532   :  { %20771 = vst [vmem:[#allocation175_spill] sm:$0xff] %v18777_v41  ;;  %v5023_v14 = vsel %vm4975_vm4, %v5018_v30, %v5022_v16  ;;  %v5024_v33 = vrot.slane %v20772_v7, 2  ;;  %v4697_v42 = vor.u32 %v4696_v17, %v4693_v61  ;;  %v4924_v30 = vrot.slane %v18449_v15, 2 }
 0x533   :  { %v5684_v0 = vpop.f32.mrf.mxu1  ;;  %v5889_v62 = vpop.f32.mrf.mxu0  ;;  %v4705_v61 = vrot.slane %v4703_v13, 2  ;;  %v4709_v13 = vshrl.u32 %v18476_v24, 16 }
 0x534   :  { %v18782_v36 = vadd.f32 %v5889_v62, %v5684_v0  ;;  %v4850_v62 = vrot.slane %v18459_v20, 2  ;;  %v20775_v20 = vshrl.u32 %v18484_v22, 16 }
 0x535   :  { %v5686_v63 = vpop.f32.mrf.mxu1  ;;  %v5891_v46 = vpop.f32.mrf.mxu0 }
 0x536   :  { %v5026_v46 = vor.u32 %v5025_v50, %v5024_v33  ;;  %v20776_v33 = vshll.u32 %v18484_v22, 16 }
 0x537   :  { %v5689_v41 = vpop.f32.mrf.mxu1  ;;  %6114 = vmatmul.mubr.bf16.gmra.mxu1 %v4689_v56  ;;  %v5894_v43 = vpop.f32.mrf.mxu0  ;;  %6319 = vmatmul.mubr.bf16.gmra.mxu0 %v4923_v19  ;;  %v4698_v19 = vsel %vm4600_vm5, %v4688_v10, %v4697_v42 }
 0x538   :  { %6121 = vmatprep.mubr.bf16.mxu1 %v4849_v55  ;;  %v18793_v44 = vadd.f32 %v5894_v43, %v5689_v41  ;;  %6326 = vmatprep.mubr.bf16.mxu0 %v5023_v14  ;;  %v4702_v55 = vrot.slane %v4700_v28, 1  ;;  %v4925_v41 = vsel %vm4828_vm3, %v4922_v8, %v4924_v30  ;;  %v4851_v43 = vsel %vm4828_vm3, %v4848_v29, %v4850_v62 }
 0x539   :  { %v5691_v0 = vpop.f32.mrf.mxu1  ;;  %v5896_v63 = vpop.f32.mrf.mxu0  ;;  %v5029_v50 = vrot.slane %v20776_v33, 3  ;;  %v4712_v8 = vshll.u32 %v18476_v24, 16 }
 0x53a   :  { %20774 = vst [vmem:[#allocation176_spill] sm:$0xff] %v18793_v44  ;;  %v5027_v0 = vsel %vm4975_vm4, %v5022_v16, %v5026_v46  ;;  %v5028_v63 = vrot.slane %v20775_v20, 2  ;;  %v4706_v28 = vor.u32 %v4705_v61, %v4702_v55  ;;  %v4926_v16 = vrot.slane %v18468_v57, 2 }
 0x53b   :  { %v5692_v7 = vpop.f32.mrf.mxu1  ;;  %v5897_v56 = vpop.f32.mrf.mxu0  ;;  %v4714_v55 = vrot.slane %v4712_v8, 2  ;;  %v4718_v8 = vshrl.u32 %v18492_v58, 16 }
 0x53c   :  { %v18798_v17 = vadd.f32 %v5897_v56, %v5692_v7  ;;  %v4852_v56 = vrot.slane %v18476_v24, 2  ;;  %v20778_v24 = vshrl.u32 %v18500_v59, 16 }
 0x53d   :  { %v5694_v37 = vpop.f32.mrf.mxu1  ;;  %v5899_v14 = vpop.f32.mrf.mxu0 }
 0x53e   :  { %v5030_v14 = vor.u32 %v5029_v50, %v5028_v63  ;;  %v20779_v63 = vshll.u32 %v18500_v59, 16 }
 0x53f   :  { %v5697_v44 = vpop.f32.mrf.mxu1  ;;  %6122 = vmatmul.mubr.bf16.gmra.mxu1 %v4698_v19  ;;  %v5902_v10 = vpop.f32.mrf.mxu0  ;;  %6327 = vmatmul.mubr.bf16.gmra.mxu0 %v4925_v41  ;;  %v4707_v41 = vsel %vm4600_vm5, %v4697_v42, %v4706_v28 }
 0x540   :  { %6129 = vmatprep.mubr.bf16.mxu1 %v4851_v43  ;;  %v18809_v29 = vadd.f32 %v5902_v10, %v5697_v44  ;;  %6334 = vmatprep.mubr.bf16.mxu0 %v5027_v0  ;;  %v4711_v43 = vrot.slane %v4709_v13, 1  ;;  %v4927_v44 = vsel %vm4828_vm3, %v4924_v30, %v4926_v16  ;;  %v4853_v10 = vsel %vm4828_vm3, %v4850_v62, %v4852_v56 }
 0x541   :  { %v5699_v7 = vpop.f32.mrf.mxu1  ;;  %v5904_v37 = vpop.f32.mrf.mxu0  ;;  %v5033_v50 = vrot.slane %v20779_v63, 3  ;;  %v4721_v30 = vshll.u32 %v18492_v58, 16 }
 0x542   :  { %20777 = vst [vmem:[#allocation177_spill] sm:$0xff] %v18809_v29  ;;  %v5031_v7 = vsel %vm4975_vm4, %v5026_v46, %v5030_v14  ;;  %v5032_v37 = vrot.slane %v20778_v24, 2  ;;  %v4715_v13 = vor.u32 %v4714_v55, %v4711_v43  ;;  %v4928_v46 = vrot.slane %v18484_v22, 2 }
 0x543   :  { %v5700_v20 = vpop.f32.mrf.mxu1  ;;  %v5905_v19 = vpop.f32.mrf.mxu0  ;;  %v4723_v43 = vrot.slane %v4721_v30, 2  ;;  %v4727_v30 = vshrl.u32 %v18508_v35, 16 }
 0x544   :  { %v18814_v61 = vadd.f32 %v5905_v19, %v5700_v20  ;;  %v4854_v19 = vrot.slane %v18492_v58, 2  ;;  %v20781_v58 = vshrl.u32 %v18516_v52, 16 }
 0x545   :  { %v5702_v33 = vpop.f32.mrf.mxu1  ;;  %v5907_v0 = vpop.f32.mrf.mxu0 }
 0x546   :  { %v5034_v0 = vor.u32 %v5033_v50, %v5032_v37  ;;  %v20782_v37 = vshll.u32 %v18516_v52, 16 }
 0x547   :  { %v5705_v29 = vpop.f32.mrf.mxu1  ;;  %6130 = vmatmul.mubr.bf16.gmra.mxu1 %v4707_v41  ;;  %v5910_v42 = vpop.f32.mrf.mxu0  ;;  %6335 = vmatmul.mubr.bf16.gmra.mxu0 %v4927_v44  ;;  %v4716_v44 = vsel %vm4600_vm5, %v4706_v28, %v4715_v13 }
 0x548   :  { %6135 = vmatprep.mubr.bf16.mxu1 %v4853_v10  ;;  %v18825_v62 = vadd.f32 %v5910_v42, %v5705_v29  ;;  %6340 = vmatprep.mubr.bf16.mxu0 %v5031_v7  ;;  %v4720_v10 = vrot.slane %v4718_v8, 1  ;;  %v4929_v29 = vsel %vm4828_vm3, %v4926_v16, %v4928_v46  ;;  %v4855_v42 = vsel %vm4828_vm3, %v4852_v56, %v4854_v19 }
 0x549   :  { %v5707_v20 = vpop.f32.mrf.mxu1  ;;  %v5912_v33 = vpop.f32.mrf.mxu0  ;;  %v5037_v50 = vrot.slane %v20782_v37, 3  ;;  %v4730_v16 = vshll.u32 %v18508_v35, 16 }
 0x54a   :  { %20780 = vst [vmem:[#allocation178_spill] sm:$0xff] %v18825_v62  ;;  %v5035_v20 = vsel %vm4975_vm4, %v5030_v14, %v5034_v0  ;;  %v5036_v33 = vrot.slane %v20781_v58, 2  ;;  %v4724_v8 = vor.u32 %v4723_v43, %v4720_v10  ;;  %v4930_v14 = vrot.slane %v18500_v59, 2 }
 0x54b   :  { %v5708_v24 = vpop.f32.mrf.mxu1  ;;  %v5913_v41 = vpop.f32.mrf.mxu0  ;;  %v4732_v10 = vrot.slane %v4730_v16, 2  ;;  %v4736_v16 = vshrl.u32 %v18524_v9, 16 }
 0x54c   :  { %v18830_v55 = vadd.f32 %v5913_v41, %v5708_v24  ;;  %v4856_v41 = vrot.slane %v18508_v35, 2  ;;  %v20785_v35 = vshrl.u32 %v18532_v51, 16 }
 0x54d   :  { %v5710_v63 = vpop.f32.mrf.mxu1  ;;  %v5915_v7 = vpop.f32.mrf.mxu0 }
 0x54e   :  { %v5038_v7 = vor.u32 %v5037_v50, %v5036_v33  ;;  %v20786_v33 = vshll.u32 %v18532_v51, 16 }
 0x54f   :  { %v5713_v62 = vpop.f32.mrf.mxu1  ;;  %6136 = vmatmul.mubr.bf16.gmra.mxu1 %v4716_v44  ;;  %v5918_v28 = vpop.f32.mrf.mxu0  ;;  %6341 = vmatmul.mubr.bf16.gmra.mxu0 %v4929_v29  ;;  %v4725_v29 = vsel %vm4600_vm5, %v4715_v13, %v4724_v8 }
 0x550   :  { %6141 = vmatprep.mubr.bf16.mxu1 %v4855_v42  ;;  %v18841_v56 = vadd.f32 %v5918_v28, %v5713_v62  ;;  %6346 = vmatprep.mubr.bf16.mxu0 %v5035_v20  ;;  %v4729_v42 = vrot.slane %v4727_v30, 1  ;;  %v4931_v62 = vsel %vm4828_vm3, %v4928_v46, %v4930_v14  ;;  %v4857_v28 = vsel %vm4828_vm3, %v4854_v19, %v4856_v41 }
 0x551   :  { %v5715_v24 = vpop.f32.mrf.mxu1  ;;  %v5920_v63 = vpop.f32.mrf.mxu0  ;;  %v5041_v50 = vrot.slane %v20786_v33, 3  ;;  %v4739_v46 = vshll.u32 %v18524_v9, 16 }
 0x552   :  { %20783 = vst [vmem:[#allocation179_spill] sm:$0xff] %v18841_v56  ;;  %v5039_v24 = vsel %vm4975_vm4, %v5034_v0, %v5038_v7  ;;  %v5040_v63 = vrot.slane %v20785_v35, 2  ;;  %v4733_v30 = vor.u32 %v4732_v10, %v4729_v42  ;;  %v4932_v0 = vrot.slane %v18516_v52, 2 }
 0x553   :  { %v5716_v58 = vpop.f32.mrf.mxu1  ;;  %v5921_v44 = vpop.f32.mrf.mxu0 }
 0x554   :  { %v18846_v43 = vadd.f32 %v5921_v44, %v5716_v58  ;;  %v4858_v58 = vrot.slane %v18524_v9, 2  ;;  %v4933_v42 = vsel %vm4828_vm3, %v4930_v14, %v4932_v0  ;;  %v20788_v9 = vshll.u32 %v18548_v47, 16 }
 0x555   :  { %v5718_v37 = vpop.f32.mrf.mxu1  ;;  %v5923_v20 = vpop.f32.mrf.mxu0  ;;  %v4748_v14 = vshll.u32 %v18540_v34, 16 }
 0x556   :  { %20784 = vst [vmem:[#allocation180_spill] sm:$0xff] %v18846_v43  ;;  %v5042_v37 = vor.u32 %v5041_v50, %v5040_v63  ;;  %v4859_v10 = vsel %vm4828_vm3, %v4856_v41, %v4858_v58  ;;  %v5045_v63 = vrot.slane %v20788_v9, 3 }
 0x557   :  { %v5721_v56 = vpop.f32.mrf.mxu1  ;;  %6142 = vmatmul.mubr.bf16.gmra.mxu1 %v4725_v29  ;;  %v5926_v13 = vpop.f32.mrf.mxu0  ;;  %6347 = vmatmul.mubr.bf16.gmra.mxu0 %v4931_v62  ;;  %v4738_v29 = vrot.slane %v4736_v16, 1  ;;  %v4741_v62 = vrot.slane %v4739_v46, 2  ;;  %v4745_v16 = vshrl.u32 %v18540_v34, 16  ;;  %v4860_v46 = vrot.slane %v18540_v34, 2 }
 0x558   :  { %6149 = vmatprep.mubr.bf16.mxu1 %v4857_v28  ;;  %6354 = vmatprep.mubr.bf16.mxu0 %v5039_v24  ;;  %v4734_v56 = vsel %vm4600_vm5, %v4724_v8, %v4733_v30  ;;  %v5043_v24 = vsel %vm4975_vm4, %v5038_v7, %v5042_v37  ;;  %v20787_v13 = vshrl.u32 %v18548_v47, 16  ;;  %v4934_v7 = vrot.slane %v18532_v51, 2 }
 0x559   :  { %v5722_v19 = vpop.f32.mrf.mxu1  ;;  %v5927_v44 = vpop.f32.mrf.mxu0  ;;  %v4742_v8 = vor.u32 %v4741_v62, %v4738_v29  ;;  %v4861_v62 = vsel %vm4828_vm3, %v4858_v58, %v4860_v46  ;;  %v20790_v34 = vshll.u32 %v18564_v39, 16 }
 0x55a   :  { %v5044_v19 = vrot.slane %v20787_v13, 2  ;;  %v4747_v13 = vrot.slane %v4745_v16, 1  ;;  %v4935_v29 = vsel %vm4828_vm3, %v4932_v0, %v4934_v7  ;;  %v4754_v16 = vshrl.u32 %v18556_v26, 16 }
 0x55b   :  { %v5723_v20 = vpop.f32.mrf.mxu1  ;;  %v5928_v35 = vpop.f32.mrf.mxu0  ;;  %v4757_v0 = vshll.u32 %v18556_v26, 16 }
 0x55c   :  { %v5046_v35 = vor.u32 %v5045_v63, %v5044_v19  ;;  %v5049_v19 = vrot.slane %v20790_v34, 3 }
 0x55d   :  { %v5724_v28 = vpop.f32.mrf.mxu1  ;;  %v5929_v33 = vpop.f32.mrf.mxu0 }
 0x55f   :  { %v5727_v50 = vpop.f32.mrf.mxu1  ;;  %6150 = vmatmul.mubr.bf16.gmra.mxu1 %v4734_v56  ;;  %v5932_v44 = vpop.f32.mrf.mxu0  ;;  %6355 = vmatmul.mubr.bf16.gmra.mxu0 %v4933_v42  ;;  %v4743_v56 = vsel %vm4600_vm5, %v4733_v30, %v4742_v8  ;;  %v4750_v42 = vrot.slane %v4748_v14, 2 }
 0x560   :  { %6157 = vmatprep.mubr.bf16.mxu1 %v4859_v10  ;;  %6362 = vmatprep.mubr.bf16.mxu0 %v5043_v24  ;;  %v5047_v24 = vsel %vm4975_vm4, %v5042_v37, %v5046_v35  ;;  %v20789_v50 = vshrl.u32 %v18564_v39, 16  ;;  %v4936_v37 = vrot.slane %v18548_v47, 2 }
 0x561   :  { %v5728_v41 = vpop.f32.mrf.mxu1  ;;  %v5933_v20 = vpop.f32.mrf.mxu0  ;;  %v4751_v30 = vor.u32 %v4750_v42, %v4747_v13  ;;  %v4759_v13 = vrot.slane %v4757_v0, 2  ;;  %v4763_v0 = vshrl.u32 %v18572_v18, 16 }
 0x562   :  { %v5048_v44 = vrot.slane %v20789_v50, 2  ;;  %v4862_v20 = vrot.slane %v18556_v26, 2  ;;  %v4937_v50 = vsel %vm4828_vm3, %v4934_v7, %v4936_v37  ;;  %v20793_v26 = vshrl.u32 %v18580_v2, 16 }
 0x563   :  { %v5729_v28 = vpop.f32.mrf.mxu1  ;;  %v5934_v33 = vpop.f32.mrf.mxu0  ;;  %v4766_v7 = vshll.u32 %v18572_v18, 16 }
 0x564   :  { %v5050_v33 = vor.u32 %v5049_v19, %v5048_v44  ;;  %v4863_v34 = vsel %vm4828_vm3, %v4860_v46, %v4862_v20  ;;  %v20794_v44 = vshll.u32 %v18580_v2, 16 }
 0x565   :  { %v5730_v10 = vpop.f32.mrf.mxu1  ;;  %v5935_v9 = vpop.f32.mrf.mxu0 }
 0x566   :  { %v5053_v19 = vrot.slane %v20794_v44, 3 }
 0x567   :  { %v5733_v63 = vpop.f32.mrf.mxu1  ;;  %6158 = vmatmul.mubr.bf16.gmra.mxu1 %v4743_v56  ;;  %v5938_v41 = vpop.f32.mrf.mxu0  ;;  %6363 = vmatmul.mubr.bf16.gmra.mxu0 %v4935_v29  ;;  %v4752_v29 = vsel %vm4600_vm5, %v4742_v8, %v4751_v30 }
 0x568   :  { %6165 = vmatprep.mubr.bf16.mxu1 %v4861_v62  ;;  %v18881_v58 = vadd.f32 %v5938_v41, %v5733_v63  ;;  %6370 = vmatprep.mubr.bf16.mxu0 %v5047_v24  ;;  %v4756_v62 = vrot.slane %v4754_v16, 1  ;;  %v5051_v63 = vsel %vm4975_vm4, %v5046_v35, %v5050_v33  ;;  %v5052_v41 = vrot.slane %v20793_v26, 2 }
 0x569   :  { %v5735_v14 = vpop.f32.mrf.mxu1  ;;  %v5940_v28 = vpop.f32.mrf.mxu0  ;;  %v4938_v35 = vrot.slane %v18564_v39, 2 }
 0x56a   :  { %20791 = vst [vmem:[#allocation182_spill] sm:$0xff] %v18881_v58  ;;  %v4760_v16 = vor.u32 %v4759_v13, %v4756_v62  ;;  %v4768_v62 = vrot.slane %v4766_v7, 2  ;;  %v4772_v7 = vshrl.u32 %v18588_v5, 16 }
 0x56b   :  { %v5736_v10 = vpop.f32.mrf.mxu1  ;;  %v5941_v56 = vpop.f32.mrf.mxu0  ;;  %v4939_v44 = vsel %vm4828_vm3, %v4936_v37, %v4938_v35  ;;  %v4775_v37 = vshll.u32 %v18588_v5, 16 }
 0x56c   :  { %v18886_v42 = vadd.f32 %v5941_v56, %v5736_v10  ;;  %v4864_v10 = vrot.slane %v18572_v18, 2  ;;  %v20797_v18 = vshrl.u32 %v18596_v25, 16 }
 0x56d   :  { %v5738_v9 = vpop.f32.mrf.mxu1  ;;  %v5943_v24 = vpop.f32.mrf.mxu0 }
 0x56e   :  { %20792 = vst [vmem:[#allocation183_spill] sm:$0xff] %v18886_v42  ;;  %v5054_v9 = vor.u32 %v5053_v19, %v5052_v41  ;;  %v20798_v41 = vshll.u32 %v18596_v25, 16 }
 0x56f   :  { %v5741_v14 = vpop.f32.mrf.mxu1  ;;  %6166 = vmatmul.mubr.bf16.gmra.mxu1 %v4752_v29  ;;  %v5946_v8 = vpop.f32.mrf.mxu0  ;;  %6371 = vmatmul.mubr.bf16.gmra.mxu0 %v4937_v50  ;;  %v4761_v50 = vsel %vm4600_vm5, %v4751_v30, %v4760_v16 }
 0x570   :  { %6173 = vmatprep.mubr.bf16.mxu1 %v4863_v34  ;;  %v18897_v46 = vadd.f32 %v5946_v8, %v5741_v14  ;;  %6378 = vmatprep.mubr.bf16.mxu0 %v5051_v63  ;;  %v4765_v34 = vrot.slane %v4763_v0, 1  ;;  %v4865_v14 = vsel %vm4828_vm3, %v4862_v20, %v4864_v10  ;;  %v5055_v8 = vsel %vm4975_vm4, %v5050_v33, %v5054_v9 }
 0x571   :  { %v5743_v28 = vpop.f32.mrf.mxu1  ;;  %v5948_v56 = vpop.f32.mrf.mxu0  ;;  %v5057_v19 = vrot.slane %v20798_v41, 3  ;;  %v4940_v33 = vrot.slane %v18580_v2, 2 }
 0x572   :  { %20795 = vst [vmem:[#allocation184_spill] sm:$0xff] %v18897_v46  ;;  %v5056_v28 = vrot.slane %v20797_v18, 2  ;;  %v4769_v0 = vor.u32 %v4768_v62, %v4765_v34  ;;  %v4100_v18 = vld [vmem:[#allocation2 + $0xb4] sm:$0xf]  ;;  %v4774_v34 = vrot.slane %v4772_v7, 1  ;;  %v4777_v62 = vrot.slane %v4775_v37, 2 }
 0x573   :  { %v5744_v24 = vpop.f32.mrf.mxu1  ;;  %v5949_v29 = vpop.f32.mrf.mxu0 }
 0x574   :  { %v18902_v13 = vadd.f32 %v5949_v29, %v5744_v24  ;;  %v4866_v29 = vrot.slane %v18588_v5, 2  ;;  %v20801_v5 = vld [vmem:[#allocation181_spill] sm:$0xff] }
 0x575   :  { %v5746_v26 = vpop.f32.mrf.mxu1  ;;  %v5951_v63 = vpop.f32.mrf.mxu0 }
 0x576   :  { %20796 = vst [vmem:[#allocation185_spill] sm:$0xff] %v18902_v13  ;;  %v5058_v63 = vor.u32 %v5057_v19, %v5056_v28 }
 0x577   :  { %v5749_v56 = vpop.f32.mrf.mxu1  ;;  %6174 = vmatmul.mubr.bf16.gmra.mxu1 %v4761_v50  ;;  %v5954_v30 = vpop.f32.mrf.mxu0  ;;  %6379 = vmatmul.mubr.bf16.gmra.mxu0 %v4939_v44  ;;  %v4770_v44 = vsel %vm4600_vm5, %v4760_v16, %v4769_v0  ;;  %v20803_v16 = vshll.u32 %v20801_v5, 16 }
 0x578   :  { %6181 = vmatprep.mubr.bf16.mxu1 %v4865_v14  ;;  %v18913_v20 = vadd.f32 %v5954_v30, %v5749_v56  ;;  %6386 = vmatprep.mubr.bf16.mxu0 %v5055_v8  ;;  %v4941_v56 = vsel %vm4828_vm3, %v4938_v35, %v4940_v33  ;;  %v4867_v8 = vsel %vm4828_vm3, %v4864_v10, %v4866_v29  ;;  %v15024_v30 = vld [vmem:[#allocation2 + $0xb0] sm:$0xf] }
 0x579   :  { %v5751_v24 = vpop.f32.mrf.mxu1  ;;  %v5956_v26 = vpop.f32.mrf.mxu0  ;;  %v5061_v7 = vrot.slane %v20803_v16, 3  ;;  %v4778_v35 = vor.u32 %v4777_v62, %v4774_v34 }
 0x57a   :  { %20799 = vst [vmem:[#allocation186_spill] sm:$0xff] %v18913_v20  ;;  %v18922_v24 = vcombine.low %v15024_v30, %v4100_v18  ;;  %v20802_v26 = vshrl.u32 %v20801_v5, 16  ;;  %v5059_v20 = vsel %vm4975_vm4, %v5054_v9, %v5058_v63 }
 0x57b   :  { %v5752_v50 = vpop.f32.mrf.mxu1  ;;  %v5957_v41 = vpop.f32.mrf.mxu0  ;;  %v4779_v62 = vsel %vm4600_vm5, %v4769_v0, %v4778_v35 }
 0x57c   :  { %v18918_v14 = vadd.f32 %v5957_v41, %v5752_v50  ;;  %v5060_v28 = vrot.slane %v20802_v26, 2  ;;  %v4942_v26 = vrot.slane %v18596_v25, 2 }
 0x57d   :  { %v5754_v13 = vpop.f32.mrf.mxu1  ;;  %v5959_v19 = vpop.f32.mrf.mxu0 }
 0x57e   :  { %20800 = vst [vmem:[#allocation187_spill] sm:$0xff] %v18918_v14  ;;  %v20804_v13 = vld [vmem:[#allocation173_spill] sm:$0xff]  ;;  %v5062_v16 = vor.u32 %v5061_v7, %v5060_v28 }
 0x57f   :  { %v5757_v37 = vpop.f32.mrf.mxu1  ;;  %6182 = vmatmul.mubr.bf16.gmra.mxu1 %v4770_v44  ;;  %v5962_v50 = vpop.f32.mrf.mxu0  ;;  %6387 = vmatmul.mubr.bf16.gmra.mxu0 %v4941_v56  ;;  %v4781_v10 = vshrl.u32 %v20804_v13, 16  ;;  %v4784_v18 = vshll.u32 %v20804_v13, 16  ;;  %v4868_v9 = vrot.slane %v20804_v13, 2  ;;  %v5065_v44 = vshrl.u32 %v18922_v24, 16 }
 0x580   :  { %6189 = vmatprep.mubr.bf16.mxu1 %v4867_v8  ;;  %v18931_v41 = vadd.f32 %v5962_v50, %v5757_v37  ;;  %6394 = vmatprep.mubr.bf16.mxu0 %v5059_v20  ;;  %v5068_v56 = vshll.u32 %v18922_v24, 16  ;;  %v4943_v20 = vsel %vm4828_vm3, %v4940_v33, %v4942_v26  ;;  %v5063_v28 = vsel %vm4975_vm4, %v5058_v63, %v5062_v16 }
 0x581   :  { %v5759_v30 = vpop.f32.mrf.mxu1  ;;  %v5964_v19 = vpop.f32.mrf.mxu0  ;;  %v4783_v14 = vrot.slane %v4781_v10, 1  ;;  %v4786_v46 = vrot.slane %v4784_v18, 2  ;;  %v5067_v7 = vrot.slane %v5065_v44, 2  ;;  %v20807_v10 = vld [vmem:[#allocation174_spill] sm:$0xff]  ;;  %v4944_v63 = vrot.slane %v20801_v5, 2 }
 0x582   :  { %20805 = vst [vmem:[#allocation181_spill] sm:$0xff] %v18931_v41  ;;  %v4869_v30 = vsel %vm4828_vm3, %v4866_v29, %v4868_v9  ;;  %v5070_v19 = vrot.slane %v5068_v56, 3  ;;  %v18943_v41 = vld [vmem:[#allocation2 + $0xb8] ss:$0 sps:$4 sm:$0x33]   ;;  %v4790_v18 = vshrl.u32 %v20807_v10, 16 }
 0x583   :  { %v5760_v8 = vpop.f32.mrf.mxu1  ;;  %v5965_v34 = vpop.f32.mrf.mxu0  ;;  %v4787_v0 = vor.u32 %v4786_v46, %v4783_v14  ;;  %v4870_v44 = vrot.slane %v20807_v10, 2 }
 0x584   :  { %v18938_v37 = vadd.f32 %v5965_v34, %v5760_v8  ;;  %v4793_v8 = vshll.u32 %v20807_v10, 16  ;;  %v5071_v34 = vor.u32 %v5070_v19, %v5067_v7  ;;  %v15004_v10 = vld [vmem:[#allocation2 + $0xb4] ss:$0 sps:$4 sm:$0x11]  }
 0x585   :  { %v5762_v50 = vpop.f32.mrf.mxu1  ;;  %v5967_v13 = vpop.f32.mrf.mxu0  ;;  %v4788_v14 = vsel %vm4600_vm5, %v4778_v35, %v4787_v0 }
 0x586   :  { %20806 = vst [vmem:[#allocation173_spill] sm:$0xff] %v18938_v37  ;;  %v5077_v50 = vshll.u32 %v18943_v41, 16  ;;  %v4795_v13 = vrot.slane %v4793_v8, 2  ;;  %v5072_v7 = vsel %vm4975_vm4, %v5062_v16, %v5071_v34 }
 0x587   :  { %v5765_v42 = vpop.f32.mrf.mxu1  ;;  %6190 = vmatmul.mubr.bf16.gmra.mxu1 %v4779_v62  ;;  %v5970_v58 = vpop.f32.mrf.mxu0  ;;  %6395 = vmatmul.mubr.bf16.gmra.mxu0 %v4943_v20  ;;  %v5074_v62 = vshrl.u32 %v18943_v41, 16 }
 0x588   :  { %6197 = vmatprep.mubr.bf16.mxu1 %v4869_v30  ;;  %v18947_v33 = vadd.f32 %v5970_v58, %v5765_v42  ;;  %6402 = vmatprep.mubr.bf16.mxu0 %v5063_v28  ;;  %v4792_v30 = vrot.slane %v4790_v18, 1  ;;  %v4945_v28 = vsel %vm4828_vm3, %v4942_v26, %v4944_v63  ;;  %v4946_v26 = vrot.slane %v18922_v24, 2 }
 0x589   :  { %v5767_v29 = vpop.f32.mrf.mxu1  ;;  %v5972_v56 = vpop.f32.mrf.mxu0  ;;  %v5076_v19 = vrot.slane %v5074_v62, 2 }
 0x58a   :  { %20808 = vst [vmem:[#allocation174_spill] sm:$0xff] %v18947_v33  ;;  %v4871_v29 = vsel %vm4828_vm3, %v4868_v9, %v4870_v44  ;;  %v5079_v33 = vrot.slane %v5077_v50, 3  ;;  %v4796_v35 = vor.u32 %v4795_v13, %v4792_v30  ;;  %v4799_v50 = vshll.u32 %v15004_v10, 16  ;;  %v15025_v13 = vld [vmem:[#allocation2 + $0xc] sm:$0xf] }
 0x58b   :  { %v5768_v20 = vpop.f32.mrf.mxu1  ;;  %v5973_v46 = vpop.f32.mrf.mxu0  ;;  %v4947_v30 = vsel %vm4828_vm3, %v4944_v63, %v4946_v26 }
 0x58c   :  { %v18954_v58 = vadd.f32 %v5973_v46, %v5768_v20  ;;  %v4872_v20 = vrot.slane %v15004_v10, 2  ;;  %v5080_v46 = vor.u32 %v5079_v33, %v5076_v19  ;;  %v4797_v62 = vsel %vm4600_vm5, %v4787_v0, %v4796_v35 }
 0x58d   :  { %v5770_v42 = vpop.f32.mrf.mxu1  ;;  %v5975_v56 = vpop.f32.mrf.mxu0  ;;  %v4801_v0 = vrot.slane %v4799_v50, 2 }
 0x58e   :  { %v4103_v42 = vld [vmem:[#allocation2 + $0x8] sm:$0x8] }
 0x58f   :  { %v5773_v37 = vpop.f32.mrf.mxu1  ;;  %6198 = vmatmul.mubr.bf16.gmra.mxu1 %v4788_v14  ;;  %v5978_v43 = vpop.f32.mrf.mxu0  ;;  %6403 = vmatmul.mubr.bf16.gmra.mxu0 %v4945_v28 }
 0x590   :  { %6205 = vmatprep.mubr.bf16.mxu1 %v4871_v29  ;;  %v18959_v18 = vadd.f32 %v5978_v43, %v5773_v37  ;;  %6410 = vmatprep.mubr.bf16.mxu0 %v5072_v7  ;;  %v4873_v43 = vsel %vm4828_vm3, %v4870_v44, %v4872_v20  ;;  %v15007_v37 = vld [vmem:[#allocation2 + $0xb8] ss:$0 sps:$4 sm:$0x11]   ;;  %v12612_v29 = vcombine.low %v4103_v42, %v15025_v13  ;;  %v5109_v44 = vrot.slane %v18274_v6, 3 }
 0x591   :  { %v5775_v8 = vpop.f32.mrf.mxu1  ;;  %v5980_v9 = vpop.f32.mrf.mxu0  ;;  %v5111_v6 = vrot.slane %v18288_v40, 3  ;;  %v5115_v40 = vrot.slane %v18329_v1, 3  ;;  %v5119_v1 = vrot.slane %v18369_v60, 3 }
 0x592   :  { %v5081_v8 = vsel %vm4975_vm4, %v5071_v34, %v5080_v46  ;;  %v5108_v63 = vrot.slane %v12612_v29, 3  ;;  %v4802_v34 = vsel %vm4600_vm5, %v4796_v35, %v4801_v0  ;;  %v5113_v35 = vrot.slane %v18309_v53, 3 }
 0x593   :  { %v5776_v56 = vpop.f32.mrf.mxu1  ;;  %v5981_v16 = vpop.f32.mrf.mxu0 }
 0x594   :  { %v18963_v14 = vadd.f32 %v5981_v16, %v5776_v56  ;;  %v4948_v56 = vrot.slane %v15007_v37, 2  ;;  %v5110_v50 = vsel %vm5107_vm6, %v5108_v63, %v5109_v44 }
 0x595   :  { %v5778_v28 = vpop.f32.mrf.mxu1  ;;  %v5983_v7 = vpop.f32.mrf.mxu0 }
 0x596   :  { %v4949_v28 = vsel %vm4828_vm3, %v4946_v26, %v4948_v56  ;;  %v5112_v26 = vsel %vm5107_vm6, %v5109_v44, %v5111_v6 }
 0x597   :  { %v5781_v33 = vpop.f32.mrf.mxu1  ;;  %6206 = vmatmul.mubr.bf16.gmra.mxu1 %v4797_v62  ;;  %v5986_v19 = vpop.f32.mrf.mxu0  ;;  %6411 = vmatmul.mubr.bf16.gmra.mxu0 %v4947_v30 }
 0x598   :  { %6213 = vmatprep.mubr.bf16.mxu1 %v4873_v43  ;;  %v18968_v10 = vadd.f32 %v5986_v19, %v5781_v33  ;;  %6418 = vmatprep.mubr.bf16.mxu0 %v5081_v8 }
 0x599   :  { %v5783_v9 = vpop.f32.mrf.mxu1  ;;  %v5988_v20 = vpop.f32.mrf.mxu0 }
 0x59a   :  { %v5114_v9 = vsel %vm5107_vm6, %v5111_v6, %v5113_v35 }
 0x59b   :  { %v5784_v42 = vpop.f32.mrf.mxu1  ;;  %v5989_v16 = vpop.f32.mrf.mxu0 }
 0x59c   :  { %v18972_v46 = vadd.f32 %v5989_v16, %v5784_v42  ;;  %v5117_v16 = vrot.slane %v18349_v31, 3 }
 0x59d   :  { %v5786_v62 = vpop.f32.mrf.mxu1  ;;  %v5991_v30 = vpop.f32.mrf.mxu0 }
 0x59f   :  { %v5789_v43 = vpop.f32.mrf.mxu1  ;;  %6214 = vmatmul.mubr.bf16.gmra.mxu1 %v4802_v34  ;;  %v5994_v37 = vpop.f32.mrf.mxu0  ;;  %6419 = vmatmul.mubr.bf16.gmra.mxu0 %v4949_v28  ;;  %v5116_v28 = vsel %vm5107_vm6, %v5113_v35, %v5115_v40 }
 0x5a0   :  { %14552 = vmatprep.mubr.bf16.mxu1 %v5110_v50  ;;  %v18977_v13 = vadd.f32 %v5994_v37, %v5789_v43  ;;  %v5118_v43 = vsel %vm5107_vm6, %v5115_v40, %v5117_v16 }
 0x5a1   :  { %v5791_v29 = vpop.f32.mrf.mxu1  ;;  %v5996_v7 = vpop.f32.mrf.mxu0 }
 0x5a3   :  { %v5792_v8 = vpop.f32.mrf.mxu1  ;;  %v5997_v33 = vpop.f32.mrf.mxu0 }
 0x5a4   :  { %v18981_v19 = vadd.f32 %v5997_v33, %v5792_v8  ;;  %v5121_v8 = vrot.slane %v18381_v4, 3 }
 0x5a5   :  { %v5794_v0 = vpop.f32.mrf.mxu1  ;;  %v5999_v56 = vpop.f32.mrf.mxu0 }
 0x5a6   :  { %v5120_v0 = vsel %vm5107_vm6, %v5117_v16, %v5119_v1 }
 0x5a7   :  { %v5797_v63 = vpop.f32.mrf.mxu1  ;;  %14553 = vmatmul.mubr.bf16.vlgmr.msra.gmra.mxu1 %v5112_v26  ;;  %v6002_v20 = vpop.f32.mrf.mxu0 }
 0x5a8   :  { %14556 = vmatprep.mubr.bf16.mxu1 %v5114_v9  ;;  %v18985_v42 = vadd.f32 %v6002_v20, %v5797_v63  ;;  %v5122_v63 = vsel %vm5107_vm6, %v5119_v1, %v5121_v8 }
 0x5a9   :  { %v5799_v53 = vpop.f32.mrf.mxu1  ;;  %v6004_v34 = vpop.f32.mrf.mxu0 }
 0x5aa   :  { %v5123_v34 = vrot.slane %v18409_v27, 3 }
 0x5ab   :  { %v5800_v62 = vpop.f32.mrf.mxu1  ;;  %v6005_v44 = vpop.f32.mrf.mxu0 }
 0x5ac   :  { %v18989_v50 = vadd.f32 %v6005_v44, %v5800_v62  ;;  %v5125_v62 = vrot.slane %v18429_v21, 3 }
 0x5ad   :  { %v5802_v30 = vpop.f32.mrf.mxu1  ;;  %v6007_v37 = vpop.f32.mrf.mxu0 }
 0x5ae   :  { %v5124_v37 = vsel %vm5107_vm6, %v5121_v8, %v5123_v34 }
 0x5af   :  { %v5805_v6 = vpop.f32.mrf.mxu1  ;;  %14557 = vmatmul.mubr.bf16.gmra.mxu1 %v5116_v28  ;;  %v6010_v29 = vpop.f32.mrf.mxu0 }
 0x5b0   :  { %14560 = vmatprep.mubr.bf16.mxu1 %v5118_v43  ;;  %v18993_v7 = vadd.f32 %v6010_v29, %v5805_v6  ;;  %v5126_v29 = vsel %vm5107_vm6, %v5123_v34, %v5125_v62 }
 0x5b1   :  { %v5807_v31 = vpop.f32.mrf.mxu1  ;;  %v6012_v33 = vpop.f32.mrf.mxu0 }
 0x5b2   :  { %v5127_v33 = vrot.slane %v18449_v15, 3 }
 0x5b3   :  { %v5808_v26 = vpop.f32.mrf.mxu1  ;;  %v6013_v35 = vpop.f32.mrf.mxu0 }
 0x5b4   :  { %v18997_v9 = vadd.f32 %v6013_v35, %v5808_v26 }
 0x5b5   :  { %v5810_v56 = vpop.f32.mrf.mxu1  ;;  %v6015_v20 = vpop.f32.mrf.mxu0 }
 0x5b6   :  { %v5128_v20 = vsel %vm5107_vm6, %v5125_v62, %v5127_v33 }
 0x5b7   :  { %v6051_v40 = vpop.f32.mrf.mxu1  ;;  %14561 = vmatmul.mubr.bf16.gmra.mxu1 %v5120_v0  ;;  %v6256_v53 = vpop.f32.mrf.mxu0 }
 0x5b8   :  { %v6052_v60 = vadd.f32 %v6051_v40, %v18697_v54  ;;  %14564 = vmatprep.mubr.bf16.mxu1 %v5122_v63 }
 0x5b9   :  { %v6053_v4 = vpop.f32.mrf.mxu1  ;;  %v6258_v16 = vpop.f32.mrf.mxu0 }
 0x5ba   :  { %v19003_v44 = vadd.f32 %v6256_v53, %v6052_v60  ;;  %v5131_v4 = vrot.slane %v18484_v22, 3 }
 0x5bb   :  { %v6054_v28 = vpop.f32.mrf.mxu1  ;;  %v6259_v43 = vpop.f32.mrf.mxu0 }
 0x5bc   :  { %v6055_v30 = vadd.f32 %v6054_v28, %v18702_v45  ;;  %v5129_v45 = vrot.slane %v18468_v57, 3 }
 0x5bd   :  { %v6056_v6 = vpop.f32.mrf.mxu1  ;;  %v6261_v1 = vpop.f32.mrf.mxu0 }
 0x5be   :  { %v19008_v54 = vadd.f32 %v6259_v43, %v6055_v30  ;;  %v5130_v60 = vsel %vm5107_vm6, %v5127_v33, %v5129_v45  ;;  %v5132_v6 = vsel %vm5107_vm6, %v5129_v45, %v5131_v4 }
 0x5bf   :  { %v6059_v31 = vpop.f32.mrf.mxu1  ;;  %14565 = vmatmul.mubr.bf16.gmra.mxu1 %v5124_v37  ;;  %v6264_v21 = vpop.f32.mrf.mxu0 }
 0x5c0   :  { %v6060_v27 = vadd.f32 %v6059_v31, %v18713_v48  ;;  %14568 = vmatprep.mubr.bf16.mxu1 %v5126_v29 }
 0x5c1   :  { %v6061_v26 = vpop.f32.mrf.mxu1  ;;  %v6266_v8 = vpop.f32.mrf.mxu0 }
 0x5c2   :  { %v19013_v35 = vadd.f32 %v6264_v21, %v6060_v27  ;;  %v5135_v21 = vrot.slane %v18516_v52, 3 }
 0x5c3   :  { %v6062_v0 = vpop.f32.mrf.mxu1  ;;  %v6267_v63 = vpop.f32.mrf.mxu0 }
 0x5c4   :  { %v6063_v56 = vadd.f32 %v6062_v0, %v18718_v23  ;;  %v5133_v23 = vrot.slane %v18500_v59, 3 }
 0x5c5   :  { %v6064_v40 = vpop.f32.mrf.mxu1  ;;  %v6269_v53 = vpop.f32.mrf.mxu0 }
 0x5c6   :  { %v19018_v48 = vadd.f32 %v6267_v63, %v6063_v56  ;;  %v5134_v1 = vsel %vm5107_vm6, %v5131_v4, %v5133_v23  ;;  %v5136_v63 = vsel %vm5107_vm6, %v5133_v23, %v5135_v21 }
 0x5c7   :  { %v6067_v34 = vpop.f32.mrf.mxu1  ;;  %14569 = vmatmul.mubr.bf16.gmra.mxu1 %v5128_v20  ;;  %v6272_v57 = vpop.f32.mrf.mxu0 }
 0x5c8   :  { %v6068_v15 = vadd.f32 %v6067_v34, %v18729_v11  ;;  %14572 = vmatprep.mubr.bf16.mxu1 %v5130_v60  ;;  %v5139_v34 = vrot.slane %v18548_v47, 3  ;;  %v20809_v47 = vld [vmem:[#allocation175_spill] sm:$0xff] }
 0x5c9   :  { %v6069_v16 = vpop.f32.mrf.mxu1  ;;  %v6274_v62 = vpop.f32.mrf.mxu0 }
 0x5ca   :  { %v19023_v28 = vadd.f32 %v6272_v57, %v6068_v15 }
 0x5cb   :  { %v6070_v30 = vpop.f32.mrf.mxu1  ;;  %v6275_v37 = vpop.f32.mrf.mxu0 }
 0x5cc   :  { %v6071_v43 = vadd.f32 %v6070_v30, %v18734_v12  ;;  %v5137_v12 = vrot.slane %v18532_v51, 3 }
 0x5cd   :  { %v6072_v29 = vpop.f32.mrf.mxu1  ;;  %v6277_v31 = vpop.f32.mrf.mxu0 }
 0x5ce   :  { %v19028_v11 = vadd.f32 %v6275_v37, %v6071_v43  ;;  %v5138_v40 = vsel %vm5107_vm6, %v5135_v21, %v5137_v12  ;;  %v5140_v30 = vsel %vm5107_vm6, %v5137_v12, %v5139_v34  ;;  %v5143_v31 = vrot.slane %v18580_v2, 3  ;;  %v20810_v2 = vld [vmem:[#allocation176_spill] sm:$0xff] }
 0x5cf   :  { %v6075_v27 = vpop.f32.mrf.mxu1  ;;  %14573 = vmatmul.mubr.bf16.gmra.mxu1 %v5132_v6  ;;  %v6280_v59 = vpop.f32.mrf.mxu0 }
 0x5d0   :  { %v6076_v22 = vadd.f32 %v6075_v27, %v18745_v32  ;;  %14576 = vmatprep.mubr.bf16.mxu1 %v5134_v1 }
 0x5d1   :  { %v6077_v33 = vpop.f32.mrf.mxu1  ;;  %v6282_v45 = vpop.f32.mrf.mxu0 }
 0x5d2   :  { %v19033_v26 = vadd.f32 %v6280_v59, %v6076_v22 }
 0x5d3   :  { %v6078_v8 = vpop.f32.mrf.mxu1  ;;  %v6283_v56 = vpop.f32.mrf.mxu0 }
 0x5d4   :  { %v6079_v0 = vadd.f32 %v6078_v8, %v18750_v49  ;;  %v5141_v49 = vrot.slane %v18564_v39, 3 }
 0x5d5   :  { %v6080_v20 = vpop.f32.mrf.mxu1  ;;  %v6285_v60 = vpop.f32.mrf.mxu0 }
 0x5d6   :  { %v19038_v32 = vadd.f32 %v6283_v56, %v6079_v0  ;;  %v5142_v37 = vsel %vm5107_vm6, %v5139_v34, %v5141_v49  ;;  %v5144_v45 = vsel %vm5107_vm6, %v5141_v49, %v5143_v31  ;;  %v5147_v60 = vrot.slane %v20801_v5, 3  ;;  %v20811_v5 = vld [vmem:[#allocation177_spill] sm:$0xff] }
 0x5d7   :  { %v6083_v53 = vpop.f32.mrf.mxu1  ;;  %14577 = vmatmul.mubr.bf16.gmra.mxu1 %v5136_v63  ;;  %v6288_v51 = vpop.f32.mrf.mxu0 }
 0x5d8   :  { %v6084_v52 = vadd.f32 %v6083_v53, %v18761_v3  ;;  %14580 = vmatprep.mubr.bf16.mxu1 %v5138_v40 }
 0x5d9   :  { %v6085_v15 = vpop.f32.mrf.mxu1  ;;  %v6290_v4 = vpop.f32.mrf.mxu0 }
 0x5da   :  { %v19043_v57 = vadd.f32 %v6288_v51, %v6084_v52 }
 0x5db   :  { %v6086_v16 = vpop.f32.mrf.mxu1  ;;  %v6291_v62 = vpop.f32.mrf.mxu0 }
 0x5dc   :  { %v6087_v23 = vadd.f32 %v6086_v16, %v18766_v38  ;;  %v5145_v38 = vrot.slane %v18596_v25, 3 }
 0x5dd   :  { %v6088_v43 = vpop.f32.mrf.mxu1  ;;  %v6293_v6 = vpop.f32.mrf.mxu0 }
 0x5de   :  { %v19048_v3 = vadd.f32 %v6291_v62, %v6087_v23  ;;  %v5146_v0 = vsel %vm5107_vm6, %v5143_v31, %v5145_v38  ;;  %v5148_v4 = vsel %vm5107_vm6, %v5145_v38, %v5147_v60  ;;  %v5151_v6 = vrot.slane %v18943_v41, 3 }
 0x5df   :  { %v6091_v29 = vpop.f32.mrf.mxu1  ;;  %14581 = vmatmul.mubr.bf16.gmra.mxu1 %v5140_v30  ;;  %v6296_v39 = vpop.f32.mrf.mxu0 }
 0x5e0   :  { %v6092_v1 = vadd.f32 %v6091_v29, %v20809_v47  ;;  %14584 = vmatprep.mubr.bf16.mxu1 %v5142_v37 }
 0x5e1   :  { %v6093_v27 = vpop.f32.mrf.mxu1  ;;  %v6298_v59 = vpop.f32.mrf.mxu0 }
 0x5e2   :  { %v19053_v22 = vadd.f32 %v6296_v39, %v6092_v1 }
 0x5e3   :  { %v6094_v21 = vpop.f32.mrf.mxu1  ;;  %v6299_v12 = vpop.f32.mrf.mxu0 }
 0x5e4   :  { %v6095_v33 = vadd.f32 %v6094_v21, %v18782_v36  ;;  %v5149_v36 = vrot.slane %v18922_v24, 3 }
 0x5e5   :  { %v6096_v8 = vpop.f32.mrf.mxu1  ;;  %v6301_v63 = vpop.f32.mrf.mxu0 }
 0x5e6   :  { %v19058_v56 = vadd.f32 %v6299_v12, %v6095_v33  ;;  %v5150_v23 = vsel %vm5107_vm6, %v5147_v60, %v5149_v36  ;;  %v5152_v27 = vsel %vm5107_vm6, %v5149_v36, %v5151_v6  ;;  %v20812_v12 = vld [vmem:[#allocation178_spill] sm:$0xff]  ;;  %v20813_v36 = vld [vmem:[#allocation179_spill] sm:$0xff] }
 0x5e7   :  { %v6099_v20 = vpop.f32.mrf.mxu1  ;;  %14585 = vmatmul.mubr.bf16.gmra.mxu1 %v5144_v45  ;;  %v6304_v25 = vpop.f32.mrf.mxu0 }
 0x5e8   :  { %v6100_v40 = vadd.f32 %v6099_v20, %v20810_v2  ;;  %14588 = vmatprep.mubr.bf16.mxu1 %v5146_v0 }
 0x5e9   :  { %v6101_v53 = vpop.f32.mrf.mxu1  ;;  %v6306_v51 = vpop.f32.mrf.mxu0 }
 0x5ea   :  { %v19063_v52 = vadd.f32 %v6304_v25, %v6100_v40 }
 0x5eb   :  { %v6102_v34 = vpop.f32.mrf.mxu1  ;;  %v6307_v49 = vpop.f32.mrf.mxu0 }
 0x5ec   :  { %v6103_v15 = vadd.f32 %v6102_v34, %v18798_v17 }
 0x5ed   :  { %v6104_v16 = vpop.f32.mrf.mxu1  ;;  %v6309_v30 = vpop.f32.mrf.mxu0 }
 0x5ee   :  { %v19068_v62 = vadd.f32 %v6307_v49, %v6103_v15 }
 0x5ef   :  { %v6107_v43 = vpop.f32.mrf.mxu1  ;;  %14589 = vmatmul.mubr.bf16.gmra.mxu1 %v5148_v4  ;;  %v6312_v24 = vpop.f32.mrf.mxu0 }
 0x5f0   :  { %v6108_v37 = vadd.f32 %v6107_v43, %v20811_v5  ;;  %14592 = vmatprep.mubr.bf16.mxu1 %v5150_v23  ;;  %v20814_v23 = vld [vmem:[#allocation180_spill] sm:$0xff] }
 0x5f1   :  { %v6109_v29 = vpop.f32.mrf.mxu1  ;;  %v6314_v17 = vpop.f32.mrf.mxu0 }
 0x5f2   :  { %v19072_v47 = vadd.f32 %v6312_v24, %v6108_v37 }
 0x5f3   :  { %v6110_v1 = vpop.f32.mrf.mxu1  ;;  %v6315_v31 = vpop.f32.mrf.mxu0 }
 0x5f4   :  { %v6111_v39 = vadd.f32 %v6110_v1, %v18814_v61 }
 0x5f5   :  { %v6112_v38 = vpop.f32.mrf.mxu1  ;;  %v6317_v21 = vpop.f32.mrf.mxu0 }
 0x5f6   :  { %v19076_v59 = vadd.f32 %v6315_v31, %v6111_v39 }
 0x5f7   :  { %v6115_v33 = vpop.f32.mrf.mxu1  ;;  %14593 = vmatmul.mubr.bf16.gmra.mxu1 %v5152_v27  ;;  %v6320_v8 = vpop.f32.mrf.mxu0 }
 0x5f8   :  { %v6116_v45 = vadd.f32 %v6115_v33, %v20812_v12 }
 0x5f9   :  { %v6117_v41 = vpop.f32.mrf.mxu1  ;;  %v6322_v63 = vpop.f32.mrf.mxu0 }
 0x5fa   :  { %v19079_v0 = vadd.f32 %v6320_v8, %v6116_v45 }
 0x5fb   :  { %v6118_v20 = vpop.f32.mrf.mxu1  ;;  %v6323_v61 = vpop.f32.mrf.mxu0 }
 0x5fc   :  { %v6119_v2 = vadd.f32 %v6118_v20, %v18830_v55 }
 0x5fd   :  { %v6120_v40 = vpop.f32.mrf.mxu1  ;;  %v6325_v60 = vpop.f32.mrf.mxu0 }
 0x5fe   :  { %v19082_v25 = vadd.f32 %v6323_v61, %v6119_v2  ;;  %v20815_v2 = vld [vmem:[#allocation182_spill] sm:$0xff] }
 0x5ff   :  { %v6123_v53 = vpop.f32.mrf.mxu1  ;;  %v6328_v34 = vpop.f32.mrf.mxu0 }
 0x600   :  { %v6124_v51 = vadd.f32 %v6123_v53, %v20813_v36 }
 0x601   :  { %v6125_v15 = vpop.f32.mrf.mxu1  ;;  %v6330_v4 = vpop.f32.mrf.mxu0 }
 0x602   :  { %v19085_v49 = vadd.f32 %v6328_v34, %v6124_v51  ;;  %v20816_v34 = vld [vmem:[#allocation183_spill] sm:$0xff] }
 0x603   :  { %v6126_v16 = vpop.f32.mrf.mxu1  ;;  %v6331_v43 = vpop.f32.mrf.mxu0 }
 0x604   :  { %v6127_v30 = vadd.f32 %v6126_v16, %v20814_v23 }
 0x605   :  { %v6128_v5 = vpop.f32.mrf.mxu1  ;;  %v6333_v55 = vpop.f32.mrf.mxu0 }
 0x606   :  { %v19088_v37 = vadd.f32 %v6331_v43, %v6127_v30  ;;  %v20817_v5 = vld [vmem:[#allocation184_spill] sm:$0xff] }
 0x607   :  { %v6131_v24 = vpop.f32.mrf.mxu1  ;;  %v6336_v6 = vpop.f32.mrf.mxu0 }
 0x609   :  { %v6132_v29 = vpop.f32.mrf.mxu1  ;;  %v6337_v17 = vpop.f32.mrf.mxu0 }
 0x60b   :  { %v6133_v1 = vpop.f32.mrf.mxu1  ;;  %v6338_v39 = vpop.f32.mrf.mxu0 }
 0x60c   :  { %v20818_v39 = vld [vmem:[#allocation185_spill] sm:$0xff] }
 0x60d   :  { %v6134_v31 = vpop.f32.mrf.mxu1  ;;  %v6339_v27 = vpop.f32.mrf.mxu0 }
 0x60f   :  { %v6137_v38 = vpop.f32.mrf.mxu1  ;;  %v6342_v21 = vpop.f32.mrf.mxu0 }
 0x611   :  { %v6138_v33 = vpop.f32.mrf.mxu1  ;;  %v6343_v12 = vpop.f32.mrf.mxu0 }
 0x613   :  { %v6139_v45 = vpop.f32.mrf.mxu1  ;;  %v6344_v8 = vpop.f32.mrf.mxu0 }
 0x614   :  { %v20819_v45 = vld [vmem:[#allocation186_spill] sm:$0xff] }
 0x615   :  { %v6140_v41 = vpop.f32.mrf.mxu1  ;;  %v6345_v63 = vpop.f32.mrf.mxu0 }
 0x617   :  { %v6143_v20 = vpop.f32.mrf.mxu1  ;;  %v6348_v40 = vpop.f32.mrf.mxu0 }
 0x618   :  { %v6144_v61 = vadd.f32 %v6143_v20, %v20815_v2 }
 0x619   :  { %v6145_v60 = vpop.f32.mrf.mxu1  ;;  %v6350_v36 = vpop.f32.mrf.mxu0 }
 0x61a   :  { %v19091_v53 = vadd.f32 %v6348_v40, %v6144_v61  ;;  %v20820_v40 = vld [vmem:[#allocation187_spill] sm:$0xff] }
 0x61b   :  { %v6146_v51 = vpop.f32.mrf.mxu1  ;;  %v6351_v4 = vpop.f32.mrf.mxu0 }
 0x61c   :  { %v6147_v15 = vadd.f32 %v6146_v51, %v20816_v34 }
 0x61d   :  { %v6148_v16 = vpop.f32.mrf.mxu1  ;;  %v6353_v30 = vpop.f32.mrf.mxu0 }
 0x61e   :  { %v19094_v23 = vadd.f32 %v6351_v4, %v6147_v15  ;;  %v20821_v16 = vld [vmem:[#allocation181_spill] sm:$0xff] }
 0x61f   :  { %v6151_v43 = vpop.f32.mrf.mxu1  ;;  %v6356_v24 = vpop.f32.mrf.mxu0 }
 0x620   :  { %v6152_v55 = vadd.f32 %v6151_v43, %v20817_v5 }
 0x621   :  { %v6153_v6 = vpop.f32.mrf.mxu1  ;;  %v6358_v17 = vpop.f32.mrf.mxu0 }
 0x622   :  { %v19097_v29 = vadd.f32 %v6356_v24, %v6152_v55  ;;  %v20822_v17 = vld [vmem:[#allocation173_spill] sm:$0xff] }
 0x623   :  { %v6154_v1 = vpop.f32.mrf.mxu1  ;;  %v6359_v27 = vpop.f32.mrf.mxu0 }
 0x624   :  { %v6155_v31 = vadd.f32 %v6154_v1, %v20818_v39 }
 0x625   :  { %v6156_v38 = vpop.f32.mrf.mxu1  ;;  %v6361_v33 = vpop.f32.mrf.mxu0 }
 0x626   :  { %v19100_v21 = vadd.f32 %v6359_v27, %v6155_v31  ;;  %v19117_v33 = vld [vmem:[%s20823_s4 + $0x4] ss:$8 sps:$4 sm:$0xff]  }
 0x627   :  { %v6159_v12 = vpop.f32.mrf.mxu1  ;;  %v6364_v41 = vpop.f32.mrf.mxu0  ;;  %12695 = vmatprep.mubr.msk.bf16.mxu0 %vm6828_vm7, %v19117_v33 }
 0x628   :  { %v6160_v8 = vadd.f32 %v6159_v12, %v20819_v45  ;;  %v20824_v45 = vld [vmem:[#allocation174_spill] sm:$0xff] }
 0x629   :  { %v6161_v63 = vpop.f32.mrf.mxu1  ;;  %v6366_v2 = vpop.f32.mrf.mxu0 }
 0x62a   :  { %v19103_v20 = vadd.f32 %v6364_v41, %v6160_v8 }
 0x62b   :  { %v6162_v61 = vpop.f32.mrf.mxu1  ;;  %v6367_v36 = vpop.f32.mrf.mxu0 }
 0x62c   :  { %v6163_v60 = vadd.f32 %v6162_v61, %v20820_v40 }
 0x62d   :  { %v6164_v51 = vpop.f32.mrf.mxu1  ;;  %v6369_v15 = vpop.f32.mrf.mxu0 }
 0x62e   :  { %v19106_v34 = vadd.f32 %v6367_v36, %v6163_v60 }
 0x62f   :  { %v6167_v4 = vpop.f32.mrf.mxu1  ;;  %v6372_v43 = vpop.f32.mrf.mxu0 }
 0x630   :  { %v6168_v30 = vadd.f32 %v6167_v4, %v20821_v16 }
 0x631   :  { %v6169_v5 = vpop.f32.mrf.mxu1  ;;  %v6374_v24 = vpop.f32.mrf.mxu0 }
 0x632   :  { %v19109_v55 = vadd.f32 %v6372_v43, %v6168_v30 }
 0x633   :  { %v6170_v6 = vpop.f32.mrf.mxu1  ;;  %v6375_v39 = vpop.f32.mrf.mxu0 }
 0x634   :  { %v6171_v1 = vadd.f32 %v6170_v6, %v20822_v17 }
 0x635   :  { %v6172_v31 = vpop.f32.mrf.mxu1  ;;  %v6377_v38 = vpop.f32.mrf.mxu0 }
 0x636   :  { %v19112_v27 = vadd.f32 %v6375_v39, %v6171_v1 }
 0x637   :  { %v6175_v12 = vpop.f32.mrf.mxu1  ;;  %v6380_v41 = vpop.f32.mrf.mxu0 }
 0x638   :  { %v6176_v8 = vadd.f32 %v6175_v12, %v20824_v45 }
 0x639   :  { %v6177_v63 = vpop.f32.mrf.mxu1  ;;  %v6382_v61 = vpop.f32.mrf.mxu0 }
 0x63a   :  { %v19122_v2 = vadd.f32 %v6380_v41, %v6176_v8 }
 0x63b   :  { %v6178_v40 = vpop.f32.mrf.mxu1  ;;  %v6383_v36 = vpop.f32.mrf.mxu0 }
 0x63c   :  { %v6179_v60 = vadd.f32 %v6178_v40, %v18954_v58 }
 0x63d   :  { %v6180_v51 = vpop.f32.mrf.mxu1  ;;  %v6385_v4 = vpop.f32.mrf.mxu0 }
 0x63e   :  { %v19125_v15 = vadd.f32 %v6383_v36, %v6179_v60 }
 0x63f   :  { %v6183_v16 = vpop.f32.mrf.mxu1  ;;  %v6388_v43 = vpop.f32.mrf.mxu0 }
 0x640   :  { %v6184_v30 = vadd.f32 %v6183_v16, %v18959_v18 }
 0x641   :  { %v6185_v5 = vpop.f32.mrf.mxu1  ;;  %v6390_v6 = vpop.f32.mrf.mxu0 }
 0x642   :  { %v19128_v24 = vadd.f32 %v6388_v43, %v6184_v30 }
 0x643   :  { %v6186_v17 = vpop.f32.mrf.mxu1  ;;  %v6391_v39 = vpop.f32.mrf.mxu0 }
 0x644   :  { %v6187_v1 = vadd.f32 %v6186_v17, %v18963_v14 }
 0x645   :  { %v6188_v31 = vpop.f32.mrf.mxu1  ;;  %v6393_v58 = vpop.f32.mrf.mxu0 }
 0x646   :  { %v19131_v38 = vadd.f32 %v6391_v39, %v6187_v1 }
 0x647   :  { %v6191_v12 = vpop.f32.mrf.mxu1  ;;  %v6396_v8 = vpop.f32.mrf.mxu0 }
 0x648   :  { %v6192_v45 = vadd.f32 %v6191_v12, %v18968_v10 }
 0x649   :  { %v6193_v41 = vpop.f32.mrf.mxu1  ;;  %v6398_v18 = vpop.f32.mrf.mxu0 }
 0x64a   :  { %v19134_v63 = vadd.f32 %v6396_v8, %v6192_v45 }
 0x64b   :  { %v6194_v61 = vpop.f32.mrf.mxu1  ;;  %v6399_v60 = vpop.f32.mrf.mxu0 }
 0x64c   :  { %v6195_v40 = vadd.f32 %v6194_v61, %v18972_v46 }
 0x64d   :  { %v6196_v36 = vpop.f32.mrf.mxu1  ;;  %v6401_v14 = vpop.f32.mrf.mxu0 }
 0x64e   :  { %v19137_v51 = vadd.f32 %v6399_v60, %v6195_v40 }
 0x64f   :  { %v6199_v4 = vpop.f32.mrf.mxu1  ;;  %v6404_v30 = vpop.f32.mrf.mxu0 }
 0x650   :  { %v6200_v16 = vadd.f32 %v6199_v4, %v18977_v13 }
 0x651   :  { %v6201_v43 = vpop.f32.mrf.mxu1  ;;  %v6406_v10 = vpop.f32.mrf.mxu0 }
 0x652   :  { %v19140_v5 = vadd.f32 %v6404_v30, %v6200_v16 }
 0x653   :  { %v6202_v6 = vpop.f32.mrf.mxu1  ;;  %v6407_v1 = vpop.f32.mrf.mxu0 }
 0x654   :  { %v6203_v17 = vadd.f32 %v6202_v6, %v18981_v19 }
 0x655   :  { %v6204_v39 = vpop.f32.mrf.mxu1  ;;  %v6409_v46 = vpop.f32.mrf.mxu0 }
 0x656   :  { %v19143_v31 = vadd.f32 %v6407_v1, %v6203_v17  ;;  %v19160_v46 = vld [vmem:[%s20825_s9] ss:$0 sm:$0xff] }
 0x657   :  { %v6207_v58 = vpop.f32.mrf.mxu1  ;;  %v6412_v45 = vpop.f32.mrf.mxu0 }
 0x658   :  { %v6208_v12 = vadd.f32 %v6207_v58, %v18985_v42 }
 0x659   :  { %v6209_v8 = vpop.f32.mrf.mxu1  ;;  %v6414_v13 = vpop.f32.mrf.mxu0 }
 0x65a   :  { %v19146_v41 = vadd.f32 %v6412_v45, %v6208_v12 }
 0x65b   :  { %v6210_v18 = vpop.f32.mrf.mxu1  ;;  %v6415_v40 = vpop.f32.mrf.mxu0 }
 0x65c   :  { %v6211_v61 = vadd.f32 %v6210_v18, %v18989_v50 }
 0x65d   :  { %v6212_v60 = vpop.f32.mrf.mxu1  ;;  %v6417_v19 = vpop.f32.mrf.mxu0 }
 0x65e   :  { %v19149_v36 = vadd.f32 %v6415_v40, %v6211_v61 }
 0x65f   :  { %v6215_v14 = vpop.f32.mrf.mxu1  ;;  %v6420_v16 = vpop.f32.mrf.mxu0 }
 0x660   :  { %v6216_v4 = vadd.f32 %v6215_v14, %v18993_v7 }
 0x661   :  { %v6217_v30 = vpop.f32.mrf.mxu1  ;;  %v6422_v42 = vpop.f32.mrf.mxu0 }
 0x662   :  { %v19152_v43 = vadd.f32 %v6420_v16, %v6216_v4 }
 0x663   :  { %v6218_v10 = vpop.f32.mrf.mxu1  ;;  %v6423_v17 = vpop.f32.mrf.mxu0 }
 0x664   :  { %v6219_v6 = vadd.f32 %v6218_v10, %v18997_v9  ;;  %v19168_v9 = vld [vmem:[%s20826_s24] ss:$0 sm:$0xff] }
 0x665   :  { %v6220_v1 = vpop.f32.mrf.mxu1  ;;  %v6425_v50 = vpop.f32.mrf.mxu0 }
 0x666   :  { %v19155_v39 = vadd.f32 %v6423_v17, %v6219_v6 }
 0x667   :  { %v14554_v58 = vpop.f32.mrf.mxu1 }
 0x668   :  { %v6470_v7 = vadd.f32 %v14554_v58, %v19013_v35 }
 0x669   :  { %v6461_v12 = vpop.f32.mrf.mxu1 }
 0x66a   :  { %v6640_v45 = vmul.f32 %v19160_v46, %v6470_v7  ;;  %v6462_v8 = vadd.f32 %v6461_v12, %v19003_v44 }
 0x66b   :  { %v14555_v13 = vpop.f32.mrf.mxu1 }
 0x66c   :  { %v6638_v18 = vmul.f32 %v19160_v46, %v6462_v8  ;;  %v6473_v61 = vadd.f32 %v14555_v13, %v19018_v48  ;;  %v6686_v60 = vadd.f32 %v19168_v9, %v6640_v45 }
 0x66d   :  { %v6464_v40 = vpop.f32.mrf.mxu1 }
 0x66e   :  { %v6641_v35 = vmul.f32 %v19160_v46, %v6473_v61  ;;  %v6465_v19 = vadd.f32 %v6464_v40, %v19008_v54  ;;  %v6684_v44 = vadd.f32 %v19168_v9, %v6638_v18  ;;  %v6726_v10 = vmax.f32 %v6686_v60, 0.0 }
 0x66f   :  { %v14558_v14 = vpop.f32.mrf.mxu1 }
 0x670   :  { %v6687_v4 = vadd.f32 %v19168_v9, %v6641_v35  ;;  %v6639_v16 = vmul.f32 %v19160_v46, %v6465_v19  ;;  %v6486_v30 = vadd.f32 %v14558_v14, %v19033_v26  ;;  %v6724_v54 = vmax.f32 %v6684_v44, 0.0 }
 0x671   :  { %v6477_v42 = vpop.f32.mrf.mxu1 }
 0x672   :  { %v6727_v6 = vmax.f32 %v6687_v4, 0.0  ;;  %v6685_v48 = vadd.f32 %v19168_v9, %v6639_v16  ;;  %v6478_v17 = vadd.f32 %v6477_v42, %v19023_v28  ;;  %v6644_v1 = vmul.f32 %v19160_v46, %v6486_v30 }
 0x673   :  { %v14559_v50 = vpop.f32.mrf.mxu1 }
 0x674   :  { %v19182_v58 = vpack.c.bf16 %v6727_v6, %v6726_v10  ;;  %v6725_v7 = vmax.f32 %v6685_v48, 0.0  ;;  %v6642_v12 = vmul.f32 %v19160_v46, %v6478_v17  ;;  %v6489_v45 = vadd.f32 %v14559_v50, %v19038_v32 }
 0x675   :  { %v6480_v8 = vpop.f32.mrf.mxu1  ;;  %v6690_v18 = vadd.f32 %v19168_v9, %v6644_v1 }
 0x676   :  { %v19186_v26 = vpack.c.bf16 %v6725_v7, %v6724_v54  ;;  %v6481_v13 = vadd.f32 %v6480_v8, %v19028_v11  ;;  %v6645_v28 = vmul.f32 %v19160_v46, %v6489_v45  ;;  %v6688_v40 = vadd.f32 %v19168_v9, %v6642_v12 }
 0x677   :  { %v14562_v61 = vpop.f32.mrf.mxu1  ;;  %v6730_v4 = vmax.f32 %v6690_v18, 0.0 }
 0x678   :  { %v6643_v60 = vmul.f32 %v19160_v46, %v6481_v13  ;;  %v6502_v35 = vadd.f32 %v14562_v61, %v19053_v22  ;;  %v6691_v19 = vadd.f32 %v19168_v9, %v6645_v28  ;;  %v6728_v42 = vmax.f32 %v6688_v40, 0.0 }
 0x679   :  { %v6493_v14 = vpop.f32.mrf.mxu1 }
 0x67a   :  { %v6689_v32 = vadd.f32 %v19168_v9, %v6643_v60  ;;  %v6648_v44 = vmul.f32 %v19160_v46, %v6502_v35  ;;  %v6494_v11 = vadd.f32 %v6493_v14, %v19043_v57  ;;  %v6731_v16 = vmax.f32 %v6691_v19, 0.0 }
 0x67b   :  { %v14563_v30 = vpop.f32.mrf.mxu1 }
 0x67c   :  { %v6729_v10 = vmax.f32 %v6689_v32, 0.0  ;;  %v6505_v6 = vadd.f32 %v14563_v30, %v19058_v56  ;;  %v19199_v48 = vpack.c.bf16 %v6731_v16, %v6730_v4  ;;  %v6646_v22 = vmul.f32 %v19160_v46, %v6494_v11 }
 0x67d   :  { %v6496_v17 = vpop.f32.mrf.mxu1  ;;  %v6694_v50 = vadd.f32 %v19168_v9, %v6648_v44 }
 0x67e   :  { %v19202_v1 = vpack.c.bf16 %v6729_v10, %v6728_v42  ;;  %v6649_v54 = vmul.f32 %v19160_v46, %v6505_v6  ;;  %v6497_v57 = vadd.f32 %v6496_v17, %v19048_v3  ;;  %v6692_v56 = vadd.f32 %v19168_v9, %v6646_v22 }
 0x67f   :  { %v14566_v7 = vpop.f32.mrf.mxu1  ;;  %v6734_v18 = vmax.f32 %v6694_v50, 0.0 }
 0x680   :  { %v6695_v12 = vadd.f32 %v19168_v9, %v6649_v54  ;;  %v6518_v45 = vadd.f32 %v14566_v7, %v19072_v47  ;;  %v6647_v8 = vmul.f32 %v19160_v46, %v6497_v57  ;;  %v6732_v47 = vmax.f32 %v6692_v56, 0.0 }
 0x681   :  { %v6509_v13 = vpop.f32.mrf.mxu1 }
 0x682   :  { %v6735_v28 = vmax.f32 %v6695_v12, 0.0  ;;  %v6652_v61 = vmul.f32 %v19160_v46, %v6518_v45  ;;  %v6510_v40 = vadd.f32 %v6509_v13, %v19063_v52  ;;  %v6693_v60 = vadd.f32 %v19168_v9, %v6647_v8 }
 0x683   :  { %v14567_v35 = vpop.f32.mrf.mxu1 }
 0x684   :  { %v6777_v3 = vpack.c.bf16 %v6735_v28, %v6734_v18  ;;  %v6650_v19 = vmul.f32 %v19160_v46, %v6510_v40  ;;  %v6521_v14 = vadd.f32 %v14567_v35, %v19076_v59  ;;  %v6733_v32 = vmax.f32 %v6693_v60, 0.0 }
 0x685   :  { %v6512_v44 = vpop.f32.mrf.mxu1  ;;  %v6698_v11 = vadd.f32 %v19168_v9, %v6652_v61  ;;  %v20827_v60 = vmov 0  }
 0x686   :  { %v6653_v4 = vmul.f32 %v19160_v46, %v6521_v14  ;;  %v6513_v16 = vadd.f32 %v6512_v44, %v19068_v62  ;;  %v6776_v30 = vpack.c.bf16 %v6733_v32, %v6732_v47  ;;  %v6696_v52 = vadd.f32 %v19168_v9, %v6650_v19 }
 0x687   :  { %v14570_v42 = vpop.f32.mrf.mxu1  ;;  %v6738_v17 = vmax.f32 %v6698_v11, 0.0 }
 0x688   :  { %v6699_v10 = vadd.f32 %v19168_v9, %v6653_v4  ;;  %v6651_v6 = vmul.f32 %v19160_v46, %v6513_v16  ;;  %v6534_v22 = vadd.f32 %v14570_v42, %v19085_v49  ;;  %v6736_v12 = vmax.f32 %v6696_v52, 0.0 }
 0x689   :  { %v6525_v59 = vpop.f32.mrf.mxu1 }
 0x68a   :  { %v6739_v50 = vmax.f32 %v6699_v10, 0.0  ;;  %v6697_v54 = vadd.f32 %v19168_v9, %v6651_v6  ;;  %v6526_v57 = vadd.f32 %v6525_v59, %v19079_v0  ;;  %v6656_v7 = vmul.f32 %v19160_v46, %v6534_v22 }
 0x68b   :  { %v14571_v62 = vpop.f32.mrf.mxu1 }
 0x68c   :  { %v6779_v45 = vpack.c.bf16 %v6739_v50, %v6738_v17  ;;  %v6737_v56 = vmax.f32 %v6697_v54, 0.0  ;;  %v6654_v8 = vmul.f32 %v19160_v46, %v6526_v57  ;;  %v6537_v13 = vadd.f32 %v14571_v62, %v19088_v37 }
 0x68d   :  { %v6528_v18 = vpop.f32.mrf.mxu1  ;;  %v6702_v61 = vadd.f32 %v19168_v9, %v6656_v7 }
 0x68e   :  { %v6778_v28 = vpack.c.bf16 %v6737_v56, %v6736_v12  ;;  %v6529_v49 = vadd.f32 %v6528_v18, %v19082_v25  ;;  %6846 = vmatpush1.bf16.msra.mxu0 %v6779_v45  ;;  %v6657_v40 = vmul.f32 %v19160_v46, %v6537_v13  ;;  %v6700_v35 = vadd.f32 %v19168_v9, %v6654_v8 }
 0x68f   :  { %v14574_v0 = vpop.f32.mrf.mxu1  ;;  %6847 = vmatprep.subr.bf16.mxu0 %v20827_v60  ;;  %v6742_v32 = vmax.f32 %v6702_v61, 0.0 }
 0x690   :  { %v6655_v19 = vmul.f32 %v19160_v46, %v6529_v49  ;;  %v6703_v14 = vadd.f32 %v19168_v9, %v6657_v40  ;;  %v6740_v11 = vmax.f32 %v6700_v35, 0.0 }
 0x691   :  { %v6541_v47 = vpop.f32.mrf.mxu1 }
 0x692   :  { %v6701_v37 = vadd.f32 %v19168_v9, %v6655_v19  ;;  %6848 = vmatpush1.bf16.msra.mxu0 %v6778_v28  ;;  %v6743_v25 = vmax.f32 %v6703_v14, 0.0 }
 0x693   :  { %v14575_v44 = vpop.f32.mrf.mxu1  ;;  %6849 = vmatprep.subr.bf16.mxu0 %v20827_v60 }
 0x694   :  { %v6741_v4 = vmax.f32 %v6701_v37, 0.0  ;;  %v19237_v42 = vpack.c.bf16 %v6743_v25, %v6742_v32 }
 0x695   :  { %v6543_v16 = vpop.f32.mrf.mxu1 }
 0x696   :  { %v19239_v52 = vpack.c.bf16 %v6741_v4, %v6740_v11  ;;  %6850 = vmatpush1.bf16.msra.mxu0 %v6777_v3 }
 0x697   :  { %v14578_v10 = vpop.f32.mrf.mxu1  ;;  %6851 = vmatprep.subr.bf16.mxu0 %v20827_v60 }
 0x698   :  { %v6562_v6 = vadd.f32 %v14578_v10, %v19097_v29 }
 0x699   :  { %v6553_v22 = vpop.f32.mrf.mxu1 }
 0x69a   :  { %v6660_v59 = vmul.f32 %v19160_v46, %v6562_v6  ;;  %v6554_v17 = vadd.f32 %v6553_v22, %v19091_v53  ;;  %6852 = vmatpush1.bf16.msra.mxu0 %v6776_v30 }
 0x69b   :  { %v14579_v50 = vpop.f32.mrf.mxu1  ;;  %6853 = vmatprep.subr.bf16.mxu0 %v20827_v60 }
 0x69c   :  { %v6658_v54 = vmul.f32 %v19160_v46, %v6554_v17  ;;  %v6565_v57 = vadd.f32 %v14579_v50, %v19100_v21  ;;  %v6706_v3 = vadd.f32 %v19168_v9, %v6660_v59 }
 0x69d   :  { %v6556_v7 = vpop.f32.mrf.mxu1 }
 0x69e   :  { %v6661_v62 = vmul.f32 %v19160_v46, %v6565_v57  ;;  %v6557_v29 = vadd.f32 %v6556_v7, %v19094_v23  ;;  %6854 = vmatpush1.bf16.msra.mxu0 %v19199_v48  ;;  %v6704_v53 = vadd.f32 %v19168_v9, %v6658_v54  ;;  %v6746_v8 = vmax.f32 %v6706_v3, 0.0 }
 0x69f   :  { %v14582_v12 = vpop.f32.mrf.mxu1  ;;  %6855 = vmatprep.subr.bf16.mxu0 %v20827_v60  ;;  %v6843_v54 = vsel %vm4440_vm1, %v19237_v42, 0 }
 0x6a0   :  { %v6707_v30 = vadd.f32 %v19168_v9, %v6661_v62  ;;  %v6659_v45 = vmul.f32 %v19160_v46, %v6557_v29  ;;  %v6578_v21 = vadd.f32 %v14582_v12, %v19109_v55  ;;  %v6744_v49 = vmax.f32 %v6704_v53, 0.0  ;;  %v19301_v53 = vld [vmem:[%s20823_s4] ss:$8 sps:$4 sm:$0xff]  }
 0x6a1   :  { %v6569_v56 = vpop.f32.mrf.mxu1 }
 0x6a2   :  { %v6747_v13 = vmax.f32 %v6707_v30, 0.0  ;;  %v6705_v18 = vadd.f32 %v19168_v9, %v6659_v45  ;;  %v6570_v23 = vadd.f32 %v6569_v56, %v19103_v20  ;;  %6856 = vmatpush1.bf16.msra.mxu0 %v19202_v1  ;;  %v6664_v48 = vmul.f32 %v19160_v46, %v6578_v21 }
 0x6a3   :  { %v14583_v28 = vpop.f32.mrf.mxu1  ;;  %6857 = vmatprep.subr.bf16.mxu0 %v20827_v60 }
 0x6a4   :  { %v19262_v61 = vpack.c.bf16 %v6747_v13, %v6746_v8  ;;  %v6745_v40 = vmax.f32 %v6705_v18, 0.0  ;;  %v6662_v55 = vmul.f32 %v19160_v46, %v6570_v23  ;;  %v6581_v0 = vadd.f32 %v14583_v28, %v19112_v27 }
 0x6a5   :  { %v6572_v35 = vpop.f32.mrf.mxu1  ;;  %v6710_v1 = vadd.f32 %v19168_v9, %v6664_v48 }
 0x6a6   :  { %v19266_v19 = vpack.c.bf16 %v6745_v40, %v6744_v49  ;;  %v6573_v20 = vadd.f32 %v6572_v35, %v19106_v34  ;;  %6858 = vmatpush1.bf16.msra.mxu0 %v19182_v58  ;;  %v6665_v14 = vmul.f32 %v19160_v46, %v6581_v0  ;;  %v6708_v37 = vadd.f32 %v19168_v9, %v6662_v55 }
 0x6a7   :  { %v14586_v47 = vpop.f32.mrf.mxu1  ;;  %6859 = vmatprep.subr.bf16.mxu0 %v20827_v60  ;;  %v6750_v4 = vmax.f32 %v6710_v1, 0.0 }
 0x6a8   :  { %v6663_v32 = vmul.f32 %v19160_v46, %v6573_v20  ;;  %v6594_v27 = vadd.f32 %v14586_v47, %v19128_v24  ;;  %v6711_v25 = vadd.f32 %v19168_v9, %v6665_v14  ;;  %v6748_v6 = vmax.f32 %v6708_v37, 0.0  ;;  %v15015_v47 = vld [vmem:[%s20823_s4 + $0x10] ss:$8 sps:$4 sm:$0xff]  }
 0x6a9   :  { %v6585_v44 = vpop.f32.mrf.mxu1 }
 0x6aa   :  { %v6709_v34 = vadd.f32 %v19168_v9, %v6663_v32  ;;  %v6668_v58 = vmul.f32 %v19160_v46, %v6594_v27  ;;  %v6586_v11 = vadd.f32 %v6585_v44, %v19122_v2  ;;  %6860 = vmatpush1.bf16.msra.mxu0 %v19186_v26  ;;  %v6751_v16 = vmax.f32 %v6711_v25, 0.0  ;;  %v15016_v25 = vld [vmem:[%s20823_s4 + $0x24] ss:$8 sps:$4 sm:$0xff]  }
 0x6ab   :  { %v14587_v10 = vpop.f32.mrf.mxu1  ;;  %6873 = vmatprep.subr.bf16.mxu0 %v20827_v60 }
 0x6ac   :  { %v6749_v22 = vmax.f32 %v6709_v34, 0.0  ;;  %v6597_v24 = vadd.f32 %v14587_v10, %v19131_v38  ;;  %v19283_v59 = vpack.c.bf16 %v6751_v16, %v6750_v4  ;;  %v6666_v17 = vmul.f32 %v19160_v46, %v6586_v11 }
 0x6ad   :  { %v6588_v50 = vpop.f32.mrf.mxu1  ;;  %v6714_v26 = vadd.f32 %v19168_v9, %v6668_v58 }
 0x6ae   :  { %v19288_v2 = vpack.c.bf16 %v6749_v22, %v6748_v6  ;;  %v6669_v57 = vmul.f32 %v19160_v46, %v6597_v24  ;;  %6874 = vmatpush2.bf16.msra.mxu0 %v6843_v54  ;;  %v6589_v7 = vadd.f32 %v6588_v50, %v19125_v15  ;;  %v6712_v29 = vadd.f32 %v19168_v9, %v6666_v17  ;;  %v15018_v54 = vld [vmem:[%s20823_s4 + $0x20] ss:$8 sps:$4 sm:$0xff]  }
 0x6af   :  { %v14590_v3 = vpop.f32.mrf.mxu1  ;;  %6875 = vmatprep.subr.bf16.mxu0 %v20827_v60  ;;  %v6754_v30 = vmax.f32 %v6714_v26, 0.0  ;;  %v15019_v26 = vld [vmem:[%s20823_s4 + $0x34] ss:$8 sps:$4 sm:$0xff]  }
 0x6b0   :  { %v6715_v38 = vadd.f32 %v19168_v9, %v6669_v57  ;;  %v6610_v62 = vadd.f32 %v14590_v3, %v19140_v5  ;;  %v6667_v42 = vmul.f32 %v19160_v46, %v6589_v7  ;;  %v19309_v5 = vld [vmem:[%s20823_s4 + $0x14] ss:$8 sps:$4 sm:$0xff]   ;;  %v6752_v48 = vmax.f32 %v6712_v29, 0.0 }
 0x6b1   :  { %v6601_v12 = vpop.f32.mrf.mxu1 }
 0x6b2   :  { %v6755_v45 = vmax.f32 %v6715_v38, 0.0  ;;  %v6672_v15 = vmul.f32 %v19160_v46, %v6610_v62  ;;  %v6602_v21 = vadd.f32 %v6601_v12, %v19134_v63  ;;  %6876 = vmatpush2.bf16.msra.mxu0 %v19239_v52  ;;  %v6713_v56 = vadd.f32 %v19168_v9, %v6667_v42 }
 0x6b3   :  { %v14591_v8 = vpop.f32.mrf.mxu1  ;;  %6953 = vmatprep.subr.bf16.mxu0 %v20827_v60 }
 0x6b4   :  { %v6787_v13 = vpack.c.bf16 %v6755_v45, %v6754_v30  ;;  %v6670_v18 = vmul.f32 %v19160_v46, %v6602_v21  ;;  %v6613_v23 = vadd.f32 %v14591_v8, %v19143_v31  ;;  %v6753_v28 = vmax.f32 %v6713_v56, 0.0 }
 0x6b5   :  { %v6604_v63 = vpop.f32.mrf.mxu1  ;;  %6878 = vmatmul.mubr.bf16.vlgmr.msra.gmra.mxu0 %v19301_v53  ;;  %v6718_v52 = vadd.f32 %v19168_v9, %v6672_v15 }
 0x6b6   :  { %v6673_v49 = vmul.f32 %v19160_v46, %v6613_v23  ;;  %v6605_v40 = vadd.f32 %v6604_v63, %v19137_v51  ;;  %12696 = vmatprep.mubr.msk.bf16.mxu0 %vm6828_vm7, %v19309_v5  ;;  %v6786_v55 = vpack.c.bf16 %v6753_v28, %v6752_v48  ;;  %v6716_v35 = vadd.f32 %v19168_v9, %v6670_v18 }
 0x6b7   :  { %v14594_v0 = vpop.f32.mrf.mxu1  ;;  %v6758_v37 = vmax.f32 %v6718_v52, 0.0 }
 0x6b8   :  { %v6719_v31 = vadd.f32 %v19168_v9, %v6673_v49  ;;  %v6671_v20 = vmul.f32 %v19160_v46, %v6605_v40  ;;  %v6626_v1 = vadd.f32 %v14594_v0, %v19152_v43  ;;  %v6756_v58 = vmax.f32 %v6716_v35, 0.0 }
 0x6b9   :  { %v6617_v14 = vpop.f32.mrf.mxu1 }
 0x6ba   :  { %v6759_v51 = vmax.f32 %v6719_v31, 0.0  ;;  %v6717_v32 = vadd.f32 %v19168_v9, %v6671_v20  ;;  %v6618_v27 = vadd.f32 %v6617_v14, %v19146_v41  ;;  %v6676_v44 = vmul.f32 %v19160_v46, %v6626_v1 }
 0x6bb   :  { %v14595_v34 = vpop.f32.mrf.mxu1 }
 0x6bc   :  { %v6789_v43 = vpack.c.bf16 %v6759_v51, %v6758_v37  ;;  %v6757_v11 = vmax.f32 %v6717_v32, 0.0  ;;  %v6674_v4 = vmul.f32 %v19160_v46, %v6618_v27  ;;  %v6629_v16 = vadd.f32 %v14595_v34, %v19155_v39 }
 0x6bd   :  { %v6620_v10 = vpop.f32.mrf.mxu1  ;;  %6886 = vmatmul.mubr.bf16.gmra.mxu0 %v15015_v47  ;;  %v6722_v41 = vadd.f32 %v19168_v9, %v6676_v44 }
 0x6be   :  { %v6788_v6 = vpack.c.bf16 %v6757_v11, %v6756_v58  ;;  %v6621_v22 = vadd.f32 %v6620_v10, %v19149_v36  ;;  %6954 = vmatpush1.bf16.msra.mxu0 %v6789_v43  ;;  %12697 = vmatprep.mubr.msk.bf16.mxu0 %vm6828_vm7, %v15016_v25  ;;  %v6677_v24 = vmul.f32 %v19160_v46, %v6629_v16 }
 0x6bf   :  { %6955 = vmatprep.subr.bf16.mxu0 %v20827_v60  ;;  %v6720_v17 = vadd.f32 %v19168_v9, %v6674_v4  ;;  %v6762_v57 = vmax.f32 %v6722_v41, 0.0 }
 0x6c0   :  { %v6675_v50 = vmul.f32 %v19160_v46, %v6621_v22  ;;  %v6723_v39 = vadd.f32 %v19168_v9, %v6677_v24 }
 0x6c1   :  { %v6760_v3 = vmax.f32 %v6720_v17, 0.0 }
 0x6c2   :  { %v6721_v36 = vadd.f32 %v19168_v9, %v6675_v50  ;;  %6956 = vmatpush1.bf16.msra.mxu0 %v6788_v6  ;;  %v6763_v7 = vmax.f32 %v6723_v39, 0.0  ;;  %v15021_v9 = vld [vmem:[%s20823_s4 + $0x30] ss:$8 sps:$4 sm:$0xff]  }
 0x6c3   :  { %6957 = vmatprep.subr.bf16.mxu0 %v20827_v60 }
 0x6c4   :  { %v6761_v38 = vmax.f32 %v6721_v36, 0.0  ;;  %v6791_v46 = vpack.c.bf16 %v6763_v7, %v6762_v57 }
 0x6c5   :  { %6894 = vmatmul.mubr.bf16.gmra.mxu0 %v15018_v54 }
 0x6c6   :  { %v6790_v62 = vpack.c.bf16 %v6761_v38, %v6760_v3  ;;  %6958 = vmatpush1.bf16.msra.mxu0 %v6787_v13  ;;  %12698 = vmatprep.mubr.msk.bf16.mxu0 %vm6828_vm7, %v15019_v26  ;;  %v6951_v29 = vsel %vm4440_vm1, %v6791_v46, 0 }
 0x6c7   :  { %6959 = vmatprep.subr.bf16.mxu0 %v20827_v60 }
 0x6ca   :  { %6960 = vmatpush1.bf16.msra.mxu0 %v6786_v55 }
 0x6cb   :  { %6961 = vmatprep.subr.bf16.mxu0 %v20827_v60 }
 0x6cd   :  { %6902 = vmatmul.mubr.bf16.gmra.mxu0 %v15021_v9 }
 0x6ce   :  { %6962 = vmatpush1.bf16.msra.mxu0 %v19283_v59  ;;  %12707 = vmatprep.mubr.msk.bf16.mxu0 %vm6828_vm7, %v19117_v33 }
 0x6cf   :  { %6963 = vmatprep.subr.bf16.mxu0 %v20827_v60 }
 0x6d2   :  { %6964 = vmatpush1.bf16.msra.mxu0 %v19288_v2 }
 0x6d3   :  { %6965 = vmatprep.subr.bf16.mxu0 %v20827_v60 }
 0x6d6   :  { %6966 = vmatpush1.bf16.msra.mxu0 %v19262_v61 }
 0x6d7   :  { %6967 = vmatprep.subr.bf16.mxu0 %v20827_v60 }
 0x6da   :  { %6968 = vmatpush1.bf16.msra.mxu0 %v19266_v19 }
 0x6db   :  { %6981 = vmatprep.subr.bf16.mxu0 %v20827_v60 }
 0x6de   :  { %6982 = vmatpush2.bf16.msra.mxu0 %v6951_v29 }
 0x6df   :  { %6983 = vmatprep.subr.bf16.mxu0 %v20827_v60 }
 0x6e2   :  { %6984 = vmatpush2.bf16.msra.mxu0 %v6790_v62 }
 0x6e5   :  { %6986 = vmatmul.mubr.bf16.vlgmr.msra.gmra.mxu0 %v19301_v53 }
 0x6e6   :  { %12708 = vmatprep.mubr.msk.bf16.mxu0 %vm6828_vm7, %v19309_v5 }
 0x6ed   :  { %6994 = vmatmul.mubr.bf16.gmra.mxu0 %v15015_v47 }
 0x6ee   :  { %12709 = vmatprep.mubr.msk.bf16.mxu0 %vm6828_vm7, %v15016_v25 }
 0x6f5   :  { %7002 = vmatmul.mubr.bf16.gmra.mxu0 %v15018_v54 }
 0x6f6   :  { %12710 = vmatprep.mubr.msk.bf16.mxu0 %vm6828_vm7, %v15019_v26 }
 0x6fd   :  { %7010 = vmatmul.mubr.bf16.gmra.mxu0 %v15021_v9 }
 0x775   :  { %v6879_v33 = vpop.f32.mrf.mxu0 }
 0x777   :  { %v6881_v61 = vpop.f32.mrf.mxu0 }
 0x779   :  { %v6882_v19 = vpop.f32.mrf.mxu0 }
 0x77a   :  { %v13385_v59 = vpack.c.bf16 %v6882_v19, %v6879_v33 }
 0x77b   :  { %v6884_v2 = vpop.f32.mrf.mxu0 }
 0x77c   :  { %13386 = vst [vmem:[#allocation3] sm:$0xff] %v13385_v59  }
 0x77d   :  { %v6887_v42 = vpop.f32.mrf.mxu0 }
 0x77f   :  { %v6889_v12 = vpop.f32.mrf.mxu0 }
 0x781   :  { %v6890_v30 = vpop.f32.mrf.mxu0 }
 0x782   :  { %v13390_v53 = vpack.c.bf16 %v6890_v30, %v6887_v42 }
 0x783   :  { %v6892_v45 = vpop.f32.mrf.mxu0 }
 0x784   :  { %13475 = vst [vmem:[#allocation3 + $0x8] sm:$0xff] %v13390_v53  }
 0x785   :  { %v6895_v15 = vpop.f32.mrf.mxu0 }
 0x787   :  { %v6897_v21 = vpop.f32.mrf.mxu0 }
 0x789   :  { %v6898_v5 = vpop.f32.mrf.mxu0 }
 0x78a   :  { %v13395_v56 = vpack.c.bf16 %v6898_v5, %v6895_v15 }
 0x78b   :  { %v6900_v8 = vpop.f32.mrf.mxu0 }
 0x78c   :  { %13476 = vst [vmem:[#allocation3 + $0x10] sm:$0xff] %v13395_v56  }
 0x78d   :  { %v6903_v13 = vpop.f32.mrf.mxu0 }
 0x78f   :  { %v6905_v18 = vpop.f32.mrf.mxu0 }
 0x791   :  { %v6906_v23 = vpop.f32.mrf.mxu0 }
 0x792   :  { %v13400_v48 = vpack.c.bf16 %v6906_v23, %v6903_v13 }
 0x793   :  { %v6908_v28 = vpop.f32.mrf.mxu0 }
 0x794   :  { %13477 = vst [vmem:[#allocation3 + $0x18] sm:$0xff] %v13400_v48  }
 0x7a5   :  { %v6987_v63 = vpop.f32.mrf.mxu0 }
 0x7a7   :  { %v6989_v52 = vpop.f32.mrf.mxu0 }
 0x7a9   :  { %v6990_v49 = vpop.f32.mrf.mxu0 }
 0x7aa   :  { %v13405_v40 = vpack.c.bf16 %v6990_v49, %v6987_v63 }
 0x7ab   :  { %v6992_v55 = vpop.f32.mrf.mxu0 }
 0x7ac   :  { %13478 = vst [vmem:[#allocation3 + $0x20] sm:$0xff] %v13405_v40  }
 0x7ad   :  { %v6995_v0 = vpop.f32.mrf.mxu0 }
 0x7af   :  { %v6997_v35 = vpop.f32.mrf.mxu0 }
 0x7b1   :  { %v6998_v31 = vpop.f32.mrf.mxu0 }
 0x7b2   :  { %v13410_v20 = vpack.c.bf16 %v6998_v31, %v6995_v0 }
 0x7b3   :  { %v7000_v1 = vpop.f32.mrf.mxu0 }
 0x7b4   :  { %13479 = vst [vmem:[#allocation3 + $0x28] sm:$0xff] %v13410_v20  }
 0x7b5   :  { %v7003_v14 = vpop.f32.mrf.mxu0 }
 0x7b7   :  { %v7005_v47 = vpop.f32.mrf.mxu0 }
 0x7b9   :  { %v7006_v37 = vpop.f32.mrf.mxu0 }
 0x7ba   :  { %v13415_v51 = vpack.c.bf16 %v7006_v37, %v7003_v14 }
 0x7bb   :  { %v7008_v32 = vpop.f32.mrf.mxu0 }
 0x7bc   :  { %13480 = vst [vmem:[#allocation3 + $0x30] sm:$0xff] %v13415_v51  }
 0x7bd   :  { %v7011_v27 = vpop.f32.mrf.mxu0 }
 0x7bf   :  { %v7013_v25 = vpop.f32.mrf.mxu0 }
 0x7c1   :  { %v7014_v44 = vpop.f32.mrf.mxu0 }
 0x7c2   :  { %v13420_v34 = vpack.c.bf16 %v7014_v44, %v7011_v27 }
 0x7c3   :  { %v7016_v58 = vpop.f32.mrf.mxu0 }
 0x7c4   :  { %13481 = vst [vmem:[#allocation3 + $0x38] sm:$0xff] %v13420_v34  }
 0x7c5   :  { %15344 = dma.done.wait [#allocation13 + $0x1], 9216 }
 0x7c6   :  { %15345 = vsyncadd [#allocation13 + $0x1], 4294958080  ;;  %v15026_v43 = vld [vmem:[#allocation8 + $0x78] sm:$0xff]   ;;  %v15030_v10 = vld [vmem:[#allocation8 + $0x70] sm:$0xff]   ;;  %vm7403_vm8 = vsmask.f32 4352 }
 0x7c7   :  { %v15027_v11 = vld [vmem:[#allocation8 + $0xf8] sm:$0xff]   ;;  %13934 = vmatprep.subr.bf16.mxu1 %v15026_v43  ;;  %v15031_v6 = vld [vmem:[#allocation8 + $0xf0] sm:$0xff]   ;;  %v15034_v24 = vld [vmem:[#allocation8 + $0x68] sm:$0xff]   ;;  %vm15358_vm9 = vmmov 0   ;;  %s20828_s30 = sld [smem:[#allocation198_spill]]  ;;  %vm8567_vm10 = vcmask 375808  }
 0x7c8   :  { %v15028_v4 = vld [vmem:[#allocation8 + $0x38] sm:$0xff]   ;;  %13992 = vmatprep.subr.bf16.mxu0 %v15027_v11  ;;  %v15032_v22 = vld [vmem:[#allocation8 + $0x30] sm:$0xff]   ;;  %v15035_v17 = vld [vmem:[#allocation8 + $0xe8] sm:$0xff]   ;;  %s20829_s0 = sld [smem:[#allocation196_spill]] }
 0x7c9   :  { %v15029_v16 = vld [vmem:[#allocation8 + $0xb8] sm:$0xff]   ;;  %13935 = vmatpush3.bf16.msra.mxu1 %v15028_v4  ;;  %v15033_v41 = vld [vmem:[#allocation8 + $0xb0] sm:$0xff]   ;;  %v15036_v50 = vld [vmem:[#allocation8 + $0x28] sm:$0xff]   ;;  %s20830_s23 = sld [smem:[#allocation197_spill]] }
 0x7ca   :  { %13993 = vmatpush3.bf16.msra.mxu0 %v15029_v16  ;;  %13936 = vmatprep.subr.bf16.mxu1 %v15030_v10  ;;  %v15037_v39 = vld [vmem:[#allocation8 + $0xa8] sm:$0xff]   ;;  %v15038_v54 = vld [vmem:[#allocation8 + $0x60] sm:$0xff]   ;;  %v15042_v7 = vld [vmem:[#allocation8 + $0x58] sm:$0xff]  }
 0x7cb   :  { %13994 = vmatprep.subr.bf16.mxu0 %v15031_v6  ;;  %v15039_v36 = vld [vmem:[#allocation8 + $0xe0] sm:$0xff]   ;;  %v15043_v3 = vld [vmem:[#allocation8 + $0xd8] sm:$0xff]   ;;  %v15046_v62 = vld [vmem:[#allocation8 + $0x50] sm:$0xff]  }
 0x7cc   :  { %v15040_v26 = vld [vmem:[#allocation8 + $0x20] sm:$0xff]   ;;  %v15044_v38 = vld [vmem:[#allocation8 + $0x18] sm:$0xff]   ;;  %v15047_v9 = vld [vmem:[#allocation8 + $0xd0] sm:$0xff]  }
 0x7cd   :  { %13937 = vmatpush3.bf16.msra.mxu1 %v15032_v22  ;;  %v15041_v57 = vld [vmem:[#allocation8 + $0xa0] sm:$0xff]   ;;  %v15045_v46 = vld [vmem:[#allocation8 + $0x98] sm:$0xff]   ;;  %v15048_v29 = vld [vmem:[#allocation8 + $0x10] sm:$0xff]  }
 0x7ce   :  { %13995 = vmatpush3.bf16.msra.mxu0 %v15033_v41  ;;  %13938 = vmatprep.subr.bf16.mxu1 %v15034_v24  ;;  %v15049_v33 = vld [vmem:[#allocation8 + $0x90] sm:$0xff]   ;;  %v15050_v61 = vld [vmem:[#allocation8 + $0x48] sm:$0xff]   ;;  %v15054_v42 = vld [vmem:[#allocation8 + $0x40] sm:$0xff]  }
 0x7cf   :  { %13996 = vmatprep.subr.bf16.mxu0 %v15035_v17  ;;  %v15051_v19 = vld [vmem:[#allocation8 + $0xc8] sm:$0xff]   ;;  %v15055_v12 = vld [vmem:[#allocation8 + $0xc0] sm:$0xff]   ;;  %v7206_v45 = vld [vmem:[#allocation3] sm:$0xf] }
 0x7d0   :  { %v15052_v59 = vld [vmem:[#allocation8 + $0x8] sm:$0xff]   ;;  %v15056_v30 = vld [vmem:[#allocation8] sm:$0xff]   ;;  %v19375_v15 = vld [vmem:[#allocation3 + $0x4] sm:$0xf] }
 0x7d1   :  { %13939 = vmatpush3.bf16.msra.mxu1 %v15036_v50  ;;  %v15053_v2 = vld [vmem:[#allocation8 + $0x88] sm:$0xff]   ;;  %v15057_v53 = vld [vmem:[#allocation8 + $0x80] sm:$0xff]   ;;  %v19377_v21 = vld [vmem:[#allocation3 + $0x8] sm:$0xf]  ;;  %v12719_v56 = vcombine.low %v7206_v45, %v19375_v15 }
 0x7d2   :  { %13997 = vmatpush3.bf16.msra.mxu0 %v15037_v39  ;;  %13940 = vmatprep.subr.bf16.mxu1 %v15038_v54  ;;  %v19379_v5 = vld [vmem:[#allocation3 + $0xc] sm:$0xf]  ;;  %v7222_v8 = vld [vmem:[#allocation3] sm:$0x8]  ;;  %v19390_v28 = vld [vmem:[#allocation3 + $0x10] sm:$0xf] }
 0x7d3   :  { %13998 = vmatprep.subr.bf16.mxu0 %v15039_v36  ;;  %v7221_v13 = vld [vmem:[#allocation3] sm:$0xe]  ;;  %v19384_v18 = vcombine.low %v19377_v21, %v19379_v5  ;;  %v19387_v23 = vcombine.low %v7222_v8, %v19375_v15  ;;  %v19392_v63 = vld [vmem:[#allocation3 + $0x14] sm:$0xf]  ;;  %v7288_v52 = vshrl.u32 %v12719_v56, 16  ;;  %v7290_v49 = vshll.u32 %v12719_v56, 16 }
 0x7d4   :  { %v12727_v48 = vcombine.low %v7221_v13, %v19375_v15  ;;  %v19394_v40 = vld [vmem:[#allocation3 + $0x18] sm:$0xf]  ;;  %v19401_v31 = vcombine.low %v19390_v28, %v19392_v63  ;;  %v19403_v20 = vld [vmem:[#allocation3 + $0x1c] sm:$0xf]  ;;  %v15065_v32 = vld [vmem:[#allocation8 + $0x178] sm:$0xff]  }
 0x7d5   :  { %13941 = vmatpush3.bf16.msra.mxu1 %v15040_v26  ;;  %v7295_v55 = vshll.u32 %v19384_v18, 16  ;;  %v7378_v0 = vrot.slane %v19387_v23, 3  ;;  %v7379_v35 = vrot.slane %v19384_v18, 3  ;;  %v7292_v1 = vrot.slane %v7290_v49, 1  ;;  %v19411_v34 = vld [vmem:[#allocation3 + $0x20] sm:$0xf] }
 0x7d6   :  { %13999 = vmatpush3.bf16.msra.mxu0 %v15041_v57  ;;  %13942 = vmatprep.subr.bf16.mxu1 %v15042_v7  ;;  %v7352_v14 = vrot.slane %v12727_v48, 1  ;;  %v7353_v47 = vrot.slane %v19384_v18, 1  ;;  %v7299_v44 = vshrl.u32 %v19384_v18, 16  ;;  %v19413_v58 = vld [vmem:[#allocation3 + $0x24] sm:$0xf]  ;;  %v7303_v43 = vshll.u32 %v19401_v31, 16 }
 0x7d7   :  { %14000 = vmatprep.subr.bf16.mxu0 %v15043_v3  ;;  %v7297_v37 = vrot.slane %v7295_v55, 1  ;;  %v7380_v51 = vsel %vm5107_vm6, %v7378_v0, %v7379_v35  ;;  %v7293_v27 = vor.u32 %v7292_v1, %v7288_v52  ;;  %v7381_v11 = vrot.slane %v19401_v31, 3  ;;  %v15066_v16 = vld [vmem:[#allocation8 + $0x138] sm:$0xff]   ;;  %v15069_v26 = vld [vmem:[#allocation8 + $0x170] sm:$0xff]   ;;  %v15075_v45 = vld [vmem:[#allocation8 + $0x128] sm:$0xff]  }
 0x7d8   :  { %8183 = vmatprep.mubr.bf16.mxu0 %v7380_v51  ;;  %v7354_v25 = vsel %vm4440_vm1, %v7352_v14, %v7353_v47  ;;  %v19419_v4 = vcombine.low %v19394_v40, %v19403_v20  ;;  %v7355_v22 = vrot.slane %v19401_v31, 1  ;;  %v7307_v41 = vshrl.u32 %v19401_v31, 16  ;;  %v15067_v24 = vld [vmem:[#allocation8 + $0x1f8] sm:$0xff]   ;;  %v15070_v3 = vld [vmem:[#allocation8 + $0x130] sm:$0xff]   ;;  %v15076_v8 = vld [vmem:[#allocation8 + $0x1e8] sm:$0xff]  }
 0x7d9   :  { %13943 = vmatpush3.bf16.msra.mxu1 %v15044_v38  ;;  %v7298_v10 = vsel %vm4239_vm2, %v7293_v27, %v7297_v37  ;;  %v7301_v6 = vor.u32 %v7299_v44, %v7297_v37  ;;  %v15068_v17 = vld [vmem:[#allocation8 + $0x1b8] sm:$0xff]   ;;  %v7305_v50 = vrot.slane %v7303_v43, 1  ;;  %v7382_v39 = vsel %vm5107_vm6, %v7379_v35, %v7381_v11  ;;  %v15077_v0 = vld [vmem:[#allocation8 + $0x1a8] sm:$0xff]   ;;  %v15078_v35 = vld [vmem:[#allocation8 + $0x160] sm:$0xff]  }
 0x7da   :  { %14001 = vmatpush3.bf16.msra.mxu0 %v15045_v46  ;;  %13944 = vmatprep.subr.bf16.mxu1 %v15046_v62  ;;  %v7311_v54 = vshll.u32 %v19419_v4, 16  ;;  %v7383_v36 = vrot.slane %v19419_v4, 3  ;;  %v19434_v7 = vcombine.low %v19411_v34, %v19413_v58  ;;  %v7356_v38 = vsel %vm4440_vm1, %v7353_v47, %v7355_v22  ;;  %v15079_v47 = vld [vmem:[#allocation8 + $0x120] sm:$0xff]  }
 0x7db   :  { %14002 = vmatprep.subr.bf16.mxu0 %v15047_v9  ;;  %8096 = vmatprep.mubr.bf16.mxu1 %v7298_v10  ;;  %v7306_v57 = vsel %vm4239_vm2, %v7301_v6, %v7305_v50  ;;  %v7309_v46 = vor.u32 %v7307_v41, %v7305_v50  ;;  %v15071_v9 = vld [vmem:[#allocation8 + $0x1f0] sm:$0xff]   ;;  %v15080_v51 = vld [vmem:[#allocation8 + $0x1e0] sm:$0xff]   ;;  %v15083_v10 = vld [vmem:[#allocation8 + $0x158] sm:$0xff]  }
 0x7dc   :  { %v7313_v62 = vrot.slane %v7311_v54, 1  ;;  %v7359_v49 = vrot.slane %v19434_v7, 1  ;;  %v7323_v14 = vshrl.u32 %v19434_v7, 16  ;;  %v15084_v6 = vld [vmem:[#allocation8 + $0x118] sm:$0xff]  }
 0x7dd   :  { %13945 = vmatpush3.bf16.msra.mxu1 %v15048_v29  ;;  %v7384_v29 = vsel %vm5107_vm6, %v7381_v11, %v7383_v36 }
 0x7de   :  { %14003 = vmatpush3.bf16.msra.mxu0 %v15049_v33  ;;  %13946 = vmatprep.subr.bf16.mxu1 %v15050_v61  ;;  %v15073_v33 = vld [vmem:[#allocation8 + $0x1b0] sm:$0xff]   ;;  %v7357_v61 = vrot.slane %v19419_v4, 1 }
 0x7df   :  { %14004 = vmatprep.subr.bf16.mxu0 %v15051_v19  ;;  %v7315_v19 = vshrl.u32 %v19419_v4, 16 }
 0x7e0   :  { %v7358_v13 = vsel %vm4440_vm1, %v7355_v22, %v7357_v61  ;;  %v7360_v22 = vsel %vm4440_vm1, %v7357_v61, %v7359_v49  ;;  %v15091_v61 = vld [vmem:[#allocation8 + $0x190] sm:$0xff]  }
 0x7e1   :  { %13947 = vmatpush3.bf16.msra.mxu1 %v15052_v59  ;;  %v7319_v59 = vshll.u32 %v19434_v7, 16  ;;  %v7317_v48 = vor.u32 %v7315_v19, %v7313_v62 }
 0x7e2   :  { %14005 = vmatpush3.bf16.msra.mxu0 %v15053_v2  ;;  %13948 = vmatprep.subr.bf16.mxu1 %v15054_v42  ;;  %v19445_v2 = vld [vmem:[#allocation3 + $0x28] sm:$0xf]  ;;  %v19447_v42 = vld [vmem:[#allocation3 + $0x2c] sm:$0xf] }
 0x7e3   :  { %14006 = vmatprep.subr.bf16.mxu0 %v15055_v12  ;;  %v7314_v12 = vsel %vm4239_vm2, %v7309_v46, %v7313_v62  ;;  %v7321_v52 = vrot.slane %v7319_v59, 1  ;;  %v15088_v46 = vld [vmem:[#allocation8 + $0x110] sm:$0xff]  }
 0x7e5   :  { %13949 = vmatpush3.bf16.msra.mxu1 %v15056_v30  ;;  %v7385_v30 = vrot.slane %v19434_v7, 3  ;;  %v7322_v27 = vsel %vm4239_vm2, %v7317_v48, %v7321_v52 }
 0x7e6   :  { %14007 = vmatpush3.bf16.msra.mxu0 %v15057_v53  ;;  %14050 = vmatprep.subr.bf16.mxu1 %v15065_v32  ;;  %v15074_v53 = vld [vmem:[#allocation8 + $0x168] sm:$0xff]   ;;  %v19465_v32 = vld [vmem:[#allocation3 + $0x30] sm:$0xf] }
 0x7e7   :  { %14108 = vmatprep.subr.bf16.mxu0 %v15067_v24  ;;  %v7386_v1 = vsel %vm5107_vm6, %v7383_v36, %v7385_v30  ;;  %v7325_v24 = vor.u32 %v7323_v14, %v7321_v52  ;;  %v15095_v52 = vld [vmem:[#allocation8 + $0x1c8] sm:$0xff]  }
 0x7e8   :  { %8097 = vmatmul.mubr.bf16.vlgmr.msra.gmra.mxu1 %v12719_v56  ;;  %v19454_v56 = vcombine.low %v19445_v2, %v19447_v42 }
 0x7e9   :  { %8184 = vmatmul.mubr.bf16.vlgmr.msra.gmra.mxu0 %v7354_v25  ;;  %14051 = vmatpush3.bf16.msra.mxu1 %v15066_v16  ;;  %v19468_v25 = vld [vmem:[#allocation3 + $0x34] sm:$0xf] }
 0x7ea   :  { %8191 = vmatprep.mubr.bf16.mxu0 %v7382_v39  ;;  %8104 = vmatprep.mubr.bf16.mxu1 %v7306_v57  ;;  %v7327_v37 = vshll.u32 %v19454_v56, 16  ;;  %v7387_v11 = vrot.slane %v19454_v56, 3  ;;  %v15082_v16 = vld [vmem:[#allocation8 + $0x1a0] sm:$0xff]   ;;  %v19479_v50 = vcombine.low %v19465_v32, %v19468_v25  ;;  %v15085_v39 = vld [vmem:[#allocation8 + $0x1d8] sm:$0xff]  }
 0x7eb   :  { %14109 = vmatpush3.bf16.msra.mxu0 %v15068_v17  ;;  %14052 = vmatprep.subr.bf16.mxu1 %v15069_v26  ;;  %v7361_v26 = vrot.slane %v19454_v56, 1  ;;  %v15086_v57 = vld [vmem:[#allocation8 + $0x198] sm:$0xff]  }
 0x7ec   :  { %14110 = vmatprep.subr.bf16.mxu0 %v15071_v9  ;;  %v7329_v17 = vrot.slane %v7327_v37, 1  ;;  %v7388_v36 = vsel %vm5107_vm6, %v7385_v30, %v7387_v11  ;;  %v7335_v9 = vshll.u32 %v19479_v50, 16  ;;  %v15093_v30 = vld [vmem:[#allocation8 + $0x148] sm:$0xff]  }
 0x7ed   :  { %14053 = vmatpush3.bf16.msra.mxu1 %v15070_v3  ;;  %v15087_v3 = vld [vmem:[#allocation8 + $0x150] sm:$0xff]  }
 0x7ee   :  { %14054 = vmatprep.subr.bf16.mxu1 %v15074_v53  ;;  %v7330_v62 = vsel %vm4239_vm2, %v7325_v24, %v7329_v17  ;;  %v7362_v53 = vsel %vm4440_vm1, %v7359_v49, %v7361_v26  ;;  %v7363_v49 = vrot.slane %v19479_v50, 1 }
 0x7ef   :  { %14111 = vmatpush3.bf16.msra.mxu0 %v15073_v33  ;;  %v7389_v33 = vrot.slane %v19479_v50, 3 }
 0x7f0   :  { %8105 = vmatmul.mubr.bf16.gmra.mxu1 %v19384_v18  ;;  %14112 = vmatprep.subr.bf16.mxu0 %v15076_v8  ;;  %v7337_v8 = vrot.slane %v7335_v9, 1 }
 0x7f1   :  { %8192 = vmatmul.mubr.bf16.gmra.mxu0 %v7356_v38  ;;  %8112 = vmatprep.mubr.bf16.mxu1 %v7314_v12  ;;  %v7331_v38 = vshrl.u32 %v19454_v56, 16  ;;  %v15090_v12 = vld [vmem:[#allocation3 + $0x38] ss:$0 sps:$4 sm:$0x33]   ;;  %v7390_v48 = vsel %vm5107_vm6, %v7387_v11, %v7389_v33  ;;  %v7339_v11 = vshrl.u32 %v19479_v50, 16 }
 0x7f2   :  { %8199 = vmatprep.mubr.bf16.mxu0 %v7384_v29  ;;  %14055 = vmatpush3.bf16.msra.mxu1 %v15075_v45  ;;  %v15089_v29 = vld [vmem:[#allocation8 + $0x1d0] sm:$0xff]  }
 0x7f3   :  { %14113 = vmatpush3.bf16.msra.mxu0 %v15077_v0  ;;  %14056 = vmatprep.subr.bf16.mxu1 %v15078_v35  ;;  %v7333_v45 = vor.u32 %v7331_v38, %v7329_v17  ;;  %v15096_v0 = vld [vmem:[#allocation8 + $0x188] sm:$0xff]   ;;  %v15097_v35 = vld [vmem:[#allocation8 + $0x140] sm:$0xff]  }
 0x7f4   :  { %14114 = vmatprep.subr.bf16.mxu0 %v15080_v51  ;;  %v7391_v51 = vrot.slane %v15090_v12, 3  ;;  %v19502_v17 = vld [vmem:[#allocation3 + $0xc] sm:$0xff]  }
 0x7f6   :  { %14057 = vmatpush3.bf16.msra.mxu1 %v15079_v47  ;;  %v15098_v47 = vld [vmem:[#allocation8 + $0x100] sm:$0xff]  }
 0x7f7   :  { %14115 = vmatpush3.bf16.msra.mxu0 %v15082_v16  ;;  %14058 = vmatprep.subr.bf16.mxu1 %v15083_v10  ;;  %v15101_v16 = vld [vmem:[#allocation8 + $0x180] sm:$0xff]   ;;  %v7225_v10 = vld [vmem:[#allocation3 + $0x4] sm:$0xc] }
 0x7f8   :  { %8113 = vmatmul.mubr.bf16.gmra.mxu1 %v19401_v31  ;;  %14116 = vmatprep.subr.bf16.mxu0 %v15085_v39  ;;  %v15357_v39 = vmov 0.0   ;;  %v15111_v31 = vld [vmem:[#allocation8 + $0x230] sm:$0xff]  }
 0x7f9   :  { %8200 = vmatmul.mubr.bf16.gmra.mxu0 %v7358_v13  ;;  %8120 = vmatprep.mubr.bf16.mxu1 %v7322_v27  ;;  %v15094_v13 = vld [vmem:[#allocation8 + $0x108] sm:$0xff]   ;;  %v15099_v27 = vld [vmem:[#allocation8 + $0x1c0] sm:$0xff]  }
 0x7fa   :  { %8207 = vmatprep.mubr.bf16.mxu0 %v7386_v1  ;;  %14059 = vmatpush3.bf16.msra.mxu1 %v15084_v6  ;;  %v7338_v1 = vsel %vm4239_vm2, %v7333_v45, %v7337_v8  ;;  %v19498_v6 = vld [vmem:[#allocation3 + $0x8] sm:$0xf] }
 0x7fb   :  { %14060 = vmatprep.subr.bf16.mxu1 %v15087_v3  ;;  %14117 = vmatpush3.bf16.msra.mxu0 %v15086_v57  ;;  %v12738_v24 = vcombine.low %v7225_v10, %v19498_v6  ;;  %v19506_v57 = vld [vmem:[#allocation3 + $0x14] sm:$0xff]  }
 0x7fc   :  { %14118 = vmatprep.subr.bf16.mxu0 %v15089_v29  ;;  %v7541_v29 = vshll.u32 %v19502_v17, 16  ;;  %v7550_v45 = vshll.u32 %v19506_v57, 16 }
 0x7fd   :  { %v7530_v3 = vshrl.u32 %v12738_v24, 16 }
 0x7fe   :  { %14061 = vmatpush3.bf16.msra.mxu1 %v15088_v46  ;;  %v7533_v46 = vshll.u32 %v12738_v24, 16 }
 0x7ff   :  { %14119 = vmatpush3.bf16.msra.mxu0 %v15091_v61  ;;  %14062 = vmatprep.subr.bf16.mxu1 %v15093_v30  ;;  %v7532_v61 = vrot.slane %v7530_v3, 2  ;;  %v7504_v3 = vrot.slane %v12738_v24, 2  ;;  %v7416_v24 = vrot.slane %v7307_v41, 3  ;;  %v19546_v41 = vld [vmem:[#allocation3 + $0x34] sm:$0xff]  }
 0x800   :  { %8121 = vmatmul.mubr.bf16.gmra.mxu1 %v19419_v4  ;;  %14120 = vmatprep.subr.bf16.mxu0 %v15095_v52  ;;  %v7535_v12 = vrot.slane %v7533_v46, 3 }
 0x801   :  { %8208 = vmatmul.mubr.bf16.gmra.mxu0 %v7360_v22  ;;  %8126 = vmatprep.mubr.bf16.mxu1 %v7330_v62  ;;  %v7364_v22 = vsel %vm4440_vm1, %v7361_v26, %v7363_v49  ;;  %v7538_v62 = vshrl.u32 %v19502_v17, 16  ;;  %v7341_v26 = vor.u32 %v7339_v11, %v7337_v8  ;;  %v7413_v8 = vrot.slane %v7295_v55, 4 }
 0x802   :  { %8213 = vmatprep.mubr.bf16.mxu0 %v7388_v36  ;;  %14063 = vmatpush3.bf16.msra.mxu1 %v15094_v13  ;;  %v7392_v36 = vsel %vm5107_vm6, %v7389_v33, %v7391_v51  ;;  %v7547_v33 = vshrl.u32 %v19506_v57, 16  ;;  %v7405_v13 = vshrl.u32 %v19387_v23, 16  ;;  %v7536_v52 = vor.u32 %v7535_v12, %v7532_v61  ;;  %v19531_v12 = vld [vmem:[#allocation3 + $0x24] sm:$0xff]  }
 0x803   :  { %14121 = vmatpush3.bf16.msra.mxu0 %v15096_v0  ;;  %14064 = vmatprep.subr.bf16.mxu1 %v15097_v35  ;;  %v7540_v30 = vrot.slane %v7538_v62, 2  ;;  %v7219_v35 = vld [vmem:[#allocation3 + $0x34] sm:$0x7]  ;;  %v7505_v55 = vrot.slane %v19502_v17, 2 }
 0x804   :  { %14122 = vmatprep.subr.bf16.mxu0 %v15099_v27  ;;  %v7549_v51 = vrot.slane %v7547_v33, 2  ;;  %v7552_v27 = vrot.slane %v7550_v45, 3  ;;  %v7507_v33 = vrot.slane %v19506_v57, 2  ;;  %v15109_v45 = vld [vmem:[#allocation8 + $0x238] sm:$0xff]  }
 0x806   :  { %14065 = vmatpush3.bf16.msra.mxu1 %v15098_v47 }
 0x807   :  { %14596 = vmatprep.subr.bf16.mxu1 %v15357_v39  ;;  %14123 = vmatpush3.bf16.msra.mxu0 %v15101_v16  ;;  %v7407_v16 = vrot.slane %v7405_v13, 3 }
 0x808   :  { %8127 = vmatmul.mubr.bf16.gmra.mxu1 %v19434_v7 }
 0x809   :  { %8214 = vmatmul.mubr.bf16.gmra.mxu0 %v7362_v53  ;;  %8134 = vmatprep.mubr.bf16.mxu1 %v7338_v1  ;;  %v7543_v53 = vrot.slane %v7541_v29, 3  ;;  %v19519_v1 = vld [vmem:[#allocation3 + $0x1c] sm:$0xff]   ;;  %v7553_v29 = vor.u32 %v7552_v27, %v7549_v51  ;;  %v7617_v51 = vrot.slane %v19531_v12, 3 }
 0x80a   :  { %8221 = vmatprep.mubr.bf16.mxu0 %v7390_v48  ;;  %v7408_v48 = vshll.u32 %v19387_v23, 16  ;;  %v7412_v23 = vrot.slane %v7299_v44, 3  ;;  %v7556_v46 = vshrl.u32 %v19519_v1, 16  ;;  %v7559_v62 = vshll.u32 %v19519_v1, 16 }
 0x80b   :  { %v7544_v0 = vor.u32 %v7543_v53, %v7540_v30  ;;  %v7506_v44 = vsel %vm4828_vm3, %v7504_v3, %v7505_v55  ;;  %v12732_v53 = vcombine.low %v19379_v5, %v19390_v28  ;;  %v7613_v5 = vrot.slane %v19506_v57, 3 }
 0x80c   :  { %v7410_v10 = vrot.slane %v7408_v48, 4  ;;  %v7561_v61 = vrot.slane %v7559_v62, 3  ;;  %v7565_v48 = vshrl.u32 %v19531_v12, 16  ;;  %v7615_v28 = vrot.slane %v19519_v1, 3 }
 0x80d   :  { %v7545_v47 = vsel %vm4975_vm4, %v7536_v52, %v7544_v0  ;;  %v7568_v52 = vshll.u32 %v19531_v12, 16  ;;  %v7621_v62 = vrot.slane %v19546_v41, 3 }
 0x80e   :  { %v7411_v18 = vor.u32 %v7410_v10, %v7407_v16  ;;  %v7508_v16 = vsel %vm4828_vm3, %v7505_v55, %v7507_v33  ;;  %v19555_v10 = vld [vmem:[#allocation3 + $0x3c] ss:$0 sps:$4 sm:$0x33]   ;;  %v7567_v57 = vrot.slane %v7565_v48, 2  ;;  %v7425_v48 = vrot.slane %v7319_v59, 4 }
 0x80f   :  { %v7586_v59 = vshll.u32 %v19546_v41, 16 }
 0x810   :  { %8135 = vmatmul.mubr.bf16.gmra.mxu1 %v19454_v56 }
 0x811   :  { %8222 = vmatmul.mubr.bf16.gmra.mxu0 %v7364_v22  ;;  %8142 = vmatprep.mubr.bf16.mxu1 %v7341_v26  ;;  %v12725_v22 = vcombine.low %v19465_v32, %v7219_v35  ;;  %v7414_v26 = vor.u32 %v7413_v8, %v7412_v23  ;;  %v7611_v8 = vrot.slane %v19502_v17, 3  ;;  %v19561_v17 = vsel %vm5107_vm6, %v7613_v5, %v7615_v28 }
 0x812   :  { %8229 = vmatprep.mubr.bf16.mxu0 %v7392_v36  ;;  %v12731_v36 = vcombine.low %v19375_v15, %v19377_v21  ;;  %v7554_v15 = vsel %vm4975_vm4, %v7544_v0, %v7553_v29  ;;  %v7417_v21 = vrot.slane %v7303_v43, 4  ;;  %v19544_v0 = vld [vmem:[#allocation3 + $0x2c] sm:$0xff]   ;;  %v7241_v43 = vld [vmem:[#allocation3 + $0x4] sm:$0x8] }
 0x813   :  { %v7415_v30 = vsel %vm7403_vm8, %v7411_v18, %v7414_v26  ;;  %v12747_v35 = vcombine.low %v7241_v43, %v19498_v6  ;;  %v7619_v27 = vrot.slane %v19544_v0, 3  ;;  %v19558_v6 = vsel %vm5107_vm6, %v7611_v8, %v7613_v5 }
 0x814   :  { %v7623_v18 = vrot.slane %v19555_v10, 3  ;;  %v7577_v4 = vshll.u32 %v19544_v0, 16 }
 0x815   :  { %v7610_v23 = vrot.slane %v12747_v35, 3  ;;  %v19568_v3 = vsel %vm5107_vm6, %v7617_v51, %v7619_v27  ;;  %v7511_v35 = vrot.slane %v19531_v12, 2  ;;  %v7588_v12 = vrot.slane %v7586_v59, 3 }
 0x818   :  { %8143 = vmatmul.mubr.bf16.gmra.mxu1 %v12725_v22  ;;  %v7570_v22 = vrot.slane %v7568_v52, 3  ;;  %v7424_v52 = vrot.slane %v7323_v14, 3  ;;  %v15119_v14 = vld [vmem:[#allocation8 + $0x210] sm:$0xff]  }
 0x819   :  { %8230 = vmatmul.mubr.bf16.gmra.mxu0 %v7363_v49  ;;  %8270 = vmatprep.mubr.bf16.mxu1 %v12731_v36  ;;  %v7558_v49 = vrot.slane %v7556_v46, 2  ;;  %v19565_v36 = vsel %vm5107_vm6, %v7615_v28, %v7617_v51  ;;  %v19572_v46 = vsel %vm5107_vm6, %v7610_v23, %v7611_v8  ;;  %v7583_v8 = vshrl.u32 %v19546_v41, 16 }
 0x81a   :  { %8357 = vmatprep.mubr.bf16.mxu0 %v7545_v47  ;;  %v7418_v47 = vor.u32 %v7417_v21, %v7416_v24  ;;  %v19584_v21 = vsel %vm5107_vm6, %v7619_v27, %v7621_v62  ;;  %v19587_v24 = vsel %vm5107_vm6, %v7621_v62, %v7623_v18  ;;  %v7426_v7 = vor.u32 %v7425_v48, %v7424_v52 }
 0x81b   :  { %v7562_v13 = vor.u32 %v7561_v61, %v7558_v49  ;;  %v12733_v49 = vcombine.low %v19392_v63, %v19394_v40  ;;  %v7420_v61 = vrot.slane %v7315_v19, 3  ;;  %v7571_v63 = vor.u32 %v7570_v22, %v7567_v57 }
 0x81c   :  { %v7574_v40 = vshrl.u32 %v19544_v0, 16  ;;  %v7429_v28 = vrot.slane %v7327_v37, 4  ;;  %v12735_v27 = vcombine.low %v19413_v58, %v19445_v2  ;;  %v7513_v23 = vrot.slane %v19544_v0, 2  ;;  %v7224_v58 = vld [vmem:[#allocation3 + $0x38] sm:$0x7] }
 0x81d   :  { %v7563_v55 = vsel %vm4975_vm4, %v7553_v29, %v7562_v13  ;;  %v15114_v29 = vld [vmem:[#allocation8 + $0x228] sm:$0xff]   ;;  %v7592_v22 = vshrl.u32 %v19555_v10, 16  ;;  %v7595_v37 = vshll.u32 %v19555_v10, 16  ;;  %v12736_v18 = vcombine.low %v19447_v42, %v19465_v32 }
 0x81e   :  { %v7433_v10 = vrot.slane %v7335_v9, 4  ;;  %v15124_v9 = vld [vmem:[#allocation3 + $0x3c] ss:$0 sps:$4 sm:$0x11]  }
 0x81f   :  { %v7594_v0 = vrot.slane %v7592_v22, 2  ;;  %v7597_v62 = vrot.slane %v7595_v37, 3 }
 0x820   :  { %8271 = vmatmul.mubr.bf16.vlgmr.msra.gmra.mxu1 %v7415_v30 }
 0x821   :  { %8358 = vmatmul.mubr.bf16.vlgmr.msra.gmra.mxu0 %v7506_v44  ;;  %8278 = vmatprep.mubr.bf16.mxu1 %v12732_v53  ;;  %v7421_v44 = vrot.slane %v7311_v54, 4  ;;  %v7509_v54 = vrot.slane %v19519_v1, 2  ;;  %v7572_v53 = vsel %vm4975_vm4, %v7562_v13, %v7571_v63  ;;  %v7579_v1 = vrot.slane %v7577_v4, 3 }
 0x822   :  { %8365 = vmatprep.mubr.bf16.mxu0 %v7554_v15  ;;  %14597 = vmatpush3.bf16.msra.mxu1 %v15109_v45  ;;  %v7419_v15 = vsel %vm7403_vm8, %v7414_v26, %v7418_v47  ;;  %v15115_v26 = vld [vmem:[#allocation8 + $0x220] sm:$0xff]   ;;  %v7576_v45 = vrot.slane %v7574_v40, 2  ;;  %v12737_v40 = vcombine.low %v19468_v25, %v7224_v58 }
 0x823   :  { %14598 = vmatprep.subr.bf16.mxu1 %v15357_v39  ;;  %v7422_v19 = vor.u32 %v7421_v44, %v7420_v61  ;;  %v7510_v30 = vsel %vm4828_vm3, %v7507_v33, %v7509_v54  ;;  %v15118_v33 = vld [vmem:[#allocation8 + $0x218] sm:$0xff]   ;;  %v7512_v5 = vsel %vm4828_vm3, %v7509_v54, %v7511_v35  ;;  %v7432_v44 = vrot.slane %v7339_v11, 3 }
 0x824   :  { %v7580_v13 = vor.u32 %v7579_v1, %v7576_v45  ;;  %v12730_v61 = vcombine.low %v7224_v58, %v7224_v58 }
 0x825   :  { %v7423_v43 = vsel %vm7403_vm8, %v7418_v47, %v7422_v19  ;;  %v7428_v47 = vrot.slane %v7331_v38, 3  ;;  %v7427_v51 = vsel %vm7403_vm8, %v7422_v19, %v7426_v7  ;;  %v15125_v38 = vld [vmem:[#allocation8 + $0x200] sm:$0xff]   ;;  %v7434_v54 = vor.u32 %v7433_v10, %v7432_v44 }
 0x826   :  { %14599 = vmatpush3.bf16.msra.mxu1 %v15111_v31  ;;  %v12734_v31 = vcombine.low %v19403_v20, %v19411_v34  ;;  %v7581_v20 = vsel %vm4975_vm4, %v7571_v63, %v7580_v13  ;;  %v7585_v34 = vrot.slane %v7583_v8, 2  ;;  %v7437_v63 = vshrl.u32 %v12730_v61, 16 }
 0x827   :  { %14600 = vmatprep.subr.bf16.mxu1 %v15357_v39  ;;  %v7430_v56 = vor.u32 %v7429_v28, %v7428_v47  ;;  %v7440_v42 = vshll.u32 %v12730_v61, 16 }
 0x828   :  { %8279 = vmatmul.mubr.bf16.gmra.mxu1 %v7419_v15  ;;  %v7589_v57 = vor.u32 %v7588_v12, %v7585_v34  ;;  %v7515_v15 = vrot.slane %v19546_v41, 2  ;;  %v7439_v4 = vrot.slane %v7437_v63, 3  ;;  %v7517_v41 = vrot.slane %v15124_v9, 2 }
 0x829   :  { %8366 = vmatmul.mubr.bf16.gmra.mxu0 %v7508_v16  ;;  %8286 = vmatprep.mubr.bf16.mxu1 %v12733_v49  ;;  %v15123_v16 = vld [vmem:[#allocation8 + $0x208] sm:$0xff]   ;;  %v7431_v49 = vsel %vm7403_vm8, %v7426_v7, %v7430_v56  ;;  %v7435_v11 = vsel %vm7403_vm8, %v7430_v56, %v7434_v54  ;;  %v7442_v19 = vrot.slane %v7440_v42, 4 }
 0x82a   :  { %8373 = vmatprep.mubr.bf16.mxu0 %v7563_v55  ;;  %14601 = vmatpush3.bf16.msra.mxu1 %v15114_v29  ;;  %v7514_v55 = vsel %vm4828_vm3, %v7511_v35, %v7513_v23  ;;  %v7590_v2 = vsel %vm4975_vm4, %v7580_v13, %v7589_v57  ;;  %v7598_v29 = vor.u32 %v7597_v62, %v7594_v0 }
 0x82b   :  { %14602 = vmatprep.subr.bf16.mxu1 %v15357_v39  ;;  %v7516_v32 = vsel %vm4828_vm3, %v7513_v23, %v7515_v15 }
 0x82c   :  { %v7599_v50 = vsel %vm4975_vm4, %v7589_v57, %v7598_v29 }
 0x82e   :  { %14603 = vmatpush3.bf16.msra.mxu1 %v15115_v26  ;;  %v7443_v26 = vor.u32 %v7442_v19, %v7439_v4 }
 0x82f   :  { %14604 = vmatprep.subr.bf16.mxu1 %v15357_v39 }
 0x830   :  { %8287 = vmatmul.mubr.bf16.gmra.mxu1 %v7423_v43 }
 0x831   :  { %8374 = vmatmul.mubr.bf16.gmra.mxu0 %v7510_v30  ;;  %8294 = vmatprep.mubr.bf16.mxu1 %v12734_v31  ;;  %v7518_v30 = vsel %vm4828_vm3, %v7515_v15, %v7517_v41 }
 0x832   :  { %8381 = vmatprep.mubr.bf16.mxu0 %v7572_v53  ;;  %14605 = vmatpush3.bf16.msra.mxu1 %v15118_v33  ;;  %v7444_v53 = vsel %vm7403_vm8, %v7434_v54, %v7443_v26 }
 0x833   :  { %14606 = vmatprep.subr.bf16.mxu1 %v15357_v39 }
 0x836   :  { %14607 = vmatpush3.bf16.msra.mxu1 %v15119_v14 }
 0x837   :  { %14608 = vmatprep.subr.bf16.mxu1 %v15357_v39 }
 0x838   :  { %8295 = vmatmul.mubr.bf16.gmra.mxu1 %v7427_v51 }
 0x839   :  { %8382 = vmatmul.mubr.bf16.gmra.mxu0 %v7512_v5  ;;  %8300 = vmatprep.mubr.bf16.mxu1 %v12735_v27 }
 0x83a   :  { %8387 = vmatprep.mubr.bf16.mxu0 %v7581_v20  ;;  %14609 = vmatpush3.bf16.msra.mxu1 %v15123_v16 }
 0x83b   :  { %14610 = vmatprep.subr.bf16.mxu1 %v15357_v39 }
 0x83e   :  { %14611 = vmatpush3.bf16.msra.mxu1 %v15125_v38 }
 0x840   :  { %8301 = vmatmul.mubr.bf16.gmra.mxu1 %v7431_v49 }
 0x841   :  { %8388 = vmatmul.mubr.bf16.gmra.mxu0 %v7514_v55  ;;  %8308 = vmatprep.mubr.bf16.mxu1 %v12736_v18 }
 0x842   :  { %8395 = vmatprep.mubr.bf16.mxu0 %v7590_v2 }
 0x848   :  { %8309 = vmatmul.mubr.bf16.gmra.mxu1 %v7435_v11 }
 0x849   :  { %8396 = vmatmul.mubr.bf16.gmra.mxu0 %v7516_v32  ;;  %8316 = vmatprep.mubr.bf16.mxu1 %v12737_v40 }
 0x84a   :  { %8403 = vmatprep.mubr.bf16.mxu0 %v7599_v50 }
 0x850   :  { %8317 = vmatmul.mubr.bf16.gmra.mxu1 %v7444_v53 }
 0x851   :  { %8404 = vmatmul.mubr.bf16.gmra.mxu0 %v7518_v30  ;;  %14612 = vmatprep.mubr.msk.bf16.mxu1 %vm15358_vm9, %v15357_v39 }
 0x858   :  { %14613 = vmatmul.mubr.bf16.vlgmr.msra.gmra.mxu1 %v19572_v46 }
 0x859   :  { %14616 = vmatprep.mubr.msk.bf16.mxu1 %vm15358_vm9, %v15357_v39 }
 0x860   :  { %14617 = vmatmul.mubr.bf16.gmra.mxu1 %v19558_v6 }
 0x861   :  { %14620 = vmatprep.mubr.msk.bf16.mxu1 %vm15358_vm9, %v15357_v39 }
 0x868   :  { %14621 = vmatmul.mubr.bf16.gmra.mxu1 %v19561_v17 }
 0x869   :  { %14624 = vmatprep.mubr.msk.bf16.mxu1 %vm15358_vm9, %v15357_v39 }
 0x870   :  { %14625 = vmatmul.mubr.bf16.gmra.mxu1 %v19565_v36 }
 0x871   :  { %14628 = vmatprep.mubr.msk.bf16.mxu1 %vm15358_vm9, %v15357_v39 }
 0x878   :  { %14629 = vmatmul.mubr.bf16.gmra.mxu1 %v19568_v3 }
 0x879   :  { %14632 = vmatprep.mubr.msk.bf16.mxu1 %vm15358_vm9, %v15357_v39 }
 0x880   :  { %14633 = vmatmul.mubr.bf16.gmra.mxu1 %v19584_v21 }
 0x881   :  { %14636 = vmatprep.mubr.msk.bf16.mxu1 %vm15358_vm9, %v15357_v39 }
 0x888   :  { %14637 = vmatmul.mubr.bf16.gmra.mxu1 %v19587_v24 }
 0x8a8   :  { %v13950_v17 = vpop.f32.mrf.mxu1 }
 0x8a9   :  { %v14008_v25 = vpop.f32.mrf.mxu0 }
 0x8aa   :  { %v13951_v45 = vpop.f32.mrf.mxu1 }
 0x8ab   :  { %v14009_v6 = vpop.f32.mrf.mxu0  ;;  %v13952_v1 = vadd.f32 %v13951_v45, %v13950_v17 }
 0x8ac   :  { %v14010_v46 = vadd.f32 %v14009_v6, %v14008_v25  ;;  %v13953_v52 = vpop.f32.mrf.mxu1 }
 0x8ad   :  { %v14011_v36 = vpop.f32.mrf.mxu0 }
 0x8ae   :  { %v19659_v43 = vadd.f32 %v14010_v46, %v13952_v1  ;;  %v13954_v33 = vpop.f32.mrf.mxu1  ;;  %v19676_v46 = vld [vmem:[%s20828_s30] sm:$0xff]  }
 0x8af   :  { %v14012_v48 = vpop.f32.mrf.mxu0  ;;  %v13955_v21 = vadd.f32 %v13954_v33, %v13953_v52  ;;  %14646 = vmatprep.mubr.msk.bf16.mxu0 %vm8567_vm10, %v19676_v46 }
 0x8b0   :  { %v14013_v3 = vadd.f32 %v14012_v48, %v14011_v36  ;;  %v13956_v13 = vpop.f32.mrf.mxu1 }
 0x8b1   :  { %v14014_v31 = vpop.f32.mrf.mxu0 }
 0x8b2   :  { %v19661_v59 = vadd.f32 %v14013_v3, %v13955_v21  ;;  %v13957_v7 = vpop.f32.mrf.mxu1 }
 0x8b3   :  { %v14015_v35 = vpop.f32.mrf.mxu0  ;;  %v13958_v14 = vadd.f32 %v13957_v7, %v13956_v13 }
 0x8b4   :  { %v14016_v8 = vadd.f32 %v14015_v35, %v14014_v31  ;;  %v13959_v20 = vpop.f32.mrf.mxu1 }
 0x8b5   :  { %v14017_v24 = vpop.f32.mrf.mxu0 }
 0x8b6   :  { %v19663_v12 = vadd.f32 %v14016_v8, %v13958_v14  ;;  %v13960_v47 = vpop.f32.mrf.mxu1 }
 0x8b7   :  { %v14018_v5 = vpop.f32.mrf.mxu0  ;;  %v13961_v51 = vadd.f32 %v13960_v47, %v13959_v20 }
 0x8b8   :  { %v14019_v34 = vadd.f32 %v14018_v5, %v14017_v24  ;;  %v13962_v16 = vpop.f32.mrf.mxu1 }
 0x8b9   :  { %v14020_v28 = vpop.f32.mrf.mxu0 }
 0x8ba   :  { %v19665_v57 = vadd.f32 %v14019_v34, %v13961_v51  ;;  %v13963_v37 = vpop.f32.mrf.mxu1 }
 0x8bb   :  { %v14021_v27 = vpop.f32.mrf.mxu0  ;;  %v13964_v56 = vadd.f32 %v13963_v37, %v13962_v16 }
 0x8bc   :  { %v14022_v23 = vadd.f32 %v14021_v27, %v14020_v28  ;;  %v13965_v55 = vpop.f32.mrf.mxu1 }
 0x8bd   :  { %v14023_v22 = vpop.f32.mrf.mxu0 }
 0x8be   :  { %v19667_v2 = vadd.f32 %v14022_v23, %v13964_v56  ;;  %v13966_v62 = vpop.f32.mrf.mxu1 }
 0x8bf   :  { %v14024_v38 = vpop.f32.mrf.mxu0  ;;  %v13967_v18 = vadd.f32 %v13966_v62, %v13965_v55 }
 0x8c0   :  { %v14025_v58 = vadd.f32 %v14024_v38, %v14023_v22  ;;  %v13968_v44 = vpop.f32.mrf.mxu1 }
 0x8c1   :  { %v14026_v0 = vpop.f32.mrf.mxu0 }
 0x8c2   :  { %v19669_v49 = vadd.f32 %v14025_v58, %v13967_v18  ;;  %v13969_v15 = vpop.f32.mrf.mxu1 }
 0x8c3   :  { %v14027_v10 = vpop.f32.mrf.mxu0 }
 0x8c4   :  { %v13971_v54 = vpop.f32.mrf.mxu1 }
 0x8c5   :  { %v14029_v61 = vpop.f32.mrf.mxu0 }
 0x8c6   :  { %v13972_v42 = vpop.f32.mrf.mxu1 }
 0x8c7   :  { %v14030_v29 = vpop.f32.mrf.mxu0 }
 0x8c8   :  { %v13974_v9 = vpop.f32.mrf.mxu1 }
 0x8c9   :  { %v14032_v63 = vpop.f32.mrf.mxu0 }
 0x8ca   :  { %v13975_v40 = vpop.f32.mrf.mxu1 }
 0x8cb   :  { %v14033_v32 = vpop.f32.mrf.mxu0  ;;  %v13976_v4 = vadd.f32 %v13975_v40, %v13974_v9 }
 0x8cc   :  { %v14034_v50 = vadd.f32 %v14033_v32, %v14032_v63  ;;  %v13977_v41 = vpop.f32.mrf.mxu1 }
 0x8cd   :  { %v14035_v11 = vpop.f32.mrf.mxu0 }
 0x8ce   :  { %v19671_v30 = vadd.f32 %v14034_v50, %v13976_v4  ;;  %v13978_v25 = vpop.f32.mrf.mxu1 }
 0x8cf   :  { %v14036_v19 = vpop.f32.mrf.mxu0  ;;  %v13979_v6 = vadd.f32 %v13978_v25, %v13977_v41 }
 0x8d0   :  { %v14037_v26 = vadd.f32 %v14036_v19, %v14035_v11  ;;  %v13980_v36 = vpop.f32.mrf.mxu1 }
 0x8d1   :  { %v14038_v53 = vpop.f32.mrf.mxu0 }
 0x8d2   :  { %v19678_v1 = vadd.f32 %v14037_v26, %v13979_v6  ;;  %v13981_v52 = vpop.f32.mrf.mxu1 }
 0x8d3   :  { %v14039_v17 = vpop.f32.mrf.mxu0  ;;  %v13982_v3 = vadd.f32 %v13981_v52, %v13980_v36 }
 0x8d4   :  { %v14040_v45 = vadd.f32 %v14039_v17, %v14038_v53  ;;  %v13983_v33 = vpop.f32.mrf.mxu1 }
 0x8d5   :  { %v14041_v48 = vpop.f32.mrf.mxu0 }
 0x8d6   :  { %v19682_v35 = vadd.f32 %v14040_v45, %v13982_v3  ;;  %v13984_v8 = vpop.f32.mrf.mxu1 }
 0x8d7   :  { %v14042_v31 = vpop.f32.mrf.mxu0  ;;  %v13985_v24 = vadd.f32 %v13984_v8, %v13983_v33 }
 0x8d8   :  { %v14043_v21 = vadd.f32 %v14042_v31, %v14041_v48  ;;  %v13986_v14 = vpop.f32.mrf.mxu1 }
 0x8d9   :  { %v14044_v13 = vpop.f32.mrf.mxu0 }
 0x8da   :  { %v19684_v20 = vadd.f32 %v14043_v21, %v13985_v24  ;;  %v13987_v28 = vpop.f32.mrf.mxu1 }
 0x8db   :  { %v14045_v7 = vpop.f32.mrf.mxu0  ;;  %v13988_v47 = vadd.f32 %v13987_v28, %v13986_v14 }
 0x8dc   :  { %v14046_v5 = vadd.f32 %v14045_v7, %v14044_v13  ;;  %v13989_v27 = vpop.f32.mrf.mxu1 }
 0x8dd   :  { %v14047_v34 = vpop.f32.mrf.mxu0 }
 0x8de   :  { %v19686_v23 = vadd.f32 %v14046_v5, %v13988_v47  ;;  %v13990_v37 = vpop.f32.mrf.mxu1 }
 0x8df   :  { %v14048_v51 = vpop.f32.mrf.mxu0  ;;  %v13991_v56 = vadd.f32 %v13990_v37, %v13989_v27 }
 0x8e0   :  { %v14049_v16 = vadd.f32 %v14048_v51, %v14047_v34  ;;  %v14066_v55 = vpop.f32.mrf.mxu1 }
 0x8e1   :  { %v14124_v22 = vpop.f32.mrf.mxu0 }
 0x8e2   :  { %v19688_v0 = vadd.f32 %v14049_v16, %v13991_v56  ;;  %v14067_v18 = vpop.f32.mrf.mxu1 }
 0x8e3   :  { %v14125_v38 = vpop.f32.mrf.mxu0  ;;  %v14068_v10 = vadd.f32 %v14067_v18, %v14066_v55 }
 0x8e4   :  { %v14126_v58 = vadd.f32 %v14125_v38, %v14124_v22  ;;  %v14069_v61 = vpop.f32.mrf.mxu1 }
 0x8e5   :  { %v14127_v62 = vpop.f32.mrf.mxu0  ;;  %v8273_v29 = vadd.f32 %v14068_v10, %v19659_v43 }
 0x8e6   :  { %v14070_v63 = vpop.f32.mrf.mxu1 }
 0x8e7   :  { %v14128_v44 = vpop.f32.mrf.mxu0  ;;  %v14071_v42 = vadd.f32 %v14070_v63, %v14069_v61  ;;  %v8360_v9 = vadd.f32 %v14126_v58, %v8273_v29 }
 0x8e8   :  { %v14129_v15 = vadd.f32 %v14128_v44, %v14127_v62  ;;  %v14072_v50 = vpop.f32.mrf.mxu1 }
 0x8e9   :  { %v14130_v54 = vpop.f32.mrf.mxu0  ;;  %v8276_v40 = vadd.f32 %v14071_v42, %v19661_v59 }
 0x8ea   :  { %v14073_v19 = vpop.f32.mrf.mxu1 }
 0x8eb   :  { %v14131_v32 = vpop.f32.mrf.mxu0  ;;  %v14074_v41 = vadd.f32 %v14073_v19, %v14072_v50  ;;  %v8363_v53 = vadd.f32 %v14129_v15, %v8276_v40  ;;  %v19724_v40 = vld [vmem:[%s20830_s23] ss:$0 sm:$0xff] }
 0x8ec   :  { %v14132_v11 = vadd.f32 %v14131_v32, %v14130_v54  ;;  %v14075_v25 = vpop.f32.mrf.mxu1 }
 0x8ed   :  { %v14133_v4 = vpop.f32.mrf.mxu0  ;;  %v8281_v6 = vadd.f32 %v14074_v41, %v19663_v12 }
 0x8ee   :  { %v14076_v36 = vpop.f32.mrf.mxu1 }
 0x8ef   :  { %v14134_v26 = vpop.f32.mrf.mxu0  ;;  %v14077_v43 = vadd.f32 %v14076_v36, %v14075_v25  ;;  %v8368_v52 = vadd.f32 %v14132_v11, %v8281_v6 }
 0x8f0   :  { %v14135_v45 = vadd.f32 %v14134_v26, %v14133_v4  ;;  %v14078_v3 = vpop.f32.mrf.mxu1 }
 0x8f1   :  { %v14136_v17 = vpop.f32.mrf.mxu0  ;;  %v8284_v31 = vadd.f32 %v14077_v43, %v19665_v57 }
 0x8f2   :  { %v14079_v21 = vpop.f32.mrf.mxu1 }
 0x8f3   :  { %v14137_v48 = vpop.f32.mrf.mxu0  ;;  %v8371_v13 = vadd.f32 %v14135_v45, %v8284_v31  ;;  %v14080_v41 = vadd.f32 %v14079_v21, %v14078_v3 }
 0x8f4   :  { %v14081_v8 = vpop.f32.mrf.mxu1 }
 0x8f5   :  { %v14139_v33 = vpop.f32.mrf.mxu0  ;;  %v8289_v31 = vadd.f32 %v14080_v41, %v19667_v2 }
 0x8f6   :  { %v14082_v7 = vpop.f32.mrf.mxu1 }
 0x8f7   :  { %v14140_v59 = vpop.f32.mrf.mxu0 }
 0x8f8   :  { %v14084_v5 = vpop.f32.mrf.mxu1 }
 0x8f9   :  { %v14142_v24 = vpop.f32.mrf.mxu0  ;;  %v14083_v5 = vadd.f32 %v14082_v7, %v14081_v8 }
 0x8fa   :  { %v14085_v12 = vpop.f32.mrf.mxu1  ;;  %v14138_v24 = vadd.f32 %v14137_v48, %v14136_v17 }
 0x8fb   :  { %v14143_v14 = vpop.f32.mrf.mxu0 }
 0x8fc   :  { %v14087_v47 = vpop.f32.mrf.mxu1  ;;  %v8376_v17 = vadd.f32 %v14138_v24, %v8289_v31 }
 0x8fd   :  { %v14145_v34 = vpop.f32.mrf.mxu0 }
 0x8fe   :  { %v14088_v51 = vpop.f32.mrf.mxu1 }
 0x8ff   :  { %v14146_v28 = vpop.f32.mrf.mxu0  ;;  %v14141_v51 = vadd.f32 %v14140_v59, %v14139_v33 }
 0x900   :  { %v14090_v27 = vpop.f32.mrf.mxu1 }
 0x901   :  { %v14148_v63 = vpop.f32.mrf.mxu0 }
 0x902   :  { %v14091_v16 = vpop.f32.mrf.mxu1 }
 0x903   :  { %v14092_v22 = vadd.f32 %v14091_v16, %v14090_v27  ;;  %v14149_v50 = vpop.f32.mrf.mxu0  ;;  %v8292_v16 = vadd.f32 %v14083_v5, %v19669_v49 }
 0x904   :  { %v14093_v37 = vpop.f32.mrf.mxu1  ;;  %v14150_v41 = vadd.f32 %v14149_v50, %v14148_v63 }
 0x905   :  { %v19695_v57 = vadd.f32 %v14092_v22, %v19671_v30  ;;  %v14151_v25 = vpop.f32.mrf.mxu0  ;;  %v8379_v33 = vadd.f32 %v14141_v51, %v8292_v16 }
 0x906   :  { %v14094_v56 = vpop.f32.mrf.mxu1 }
 0x907   :  { %v14095_v38 = vadd.f32 %v14094_v56, %v14093_v37  ;;  %v14152_v34 = vpop.f32.mrf.mxu0 }
 0x908   :  { %v14096_v55 = vpop.f32.mrf.mxu1  ;;  %v14153_v31 = vadd.f32 %v14152_v34, %v14151_v25 }
 0x909   :  { %v19698_v58 = vadd.f32 %v14095_v38, %v19678_v1  ;;  %v19718_v1 = vld [vmem:[%s20829_s0] ss:$0 sm:$0xff]  ;;  %v14154_v22 = vpop.f32.mrf.mxu0 }
 0x90a   :  { %v14097_v62 = vpop.f32.mrf.mxu1 }
 0x90b   :  { %v14098_v18 = vadd.f32 %v14097_v62, %v14096_v55  ;;  %v14155_v56 = vpop.f32.mrf.mxu0  ;;  %v8393_v25 = vadd.f32 %v14153_v31, %v19698_v58  ;;  %v15128_v58 = vld [vmem:[%s20828_s30 + $0x8] sm:$0xff]  }
 0x90c   :  { %v19700_v10 = vpop.f32.mrf.mxu1 }
 0x90d   :  { %v19703_v44 = vadd.f32 %v14098_v18, %v19682_v35 }
 0x90e   :  { %v19705_v61 = vpop.f32.mrf.mxu1 }
 0x90f   :  { %v14101_v63 = vadd.f32 %v19705_v61, %v19700_v10 }
 0x910   :  { %v19707_v15 = vpop.f32.mrf.mxu1 }
 0x912   :  { %v19709_v29 = vpop.f32.mrf.mxu1 }
 0x913   :  { %v14104_v16 = vadd.f32 %v19709_v29, %v19707_v15 }
 0x914   :  { %v19711_v30 = vpop.f32.mrf.mxu1 }
 0x916   :  { %v19713_v54 = vpop.f32.mrf.mxu1 }
 0x918   :  { %v8446_v42 = vpop.f32.mrf.mxu1 }
 0x919   :  { %v8447_v32 = vadd.f32 %v8446_v42, %v8360_v9  ;;  %v14157_v42 = vpop.f32.mrf.mxu0 }
 0x91a   :  { %v14614_v35 = vpop.f32.mrf.mxu1 }
 0x91b   :  { %v8505_v11 = vmul.f32 %v19718_v1, %v8447_v32 }
 0x91c   :  { %v8449_v4 = vpop.f32.mrf.mxu1 }
 0x91d   :  { %v8450_v19 = vadd.f32 %v8449_v4, %v8363_v53  ;;  %v8523_v6 = vadd.f32 %v19724_v40, %v8505_v11 }
 0x91e   :  { %v14615_v26 = vpop.f32.mrf.mxu1 }
 0x91f   :  { %v8506_v36 = vmul.f32 %v19718_v1, %v8450_v19  ;;  %v8535_v12 = vmax.f32 %v8523_v6, 0.0  ;;  %v14158_v26 = vpop.f32.mrf.mxu0 }
 0x920   :  { %v8454_v43 = vpop.f32.mrf.mxu1 }
 0x921   :  { %v8524_v9 = vadd.f32 %v19724_v40, %v8506_v36  ;;  %v8455_v45 = vadd.f32 %v8454_v43, %v8368_v52  ;;  %v14160_v24 = vpop.f32.mrf.mxu0 }
 0x922   :  { %v14618_v14 = vpop.f32.mrf.mxu1 }
 0x923   :  { %v8536_v28 = vmax.f32 %v8524_v9, 0.0  ;;  %v8507_v53 = vmul.f32 %v19718_v1, %v8455_v45  ;;  %v8390_v14 = vadd.f32 %v14150_v41, %v19695_v57  ;;  %v8314_v57 = vadd.f32 %v14101_v63, %v19684_v20 }
 0x924   :  { %v8457_v3 = vpop.f32.mrf.mxu1 }
 0x925   :  { %v8458_v21 = vadd.f32 %v8457_v3, %v8371_v13  ;;  %v8551_v47 = vpack.c.bf16 %v8536_v28, %v8535_v12  ;;  %v8525_v52 = vadd.f32 %v19724_v40, %v8507_v53  ;;  %v14156_v53 = vadd.f32 %v14155_v56, %v14154_v22  ;;  %v14161_v3 = vpop.f32.mrf.mxu0 }
 0x926   :  { %v14619_v27 = vpop.f32.mrf.mxu1  ;;  %v14162_v15 = vadd.f32 %v14161_v3, %v14160_v24 }
 0x927   :  { %v8508_v2 = vmul.f32 %v19718_v1, %v8458_v21  ;;  %v8537_v38 = vmax.f32 %v8525_v52, 0.0  ;;  %v14159_v27 = vadd.f32 %v14158_v26, %v14157_v42  ;;  %v8398_v22 = vadd.f32 %v14156_v53, %v19703_v44 }
 0x928   :  { %v8462_v48 = vpop.f32.mrf.mxu1 }
 0x929   :  { %v8526_v8 = vadd.f32 %v19724_v40, %v8508_v2  ;;  %v8463_v7 = vadd.f32 %v8462_v48, %v8376_v17  ;;  %v14163_v2 = vpop.f32.mrf.mxu0 }
 0x92a   :  { %v14622_v37 = vpop.f32.mrf.mxu1 }
 0x92b   :  { %v8538_v55 = vmax.f32 %v8526_v8, 0.0  ;;  %v8509_v13 = vmul.f32 %v19718_v1, %v8463_v7  ;;  %v8319_v8 = vadd.f32 %v14104_v16, %v19686_v23  ;;  %v8401_v7 = vadd.f32 %v14159_v27, %v8314_v57  ;;  %v14164_v56 = vpop.f32.mrf.mxu0 }
 0x92c   :  { %v8465_v59 = vpop.f32.mrf.mxu1  ;;  %v14107_v37 = vadd.f32 %v19713_v54, %v19711_v30  ;;  %v14165_v23 = vadd.f32 %v14164_v56, %v14163_v2 }
 0x92d   :  { %v8466_v62 = vadd.f32 %v8465_v59, %v8379_v33  ;;  %v8552_v49 = vpack.c.bf16 %v8538_v55, %v8537_v38  ;;  %v8527_v32 = vadd.f32 %v19724_v40, %v8509_v13  ;;  %v8406_v54 = vadd.f32 %v14162_v15, %v8319_v8 }
 0x92e   :  { %v14623_v18 = vpop.f32.mrf.mxu1 }
 0x92f   :  { %v8510_v35 = vmul.f32 %v19718_v1, %v8466_v62  ;;  %v8539_v6 = vmax.f32 %v8527_v32, 0.0  ;;  %v8322_v62 = vadd.f32 %v14107_v37, %v19688_v0 }
 0x930   :  { %v8470_v11 = vpop.f32.mrf.mxu1 }
 0x931   :  { %v8528_v4 = vadd.f32 %v19724_v40, %v8510_v35 }
 0x932   :  { %v14626_v19 = vpop.f32.mrf.mxu1 }
 0x933   :  { %v8540_v36 = vmax.f32 %v8528_v4, 0.0  ;;  %v8409_v19 = vadd.f32 %v14165_v23, %v8322_v62 }
 0x934   :  { %v8472_v43 = vpop.f32.mrf.mxu1 }
 0x935   :  { %v8553_v9 = vpack.c.bf16 %v8540_v36, %v8539_v6 }
 0x936   :  { %v14627_v45 = vpop.f32.mrf.mxu1 }
 0x937   :  { %14728 = vmatprep.subr.msk.bf16.mxu0 %vm4440_vm1, %v8553_v9  ;;  %v8575_v5 = vsel %vm4440_vm1, %v8553_v9, 0 }
 0x938   :  { %v8476_v12 = vpop.f32.mrf.mxu1  ;;  %14641 = vmatpush3.bf16.msra.mxu0 %v8575_v5 }
 0x939   :  { %v8477_v28 = vadd.f32 %v8476_v12, %v8390_v14  ;;  %14642 = vmatprep.subr.bf16.mxu0 %v8552_v49 }
 0x93a   :  { %v14630_v50 = vpop.f32.mrf.mxu1 }
 0x93b   :  { %v8511_v21 = vmul.f32 %v19718_v1, %v8477_v28 }
 0x93c   :  { %v8479_v34 = vpop.f32.mrf.mxu1  ;;  %14643 = vmatpush3.bf16.msra.mxu0 %v8552_v49 }
 0x93d   :  { %v8480_v51 = vadd.f32 %v8479_v34, %v8393_v25  ;;  %14644 = vmatprep.subr.bf16.mxu0 %v8551_v47  ;;  %v8529_v10 = vadd.f32 %v19724_v40, %v8511_v21 }
 0x93e   :  { %v14631_v52 = vpop.f32.mrf.mxu1 }
 0x93f   :  { %v8512_v61 = vmul.f32 %v19718_v1, %v8480_v51  ;;  %v8541_v38 = vmax.f32 %v8529_v10, 0.0 }
 0x940   :  { %v8484_v17 = vpop.f32.mrf.mxu1  ;;  %14645 = vmatpush3.bf16.msra.mxu0 %v8551_v47 }
 0x941   :  { %v8530_v20 = vadd.f32 %v19724_v40, %v8512_v61  ;;  %v8485_v48 = vadd.f32 %v8484_v17, %v8398_v22 }
 0x942   :  { %v14634_v29 = vpop.f32.mrf.mxu1 }
 0x943   :  { %v8542_v44 = vmax.f32 %v8530_v20, 0.0  ;;  %v8513_v55 = vmul.f32 %v19718_v1, %v8485_v48  ;;  %14647 = vmatmul.mubr.msk.bf16.vlgmr.msra.gmra.mxu0 %vm8567_vm10, %v15128_v58 }
 0x944   :  { %v8487_v13 = vpop.f32.mrf.mxu1  ;;  %14656 = vmatprep.mubr.msk.bf16.mxu0 %vm8567_vm10, %v19676_v46 }
 0x945   :  { %v8488_v47 = vadd.f32 %v8487_v13, %v8401_v7  ;;  %v8554_v33 = vpack.c.bf16 %v8542_v44, %v8541_v38  ;;  %v8531_v49 = vadd.f32 %v19724_v40, %v8513_v55 }
 0x946   :  { %v14635_v59 = vpop.f32.mrf.mxu1 }
 0x947   :  { %v8514_v30 = vmul.f32 %v19718_v1, %v8488_v47  ;;  %v8543_v11 = vmax.f32 %v8531_v49, 0.0 }
 0x948   :  { %v8492_v18 = vpop.f32.mrf.mxu1 }
 0x949   :  { %v8532_v42 = vadd.f32 %v19724_v40, %v8514_v30  ;;  %v8493_v32 = vadd.f32 %v8492_v18, %v8406_v54 }
 0x94a   :  { %v14638_v35 = vpop.f32.mrf.mxu1 }
 0x94b   :  { %v8544_v4 = vmax.f32 %v8532_v42, 0.0  ;;  %v8515_v46 = vmul.f32 %v19718_v1, %v8493_v32 }
 0x94c   :  { %v8495_v41 = vpop.f32.mrf.mxu1 }
 0x94d   :  { %v8496_v26 = vadd.f32 %v8495_v41, %v8409_v19  ;;  %v8555_v6 = vpack.c.bf16 %v8544_v4, %v8543_v11  ;;  %v8533_v0 = vadd.f32 %v19724_v40, %v8515_v46 }
 0x94e   :  { %v14639_v36 = vpop.f32.mrf.mxu1 }
 0x94f   :  { %v8516_v43 = vmul.f32 %v19718_v1, %v8496_v26  ;;  %v8545_v45 = vmax.f32 %v8533_v0, 0.0 }
 0x951   :  { %v8534_v9 = vadd.f32 %v19724_v40, %v8516_v43 }
 0x953   :  { %v8546_v31 = vmax.f32 %v8534_v9, 0.0 }
 0x955   :  { %v8556_v24 = vpack.c.bf16 %v8546_v31, %v8545_v45 }
 0x957   :  { %14729 = vmatprep.subr.msk.bf16.mxu0 %vm4440_vm1, %v8556_v24  ;;  %v8647_v14 = vsel %vm4440_vm1, %v8556_v24, 0 }
 0x958   :  { %14651 = vmatpush3.bf16.msra.mxu0 %v8647_v14 }
 0x959   :  { %14652 = vmatprep.subr.bf16.mxu0 %v8555_v6 }
 0x95c   :  { %14653 = vmatpush3.bf16.msra.mxu0 %v8555_v6 }
 0x95d   :  { %14654 = vmatprep.subr.bf16.mxu0 %v8554_v33 }
 0x960   :  { %14655 = vmatpush3.bf16.msra.mxu0 %v8554_v33 }
 0x963   :  { %14657 = vmatmul.mubr.msk.bf16.vlgmr.msra.gmra.mxu0 %vm8567_vm10, %v15128_v58 }
 0xa03   :  { %v14648_v5 = vpop.f32.mrf.mxu0 }
 0xa05   :  { %v8611_v12 = vpop.f32.mrf.mxu0 }
 0xa07   :  { %v14649_v28 = vpop.f32.mrf.mxu0 }
 0xa08   :  { %v13430_v1 = vpack.c.bf16 %v14649_v28, %v14648_v5 }
 0xa09   :  { %v8614_v63 = vpop.f32.mrf.mxu0 }
 0xa0a   :  { %13482 = vst [vmem:[#allocation4 + $0x8] sm:$0xff] %v13430_v1   ;;  %v13425_v40 = vpack.c.bf16 %v8614_v63, %v8611_v12 }
 0xa0c   :  { %13426 = vst [vmem:[#allocation4] sm:$0xff] %v13425_v40  }
 0xa23   :  { %v14658_v50 = vpop.f32.mrf.mxu0 }
 0xa25   :  { %v8683_v53 = vpop.f32.mrf.mxu0 }
 0xa27   :  { %v14659_v3 = vpop.f32.mrf.mxu0 }
 0xa28   :  { %v13440_v21 = vpack.c.bf16 %v14659_v3, %v14658_v50 }
 0xa29   :  { %v8686_v25 = vpop.f32.mrf.mxu0 }
 0xa2a   :  { %13484 = vst [vmem:[#allocation4 + $0x18] sm:$0xff] %v13440_v21   ;;  %v13435_v34 = vpack.c.bf16 %v8686_v25, %v8683_v53 }
 0xa2c   :  { %13483 = vst [vmem:[#allocation4 + $0x10] sm:$0xff] %v13435_v34  }
 0xa2d   :  { %15346 = dma.done.wait [#allocation13 + $0x2], 9216 }
 0xa2e   :  { %15347 = vsyncadd [#allocation13 + $0x2], 4294958080  ;;  %v15129_v51 = vld [vmem:[#allocation9 + $0x78] sm:$0xff]   ;;  %v15133_v52 = vld [vmem:[#allocation9 + $0x70] sm:$0xff]   ;;  %s20831_s2 = sld [smem:[#allocation199_spill]]  ;;  %vm9787_vm11 = vcmask 113664  }
 0xa2f   :  { %v15130_v57 = vld [vmem:[#allocation9 + $0xf8] sm:$0xff]   ;;  %14191 = vmatprep.subr.bf16.mxu1 %v15129_v51  ;;  %v15134_v2 = vld [vmem:[#allocation9 + $0xf0] sm:$0xff]   ;;  %v15137_v22 = vld [vmem:[#allocation9 + $0x68] sm:$0xff]  }
 0xa30   :  { %v15131_v27 = vld [vmem:[#allocation9 + $0x38] sm:$0xff]   ;;  %14225 = vmatprep.subr.bf16.mxu0 %v15130_v57  ;;  %v15135_v10 = vld [vmem:[#allocation9 + $0x30] sm:$0xff]   ;;  %v15138_v58 = vld [vmem:[#allocation9 + $0xe8] sm:$0xff]  }
 0xa31   :  { %v15132_v16 = vld [vmem:[#allocation9 + $0xb8] sm:$0xff]   ;;  %14192 = vmatpush3.bf16.msra.mxu1 %v15131_v27  ;;  %v15136_v61 = vld [vmem:[#allocation9 + $0xb0] sm:$0xff]   ;;  %v15139_v17 = vld [vmem:[#allocation9 + $0x28] sm:$0xff]  }
 0xa32   :  { %14226 = vmatpush3.bf16.msra.mxu0 %v15132_v16  ;;  %14193 = vmatprep.subr.bf16.mxu1 %v15133_v52  ;;  %v15140_v20 = vld [vmem:[#allocation9 + $0xa8] sm:$0xff]   ;;  %v15141_v48 = vld [vmem:[#allocation9 + $0x60] sm:$0xff]   ;;  %v15145_v7 = vld [vmem:[#allocation9 + $0x58] sm:$0xff]  }
 0xa33   :  { %14227 = vmatprep.subr.bf16.mxu0 %v15134_v2  ;;  %v15142_v8 = vld [vmem:[#allocation9 + $0xe0] sm:$0xff]   ;;  %v15146_v37 = vld [vmem:[#allocation9 + $0xd8] sm:$0xff]   ;;  %v15149_v44 = vld [vmem:[#allocation9 + $0x50] sm:$0xff]  }
 0xa34   :  { %v15143_v15 = vld [vmem:[#allocation9 + $0x20] sm:$0xff]   ;;  %v15147_v56 = vld [vmem:[#allocation9 + $0x18] sm:$0xff]   ;;  %v15150_v55 = vld [vmem:[#allocation9 + $0xd0] sm:$0xff]  }
 0xa35   :  { %14194 = vmatpush3.bf16.msra.mxu1 %v15135_v10  ;;  %v15144_v29 = vld [vmem:[#allocation9 + $0xa0] sm:$0xff]   ;;  %v15148_v38 = vld [vmem:[#allocation9 + $0x98] sm:$0xff]   ;;  %v15151_v13 = vld [vmem:[#allocation9 + $0x10] sm:$0xff]  }
 0xa36   :  { %14228 = vmatpush3.bf16.msra.mxu0 %v15136_v61  ;;  %14195 = vmatprep.subr.bf16.mxu1 %v15137_v22  ;;  %v15152_v47 = vld [vmem:[#allocation9 + $0x90] sm:$0xff]   ;;  %v15153_v33 = vld [vmem:[#allocation9 + $0x48] sm:$0xff]   ;;  %v15157_v49 = vld [vmem:[#allocation9 + $0x40] sm:$0xff]  }
 0xa37   :  { %14229 = vmatprep.subr.bf16.mxu0 %v15138_v58  ;;  %v15154_v23 = vld [vmem:[#allocation9 + $0xc8] sm:$0xff]   ;;  %v15158_v30 = vld [vmem:[#allocation9 + $0xc0] sm:$0xff]   ;;  %v8866_v42 = vld [vmem:[#allocation4] sm:$0xf] }
 0xa38   :  { %v15155_v59 = vld [vmem:[#allocation9 + $0x8] sm:$0xff]   ;;  %v15159_v54 = vld [vmem:[#allocation9] sm:$0xff]   ;;  %v19774_v32 = vld [vmem:[#allocation4 + $0x4] sm:$0xf] }
 0xa39   :  { %14196 = vmatpush3.bf16.msra.mxu1 %v15139_v17  ;;  %v15156_v62 = vld [vmem:[#allocation9 + $0x88] sm:$0xff]   ;;  %v15160_v18 = vld [vmem:[#allocation9 + $0x80] sm:$0xff]   ;;  %v19776_v35 = vld [vmem:[#allocation4 + $0x8] sm:$0xf]  ;;  %v12836_v4 = vcombine.low %v8866_v42, %v19774_v32 }
 0xa3a   :  { %14230 = vmatpush3.bf16.msra.mxu0 %v15140_v20  ;;  %14197 = vmatprep.subr.bf16.mxu1 %v15141_v48  ;;  %v8869_v11 = vld [vmem:[#allocation4 + $0xc] sm:$0xf]  ;;  %v8874_v46 = vld [vmem:[#allocation4] sm:$0xc]  ;;  %v19797_v51 = vcombine.low %v19774_v32, %v19776_v35  ;;  %v15173_v16 = vld [vmem:[#allocation9 + $0x168] sm:$0xff]  }
 0xa3b   :  { %14231 = vmatprep.subr.bf16.mxu0 %v15142_v8  ;;  %v8873_v19 = vld [vmem:[#allocation4] sm:$0xe]  ;;  %v19780_v41 = vcombine.low %v19776_v35, %v8869_v11  ;;  %v19783_v26 = vcombine.low %v8874_v46, %v19774_v32  ;;  %v15165_v36 = vld [vmem:[#allocation9 + $0x178] sm:$0xff]   ;;  %v8903_v0 = vshrl.u32 %v12836_v4, 16  ;;  %v8905_v43 = vshll.u32 %v12836_v4, 16  ;;  %v15174_v10 = vld [vmem:[#allocation9 + $0x128] sm:$0xff]  }
 0xa3c   :  { %v12840_v6 = vcombine.low %v8873_v19, %v19774_v32  ;;  %v15167_v14 = vld [vmem:[#allocation9 + $0x1f8] sm:$0xff]   ;;  %v15169_v21 = vld [vmem:[#allocation9 + $0x170] sm:$0xff]   ;;  %v19800_v52 = vld [vmem:[#allocation4 + $0x10] sm:$0xf]  ;;  %v9011_v58 = vshrl.u32 %v19797_v51, 16  ;;  %v9013_v20 = vshll.u32 %v19797_v51, 16 }
 0xa3d   :  { %14198 = vmatpush3.bf16.msra.mxu1 %v15143_v15  ;;  %v8910_v9 = vshll.u32 %v19780_v41, 16  ;;  %v8945_v45 = vrot.slane %v19783_v26, 2  ;;  %v8946_v31 = vrot.slane %v19780_v41, 2  ;;  %v8907_v5 = vrot.slane %v8905_v43, 1  ;;  %v15168_v50 = vld [vmem:[#allocation9 + $0x1b8] sm:$0xff]   ;;  %v15171_v25 = vld [vmem:[#allocation9 + $0x1f0] sm:$0xff]  }
 0xa3e   :  { %14232 = vmatpush3.bf16.msra.mxu0 %v15144_v29  ;;  %14199 = vmatprep.subr.bf16.mxu1 %v15145_v7  ;;  %v8931_v24 = vrot.slane %v12840_v6, 1  ;;  %v8932_v12 = vrot.slane %v19780_v41, 1  ;;  %v15166_v53 = vld [vmem:[#allocation9 + $0x138] sm:$0xff]   ;;  %v15172_v34 = vld [vmem:[#allocation9 + $0x1b0] sm:$0xff]   ;;  %v8914_v27 = vshrl.u32 %v19780_v41, 16  ;;  %v15176_v22 = vld [vmem:[#allocation9 + $0x1e8] sm:$0xff]  }
 0xa3f   :  { %14233 = vmatprep.subr.bf16.mxu0 %v15146_v37  ;;  %v8912_v28 = vrot.slane %v8910_v9, 1  ;;  %v8947_v1 = vsel %vm4828_vm3, %v8945_v45, %v8946_v31  ;;  %v8908_v63 = vor.u32 %v8907_v5, %v8903_v0  ;;  %v15170_v57 = vld [vmem:[#allocation9 + $0x130] sm:$0xff]   ;;  %v19802_v2 = vld [vmem:[#allocation4 + $0x14] sm:$0xf]  ;;  %v15177_v17 = vld [vmem:[#allocation9 + $0x1a8] sm:$0xff]   ;;  %v19816_v37 = vcombine.low %v8869_v11, %v19800_v52 }
 0xa40   :  { %9566 = vmatprep.mubr.bf16.mxu0 %v8947_v1  ;;  %v8933_v40 = vsel %vm4440_vm1, %v8931_v24, %v8932_v12  ;;  %v19806_v61 = vcombine.low %v19800_v52, %v19802_v2  ;;  %v15178_v7 = vld [vmem:[#allocation9 + $0x160] sm:$0xff]   ;;  %v15185_v11 = vld [vmem:[#allocation9 + $0x1d8] sm:$0xff]   ;;  %v15188_v43 = vld [vmem:[#allocation9 + $0x150] sm:$0xff]   ;;  %v8959_v24 = vshrl.u32 %v19783_v26, 16  ;;  %v8962_v5 = vshll.u32 %v19783_v26, 16 }
 0xa41   :  { %14200 = vmatpush3.bf16.msra.mxu1 %v15147_v56  ;;  %v8913_v3 = vsel %vm4239_vm2, %v8908_v63, %v8912_v28  ;;  %v8916_v48 = vor.u32 %v8914_v27, %v8912_v28  ;;  %v8871_v19 = vld [vmem:[#allocation4 + $0x14] sm:$0x7]  ;;  %v15187_v6 = vld [vmem:[#allocation9 + $0x198] sm:$0xff]   ;;  %v15191_v28 = vld [vmem:[#allocation9 + $0x190] sm:$0xff]   ;;  %v8966_v1 = vrot.slane %v8914_v27, 2 }
 0xa42   :  { %14234 = vmatpush3.bf16.msra.mxu0 %v15148_v38  ;;  %14201 = vmatprep.subr.bf16.mxu1 %v15149_v44  ;;  %v8918_v8 = vshll.u32 %v19806_v61, 16  ;;  %v8948_v15 = vrot.slane %v19806_v61, 2  ;;  %v8934_v29 = vrot.slane %v19806_v61, 1  ;;  %v12838_v0 = vcombine.low %v19800_v52, %v8871_v19  ;;  %v15192_v63 = vld [vmem:[#allocation9 + $0x148] sm:$0xff]  }
 0xa43   :  { %14235 = vmatprep.subr.bf16.mxu0 %v15150_v55  ;;  %9511 = vmatprep.mubr.bf16.mxu1 %v8913_v3  ;;  %v15179_v55 = vld [vmem:[#allocation9 + $0x120] sm:$0xff]   ;;  %v8964_v3 = vrot.slane %v8962_v5, 3  ;;  %v15195_v26 = vld [vmem:[#allocation9 + $0x188] sm:$0xff]  }
 0xa44   :  { %v8920_v56 = vrot.slane %v8918_v8, 1  ;;  %v8949_v38 = vsel %vm4828_vm3, %v8946_v31, %v8948_v15  ;;  %v8935_v44 = vsel %vm4440_vm1, %v8932_v12, %v8934_v29  ;;  %v15189_v31 = vld [vmem:[#allocation9 + $0x110] sm:$0xff]   ;;  %v8967_v12 = vrot.slane %v8910_v9, 3  ;;  %v15197_v9 = vld [vmem:[#allocation9 + $0x100] sm:$0xff]  }
 0xa45   :  { %14202 = vmatpush3.bf16.msra.mxu1 %v15151_v13  ;;  %v15180_v13 = vld [vmem:[#allocation9 + $0x1e0] sm:$0xff]  }
 0xa46   :  { %14236 = vmatpush3.bf16.msra.mxu0 %v15152_v47  ;;  %14203 = vmatprep.subr.bf16.mxu1 %v15153_v33  ;;  %v8922_v47 = vshrl.u32 %v19806_v61, 16  ;;  %v8921_v33 = vsel %vm4239_vm2, %v8916_v48, %v8920_v56  ;;  %v8879_v48 = vld [vmem:[#allocation4 + $0x18] sm:$0xf] }
 0xa47   :  { %14237 = vmatprep.subr.bf16.mxu0 %v15154_v23  ;;  %v15181_v23 = vld [vmem:[#allocation9 + $0x1a0] sm:$0xff]  }
 0xa49   :  { %14204 = vmatpush3.bf16.msra.mxu1 %v15155_v59  ;;  %v9015_v59 = vrot.slane %v9013_v20, 1  ;;  %v8970_v20 = vrot.slane %v8922_v47, 2 }
 0xa4a   :  { %14238 = vmatpush3.bf16.msra.mxu0 %v15156_v62  ;;  %14205 = vmatprep.subr.bf16.mxu1 %v15157_v49  ;;  %v15182_v62 = vld [vmem:[#allocation9 + $0x158] sm:$0xff]   ;;  %v8924_v49 = vor.u32 %v8922_v47, %v8920_v56 }
 0xa4b   :  { %14239 = vmatprep.subr.bf16.mxu0 %v15158_v30  ;;  %v9018_v30 = vshll.u32 %v19816_v37, 16  ;;  %v9016_v42 = vor.u32 %v9015_v59, %v9011_v58  ;;  %v9022_v58 = vshrl.u32 %v19816_v37, 16 }
 0xa4d   :  { %14206 = vmatpush3.bf16.msra.mxu1 %v15159_v54  ;;  %v15183_v54 = vld [vmem:[#allocation9 + $0x118] sm:$0xff]  }
 0xa4e   :  { %14240 = vmatpush3.bf16.msra.mxu0 %v15160_v18  ;;  %14259 = vmatprep.subr.bf16.mxu1 %v15165_v36  ;;  %v15184_v18 = vld [vmem:[#allocation4 + $0x18] ss:$0 sps:$4 sm:$0x11]  }
 0xa4f   :  { %14293 = vmatprep.subr.bf16.mxu0 %v15167_v14  ;;  %v8950_v46 = vrot.slane %v15184_v18, 2  ;;  %v15190_v14 = vld [vmem:[#allocation9 + $0x1d0] sm:$0xff]  }
 0xa50   :  { %9512 = vmatmul.mubr.bf16.vlgmr.msra.gmra.mxu1 %v12836_v4  ;;  %v19828_v4 = vrot.slane %v9018_v30, 1  ;;  %v15206_v30 = vld [vmem:[#allocation9 + $0x228] sm:$0xff]  }
 0xa51   :  { %9567 = vmatmul.mubr.bf16.vlgmr.msra.gmra.mxu0 %v8933_v40  ;;  %14260 = vmatpush3.bf16.msra.mxu1 %v15166_v53  ;;  %v8951_v36 = vsel %vm4828_vm3, %v8948_v15, %v8950_v46  ;;  %v15193_v40 = vld [vmem:[#allocation9 + $0x108] sm:$0xff]   ;;  %v15203_v15 = vld [vmem:[#allocation9 + $0x238] sm:$0xff]  }
 0xa52   :  { %14294 = vmatpush3.bf16.msra.mxu0 %v15168_v50  ;;  %14261 = vmatprep.subr.bf16.mxu1 %v15169_v21  ;;  %v9021_v45 = vsel %vm4239_vm2, %v9016_v42, %v19828_v4  ;;  %v8961_v50 = vrot.slane %v8959_v24, 2  ;;  %v15194_v53 = vld [vmem:[#allocation9 + $0x1c8] sm:$0xff]   ;;  %v15196_v21 = vld [vmem:[#allocation9 + $0x140] sm:$0xff]  }
 0xa53   :  { %14295 = vmatprep.subr.bf16.mxu0 %v15171_v25  ;;  %9574 = vmatprep.mubr.bf16.mxu0 %v8949_v38  ;;  %v15198_v25 = vld [vmem:[#allocation9 + $0x1c0] sm:$0xff]   ;;  %v9024_v38 = vor.u32 %v9022_v58, %v19828_v4 }
 0xa54   :  { %9519 = vmatprep.mubr.bf16.mxu1 %v8921_v33  ;;  %v8965_v27 = vor.u32 %v8964_v3, %v8961_v50  ;;  %v15207_v4 = vld [vmem:[#allocation9 + $0x220] sm:$0xff]  }
 0xa55   :  { %14262 = vmatpush3.bf16.msra.mxu1 %v15170_v57  ;;  %v8990_v57 = vrot.slane %v19780_v41, 3 }
 0xa56   :  { %14296 = vmatpush3.bf16.msra.mxu0 %v15172_v34  ;;  %14263 = vmatprep.subr.bf16.mxu1 %v15173_v16  ;;  %v8877_v34 = vld [vmem:[#allocation4] sm:$0x8]  ;;  %v8968_v16 = vor.u32 %v8967_v12, %v8966_v1 }
 0xa57   :  { %14297 = vmatprep.subr.bf16.mxu0 %v15176_v22  ;;  %v12844_v52 = vcombine.low %v8877_v34, %v19774_v32  ;;  %v8992_v22 = vrot.slane %v19806_v61, 3  ;;  %v19850_v32 = vcombine.low %v19802_v2, %v8879_v48  ;;  %v15208_v61 = vld [vmem:[#allocation4 + $0x18] ss:$0 sps:$4 sm:$0x33]  }
 0xa58   :  { %9520 = vmatmul.mubr.bf16.gmra.mxu1 %v19780_v41  ;;  %v8969_v41 = vsel %vm4975_vm4, %v8965_v27, %v8968_v16  ;;  %v8975_v33 = vshrl.u32 %v15208_v61, 16  ;;  %v8994_v59 = vrot.slane %v15208_v61, 3 }
 0xa59   :  { %14264 = vmatpush3.bf16.msra.mxu1 %v15174_v10  ;;  %9575 = vmatmul.mubr.bf16.gmra.mxu0 %v8935_v44  ;;  %v15200_v10 = vld [vmem:[#allocation9 + $0x180] sm:$0xff]   ;;  %v8993_v56 = vsel %vm5107_vm6, %v8990_v57, %v8992_v22  ;;  %v9026_v44 = vshll.u32 %v19850_v32, 16  ;;  %v9042_v12 = vrot.slane %v19850_v32, 1 }
 0xa5a   :  { %14298 = vmatpush3.bf16.msra.mxu0 %v15177_v17  ;;  %14265 = vmatprep.subr.bf16.mxu1 %v15178_v7  ;;  %v8989_v17 = vrot.slane %v12844_v52, 3  ;;  %v8995_v42 = vsel %vm5107_vm6, %v8992_v22, %v8994_v59 }
 0xa5b   :  { %14299 = vmatprep.subr.bf16.mxu0 %v15180_v13  ;;  %9525 = vmatprep.mubr.bf16.mxu1 %v8924_v49  ;;  %v9028_v47 = vrot.slane %v9026_v44, 1 }
 0xa5c   :  { %9580 = vmatprep.mubr.bf16.mxu0 %v8951_v36  ;;  %v8991_v7 = vsel %vm5107_vm6, %v8989_v17, %v8990_v57  ;;  %v15209_v36 = vld [vmem:[#allocation9 + $0x218] sm:$0xff]  }
 0xa5d   :  { %14266 = vmatpush3.bf16.msra.mxu1 %v15179_v55  ;;  %v15204_v55 = vld [vmem:[#allocation9 + $0x230] sm:$0xff]  }
 0xa5e   :  { %14300 = vmatpush3.bf16.msra.mxu0 %v15181_v23  ;;  %14267 = vmatprep.subr.bf16.mxu1 %v15182_v62  ;;  %v8978_v23 = vshll.u32 %v15208_v61, 16 }
 0xa5f   :  { %14301 = vmatprep.subr.bf16.mxu0 %v15185_v11  ;;  %v8878_v11 = vld [vmem:[#allocation4 + $0x18] sm:$0x7] }
 0xa60   :  { %9526 = vmatmul.mubr.bf16.gmra.mxu1 %v12838_v0  ;;  %v8980_v18 = vrot.slane %v8978_v23, 3  ;;  %v12847_v19 = vcombine.low %v19802_v2, %v8878_v11  ;;  %v15211_v0 = vld [vmem:[#allocation9 + $0x210] sm:$0xff]   ;;  %v15212_v2 = vld [vmem:[#allocation9 + $0x208] sm:$0xff]  }
 0xa61   :  { %14268 = vmatpush3.bf16.msra.mxu1 %v15183_v54  ;;  %9581 = vmatmul.mubr.bf16.gmra.mxu0 %v8934_v29  ;;  %v8971_v29 = vrot.slane %v8918_v8, 3  ;;  %v9030_v8 = vshrl.u32 %v19850_v32, 16  ;;  %v8977_v54 = vrot.slane %v8975_v33, 2 }
 0xa62   :  { %14302 = vmatpush3.bf16.msra.mxu0 %v15187_v6  ;;  %14269 = vmatprep.subr.bf16.mxu1 %v15188_v43  ;;  %v8880_v43 = vld [vmem:[#allocation4 + $0x4] sm:$0xe] }
 0xa63   :  { %9676 = vmatprep.mubr.bf16.mxu0 %v9021_v45  ;;  %14303 = vmatprep.subr.bf16.mxu0 %v15190_v14  ;;  %v8972_v13 = vor.u32 %v8971_v29, %v8970_v20  ;;  %v9032_v62 = vor.u32 %v9030_v8, %v9028_v47  ;;  %v8981_v46 = vor.u32 %v8980_v18, %v8977_v54  ;;  %v9040_v14 = vrot.slane %v19816_v37, 1 }
 0xa64   :  { %9621 = vmatprep.mubr.bf16.mxu1 %v8991_v7  ;;  %v12849_v45 = vcombine.low %v8880_v43, %v19776_v35 }
 0xa65   :  { %14270 = vmatpush3.bf16.msra.mxu1 %v15189_v31  ;;  %v8973_v49 = vsel %vm4975_vm4, %v8968_v16, %v8972_v13  ;;  %v8982_v6 = vsel %vm4975_vm4, %v8972_v13, %v8981_v46  ;;  %v15213_v31 = vld [vmem:[#allocation9 + $0x200] sm:$0xff]   ;;  %v9043_v35 = vsel %vm4440_vm1, %v9040_v14, %v9042_v12 }
 0xa66   :  { %14304 = vmatpush3.bf16.msra.mxu0 %v15191_v28  ;;  %14271 = vmatprep.subr.bf16.mxu1 %v15192_v63  ;;  %v9039_v24 = vrot.slane %v12849_v45, 1 }
 0xa67   :  { %14305 = vmatprep.subr.bf16.mxu0 %v15194_v53 }
 0xa68   :  { %v9041_v5 = vsel %vm4440_vm1, %v9039_v24, %v9040_v14  ;;  %v12922_v14 = vld [vmem:[%s20831_s2] ss:$0 sm:$0xff] }
 0xa69   :  { %14272 = vmatpush3.bf16.msra.mxu1 %v15193_v40 }
 0xa6a   :  { %14306 = vmatpush3.bf16.msra.mxu0 %v15195_v26  ;;  %14273 = vmatprep.subr.bf16.mxu1 %v15196_v21 }
 0xa6b   :  { %14307 = vmatprep.subr.bf16.mxu0 %v15198_v25 }
 0xa6d   :  { %14274 = vmatpush3.bf16.msra.mxu1 %v15197_v9 }
 0xa6e   :  { %14308 = vmatpush3.bf16.msra.mxu0 %v15200_v10  ;;  %14660 = vmatprep.subr.bf16.mxu1 %v15357_v39 }
 0xa6f   :  { %14688 = vmatprep.subr.bf16.mxu0 %v15357_v39 }
 0xa70   :  { %9622 = vmatmul.mubr.bf16.vlgmr.msra.gmra.mxu1 %v8969_v41 }
 0xa71   :  { %9677 = vmatmul.mubr.bf16.vlgmr.msra.gmra.mxu0 %v19797_v51  ;;  %14661 = vmatpush3.bf16.msra.mxu1 %v15203_v15  ;;  %v9029_v51 = vsel %vm4239_vm2, %v9024_v38, %v9028_v47 }
 0xa72   :  { %9629 = vmatprep.mubr.bf16.mxu1 %v8993_v56  ;;  %14662 = vmatprep.subr.bf16.mxu1 %v15357_v39 }
 0xa73   :  { %9684 = vmatprep.mubr.bf16.mxu0 %v9029_v51 }
 0xa75   :  { %14663 = vmatpush3.bf16.msra.mxu1 %v15204_v55 }
 0xa76   :  { %14664 = vmatprep.subr.bf16.mxu1 %v15357_v39 }
 0xa78   :  { %9630 = vmatmul.mubr.bf16.gmra.mxu1 %v8973_v49 }
 0xa79   :  { %9685 = vmatmul.mubr.bf16.gmra.mxu0 %v19816_v37  ;;  %14665 = vmatpush3.bf16.msra.mxu1 %v15206_v30 }
 0xa7a   :  { %9690 = vmatprep.mubr.bf16.mxu0 %v9032_v62  ;;  %9635 = vmatprep.mubr.bf16.mxu1 %v8995_v42 }
 0xa7b   :  { %14666 = vmatprep.subr.bf16.mxu1 %v15357_v39 }
 0xa7d   :  { %14667 = vmatpush3.bf16.msra.mxu1 %v15207_v4 }
 0xa7e   :  { %14668 = vmatprep.subr.bf16.mxu1 %v15357_v39 }
 0xa80   :  { %9636 = vmatmul.mubr.bf16.gmra.mxu1 %v8982_v6 }
 0xa81   :  { %9691 = vmatmul.mubr.bf16.gmra.mxu0 %v12847_v19  ;;  %14669 = vmatpush3.bf16.msra.mxu1 %v15209_v36 }
 0xa82   :  { %14690 = vmatprep.mubr.msk.bf16.mxu0 %vm15358_vm9, %v15357_v39  ;;  %14676 = vmatprep.mubr.msk.bf16.mxu1 %vm15358_vm9, %v15357_v39 }
 0xa83   :  { %14670 = vmatprep.subr.bf16.mxu1 %v15357_v39 }
 0xa85   :  { %14671 = vmatpush3.bf16.msra.mxu1 %v15211_v0 }
 0xa86   :  { %14672 = vmatprep.subr.bf16.mxu1 %v15357_v39 }
 0xa89   :  { %14673 = vmatpush3.bf16.msra.mxu1 %v15212_v2 }
 0xa8a   :  { %14674 = vmatprep.subr.bf16.mxu1 %v15357_v39 }
 0xa8d   :  { %14675 = vmatpush3.bf16.msra.mxu1 %v15213_v31 }
 0xa90   :  { %14677 = vmatmul.mubr.bf16.vlgmr.msra.gmra.mxu1 %v9041_v5 }
 0xa91   :  { %14680 = vmatprep.mubr.msk.bf16.mxu1 %vm15358_vm9, %v15357_v39 }
 0xa98   :  { %14681 = vmatmul.mubr.bf16.gmra.mxu1 %v9043_v35 }
 0xa99   :  { %14684 = vmatprep.mubr.msk.bf16.mxu1 %vm15358_vm9, %v15357_v39 }
 0xaa0   :  { %14685 = vmatmul.mubr.bf16.gmra.mxu1 %v9042_v12 }
 0xb10   :  { %v14207_v1 = vpop.f32.mrf.mxu1 }
 0xb11   :  { %v14241_v28 = vpop.f32.mrf.mxu0 }
 0xb12   :  { %v14208_v63 = vpop.f32.mrf.mxu1 }
 0xb13   :  { %v14242_v37 = vpop.f32.mrf.mxu0  ;;  %v14209_v49 = vadd.f32 %v14208_v63, %v14207_v1  ;;  %v12923_v63 = vld [vmem:[%s20347_s12] ss:$0 sm:$0xff] }
 0xb14   :  { %v14210_v50 = vpop.f32.mrf.mxu1  ;;  %v14243_v30 = vadd.f32 %v14242_v37, %v14241_v28 }
 0xb15   :  { %v14244_v40 = vpop.f32.mrf.mxu0 }
 0xb16   :  { %v14211_v3 = vpop.f32.mrf.mxu1  ;;  %v9569_v42 = vadd.f32 %v14243_v30, %v14209_v49 }
 0xb17   :  { %v14245_v53 = vpop.f32.mrf.mxu0  ;;  %v14212_v11 = vadd.f32 %v14211_v3, %v14210_v50 }
 0xb18   :  { %v14213_v21 = vpop.f32.mrf.mxu1  ;;  %v14246_v4 = vadd.f32 %v14245_v53, %v14244_v40 }
 0xb19   :  { %v14247_v26 = vpop.f32.mrf.mxu0 }
 0xb1a   :  { %v14214_v25 = vpop.f32.mrf.mxu1  ;;  %v9572_v0 = vadd.f32 %v14246_v4, %v14212_v11 }
 0xb1b   :  { %v14248_v9 = vpop.f32.mrf.mxu0 }
 0xb1c   :  { %v14216_v57 = vpop.f32.mrf.mxu1 }
 0xb1d   :  { %v14250_v34 = vpop.f32.mrf.mxu0 }
 0xb1e   :  { %v14217_v16 = vpop.f32.mrf.mxu1 }
 0xb1f   :  { %v14251_v27 = vpop.f32.mrf.mxu0 }
 0xb20   :  { %v14219_v10 = vpop.f32.mrf.mxu1 }
 0xb21   :  { %v14253_v52 = vpop.f32.mrf.mxu0 }
 0xb22   :  { %v14220_v58 = vpop.f32.mrf.mxu1 }
 0xb23   :  { %v14254_v22 = vpop.f32.mrf.mxu0  ;;  %v14221_v50 = vadd.f32 %v14220_v58, %v14219_v10 }
 0xb24   :  { %v14222_v20 = vpop.f32.mrf.mxu1  ;;  %v14255_v53 = vadd.f32 %v14254_v22, %v14253_v52 }
 0xb25   :  { %v14256_v17 = vpop.f32.mrf.mxu0 }
 0xb26   :  { %v14223_v41 = vpop.f32.mrf.mxu1  ;;  %v9583_v27 = vadd.f32 %v14255_v53, %v14221_v50 }
 0xb27   :  { %v14257_v48 = vpop.f32.mrf.mxu0  ;;  %v14224_v16 = vadd.f32 %v14223_v41, %v14222_v20 }
 0xb30   :  { %v14275_v29 = vpop.f32.mrf.mxu1 }
 0xb31   :  { %v14309_v15 = vpop.f32.mrf.mxu0 }
 0xb32   :  { %v14276_v7 = vpop.f32.mrf.mxu1 }
 0xb33   :  { %v14310_v32 = vpop.f32.mrf.mxu0  ;;  %v14277_v18 = vadd.f32 %v14276_v7, %v14275_v29 }
 0xb34   :  { %v14278_v38 = vpop.f32.mrf.mxu1  ;;  %v14311_v6 = vadd.f32 %v14310_v32, %v14309_v15  ;;  %v14258_v15 = vadd.f32 %v14257_v48, %v14256_v17  ;;  %v15215_v17 = vld [vmem:[%s20348_s13] sm:$0xff]  }
 0xb35   :  { %v14312_v56 = vpop.f32.mrf.mxu0  ;;  %v9624_v19 = vadd.f32 %v14277_v18, %v9569_v42 }
 0xb36   :  { %v14279_v61 = vpop.f32.mrf.mxu1  ;;  %v9586_v52 = vadd.f32 %v14258_v15, %v14224_v16 }
 0xb37   :  { %v14313_v44 = vpop.f32.mrf.mxu0  ;;  %v14280_v36 = vadd.f32 %v14279_v61, %v14278_v38  ;;  %v9679_v31 = vadd.f32 %v14311_v6, %v9624_v19 }
 0xb38   :  { %v14281_v55 = vpop.f32.mrf.mxu1  ;;  %v14314_v45 = vadd.f32 %v14313_v44, %v14312_v56 }
 0xb39   :  { %v14315_v8 = vpop.f32.mrf.mxu0  ;;  %v9627_v2 = vadd.f32 %v14280_v36, %v9572_v0 }
 0xb3a   :  { %v14282_v47 = vpop.f32.mrf.mxu1 }
 0xb3b   :  { %v14316_v13 = vpop.f32.mrf.mxu0  ;;  %v9682_v37 = vadd.f32 %v14314_v45, %v9627_v2 }
 0xb3c   :  { %v14284_v23 = vpop.f32.mrf.mxu1 }
 0xb3d   :  { %v14318_v33 = vpop.f32.mrf.mxu0 }
 0xb3e   :  { %v14285_v51 = vpop.f32.mrf.mxu1 }
 0xb3f   :  { %v14319_v59 = vpop.f32.mrf.mxu0 }
 0xb40   :  { %v14287_v62 = vpop.f32.mrf.mxu1 }
 0xb41   :  { %v14321_v24 = vpop.f32.mrf.mxu0 }
 0xb42   :  { %v14288_v54 = vpop.f32.mrf.mxu1 }
 0xb43   :  { %v14322_v1 = vpop.f32.mrf.mxu0  ;;  %v14289_v21 = vadd.f32 %v14288_v54, %v14287_v62 }
 0xb44   :  { %v14290_v46 = vpop.f32.mrf.mxu1  ;;  %v14323_v32 = vadd.f32 %v14322_v1, %v14321_v24 }
 0xb45   :  { %v14324_v34 = vpop.f32.mrf.mxu0  ;;  %v9638_v56 = vadd.f32 %v14289_v21, %v9583_v27 }
 0xb46   :  { %v14291_v43 = vpop.f32.mrf.mxu1 }
 0xb47   :  { %v14292_v38 = vadd.f32 %v14291_v43, %v14290_v46  ;;  %v14325_v8 = vpop.f32.mrf.mxu0  ;;  %v9693_v47 = vadd.f32 %v14323_v32, %v9638_v56 }
 0xb48   :  { %v14326_v13 = vadd.f32 %v14325_v8, %v14324_v34 }
 0xb49   :  { %v9641_v55 = vadd.f32 %v14292_v38, %v9586_v52 }
 0xb4b   :  { %v9696_v59 = vadd.f32 %v14326_v13, %v9641_v55 }
 0xb50   :  { %v9733_v5 = vpop.f32.mrf.mxu1 }
 0xb51   :  { %v9734_v12 = vadd.f32 %v9733_v5, %v9679_v31  ;;  %v20832_v5 = vld [vmem:[#allocation44_spill] sm:$0xff] }
 0xb52   :  { %v14678_v35 = vpop.f32.mrf.mxu1 }
 0xb53   :  { %v9760_v28 = vmul.f32 %v12922_v14, %v9734_v12  ;;  %v20833_v12 = vld [vmem:[#allocation43_spill] sm:$0xff] }
 0xb54   :  { %v9736_v40 = vpop.f32.mrf.mxu1  ;;  %v12958_v35 = vcombine.high %v20833_v12, %v20832_v5 }
 0xb55   :  { %v9737_v3 = vadd.f32 %v9736_v40, %v9682_v37  ;;  %v9770_v9 = vadd.f32 %v12923_v63, %v9760_v28  ;;  %v20834_v28 = vld [vmem:[#allocation76_spill] sm:$0xff]  ;;  %v20835_v37 = vld [vmem:[#allocation75_spill] sm:$0xff] }
 0xb56   :  { %v14679_v26 = vpop.f32.mrf.mxu1  ;;  %v12990_v1 = vcombine.high %v20835_v37, %v20834_v28  ;;  %v12989_v40 = vcombine.low %v20835_v37, %v20834_v28 }
 0xb57   :  { %v9761_v25 = vmul.f32 %v12922_v14, %v9737_v3  ;;  %v9774_v44 = vmax.f32 %v9770_v9, 0.0 }
 0xb58   :  { %v9741_v57 = vpop.f32.mrf.mxu1 }
 0xb59   :  { %v9771_v29 = vadd.f32 %v12923_v63, %v9761_v25 }
 0xb5a   :  { %v14682_v7 = vpop.f32.mrf.mxu1 }
 0xb5b   :  { %v9775_v61 = vmax.f32 %v9771_v29, 0.0 }
 0xb5c   :  { %v9743_v10 = vpop.f32.mrf.mxu1 }
 0xb5d   :  { %v9780_v22 = vpack.c.bf16 %v9775_v61, %v9774_v44 }
 0xb5e   :  { %v14683_v58 = vpop.f32.mrf.mxu1 }
 0xb5f   :  { %v9792_v33 = vsel %vm4440_vm1, %v9780_v22, 0 }
 0xb60   :  { %v9747_v20 = vpop.f32.mrf.mxu1  ;;  %14689 = vmatpush3.bf16.msra.mxu0 %v9792_v33 }
 0xb61   :  { %v9748_v48 = vadd.f32 %v9747_v20, %v9693_v47  ;;  %14694 = vmatprep.subr.bf16.mxu0 %v15357_v39 }
 0xb62   :  { %v14686_v41 = vpop.f32.mrf.mxu1 }
 0xb63   :  { %v9762_v23 = vmul.f32 %v12922_v14, %v9748_v48  ;;  %14691 = vmatmul.mubr.msk.bf16.vlgmr.msra.gmra.mxu0 %vm9787_vm11, %v15215_v17 }
 0xb64   :  { %v9750_v51 = vpop.f32.mrf.mxu1  ;;  %14696 = vmatprep.mubr.msk.bf16.mxu0 %vm15358_vm9, %v15357_v39 }
 0xb65   :  { %v9751_v62 = vadd.f32 %v9750_v51, %v9696_v59  ;;  %v9772_v30 = vadd.f32 %v12923_v63, %v9762_v23 }
 0xb66   :  { %v14687_v49 = vpop.f32.mrf.mxu1 }
 0xb67   :  { %v9763_v54 = vmul.f32 %v12922_v14, %v9751_v62  ;;  %v9776_v42 = vmax.f32 %v9772_v30, 0.0 }
 0xb69   :  { %v9773_v18 = vadd.f32 %v12923_v63, %v9763_v54  ;;  %v12957_v63 = vcombine.low %v20833_v12, %v20832_v5 }
 0xb6b   :  { %v9777_v11 = vmax.f32 %v9773_v18, 0.0 }
 0xb6d   :  { %v9781_v4 = vpack.c.bf16 %v9777_v11, %v9776_v42 }
 0xb6f   :  { %v9846_v46 = vsel %vm4440_vm1, %v9781_v4, 0 }
 0xb70   :  { %14695 = vmatpush3.bf16.msra.mxu0 %v9846_v46 }
 0xb73   :  { %14697 = vmatmul.mubr.msk.bf16.vlgmr.msra.gmra.mxu0 %vm9787_vm11, %v15215_v17 }
 0xc23   :  { %v9828_v19 = vpop.f32.mrf.mxu0 }
 0xc25   :  { %v14692_v6 = vpop.f32.mrf.mxu0 }
 0xc27   :  { %v9831_v36 = vpop.f32.mrf.mxu0 }
 0xc28   :  { %v13445_v0 = vpack.c.bf16 %v9831_v36, %v9828_v19 }
 0xc29   :  { %v14693_v43 = vpop.f32.mrf.mxu0 }
 0xc2a   :  { %13446 = vst [vmem:[#allocation5] sm:$0xff] %v13445_v0  }
 0xc33   :  { %v9882_v2 = vpop.f32.mrf.mxu0 }
 0xc35   :  { %v14698_v45 = vpop.f32.mrf.mxu0 }
 0xc37   :  { %v9885_v31 = vpop.f32.mrf.mxu0 }
 0xc38   :  { %v13450_v24 = vpack.c.bf16 %v9885_v31, %v9882_v2 }
 0xc39   :  { %v14699_v14 = vpop.f32.mrf.mxu0 }
 0xc3a   :  { %13485 = vst [vmem:[#allocation5 + $0x8] sm:$0xff] %v13450_v24  }
 0xc3b   :  { %15348 = dma.done.wait [#allocation13 + $0x3], 18432 }
 0xc3c   :  { %15349 = vsyncadd [#allocation13 + $0x3], 4294948864  ;;  %v20836_v50 = vld [vmem:[#allocation42_spill] sm:$0xff]  ;;  %v20837_v53 = vld [vmem:[#allocation41_spill] sm:$0xff]  ;;  %10899 = vmatprep.subr.bf16.mxu1 %v12958_v35  ;;  %10950 = vmatprep.subr.bf16.mxu0 %v12990_v1  ;;  %vm11209_vm12 = vcmask 1042432   ;;  %vm11205_vm13 = vcmask 48128  }
 0xc3d   :  { %v12956_v3 = vcombine.high %v20837_v53, %v20836_v50  ;;  %v20838_v26 = vld [vmem:[#allocation74_spill] sm:$0xff]  ;;  %v20839_v21 = vld [vmem:[#allocation73_spill] sm:$0xff]  ;;  %10900 = vmatpush1.bf16.msra.mxu1 %v12957_v63  ;;  %10951 = vmatpush1.bf16.msra.mxu0 %v12989_v40  ;;  %v12955_v25 = vcombine.low %v20837_v53, %v20836_v50  ;;  %v20840_v57 = vld [vmem:[#allocation40_spill] sm:$0xff] }
 0xc3e   :  { %v12988_v9 = vcombine.high %v20839_v21, %v20838_v26  ;;  %v12987_v34 = vcombine.low %v20839_v21, %v20838_v26  ;;  %v20841_v27 = vld [vmem:[#allocation39_spill] sm:$0xff]  ;;  %v20842_v15 = vld [vmem:[#allocation72_spill] sm:$0xff]  ;;  %v20844_v38 = vld [vmem:[#allocation38_spill] sm:$0xff] }
 0xc3f   :  { %10901 = vmatprep.subr.bf16.mxu1 %v12956_v3  ;;  %v12954_v16 = vcombine.high %v20841_v27, %v20840_v57  ;;  %v20843_v29 = vld [vmem:[#allocation71_spill] sm:$0xff]  ;;  %v12953_v7 = vcombine.low %v20841_v27, %v20840_v57  ;;  %v20845_v44 = vld [vmem:[#allocation37_spill] sm:$0xff]  ;;  %v20846_v8 = vld [vmem:[#allocation70_spill] sm:$0xff] }
 0xc40   :  { %10952 = vmatprep.subr.bf16.mxu0 %v12988_v9  ;;  %v12986_v32 = vcombine.high %v20843_v29, %v20842_v15  ;;  %v12985_v56 = vcombine.low %v20843_v29, %v20842_v15  ;;  %v12952_v61 = vcombine.high %v20845_v44, %v20844_v38  ;;  %v20847_v10 = vld [vmem:[#allocation69_spill] sm:$0xff]  ;;  %v12951_v22 = vcombine.low %v20845_v44, %v20844_v38  ;;  %v20848_v55 = vld [vmem:[#allocation36_spill] sm:$0xff]  ;;  %v20849_v13 = vld [vmem:[#allocation35_spill] sm:$0xff] }
 0xc41   :  { %10902 = vmatpush1.bf16.msra.mxu1 %v12955_v25  ;;  %10953 = vmatpush1.bf16.msra.mxu0 %v12987_v34  ;;  %v12984_v52 = vcombine.high %v20847_v10, %v20846_v8  ;;  %v12983_v58 = vcombine.low %v20847_v10, %v20846_v8  ;;  %v12950_v47 = vcombine.high %v20849_v13, %v20848_v55  ;;  %v20850_v33 = vld [vmem:[#allocation68_spill] sm:$0xff]  ;;  %v20851_v17 = vld [vmem:[#allocation67_spill] sm:$0xff]  ;;  %v20852_v30 = vld [vmem:[#allocation34_spill] sm:$0xff] }
 0xc42   :  { %10903 = vmatprep.subr.bf16.mxu1 %v12954_v16  ;;  %10954 = vmatprep.subr.bf16.mxu0 %v12986_v32  ;;  %v12982_v20 = vcombine.high %v20851_v17, %v20850_v33  ;;  %v10048_v48 = vld [vmem:[#allocation5] sm:$0xf]  ;;  %v19938_v41 = vld [vmem:[#allocation5 + $0x8] ss:$0 sps:$4 sm:$0xff]   ;;  %v12949_v23 = vcombine.low %v20849_v13, %v20848_v55  ;;  %v12981_v59 = vcombine.low %v20851_v17, %v20850_v33  ;;  %v19944_v51 = vld [vmem:[#allocation5 + $0x4] sm:$0xf] }
 0xc43   :  { %v10053_v62 = vld [vmem:[#allocation5] sm:$0xc]  ;;  %v19946_v49 = vld [vmem:[#allocation5 + $0x4] sm:$0xf]  ;;  %v20853_v54 = vld [vmem:[#allocation33_spill] sm:$0xff]  ;;  %v19957_v36 = vcombine.low %v10048_v48, %v19944_v51  ;;  %v10083_v0 = vshll.u32 %v19938_v41, 16 }
 0xc44   :  { %v12948_v18 = vcombine.high %v20853_v54, %v20852_v30  ;;  %v20854_v42 = vld [vmem:[#allocation66_spill] sm:$0xff]  ;;  %v20855_v11 = vld [vmem:[#allocation65_spill] sm:$0xff]  ;;  %v19952_v46 = vld [vmem:[#allocation5 + $0x8] sm:$0xf]  ;;  %v12947_v6 = vcombine.low %v20853_v54, %v20852_v30  ;;  %v19961_v43 = vcombine.low %v10053_v62, %v19946_v49 }
 0xc45   :  { %10904 = vmatpush1.bf16.msra.mxu1 %v12953_v7  ;;  %10955 = vmatpush1.bf16.msra.mxu0 %v12985_v56  ;;  %v12980_v4 = vcombine.high %v20855_v11, %v20854_v42  ;;  %v10056_v19 = vld [vmem:[#allocation5 + $0xc] sm:$0x1]  ;;  %v12979_v2 = vcombine.low %v20855_v11, %v20854_v42  ;;  %v20857_v31 = vld [vmem:[#allocation31_spill] sm:$0xff]  ;;  %v10076_v28 = vshrl.u32 %v19957_v36, 16  ;;  %v10078_v37 = vshll.u32 %v19957_v36, 16  ;;  %v20860_v21 = vld [vmem:[#allocation30_spill] sm:$0xff] }
 0xc46   :  { %10905 = vmatprep.subr.bf16.mxu1 %v12952_v61  ;;  %10956 = vmatprep.subr.bf16.mxu0 %v12984_v52  ;;  %v20856_v45 = vld [vmem:[#allocation32_spill] sm:$0xff]  ;;  %v12936_v14 = vcombine.low %v19952_v46, %v10056_v19  ;;  %v20859_v12 = vld [vmem:[#allocation63_spill] sm:$0xff]  ;;  %v10110_v1 = vrot.slane %v19961_v43, 2  ;;  %v19975_v50 = vrot.slane %v10083_v0, 1  ;;  %v20861_v9 = vld [vmem:[#allocation29_spill] sm:$0xff] }
 0xc47   :  { %v12946_v24 = vcombine.high %v20857_v31, %v20856_v45  ;;  %v20858_v5 = vld [vmem:[#allocation64_spill] sm:$0xff]  ;;  %v10080_v40 = vrot.slane %v10078_v37, 1  ;;  %v12945_v53 = vcombine.low %v20857_v31, %v20856_v45  ;;  %v12944_v25 = vcombine.high %v20861_v9, %v20860_v21  ;;  %v20862_v34 = vld [vmem:[#allocation62_spill] sm:$0xff]  ;;  %v20863_v57 = vld [vmem:[#allocation61_spill] sm:$0xff] }
 0xc48   :  { %v12978_v35 = vcombine.high %v20859_v12, %v20858_v5  ;;  %v19973_v63 = vrot.slane %v12936_v14, 2  ;;  %v12977_v3 = vcombine.low %v20859_v12, %v20858_v5  ;;  %v12976_v27 = vcombine.high %v20863_v57, %v20862_v34  ;;  %v20864_v7 = vld [vmem:[#allocation60_spill] sm:$0xff]  ;;  %v20865_v56 = vld [vmem:[#allocation59_spill] sm:$0xff]  ;;  %v20870_v13 = vld [vmem:[#allocation90_spill] sm:$0xff] }
 0xc49   :  { %10906 = vmatpush1.bf16.msra.mxu1 %v12951_v22  ;;  %10957 = vmatpush1.bf16.msra.mxu0 %v12983_v58  ;;  %v10081_v16 = vor.u32 %v10080_v40, %v10076_v28  ;;  %v12943_v29 = vcombine.low %v20861_v9, %v20860_v21  ;;  %v12975_v32 = vcombine.low %v20863_v57, %v20862_v34  ;;  %v20866_v44 = vld [vmem:[#allocation92_spill] sm:$0xff]  ;;  %v20867_v61 = vld [vmem:[#allocation91_spill] sm:$0xff]  ;;  %v20868_v22 = vld [vmem:[#allocation58_spill] sm:$0xff] }
 0xc4a   :  { %10907 = vmatprep.subr.bf16.mxu1 %v12950_v47  ;;  %10958 = vmatprep.subr.bf16.mxu0 %v12982_v20  ;;  %v10112_v26 = vsel %vm4828_vm3, %v10110_v1, %v19973_v63  ;;  %v12974_v38 = vcombine.high %v20865_v56, %v20864_v7  ;;  %v13006_v8 = vcombine.high %v20867_v61, %v20866_v44  ;;  %v20869_v58 = vld [vmem:[#allocation57_spill] sm:$0xff]  ;;  %v20872_v48 = vld [vmem:[#allocation56_spill] sm:$0xff]  ;;  %v20875_v30 = vld [vmem:[#allocation87_spill] sm:$0xff] }
 0xc4b   :  { %10982 = vmatprep.mubr.bf16.mxu0 %v10112_v26  ;;  %v10086_v15 = vsel %vm4239_vm2, %v10081_v16, %v19975_v50  ;;  %v12973_v10 = vcombine.low %v20865_v56, %v20864_v7  ;;  %v13005_v52 = vcombine.low %v20867_v61, %v20866_v44  ;;  %v12972_v55 = vcombine.high %v20869_v58, %v20868_v22  ;;  %v20871_v47 = vld [vmem:[#allocation89_spill] sm:$0xff]  ;;  %v20874_v62 = vld [vmem:[#allocation88_spill] sm:$0xff]  ;;  %v20876_v11 = vld [vmem:[#allocation54_spill] sm:$0xff] }
 0xc4c   :  { %10931 = vmatprep.mubr.bf16.mxu1 %v10086_v15  ;;  %v13004_v33 = vcombine.high %v20871_v47, %v20870_v13  ;;  %v12971_v17 = vcombine.low %v20869_v58, %v20868_v22  ;;  %v13003_v20 = vcombine.low %v20871_v47, %v20870_v13  ;;  %v13002_v54 = vcombine.high %v20875_v30, %v20874_v62  ;;  %v20879_v0 = vld [vmem:[#allocation85_spill] sm:$0xff]  ;;  %v20881_v14 = vld [vmem:[#allocation51_spill] sm:$0xff]  ;;  %v20882_v12 = vld [vmem:[#allocation84_spill] sm:$0xff] }
 0xc4d   :  { %10908 = vmatpush1.bf16.msra.mxu1 %v12949_v23  ;;  %10959 = vmatpush1.bf16.msra.mxu0 %v12981_v59  ;;  %v20873_v23 = vld [vmem:[#allocation55_spill] sm:$0xff]  ;;  %v13001_v42 = vcombine.low %v20875_v30, %v20874_v62  ;;  %v20886_v21 = vld [vmem:[#allocation82_spill] sm:$0xff]  ;;  %v20887_v9 = vld [vmem:[#allocation81_spill] sm:$0xff]  ;;  %v10096_v62 = vrot.slane %v19938_v41, 1 }
 0xc4e   :  { %10909 = vmatprep.subr.bf16.mxu1 %v12948_v18  ;;  %10960 = vmatprep.subr.bf16.mxu0 %v12980_v4  ;;  %v12970_v59 = vcombine.high %v20873_v23, %v20872_v48  ;;  %v12969_v18 = vcombine.low %v20873_v23, %v20872_v48  ;;  %v20877_v4 = vld [vmem:[#allocation53_spill] sm:$0xff]  ;;  %v10061_v40 = vld [vmem:[#allocation5 + $0x4] sm:$0xe]  ;;  %v20037_v34 = vld [vmem:[#allocation5 + $0xc] ss:$0 sps:$4 sm:$0xff]   ;;  %v12995_v15 = vcombine.low %v20887_v9, %v20886_v21 }
 0xc4f   :  { %v12968_v19 = vcombine.high %v20877_v4, %v20876_v11  ;;  %v12967_v45 = vcombine.low %v20877_v4, %v20876_v11  ;;  %v12942_v57 = vcombine.low %v10061_v40, %v19952_v46  ;;  %v20890_v56 = vld [vmem:[#allocation80_spill] sm:$0xff]  ;;  %v10052_v61 = vld [vmem:[#allocation5] sm:$0xe]  ;;  %v20893_v13 = vld [vmem:[#allocation45_spill] sm:$0xff]  ;;  %v20065_v48 = vcombine.low %v19946_v49, %v19952_v46 }
 0xc50   :  { %v12934_v58 = vcombine.low %v10052_v61, %v19944_v51  ;;  %v20896_v30 = vld [vmem:[#allocation108_spill] sm:$0xff]  ;;  %v20899_v11 = vld [vmem:[#allocation139_spill] sm:$0xff]  ;;  %v20909_v61 = vld [vmem:[#allocation101_spill] sm:$0xff] }
 0xc51   :  { %10910 = vmatpush1.bf16.msra.mxu1 %v12947_v6  ;;  %10961 = vmatpush1.bf16.msra.mxu0 %v12979_v2  ;;  %v20878_v6 = vld [vmem:[#allocation86_spill] sm:$0xff]  ;;  %v10155_v40 = vshrl.u32 %v20065_v48, 16 }
 0xc52   :  { %10911 = vmatprep.subr.bf16.mxu1 %v12946_v24  ;;  %10962 = vmatprep.subr.bf16.mxu0 %v12978_v35  ;;  %v13000_v2 = vcombine.high %v20879_v0, %v20878_v6  ;;  %v12999_v31 = vcombine.low %v20879_v0, %v20878_v6  ;;  %v20880_v24 = vld [vmem:[#allocation52_spill] sm:$0xff]  ;;  %v20883_v35 = vld [vmem:[#allocation83_spill] sm:$0xff]  ;;  %v10157_v6 = vshll.u32 %v20065_v48, 16 }
 0xc53   :  { %v12966_v5 = vcombine.high %v20881_v14, %v20880_v24  ;;  %v12998_v28 = vcombine.high %v20883_v35, %v20882_v12  ;;  %v12965_v37 = vcombine.low %v20881_v14, %v20880_v24  ;;  %v12997_v1 = vcombine.low %v20883_v35, %v20882_v12  ;;  %v20900_v24 = vld [vmem:[#allocation106_spill] sm:$0xff]  ;;  %v20901_v14 = vld [vmem:[#allocation105_spill] sm:$0xff] }
 0xc54   :  { %v20902_v12 = vld [vmem:[#allocation138_spill] sm:$0xff] }
 0xc55   :  { %10912 = vmatpush1.bf16.msra.mxu1 %v12945_v53  ;;  %10963 = vmatpush1.bf16.msra.mxu0 %v12977_v3  ;;  %v20884_v53 = vld [vmem:[#allocation50_spill] sm:$0xff]  ;;  %v20885_v3 = vld [vmem:[#allocation49_spill] sm:$0xff] }
 0xc56   :  { %10913 = vmatprep.subr.bf16.mxu1 %v12944_v25  ;;  %10964 = vmatprep.subr.bf16.mxu0 %v12976_v27  ;;  %v12964_v26 = vcombine.high %v20885_v3, %v20884_v53  ;;  %v12996_v25 = vcombine.high %v20887_v9, %v20886_v21  ;;  %v10175_v27 = vrot.slane %v20037_v34, 1  ;;  %v12963_v16 = vcombine.low %v20885_v3, %v20884_v53 }
 0xc57   :  { %v10159_v53 = vrot.slane %v10157_v6, 1  ;;  %v10162_v3 = vshll.u32 %v20037_v34, 16 }
 0xc59   :  { %10914 = vmatpush1.bf16.msra.mxu1 %v12943_v29  ;;  %10965 = vmatpush1.bf16.msra.mxu0 %v12975_v32  ;;  %v20888_v29 = vld [vmem:[#allocation48_spill] sm:$0xff]  ;;  %v20889_v32 = vld [vmem:[#allocation47_spill] sm:$0xff] }
 0xc5a   :  { %10915 = vmatprep.subr.bf16.mxu1 %v12974_v38  ;;  %10966 = vmatprep.subr.bf16.mxu0 %v13006_v8  ;;  %v12962_v7 = vcombine.high %v20889_v32, %v20888_v29  ;;  %v20891_v38 = vld [vmem:[#allocation79_spill] sm:$0xff]  ;;  %v10174_v8 = vrot.slane %v12942_v57, 1 }
 0xc5b   :  { %v12994_v44 = vcombine.high %v20891_v38, %v20890_v56  ;;  %v12993_v22 = vcombine.low %v20891_v38, %v20890_v56  ;;  %v20105_v56 = vrot.slane %v10162_v3, 1 }
 0xc5d   :  { %10916 = vmatpush2.bf16.msra.mxu1 %v12973_v10  ;;  %10967 = vmatpush2.bf16.msra.mxu0 %v13005_v52  ;;  %v20052_v10 = vsel %vm4440_vm1, %v10174_v8, %v10175_v27  ;;  %v12961_v52 = vcombine.low %v20889_v32, %v20888_v29  ;;  %v20910_v8 = vld [vmem:[#allocation134_spill] sm:$0xff] }
 0xc5e   :  { %10917 = vmatprep.subr.bf16.mxu1 %v12972_v55  ;;  %10968 = vmatprep.subr.bf16.mxu0 %v13004_v33  ;;  %v20892_v55 = vld [vmem:[#allocation46_spill] sm:$0xff] }
 0xc5f   :  { %v12960_v47 = vcombine.high %v20893_v13, %v20892_v55  ;;  %v20894_v33 = vld [vmem:[#allocation78_spill] sm:$0xff]  ;;  %v12959_v23 = vcombine.low %v20893_v13, %v20892_v55 }
 0xc61   :  { %10918 = vmatpush2.bf16.msra.mxu1 %v12971_v17  ;;  %10969 = vmatpush2.bf16.msra.mxu0 %v13003_v20  ;;  %v20895_v17 = vld [vmem:[#allocation77_spill] sm:$0xff] }
 0xc62   :  { %10919 = vmatprep.subr.bf16.mxu1 %v12970_v59  ;;  %10970 = vmatprep.subr.bf16.mxu0 %v13002_v54  ;;  %v12992_v20 = vcombine.high %v20895_v17, %v20894_v33  ;;  %v12991_v51 = vcombine.low %v20895_v17, %v20894_v33  ;;  %v10095_v59 = vrot.slane %v12934_v58, 1  ;;  %v20897_v54 = vld [vmem:[#allocation107_spill] sm:$0xff]  ;;  %v20912_v33 = vld [vmem:[#allocation100_spill] sm:$0xff] }
 0xc63   :  { %v20913_v17 = vld [vmem:[#allocation99_spill] sm:$0xff] }
 0xc64   :  { %v10097_v0 = vsel %vm4440_vm1, %v10095_v59, %v10096_v62 }
 0xc65   :  { %10920 = vmatpush2.bf16.msra.mxu1 %v12969_v18  ;;  %10971 = vmatpush2.bf16.msra.mxu0 %v13001_v42  ;;  %v13022_v18 = vcombine.high %v20897_v54, %v20896_v30  ;;  %v20898_v42 = vld [vmem:[#allocation140_spill] sm:$0xff] }
 0xc66   :  { %10921 = vmatprep.subr.bf16.mxu1 %v12968_v19  ;;  %10972 = vmatprep.subr.bf16.mxu0 %v13000_v2  ;;  %v13054_v4 = vcombine.high %v20899_v11, %v20898_v42  ;;  %v10087_v19 = vshrl.u32 %v19938_v41, 16  ;;  %v13021_v2 = vcombine.low %v20897_v54, %v20896_v30  ;;  %v20903_v41 = vld [vmem:[#allocation137_spill] sm:$0xff]  ;;  %v20916_v54 = vld [vmem:[#allocation98_spill] sm:$0xff] }
 0xc67   :  { %v13052_v35 = vcombine.high %v20903_v41, %v20902_v12  ;;  %v13051_v21 = vcombine.low %v20903_v41, %v20902_v12 }
 0xc69   :  { %10922 = vmatpush2.bf16.msra.mxu1 %v12967_v45  ;;  %10973 = vmatpush2.bf16.msra.mxu0 %v12999_v31  ;;  %v13053_v45 = vcombine.low %v20899_v11, %v20898_v42  ;;  %v10058_v31 = vld [vmem:[#allocation5] sm:$0x8]  ;;  %v20918_v11 = vld [vmem:[#allocation130_spill] sm:$0xff] }
 0xc6a   :  { %10923 = vmatprep.subr.bf16.mxu1 %v12966_v5  ;;  %10974 = vmatprep.subr.bf16.mxu0 %v12998_v28  ;;  %v13020_v5 = vcombine.high %v20901_v14, %v20900_v24  ;;  %v10089_v28 = vor.u32 %v10087_v19, %v19975_v50  ;;  %v20904_v50 = vld [vmem:[#allocation104_spill] sm:$0xff] }
 0xc6d   :  { %10924 = vmatpush2.bf16.msra.mxu1 %v12965_v37  ;;  %10975 = vmatpush2.bf16.msra.mxu0 %v12997_v1  ;;  %v10057_v37 = vld [vmem:[#allocation5 + $0xc] sm:$0x3]  ;;  %v12938_v1 = vcombine.low %v10058_v31, %v19946_v49  ;;  %v20907_v49 = vld [vmem:[#allocation135_spill] sm:$0xff] }
 0xc6e   :  { %10925 = vmatprep.subr.bf16.mxu1 %v12964_v26  ;;  %10976 = vmatprep.subr.bf16.mxu0 %v12996_v25  ;;  %v13019_v26 = vcombine.low %v20901_v14, %v20900_v24  ;;  %v20906_v25 = vld [vmem:[#allocation136_spill] sm:$0xff]  ;;  %v20923_v14 = vld [vmem:[#allocation127_spill] sm:$0xff] }
 0xc6f   :  { %v13050_v57 = vcombine.high %v20907_v49, %v20906_v25  ;;  %v10140_v29 = vrot.slane %v12938_v1, 3  ;;  %v20922_v24 = vld [vmem:[#allocation128_spill] sm:$0xff]  ;;  %v20926_v1 = vld [vmem:[#allocation126_spill] sm:$0xff] }
 0xc70   :  { %v13041_v41 = vcombine.low %v20923_v14, %v20922_v24 }
 0xc71   :  { %10926 = vmatpush2.bf16.msra.mxu1 %v12963_v16  ;;  %10977 = vmatpush2.bf16.msra.mxu0 %v12995_v15  ;;  %v20101_v16 = vcombine.low %v19952_v46, %v10057_v37  ;;  %v15221_v15 = vld [vmem:[#allocation5 + $0x8] ss:$0 sps:$4 sm:$0x77]   ;;  %v20908_v46 = vld [vmem:[#allocation102_spill] sm:$0xff] }
 0xc72   :  { %10927 = vmatprep.subr.bf16.mxu1 %v12962_v7  ;;  %10978 = vmatprep.subr.bf16.mxu0 %v12994_v44  ;;  %v10160_v7 = vor.u32 %v10159_v53, %v10155_v40  ;;  %v13049_v44 = vcombine.low %v20907_v49, %v20906_v25  ;;  %v13015_v13 = vcombine.low %v20909_v61, %v20908_v46  ;;  %v20927_v40 = vld [vmem:[#allocation125_spill] sm:$0xff]  ;;  %v20931_v25 = vld [vmem:[#allocation155_spill] sm:$0xff] }
 0xc73   :  { %v10141_v32 = vrot.slane %v20101_v16, 3  ;;  %v13040_v53 = vcombine.high %v20927_v40, %v20926_v1 }
 0xc74   :  { %v10165_v55 = vsel %vm4239_vm2, %v10160_v7, %v20105_v56  ;;  %v20933_v7 = vld [vmem:[#allocation121_spill] sm:$0xff] }
 0xc75   :  { %10928 = vmatpush2.bf16.msra.mxu1 %v12961_v52  ;;  %10979 = vmatpush2.bf16.msra.mxu0 %v12993_v22  ;;  %v20911_v52 = vld [vmem:[#allocation133_spill] sm:$0xff]  ;;  %v10142_v58 = vsel %vm5107_vm6, %v10140_v29, %v10141_v32  ;;  %v20932_v29 = vld [vmem:[#allocation122_spill] sm:$0xff] }
 0xc76   :  { %10929 = vmatprep.subr.bf16.mxu1 %v12960_v47  ;;  %10980 = vmatprep.subr.bf16.mxu0 %v12992_v20  ;;  %v13048_v22 = vcombine.high %v20911_v52, %v20910_v8  ;;  %v13047_v47 = vcombine.low %v20911_v52, %v20910_v8  ;;  %v13014_v20 = vcombine.high %v20913_v17, %v20912_v33  ;;  %v20936_v52 = vld [vmem:[#allocation120_spill] sm:$0xff] }
 0xc79   :  { %10930 = vmatpush2.bf16.msra.mxu1 %v12959_v23  ;;  %10981 = vmatpush2.bf16.msra.mxu0 %v12991_v51  ;;  %v20914_v23 = vld [vmem:[#allocation132_spill] sm:$0xff]  ;;  %v20915_v51 = vld [vmem:[#allocation131_spill] sm:$0xff] }
 0xc7a   :  { %11001 = vmatprep.subr.bf16.mxu1 %v13022_v18  ;;  %11052 = vmatprep.subr.bf16.mxu0 %v13054_v4  ;;  %v13046_v59 = vcombine.high %v20915_v51, %v20914_v23  ;;  %v13045_v30 = vcombine.low %v20915_v51, %v20914_v23  ;;  %v20917_v18 = vld [vmem:[#allocation97_spill] sm:$0xff] }
 0xc7b   :  { %v13012_v42 = vcombine.high %v20917_v18, %v20916_v54  ;;  %v20919_v4 = vld [vmem:[#allocation129_spill] sm:$0xff]  ;;  %v13011_v6 = vcombine.low %v20917_v18, %v20916_v54 }
 0xc7c   :  { %10932 = vmatmul.mubr.bf16.vlgmr.msra.gmra.mxu1 %v19957_v36  ;;  %10983 = vmatmul.mubr.bf16.vlgmr.msra.gmra.mxu0 %v10097_v0  ;;  %v20905_v36 = vld [vmem:[#allocation103_spill] sm:$0xff]  ;;  %v13044_v19 = vcombine.high %v20919_v4, %v20918_v11  ;;  %v13043_v0 = vcombine.low %v20919_v4, %v20918_v11  ;;  %v20941_v23 = vld [vmem:[#allocation117_spill] sm:$0xff] }
 0xc7d   :  { %11002 = vmatpush1.bf16.msra.mxu1 %v13021_v2  ;;  %11053 = vmatpush1.bf16.msra.mxu0 %v13053_v45  ;;  %v13018_v9 = vcombine.high %v20905_v36, %v20904_v50  ;;  %v13017_v38 = vcombine.low %v20905_v36, %v20904_v50  ;;  %v20920_v2 = vld [vmem:[#allocation96_spill] sm:$0xff]  ;;  %v20921_v45 = vld [vmem:[#allocation95_spill] sm:$0xff] }
 0xc7e   :  { %11003 = vmatprep.subr.bf16.mxu1 %v13020_v5  ;;  %11054 = vmatprep.subr.bf16.mxu0 %v13052_v35  ;;  %v13010_v31 = vcombine.high %v20921_v45, %v20920_v2  ;;  %v13042_v5 = vcombine.high %v20923_v14, %v20922_v24  ;;  %v13009_v12 = vcombine.low %v20921_v45, %v20920_v2  ;;  %v20924_v35 = vld [vmem:[#allocation94_spill] sm:$0xff]  ;;  %v20929_v50 = vld [vmem:[#allocation123_spill] sm:$0xff]  ;;  %v20949_v24 = vld [vmem:[#allocation113_spill] sm:$0xff] }
 0xc7f   :  { %10941 = vmatprep.mubr.bf16.mxu1 %v10089_v28  ;;  %10992 = vmatprep.mubr.bf16.mxu0 %v19973_v63  ;;  %v13016_v63 = vcombine.high %v20909_v61, %v20908_v46  ;;  %v20925_v28 = vld [vmem:[#allocation93_spill] sm:$0xff]  ;;  %v20945_v11 = vld [vmem:[#allocation115_spill] sm:$0xff] }
 0xc80   :  { %v13008_v37 = vcombine.high %v20925_v28, %v20924_v35  ;;  %v13007_v3 = vcombine.low %v20925_v28, %v20924_v35  ;;  %v20935_v46 = vld [vmem:[#allocation153_spill] sm:$0xff]  ;;  %v10119_v35 = vshrl.u32 %v19961_v43, 16  ;;  %v10122_v28 = vshll.u32 %v19961_v43, 16 }
 0xc81   :  { %11004 = vmatpush1.bf16.msra.mxu1 %v13019_v26  ;;  %11055 = vmatpush1.bf16.msra.mxu0 %v13051_v21  ;;  %v13039_v26 = vcombine.low %v20927_v40, %v20926_v1  ;;  %v20928_v21 = vld [vmem:[#allocation124_spill] sm:$0xff]  ;;  %v10127_v40 = vshrl.u32 %v20101_v16, 16 }
 0xc82   :  { %11005 = vmatprep.subr.bf16.mxu1 %v13018_v9  ;;  %11056 = vmatprep.subr.bf16.mxu0 %v13050_v57  ;;  %v13038_v36 = vcombine.high %v20929_v50, %v20928_v21  ;;  %v20930_v9 = vld [vmem:[#allocation156_spill] sm:$0xff]  ;;  %v13037_v57 = vcombine.low %v20929_v50, %v20928_v21 }
 0xc83   :  { %v13070_v49 = vcombine.high %v20931_v25, %v20930_v9  ;;  %v20954_v50 = vld [vmem:[#allocation144_spill] sm:$0xff] }
 0xc84   :  { %10942 = vmatmul.mubr.bf16.gmra.mxu1 %v15221_v15  ;;  %10993 = vmatmul.mubr.bf16.gmra.mxu0 %v10096_v62  ;;  %v13013_v62 = vcombine.low %v20913_v17, %v20912_v33  ;;  %v13069_v15 = vcombine.low %v20931_v25, %v20930_v9  ;;  %v10121_v9 = vrot.slane %v10119_v35, 2  ;;  %v10124_v25 = vrot.slane %v10122_v28, 3  ;;  %v20974_v28 = vld [vmem:[#allocation158_spill] sm:$0xff] }
 0xc85   :  { %11006 = vmatpush1.bf16.msra.mxu1 %v13017_v38  ;;  %11057 = vmatpush1.bf16.msra.mxu0 %v13049_v44  ;;  %v13036_v38 = vcombine.high %v20933_v7, %v20932_v29  ;;  %v20934_v44 = vld [vmem:[#allocation154_spill] sm:$0xff] }
 0xc86   :  { %11007 = vmatprep.subr.bf16.mxu1 %v13016_v63  ;;  %11058 = vmatprep.subr.bf16.mxu0 %v13048_v22  ;;  %v13068_v61 = vcombine.high %v20935_v46, %v20934_v44  ;;  %v13035_v63 = vcombine.low %v20933_v7, %v20932_v29  ;;  %v13067_v8 = vcombine.low %v20935_v46, %v20934_v44  ;;  %v20937_v22 = vld [vmem:[#allocation119_spill] sm:$0xff]  ;;  %v20956_v7 = vld [vmem:[#allocation110_spill] sm:$0xff] }
 0xc87   :  { %11033 = vmatprep.mubr.bf16.mxu1 %v10142_v58  ;;  %11084 = vmatprep.mubr.bf16.mxu0 %v10165_v55  ;;  %v13034_v58 = vcombine.high %v20937_v22, %v20936_v52  ;;  %v20938_v55 = vld [vmem:[#allocation152_spill] sm:$0xff]  ;;  %v13033_v33 = vcombine.low %v20937_v22, %v20936_v52  ;;  %v20958_v46 = vld [vmem:[#allocation142_spill] sm:$0xff]  ;;  %v10125_v22 = vor.u32 %v10124_v25, %v10121_v9 }
 0xc89   :  { %11008 = vmatpush1.bf16.msra.mxu1 %v13015_v13  ;;  %11059 = vmatpush1.bf16.msra.mxu0 %v13047_v47  ;;  %v20939_v13 = vld [vmem:[#allocation151_spill] sm:$0xff] }
 0xc8a   :  { %11009 = vmatprep.subr.bf16.mxu1 %v13014_v20  ;;  %11060 = vmatprep.subr.bf16.mxu0 %v13046_v59  ;;  %v13066_v47 = vcombine.high %v20939_v13, %v20938_v55  ;;  %v13065_v17 = vcombine.low %v20939_v13, %v20938_v55  ;;  %v20940_v20 = vld [vmem:[#allocation118_spill] sm:$0xff]  ;;  %v20960_v55 = vld [vmem:[#allocation172_spill] sm:$0xff]  ;;  %v20961_v13 = vld [vmem:[#allocation171_spill] sm:$0xff] }
 0xc8b   :  { %v13032_v51 = vcombine.high %v20941_v23, %v20940_v20  ;;  %v20942_v59 = vld [vmem:[#allocation150_spill] sm:$0xff]  ;;  %v13031_v54 = vcombine.low %v20941_v23, %v20940_v20  ;;  %v13085_v20 = vcombine.low %v20961_v13, %v20960_v55 }
 0xc8c   :  { %v20962_v23 = vld [vmem:[#allocation170_spill] sm:$0xff] }
 0xc8d   :  { %11010 = vmatpush1.bf16.msra.mxu1 %v13013_v62  ;;  %11061 = vmatpush1.bf16.msra.mxu0 %v13045_v30  ;;  %v20943_v62 = vld [vmem:[#allocation149_spill] sm:$0xff] }
 0xc8e   :  { %11011 = vmatprep.subr.bf16.mxu1 %v13012_v42  ;;  %11062 = vmatprep.subr.bf16.mxu0 %v13044_v19  ;;  %v13064_v30 = vcombine.high %v20943_v62, %v20942_v59  ;;  %v13063_v18 = vcombine.low %v20943_v62, %v20942_v59  ;;  %v20944_v42 = vld [vmem:[#allocation116_spill] sm:$0xff] }
 0xc8f   :  { %v13030_v4 = vcombine.high %v20945_v11, %v20944_v42  ;;  %v20946_v19 = vld [vmem:[#allocation148_spill] sm:$0xff]  ;;  %v13029_v2 = vcombine.low %v20945_v11, %v20944_v42 }
 0xc90   :  { %v15226_v11 = vld [vmem:[#allocation5 + $0xc] ss:$0 sps:$4 sm:$0x77]  }
 0xc91   :  { %11012 = vmatpush1.bf16.msra.mxu1 %v13011_v6  ;;  %11063 = vmatpush1.bf16.msra.mxu0 %v13043_v0  ;;  %v20947_v6 = vld [vmem:[#allocation147_spill] sm:$0xff] }
 0xc92   :  { %11013 = vmatprep.subr.bf16.mxu1 %v13010_v31  ;;  %11064 = vmatprep.subr.bf16.mxu0 %v13042_v5  ;;  %v13062_v0 = vcombine.high %v20947_v6, %v20946_v19  ;;  %v13061_v45 = vcombine.low %v20947_v6, %v20946_v19  ;;  %v20948_v31 = vld [vmem:[#allocation114_spill] sm:$0xff]  ;;  %v20969_v6 = vld [vmem:[#allocation163_spill] sm:$0xff] }
 0xc93   :  { %v13028_v14 = vcombine.high %v20949_v24, %v20948_v31  ;;  %v20950_v5 = vld [vmem:[#allocation146_spill] sm:$0xff] }
 0xc95   :  { %11014 = vmatpush1.bf16.msra.mxu1 %v13009_v12  ;;  %11065 = vmatpush1.bf16.msra.mxu0 %v13041_v41  ;;  %v20951_v12 = vld [vmem:[#allocation145_spill] sm:$0xff] }
 0xc96   :  { %11015 = vmatprep.subr.bf16.mxu1 %v13008_v37  ;;  %11066 = vmatprep.subr.bf16.mxu0 %v13040_v53  ;;  %v13060_v41 = vcombine.high %v20951_v12, %v20950_v5  ;;  %v13027_v37 = vcombine.low %v20949_v24, %v20948_v31  ;;  %v13059_v1 = vcombine.low %v20951_v12, %v20950_v5  ;;  %v10130_v53 = vshll.u32 %v20101_v16, 16  ;;  %v20971_v31 = vld [vmem:[#allocation161_spill] sm:$0xff]  ;;  %v20972_v5 = vld [vmem:[#allocation160_spill] sm:$0xff]  ;;  %v20973_v12 = vld [vmem:[#allocation159_spill] sm:$0xff] }
 0xc97   :  { %v13073_v35 = vcombine.low %v20973_v12, %v20972_v5 }
 0xc98   :  { %v10132_v29 = vrot.slane %v10130_v53, 3 }
 0xc99   :  { %11016 = vmatpush1.bf16.msra.mxu1 %v13007_v3  ;;  %11067 = vmatpush1.bf16.msra.mxu0 %v13039_v26  ;;  %v20952_v3 = vld [vmem:[#allocation112_spill] sm:$0xff]  ;;  %v20953_v26 = vld [vmem:[#allocation111_spill] sm:$0xff] }
 0xc9a   :  { %11017 = vmatprep.subr.bf16.mxu1 %v13038_v36  ;;  %11068 = vmatprep.subr.bf16.mxu0 %v13070_v49  ;;  %v13026_v21 = vcombine.high %v20953_v26, %v20952_v3  ;;  %v20955_v36 = vld [vmem:[#allocation143_spill] sm:$0xff]  ;;  %v13025_v49 = vcombine.low %v20953_v26, %v20952_v3 }
 0xc9b   :  { %v13058_v43 = vcombine.high %v20955_v36, %v20954_v50 }
 0xc9d   :  { %11018 = vmatpush2.bf16.msra.mxu1 %v13037_v57  ;;  %11069 = vmatpush2.bf16.msra.mxu0 %v13069_v15  ;;  %v13057_v57 = vcombine.low %v20955_v36, %v20954_v50  ;;  %v10129_v15 = vrot.slane %v10127_v40, 2 }
 0xc9e   :  { %11019 = vmatprep.subr.bf16.mxu1 %v13036_v38  ;;  %11070 = vmatprep.subr.bf16.mxu0 %v13068_v61  ;;  %v20957_v38 = vld [vmem:[#allocation109_spill] sm:$0xff] }
 0xc9f   :  { %v13024_v44 = vcombine.high %v20957_v38, %v20956_v7  ;;  %v20959_v61 = vld [vmem:[#allocation141_spill] sm:$0xff] }
 0xca0   :  { %v13055_v52 = vcombine.low %v20959_v61, %v20958_v46 }
 0xca1   :  { %11020 = vmatpush2.bf16.msra.mxu1 %v13035_v63  ;;  %11071 = vmatpush2.bf16.msra.mxu0 %v13067_v8  ;;  %v13056_v63 = vcombine.high %v20959_v61, %v20958_v46  ;;  %v13023_v8 = vcombine.low %v20957_v38, %v20956_v7 }
 0xca2   :  { %11021 = vmatprep.subr.bf16.mxu1 %v13034_v58  ;;  %11072 = vmatprep.subr.bf16.mxu0 %v13066_v47  ;;  %v10133_v58 = vor.u32 %v10132_v29, %v10129_v15  ;;  %v13086_v47 = vcombine.high %v20961_v13, %v20960_v55 }
 0xca5   :  { %11022 = vmatpush2.bf16.msra.mxu1 %v13033_v33  ;;  %11073 = vmatpush2.bf16.msra.mxu0 %v13065_v17  ;;  %v10166_v33 = vshrl.u32 %v20037_v34, 16  ;;  %v10134_v17 = vsel %vm4975_vm4, %v10125_v22, %v10133_v58 }
 0xca6   :  { %11023 = vmatprep.subr.bf16.mxu1 %v13032_v51  ;;  %11074 = vmatprep.subr.bf16.mxu0 %v13064_v30  ;;  %v20963_v51 = vld [vmem:[#allocation169_spill] sm:$0xff] }
 0xca7   :  { %v13084_v59 = vcombine.high %v20963_v51, %v20962_v23  ;;  %v10168_v62 = vor.u32 %v10166_v33, %v20105_v56  ;;  %v13083_v30 = vcombine.low %v20963_v51, %v20962_v23 }
 0xca9   :  { %11024 = vmatpush2.bf16.msra.mxu1 %v13031_v54  ;;  %11075 = vmatpush2.bf16.msra.mxu0 %v13063_v18  ;;  %v20964_v54 = vld [vmem:[#allocation168_spill] sm:$0xff]  ;;  %v20965_v18 = vld [vmem:[#allocation167_spill] sm:$0xff] }
 0xcaa   :  { %11025 = vmatprep.subr.bf16.mxu1 %v13030_v4  ;;  %11076 = vmatprep.subr.bf16.mxu0 %v13062_v0  ;;  %v13082_v42 = vcombine.high %v20965_v18, %v20964_v54  ;;  %v13081_v56 = vcombine.low %v20965_v18, %v20964_v54  ;;  %v20966_v4 = vld [vmem:[#allocation166_spill] sm:$0xff]  ;;  %v11155_v18 = vlaneseq }
 0xcad   :  { %11026 = vmatpush2.bf16.msra.mxu1 %v13029_v2  ;;  %11077 = vmatpush2.bf16.msra.mxu0 %v13061_v45  ;;  %v20970_v45 = vld [vmem:[#allocation162_spill] sm:$0xff] }
 0xcae   :  { %11027 = vmatprep.subr.bf16.mxu1 %v13028_v14  ;;  %11078 = vmatprep.subr.bf16.mxu0 %v13060_v41  ;;  %v13076_v24 = vcombine.high %v20971_v31, %v20970_v45  ;;  %v13075_v14 = vcombine.low %v20971_v31, %v20970_v45  ;;  %v13074_v41 = vcombine.high %v20973_v12, %v20972_v5 }
 0xcb1   :  { %11028 = vmatpush2.bf16.msra.mxu1 %v13027_v37  ;;  %11079 = vmatpush2.bf16.msra.mxu0 %v13059_v1  ;;  %v20975_v37 = vld [vmem:[#allocation157_spill] sm:$0xff] }
 0xcb2   :  { %11029 = vmatprep.subr.bf16.mxu1 %v13026_v21  ;;  %11080 = vmatprep.subr.bf16.mxu0 %v13058_v43  ;;  %v13072_v1 = vcombine.high %v20975_v37, %v20974_v28  ;;  %v13071_v40 = vcombine.low %v20975_v37, %v20974_v28 }
 0xcb5   :  { %11030 = vmatpush2.bf16.msra.mxu1 %v13025_v49  ;;  %11081 = vmatpush2.bf16.msra.mxu0 %v13057_v57 }
 0xcb6   :  { %11031 = vmatprep.subr.bf16.mxu1 %v13024_v44  ;;  %11082 = vmatprep.subr.bf16.mxu0 %v13056_v63 }
 0xcb9   :  { %11032 = vmatpush2.bf16.msra.mxu1 %v13023_v8  ;;  %11083 = vmatpush2.bf16.msra.mxu0 %v13055_v52 }
 0xcba   :  { %11103 = vmatprep.subr.bf16.mxu1 %v13086_v47 }
 0xcbc   :  { %11034 = vmatmul.mubr.bf16.vlgmr.msra.gmra.mxu1 %v10134_v17  ;;  %11085 = vmatmul.mubr.bf16.vlgmr.msra.gmra.mxu0 %v20065_v48  ;;  %v20967_v48 = vld [vmem:[#allocation165_spill] sm:$0xff] }
 0xcbd   :  { %11104 = vmatpush1.bf16.msra.mxu1 %v13085_v20  ;;  %11043 = vmatprep.mubr.bf16.mxu1 %v10141_v32  ;;  %v13080_v19 = vcombine.high %v20967_v48, %v20966_v4  ;;  %v13079_v16 = vcombine.low %v20967_v48, %v20966_v4  ;;  %v20968_v32 = vld [vmem:[#allocation164_spill] sm:$0xff]  ;;  %v9902_v4 = vld [vmem:[%s20349_s14] sm:$0x3] }
 0xcbe   :  { %11105 = vmatprep.subr.bf16.mxu1 %v13084_v59  ;;  %11094 = vmatprep.mubr.bf16.mxu0 %v10168_v62  ;;  %v13078_v0 = vcombine.high %v20969_v6, %v20968_v32  ;;  %v13077_v2 = vcombine.low %v20969_v6, %v20968_v32  ;;  %v9903_v6 = vld [vmem:[%s20350_s15] sm:$0x3] }
 0xcc1   :  { %11106 = vmatpush1.bf16.msra.mxu1 %v13083_v30 }
 0xcc2   :  { %11107 = vmatprep.subr.bf16.mxu1 %v13082_v42  ;;  %v20268_v42 = vshrl.u32 %v11155_v18, 7 }
 0xcc4   :  { %11044 = vmatmul.mubr.bf16.gmra.mxu1 %v10133_v58  ;;  %11095 = vmatmul.mubr.bf16.gmra.mxu0 %v15226_v11 }
 0xcc5   :  { %11108 = vmatpush1.bf16.msra.mxu1 %v13081_v56  ;;  %11135 = vmatprep.mubr.bf16.mxu1 %v20827_v60  ;;  %v20271_v56 = vsub.s32 0, %v20268_v42 }
 0xcc6   :  { %11109 = vmatprep.subr.bf16.mxu1 %v13080_v19  ;;  %11248 = vmatprep.mubr.bf16.mxu0 %v20827_v60  ;;  %v20277_v19 = vsub.s32 1, %v20268_v42 }
 0xcc7   :  { %v11175_v5 = vrot.slane %v9903_v6, %v20271_v56 }
 0xcc9   :  { %11110 = vmatpush1.bf16.msra.mxu1 %v13079_v16 }
 0xcca   :  { %11111 = vmatprep.subr.bf16.mxu1 %v13078_v0  ;;  %v11158_v0 = vrot.slane %v9902_v4, %v20271_v56 }
 0xccd   :  { %11112 = vmatpush1.bf16.msra.mxu1 %v13077_v2 }
 0xcce   :  { %11113 = vmatprep.subr.bf16.mxu1 %v13076_v24 }
 0xcd1   :  { %11114 = vmatpush1.bf16.msra.mxu1 %v13075_v14  ;;  %v11162_v14 = vrot.slane %v9902_v4, %v20277_v19 }
 0xcd2   :  { %11115 = vmatprep.subr.bf16.mxu1 %v13074_v41 }
 0xcd5   :  { %11116 = vmatpush1.bf16.msra.mxu1 %v13073_v35 }
 0xcd6   :  { %11117 = vmatprep.subr.bf16.mxu1 %v13072_v1  ;;  %v11179_v1 = vrot.slane %v9903_v6, %v20277_v19 }
 0xcd9   :  { %11118 = vmatpush1.bf16.msra.mxu1 %v13071_v40 }
 0xcdc   :  { %11136 = vmatmul.mubr.bf16.vlgmr.msra.gmra.mxu1 %v20052_v10 }
 0xcdd   :  { %11145 = vmatprep.mubr.bf16.mxu1 %v20827_v60 }
 0xce4   :  { %11146 = vmatmul.mubr.bf16.gmra.mxu1 %v10175_v27 }
 0xd3c   :  { %v10933_v53 = vpop.f32.mrf.mxu1  ;;  %v10984_v3 = vpop.f32.mrf.mxu0 }
 0xd3d   :  { %v10985_v26 = vadd.f32 %v10984_v3, %v10933_v53 }
 0xd3e   :  { %v10935_v21 = vpop.f32.mrf.mxu1  ;;  %v10986_v50 = vpop.f32.mrf.mxu0 }
 0xd3f   :  { %v10987_v36 = vadd.f32 %v10986_v50, %v10935_v21 }
 0xd40   :  { %v10937_v43 = vpop.f32.mrf.mxu1  ;;  %v10988_v9 = vpop.f32.mrf.mxu0 }
 0xd41   :  { %v10989_v25 = vadd.f32 %v10988_v9, %v10937_v43 }
 0xd42   :  { %v10939_v49 = vpop.f32.mrf.mxu1  ;;  %v10990_v57 = vpop.f32.mrf.mxu0 }
 0xd43   :  { %v10991_v15 = vadd.f32 %v10990_v57, %v10939_v49 }
 0xd44   :  { %v10943_v29 = vpop.f32.mrf.mxu1  ;;  %v10994_v7 = vpop.f32.mrf.mxu0 }
 0xd45   :  { %v10995_v10 = vadd.f32 %v10994_v7, %v10943_v29 }
 0xd46   :  { %v10945_v38 = vpop.f32.mrf.mxu1  ;;  %v10996_v44 = vpop.f32.mrf.mxu0 }
 0xd47   :  { %v10997_v46 = vadd.f32 %v10996_v44, %v10945_v38 }
 0xd48   :  { %v10947_v34 = vpop.f32.mrf.mxu1  ;;  %v10998_v27 = vpop.f32.mrf.mxu0 }
 0xd4a   :  { %v10948_v61 = vpop.f32.mrf.mxu1  ;;  %v10999_v63 = vpop.f32.mrf.mxu0 }
 0xd7c   :  { %v11035_v8 = vpop.f32.mrf.mxu1  ;;  %v11086_v52 = vpop.f32.mrf.mxu0 }
 0xd7d   :  { %v11036_v11 = vadd.f32 %v11035_v8, %v10985_v26 }
 0xd7e   :  { %v11037_v22 = vpop.f32.mrf.mxu1  ;;  %v11088_v58 = vpop.f32.mrf.mxu0 }
 0xd7f   :  { %v11038_v48 = vadd.f32 %v11037_v22, %v10987_v36  ;;  %v11087_v16 = vadd.f32 %v11086_v52, %v11036_v11 }
 0xd80   :  { %v11039_v55 = vpop.f32.mrf.mxu1  ;;  %v11090_v13 = vpop.f32.mrf.mxu0 }
 0xd81   :  { %v11040_v32 = vadd.f32 %v11039_v55, %v10989_v25  ;;  %v11089_v45 = vadd.f32 %v11088_v58, %v11038_v48 }
 0xd82   :  { %v11041_v47 = vpop.f32.mrf.mxu1  ;;  %v11092_v33 = vpop.f32.mrf.mxu0 }
 0xd83   :  { %v11042_v31 = vadd.f32 %v11041_v47, %v10991_v15  ;;  %v11091_v41 = vadd.f32 %v11090_v13, %v11040_v32 }
 0xd84   :  { %v11045_v17 = vpop.f32.mrf.mxu1  ;;  %v11096_v20 = vpop.f32.mrf.mxu0 }
 0xd85   :  { %v11046_v35 = vadd.f32 %v11045_v17, %v10995_v10  ;;  %v11093_v53 = vadd.f32 %v11092_v33, %v11042_v31 }
 0xd86   :  { %v11047_v23 = vpop.f32.mrf.mxu1  ;;  %v11098_v51 = vpop.f32.mrf.mxu0 }
 0xd87   :  { %v11048_v3 = vadd.f32 %v11047_v23, %v10997_v46  ;;  %v11097_v43 = vadd.f32 %v11096_v20, %v11046_v35 }
 0xd88   :  { %v11049_v59 = vpop.f32.mrf.mxu1  ;;  %v11100_v62 = vpop.f32.mrf.mxu0 }
 0xd89   :  { %v11099_v15 = vadd.f32 %v11098_v51, %v11048_v3  ;;  %v15228_v51 = vld [vmem:[%s20351_s16] sm:$0xff]  }
 0xd8a   :  { %v11050_v30 = vpop.f32.mrf.mxu1  ;;  %v11101_v54 = vpop.f32.mrf.mxu0 }
 0xd9c   :  { %v11137_v2 = vpop.f32.mrf.mxu1 }
 0xd9d   :  { %v11138_v24 = vadd.f32 %v11137_v2, %v11087_v16 }
 0xd9e   :  { %v11139_v12 = vpop.f32.mrf.mxu1 }
 0xd9f   :  { %v11165_v28 = vmul.f32 %v11158_v0, %v11138_v24  ;;  %v11140_v37 = vadd.f32 %v11139_v12, %v11089_v45 }
 0xda0   :  { %v11141_v40 = vpop.f32.mrf.mxu1 }
 0xda1   :  { %v11166_v26 = vmul.f32 %v11162_v14, %v11140_v37  ;;  %v11142_v21 = vadd.f32 %v11141_v40, %v11091_v41  ;;  %v11182_v50 = vadd.f32 %v11175_v5, %v11165_v28 }
 0xda2   :  { %v11143_v36 = vpop.f32.mrf.mxu1 }
 0xda3   :  { %v11167_v9 = vmul.f32 %v11158_v0, %v11142_v21  ;;  %v11144_v25 = vadd.f32 %v11143_v36, %v11093_v53  ;;  %v11183_v49 = vadd.f32 %v11179_v1, %v11166_v26  ;;  %v11188_v38 = vmax.f32 %v11182_v50, 0.0 }
 0xda4   :  { %v11147_v57 = vpop.f32.mrf.mxu1 }
 0xda5   :  { %v11184_v29 = vadd.f32 %v11175_v5, %v11167_v9  ;;  %v11168_v7 = vmul.f32 %v11162_v14, %v11144_v25  ;;  %v11148_v10 = vadd.f32 %v11147_v57, %v11097_v43  ;;  %v11189_v46 = vmax.f32 %v11183_v49, 0.0 }
 0xda6   :  { %v11149_v44 = vpop.f32.mrf.mxu1 }
 0xda7   :  { %v11190_v34 = vmax.f32 %v11184_v29, 0.0  ;;  %v11185_v27 = vadd.f32 %v11179_v1, %v11168_v7  ;;  %v11169_v61 = vmul.f32 %v11158_v0, %v11148_v10  ;;  %v11150_v63 = vadd.f32 %v11149_v44, %v11099_v15 }
 0xda8   :  { %v11151_v8 = vpop.f32.mrf.mxu1 }
 0xda9   :  { %v11191_v52 = vmax.f32 %v11185_v27, 0.0  ;;  %v11186_v22 = vadd.f32 %v11175_v5, %v11169_v61  ;;  %v11170_v58 = vmul.f32 %v11162_v14, %v11150_v63  ;;  %v11196_v55 = vpack.c.bf16 %v11190_v34, %v11188_v38 }
 0xdaa   :  { %v11152_v13 = vpop.f32.mrf.mxu1 }
 0xdab   :  { %v11197_v47 = vpack.c.bf16 %v11191_v52, %v11189_v46  ;;  %v11192_v33 = vmax.f32 %v11186_v22, 0.0  ;;  %v11187_v17 = vadd.f32 %v11179_v1, %v11170_v58  ;;  %v11211_v23 = vsel %vm11209_vm12, %v11196_v55, 0 }
 0xdad   :  { %v11193_v20 = vmax.f32 %v11187_v17, 0.0  ;;  %13088 = vmatprep.subr.msk.bf16.mxu0 %vm11209_vm12, %v11197_v47  ;;  %v11198_v59 = vpack.c.bf16 %v11192_v33, %v11192_v33 }
 0xdae   :  { %11231 = vmatpush1.bf16.msra.mxu0 %v11211_v23 }
 0xdaf   :  { %v11199_v62 = vpack.c.bf16 %v11193_v20, %v11193_v20  ;;  %v11274_v30 = vsel %vm11209_vm12, %v11198_v59, 0 }
 0xdb1   :  { %13092 = vmatprep.subr.msk.bf16.mxu0 %vm11209_vm12, %v11199_v62  ;;  %13089 = vmatmul.mubr.msk.bf16.vlgmr.msra.gmra.mxu0 %vm11205_vm13, %v15228_v51 }
 0xdb2   :  { %11294 = vmatpush1.bf16.msra.mxu0 %v11274_v30  ;;  %11311 = vmatprep.mubr.bf16.mxu0 %v20827_v60 }
 0xdb9   :  { %13093 = vmatmul.mubr.msk.bf16.vlgmr.msra.gmra.mxu0 %vm11205_vm13, %v15228_v51 }
 0xe71   :  { %v11250_v54 = vpop.f32.mrf.mxu0 }
 0xe73   :  { %v11252_v18 = vpop.f32.mrf.mxu0 }
 0xe74   :  { %v13258_v11 = vpack.c.bf16 %v11252_v18, %v11250_v54 }
 0xe75   :  { %v11254_v4 = vpop.f32.mrf.mxu0 }
 0xe76   :  { %11271 = vst [vmem:[#allocation6 + $0x10] sm:$0xff] %v13258_v11 }
 0xe77   :  { %v11256_v48 = vpop.f32.mrf.mxu0 }
 0xe78   :  { %v13259_v16 = vpack.c.bf16 %v11256_v48, %v11254_v4 }
 0xe79   :  { %v11313_v32 = vpop.f32.mrf.mxu0 }
 0xe7a   :  { %11272 = vst [vmem:[#allocation6] sm:$0xff] %v13259_v16 }
 0xe7b   :  { %v11315_v6 = vpop.f32.mrf.mxu0 }
 0xe7c   :  { %v13260_v0 = vpack.c.bf16 %v11315_v6, %v11313_v32 }
 0xe7d   :  { %v11317_v2 = vpop.f32.mrf.mxu0 }
 0xe7e   :  { %11334 = vst [vmem:[#allocation6 + $0x18] sm:$0xff] %v13260_v0 }
 0xe7f   :  { %v11319_v45 = vpop.f32.mrf.mxu0 }
 0xe80   :  { %15350 = dma.done.wait [#allocation13 + $0x4], 6144 }
 0xe81   :  { %15351 = vsyncadd [#allocation13 + $0x4], 4294961152  ;;  %v15229_v31 = vld [vmem:[#allocation11 + $0xac] ss:$12 sps:$4 sm:$0xff]   ;;  %v15231_v24 = vld [vmem:[#allocation11 + $0xa8] ss:$12 sps:$4 sm:$0xff]  }
 0xe82   :  { %11682 = vmatprep.subr.bf16.mxu1 %v15229_v31  ;;  %v15232_v14 = vld [vmem:[#allocation11 + $0x94] ss:$12 sps:$4 sm:$0xff]   ;;  %v15234_v5 = vld [vmem:[#allocation11 + $0x90] ss:$12 sps:$4 sm:$0xff]   ;;  %v15237_v41 = vld [vmem:[#allocation11 + $0x78] ss:$12 sps:$4 sm:$0xff]  }
 0xe83   :  { %11683 = vmatpush1.bf16.msra.mxu1 %v15231_v24  ;;  %v15235_v12 = vld [vmem:[#allocation11 + $0x7c] ss:$12 sps:$4 sm:$0xff]   ;;  %v15238_v35 = vld [vmem:[#allocation11 + $0x64] ss:$12 sps:$4 sm:$0xff]   ;;  %v15240_v37 = vld [vmem:[#allocation11 + $0x60] ss:$12 sps:$4 sm:$0xff]  }
 0xe84   :  { %11684 = vmatprep.subr.bf16.mxu1 %v15232_v14  ;;  %v15249_v28 = vld [vmem:[#allocation11 + $0x170] ss:$12 sps:$4 sm:$0xff]   ;;  %v15241_v40 = vld [vmem:[#allocation11 + $0x4c] ss:$12 sps:$4 sm:$0xff]   ;;  %v15243_v26 = vld [vmem:[#allocation11 + $0x48] ss:$12 sps:$4 sm:$0xff]  }
 0xe85   :  { %14342 = vmatprep.subr.bf16.mxu0 %v15249_v28  ;;  %v15251_v1 = vld [vmem:[#allocation11 + $0xb0] ss:$12 sps:$4 sm:$0xff]   ;;  %v15254_v53 = vld [vmem:[#allocation11 + $0x158] ss:$12 sps:$4 sm:$0xff]   ;;  %v15244_v21 = vld [vmem:[#allocation11 + $0x34] ss:$12 sps:$4 sm:$0xff]  }
 0xe86   :  { %14343 = vmatpush3.bf16.msra.mxu0 %v15251_v1  ;;  %v15256_v3 = vld [vmem:[#allocation11 + $0x98] ss:$12 sps:$4 sm:$0xff]   ;;  %v15259_v50 = vld [vmem:[#allocation11 + $0x140] ss:$12 sps:$4 sm:$0xff]   ;;  %v15246_v43 = vld [vmem:[#allocation11 + $0x30] ss:$12 sps:$4 sm:$0xff]  }
 0xe87   :  { %11685 = vmatpush1.bf16.msra.mxu1 %v15234_v5  ;;  %14344 = vmatprep.subr.bf16.mxu0 %v15254_v53  ;;  %v15261_v36 = vld [vmem:[#allocation11 + $0x80] ss:$12 sps:$4 sm:$0xff]   ;;  %v15264_v9 = vld [vmem:[#allocation11 + $0x128] ss:$12 sps:$4 sm:$0xff]   ;;  %v15250_v57 = vld [vmem:[#allocation11 + $0x18] ss:$12 sps:$4 sm:$0xff]  }
 0xe88   :  { %11686 = vmatprep.subr.bf16.mxu1 %v15235_v12  ;;  %v15247_v25 = vld [vmem:[#allocation11 + $0x1c] ss:$12 sps:$4 sm:$0xff]   ;;  %v15252_v29 = vld [vmem:[#allocation11 + $0x4] ss:$12 sps:$4 sm:$0xff]   ;;  %v15255_v38 = vld [vmem:[#allocation11] ss:$12 sps:$4 sm:$0xff]  }
 0xe89   :  { %v15266_v49 = vld [vmem:[#allocation11 + $0x68] ss:$12 sps:$4 sm:$0xff]   ;;  %v15269_v15 = vld [vmem:[#allocation11 + $0x110] ss:$12 sps:$4 sm:$0xff]   ;;  %v15274_v10 = vld [vmem:[#allocation11 + $0xf8] ss:$12 sps:$4 sm:$0xff]  }
 0xe8a   :  { %14345 = vmatpush3.bf16.msra.mxu0 %v15256_v3  ;;  %v15271_v7 = vld [vmem:[#allocation11 + $0x50] ss:$12 sps:$4 sm:$0xff]   ;;  %v15257_v44 = vld [vmem:[#allocation11 + $0x16c] ss:$12 sps:$4 sm:$0xff]   ;;  %v15260_v61 = vld [vmem:[#allocation11 + $0x168] ss:$12 sps:$4 sm:$0xff]  }
 0xe8b   :  { %11687 = vmatpush1.bf16.msra.mxu1 %v15237_v41  ;;  %14346 = vmatprep.subr.bf16.mxu0 %v15259_v50  ;;  %v15276_v34 = vld [vmem:[#allocation11 + $0x38] ss:$12 sps:$4 sm:$0xff]   ;;  %v15279_v27 = vld [vmem:[#allocation11 + $0xe0] ss:$12 sps:$4 sm:$0xff]   ;;  %v15284_v8 = vld [vmem:[#allocation11 + $0xc8] ss:$12 sps:$4 sm:$0xff]  }
 0xe8c   :  { %11688 = vmatprep.subr.bf16.mxu1 %v15238_v35  ;;  %v15262_v63 = vld [vmem:[#allocation11 + $0x154] ss:$12 sps:$4 sm:$0xff]   ;;  %v15265_v52 = vld [vmem:[#allocation11 + $0x150] ss:$12 sps:$4 sm:$0xff]   ;;  %v15270_v47 = vld [vmem:[#allocation11 + $0x138] ss:$12 sps:$4 sm:$0xff]  }
 0xe8d   :  { %v15281_v46 = vld [vmem:[#allocation11 + $0x20] ss:$12 sps:$4 sm:$0xff]   ;;  %v15289_v22 = vld [vmem:[#allocation6 + $0x14] ss:$-16 sps:$4 sm:$0xff]   ;;  %v15267_v58 = vld [vmem:[#allocation11 + $0x13c] ss:$12 sps:$4 sm:$0xff]  }
 0xe8e   :  { %14347 = vmatpush3.bf16.msra.mxu0 %v15261_v36  ;;  %v15286_v55 = vld [vmem:[#allocation11 + $0x8] ss:$12 sps:$4 sm:$0xff]   ;;  %11765 = vmatprep.mubr.bf16.mxu0 %v15289_v22  ;;  %v11408_v13 = vld [vmem:[#allocation6 + $0x18] sm:$0x11]  ;;  %v15272_v33 = vld [vmem:[#allocation11 + $0x124] ss:$12 sps:$4 sm:$0xff]  }
 0xe8f   :  { %11689 = vmatpush1.bf16.msra.mxu1 %v15240_v37  ;;  %14348 = vmatprep.subr.bf16.mxu0 %v15264_v9  ;;  %v15287_v17 = vld [vmem:[#allocation6 + $0x10] ss:$-16 sps:$4 sm:$0xff]   ;;  %v13099_v20 = vcombine.high %v11408_v13, %v11408_v13  ;;  %v15277_v51 = vld [vmem:[#allocation11 + $0x10c] ss:$12 sps:$4 sm:$0xff]   ;;  %v15280_v59 = vld [vmem:[#allocation11 + $0x108] ss:$12 sps:$4 sm:$0xff]   ;;  %v13098_v30 = vcombine.low %v11408_v13, %v11408_v13 }
 0xe90   :  { %11690 = vmatprep.subr.bf16.mxu1 %v15241_v40  ;;  %11714 = vmatprep.mubr.bf16.mxu1 %v15289_v22  ;;  %v15275_v23 = vld [vmem:[#allocation11 + $0x120] ss:$12 sps:$4 sm:$0xff]   ;;  %v15285_v54 = vld [vmem:[#allocation11 + $0xf0] ss:$12 sps:$4 sm:$0xff]   ;;  %v15292_v11 = vld [vmem:[#allocation11 + $0xd8] ss:$12 sps:$4 sm:$0xff]  }
 0xe91   :  { %v15282_v62 = vld [vmem:[#allocation11 + $0xf4] ss:$12 sps:$4 sm:$0xff]   ;;  %v15290_v18 = vld [vmem:[#allocation11 + $0xdc] ss:$12 sps:$4 sm:$0xff]   ;;  %v15293_v4 = vld [vmem:[#allocation11 + $0xc4] ss:$12 sps:$4 sm:$0xff]  }
 0xe92   :  { %14349 = vmatpush3.bf16.msra.mxu0 %v15266_v49  ;;  %v15295_v48 = vld [vmem:[#allocation11 + $0xc0] ss:$12 sps:$4 sm:$0xff]   ;;  %v11792_v16 = vsub.s32 2, %v20268_v42  ;;  %v11340_v32 = vld [vmem:[%s20352_s17] sm:$0x7] }
 0xe93   :  { %11691 = vmatpush1.bf16.msra.mxu1 %v15243_v26  ;;  %14350 = vmatprep.subr.bf16.mxu0 %v15269_v15  ;;  %v11341_v0 = vld [vmem:[%s20353_s18] sm:$0x7]  ;;  %v11785_v9 = vrot.slane %v11340_v32, %v20271_v56  ;;  %v11789_v49 = vrot.slane %v11340_v32, %v20277_v19 }
 0xe94   :  { %11692 = vmatprep.subr.bf16.mxu1 %v15244_v21  ;;  %v11793_v2 = vrot.slane %v11340_v32, %v11792_v16  ;;  %v11818_v24 = vrot.slane %v11341_v0, %v11792_v16 }
 0xe96   :  { %14351 = vmatpush3.bf16.msra.mxu0 %v15271_v7 }
 0xe97   :  { %11693 = vmatpush1.bf16.msra.mxu1 %v15246_v43  ;;  %14352 = vmatprep.subr.bf16.mxu0 %v15274_v10 }
 0xe98   :  { %11694 = vmatprep.subr.bf16.mxu1 %v15247_v25  ;;  %v11810_v25 = vrot.slane %v11341_v0, %v20271_v56 }
 0xe9a   :  { %14353 = vmatpush3.bf16.msra.mxu0 %v15276_v34 }
 0xe9b   :  { %11695 = vmatpush1.bf16.msra.mxu1 %v15250_v57  ;;  %14354 = vmatprep.subr.bf16.mxu0 %v15279_v27 }
 0xe9c   :  { %11696 = vmatprep.subr.bf16.mxu1 %v15252_v29  ;;  %v11814_v29 = vrot.slane %v11341_v0, %v20277_v19 }
 0xe9e   :  { %14355 = vmatpush3.bf16.msra.mxu0 %v15281_v46 }
 0xe9f   :  { %11697 = vmatpush1.bf16.msra.mxu1 %v15255_v38  ;;  %14356 = vmatprep.subr.bf16.mxu0 %v15284_v8 }
 0xea0   :  { %11698 = vmatprep.subr.bf16.mxu1 %v15257_v44 }
 0xea2   :  { %14357 = vmatpush3.bf16.msra.mxu0 %v15286_v55 }
 0xea3   :  { %11699 = vmatpush2.bf16.msra.mxu1 %v15260_v61 }
 0xea4   :  { %11700 = vmatprep.subr.bf16.mxu1 %v15262_v63 }
 0xea5   :  { %11766 = vmatmul.mubr.bf16.vlgmr.msra.gmra.mxu0 %v15287_v17 }
 0xea6   :  { %11773 = vmatprep.mubr.bf16.mxu0 %v13099_v20 }
 0xea7   :  { %11701 = vmatpush2.bf16.msra.mxu1 %v15265_v52 }
 0xea8   :  { %11702 = vmatprep.subr.bf16.mxu1 %v15267_v58 }
 0xeab   :  { %11703 = vmatpush2.bf16.msra.mxu1 %v15270_v47 }
 0xeac   :  { %11704 = vmatprep.subr.bf16.mxu1 %v15272_v33 }
 0xead   :  { %11774 = vmatmul.mubr.bf16.gmra.mxu0 %v13098_v30 }
 0xeaf   :  { %11705 = vmatpush2.bf16.msra.mxu1 %v15275_v23 }
 0xeb0   :  { %11706 = vmatprep.subr.bf16.mxu1 %v15277_v51 }
 0xeb3   :  { %11707 = vmatpush2.bf16.msra.mxu1 %v15280_v59 }
 0xeb4   :  { %11708 = vmatprep.subr.bf16.mxu1 %v15282_v62 }
 0xeb7   :  { %11709 = vmatpush2.bf16.msra.mxu1 %v15285_v54 }
 0xeb8   :  { %11710 = vmatprep.subr.bf16.mxu1 %v15290_v18 }
 0xebb   :  { %11711 = vmatpush2.bf16.msra.mxu1 %v15292_v11 }
 0xebc   :  { %11712 = vmatprep.subr.bf16.mxu1 %v15293_v4 }
 0xebf   :  { %11713 = vmatpush2.bf16.msra.mxu1 %v15295_v48 }
 0xec2   :  { %11715 = vmatmul.mubr.bf16.vlgmr.msra.gmra.mxu1 %v15287_v17 }
 0xec3   :  { %11724 = vmatprep.mubr.bf16.mxu1 %v13099_v20 }
 0xeca   :  { %11725 = vmatmul.mubr.bf16.gmra.mxu1 %v13098_v30 }
 0xf65   :  { %v14358_v6 = vpop.f32.mrf.mxu0 }
 0xf67   :  { %v14359_v45 = vpop.f32.mrf.mxu0 }
 0xf68   :  { %v14360_v31 = vadd.f32 %v14359_v45, %v14358_v6 }
 0xf69   :  { %v14361_v14 = vpop.f32.mrf.mxu0 }
 0xf6a   :  { %v11799_v5 = vmul.f32 %v14360_v31, %v11793_v2 }
 0xf6b   :  { %v14362_v12 = vpop.f32.mrf.mxu0 }
 0xf6c   :  { %v20297_v41 = vadd.f32 %v11818_v24, %v11799_v5  ;;  %v14363_v35 = vadd.f32 %v14362_v12, %v14361_v14 }
 0xf6d   :  { %v14364_v42 = vpop.f32.mrf.mxu0 }
 0xf6e   :  { %v11833_v28 = vmax.f32 %v20297_v41, 0.0  ;;  %v11802_v37 = vmul.f32 %v14363_v35, %v11793_v2 }
 0xf6f   :  { %v14365_v1 = vpop.f32.mrf.mxu0 }
 0xf70   :  { %v11827_v40 = vadd.f32 %v11818_v24, %v11802_v37  ;;  %v14366_v53 = vadd.f32 %v14365_v1, %v14364_v42 }
 0xf71   :  { %v14367_v3 = vpop.f32.mrf.mxu0 }
 0xf72   :  { %v11836_v26 = vmax.f32 %v11827_v40, 0.0  ;;  %v11805_v21 = vmul.f32 %v14366_v53, %v11793_v2 }
 0xf73   :  { %v14368_v50 = vpop.f32.mrf.mxu0 }
 0xf74   :  { %v11830_v36 = vadd.f32 %v11818_v24, %v11805_v21 }
 0xf76   :  { %v11839_v43 = vmax.f32 %v11830_v36, 0.0 }
 0xf82   :  { %v11716_v57 = vpop.f32.mrf.mxu1 }
 0xf83   :  { %v11797_v15 = vmul.f32 %v11785_v9, %v11716_v57 }
 0xf84   :  { %v11718_v7 = vpop.f32.mrf.mxu1 }
 0xf85   :  { %v11822_v10 = vadd.f32 %v11810_v25, %v11797_v15  ;;  %v11798_v38 = vmul.f32 %v11789_v49, %v11718_v7 }
 0xf86   :  { %v11720_v44 = vpop.f32.mrf.mxu1 }
 0xf87   :  { %v11831_v34 = vmax.f32 %v11822_v10, 0.0  ;;  %v11823_v27 = vadd.f32 %v11814_v29, %v11798_v38  ;;  %v11800_v61 = vmul.f32 %v11785_v9, %v11720_v44 }
 0xf88   :  { %v11722_v63 = vpop.f32.mrf.mxu1 }
 0xf89   :  { %v11832_v46 = vmax.f32 %v11823_v27, 0.0  ;;  %v11825_v8 = vadd.f32 %v11810_v25, %v11800_v61  ;;  %v11801_v52 = vmul.f32 %v11789_v49, %v11722_v63 }
 0xf8a   :  { %v11726_v22 = vpop.f32.mrf.mxu1 }
 0xf8b   :  { %v11834_v58 = vmax.f32 %v11825_v8, 0.0  ;;  %v11826_v56 = vadd.f32 %v11814_v29, %v11801_v52  ;;  %v11803_v55 = vmul.f32 %v11785_v9, %v11726_v22 }
 0xf8c   :  { %v11728_v13 = vpop.f32.mrf.mxu1 }
 0xf8d   :  { %v11835_v47 = vmax.f32 %v11826_v56, 0.0  ;;  %v11828_v33 = vadd.f32 %v11810_v25, %v11803_v55  ;;  %v11804_v17 = vmul.f32 %v11789_v49, %v11728_v13 }
 0xf8e   :  { %v11730_v19 = vpop.f32.mrf.mxu1 }
 0xf8f   :  { %v11837_v20 = vmax.f32 %v11828_v33, 0.0  ;;  %v11829_v23 = vadd.f32 %v11814_v29, %v11804_v17 }
 0xf90   :  { %v11731_v51 = vpop.f32.mrf.mxu1 }
 0xf91   :  { %v11838_v59 = vmax.f32 %v11829_v23, 0.0 }
 0xf92   :  { %15352 = dma.done.wait [#allocation13 + $0x5], 3072 }
 0xf93   :  { %15353 = vsyncadd [#allocation13 + $0x5], 4294964224  ;;  %v11850_v62 = vpack.c.bf16 %v11838_v59, %v11838_v59  ;;  %vm11856_vm14 = vcmask 1040384   ;;  %v11849_v30 = vpack.c.bf16 %v11837_v20, %v11837_v20  ;;  %v11847_v54 = vpack.c.bf16 %v11835_v47, %v11832_v46  ;;  %11898 = vmatprep.mubr.bf16.mxu0 %v20827_v60  ;;  %14708 = vmatprep.subr.bf16.mxu1 %v15357_v39  ;;  %v11844_v48 = vld [vmem:[%s20354_s19] sm:$0x1]  ;;  %v15298_v32 = vld [vmem:[#allocation12 + $0x78] sm:$0xff]  }
 0xf94   :  { %14724 = vmatprep.mubr.msk.bf16.mxu1 %vm15358_vm9, %v15357_v39  ;;  %v11846_v11 = vpack.c.bf16 %v11834_v58, %v11831_v34  ;;  %v11851_v4 = vpack.c.bf16 %v11839_v43, %v11839_v43  ;;  %vm11852_vm15 = vcmask 146432   ;;  %v11848_v16 = vpack.c.bf16 %v11836_v26, %v11833_v28  ;;  %v15302_v6 = vld [vmem:[#allocation12 + $0xb8] sm:$0xff]   ;;  %v15305_v2 = vld [vmem:[#allocation12 + $0xb0] sm:$0xff]   ;;  %v15308_v31 = vld [vmem:[#allocation12 + $0xa8] sm:$0xff]   ;;  %s15359_s9 = smov [#allocation14]  }
 0xf95   :  { %13148 = vmatprep.subr.msk.bf16.mxu0 %vm11856_vm14, %v11850_v62  ;;  %v11858_v18 = vsel %vm11856_vm14, %v11849_v30, 0  ;;  %v15299_v0 = vld [vmem:[#allocation12 + $0x38] sm:$0xff]   ;;  %14709 = vmatpush3.bf16.msra.mxu1 %v15302_v6  ;;  %v15300_v45 = vld [vmem:[#allocation12 + $0x70] sm:$0xff]   ;;  %v15303_v14 = vld [vmem:[#allocation12 + $0x68] sm:$0xff]   ;;  %s12235_s28 = sshll.u32 %s15359_s9, 4  ;;  %s12236_s28 = int_to_ptr.vmem [resolvable:$true] %s12235_s28 }
 0xf96   :  { %11879 = vmatpush1.bf16.msra.mxu0 %v11858_v18  ;;  %v11864_v60 = vsel %vm11856_vm14, %v11851_v4, 0  ;;  %14710 = vmatprep.subr.bf16.mxu1 %v15357_v39  ;;  %v15301_v24 = vld [vmem:[#allocation12 + $0x30] sm:$0xff]   ;;  %v15311_v5 = vld [vmem:[#allocation12 + $0xa0] sm:$0xff]   ;;  %v15304_v12 = vld [vmem:[#allocation12 + $0x28] sm:$0xff]   ;;  %s15322_s0 = scalar_lea.vmem %s12236_s28, 32  ;;  %p15327_p1 = scmp.lt.s32.totalorder %s12236_s28, %s12236_s28 }
 0xf97   :  { %11880 = vmatprep.subr.bf16.mxu0 %v11847_v54  ;;  %v15306_v41 = vld [vmem:[#allocation12 + $0x60] sm:$0xff]   ;;  %v15309_v42 = vld [vmem:[#allocation12 + $0x58] sm:$0xff]   ;;  %v15312_v1 = vld [vmem:[#allocation12 + $0x50] sm:$0xff]   ;;  %p15323_p0 = scmp.ne.s32.totalorder %s12236_s28, %s15322_s0  ;;  %p15328_p2 = scmp.lt.s32.totalorder %s15322_s0, %s15322_s0 }
 0xf98   :  { %v15307_v35 = vld [vmem:[#allocation12 + $0x20] sm:$0xff]   ;;  %v15314_v28 = vld [vmem:[#allocation12 + $0x98] sm:$0xff]   ;;  %v15313_v40 = vld [vmem:[#allocation12 + $0x10] sm:$0xff]  }
 0xf99   :  { %14711 = vmatpush3.bf16.msra.mxu1 %v15305_v2  ;;  %v15310_v37 = vld [vmem:[#allocation12 + $0x18] sm:$0xff]   ;;  %v15315_v53 = vld [vmem:[#allocation12 + $0x48] sm:$0xff]   ;;  %v15317_v26 = vld [vmem:[#allocation12 + $0x90] sm:$0xff]   ;;  %p15329_p3 = por %p15328_p2, %p15327_p1 }
 0xf9a   :  { %11881 = vmatpush1.bf16.msra.mxu0 %v11846_v11  ;;  %14712 = vmatprep.subr.bf16.mxu1 %v15357_v39  ;;  %v15316_v3 = vld [vmem:[#allocation12 + $0x8] sm:$0xff]   ;;  %v15318_v21 = vld [vmem:[#allocation12 + $0x40] sm:$0xff]  }
 0xf9b   :  { %14700 = vmatprep.subr.bf16.mxu0 %v15357_v39  ;;  %v15319_v50 = vld [vmem:[#allocation12] sm:$0xff]   ;;  %v15320_v36 = vld [vmem:[#allocation12 + $0x88] sm:$0xff]   ;;  %p15330_p4 = pnand %p15329_p3, %p15323_p0 }
 0xf9c   :  { %v15321_v43 = vld [vmem:[#allocation12 + $0x80] sm:$0xff]  }
 0xf9d   :  { %13149 = vmatmul.mubr.msk.bf16.vlgmr.msra.gmra.mxu0 %vm11852_vm15, %v11844_v48  ;;  %14713 = vmatpush3.bf16.msra.mxu1 %v15308_v31 }
 0xf9e   :  { %14701 = vmatpush3.bf16.msra.mxu0 %v11864_v60  ;;  %14704 = vmatprep.mubr.msk.bf16.mxu0 %vm15358_vm9, %v15357_v39 }
 0xf9f   :  { %14702 = vmatprep.subr.bf16.mxu0 %v15357_v39  ;;  %14714 = vmatprep.subr.bf16.mxu1 %v15357_v39 }
 0xfa1   :  { %14715 = vmatpush3.bf16.msra.mxu1 %v15311_v5 }
 0xfa2   :  { %14703 = vmatpush3.bf16.msra.mxu0 %v11848_v16  ;;  %14716 = vmatprep.subr.bf16.mxu1 %v15357_v39 }
 0xfa3   :  { %14373 = vmatprep.subr.bf16.mxu0 %v15298_v32 }
 0xfa5   :  { %14705 = vmatmul.mubr.msk.bf16.vlgmr.msra.gmra.mxu0 %vm11852_vm15, %v11844_v48  ;;  %14717 = vmatpush3.bf16.msra.mxu1 %v15314_v28 }
 0xfa6   :  { %14374 = vmatpush3.bf16.msra.mxu0 %v15299_v0  ;;  %14718 = vmatprep.subr.bf16.mxu1 %v15357_v39 }
 0xfa7   :  { %14375 = vmatprep.subr.bf16.mxu0 %v15300_v45 }
 0xfa9   :  { %14719 = vmatpush3.bf16.msra.mxu1 %v15317_v26 }
 0xfaa   :  { %14376 = vmatpush3.bf16.msra.mxu0 %v15301_v24  ;;  %14720 = vmatprep.subr.bf16.mxu1 %v15357_v39 }
 0xfab   :  { %14377 = vmatprep.subr.bf16.mxu0 %v15303_v14 }
 0xfad   :  { %14721 = vmatpush3.bf16.msra.mxu1 %v15320_v36 }
 0xfae   :  { %14378 = vmatpush3.bf16.msra.mxu0 %v15304_v12  ;;  %14722 = vmatprep.subr.bf16.mxu1 %v15357_v39  ;;  %v13151_v39 = vld [vmem:[%s20355_s20] ss:$0 sm:$0xff] }
 0xfaf   :  { %14379 = vmatprep.subr.bf16.mxu0 %v15306_v41 }
 0xfb1   :  { %14723 = vmatpush3.bf16.msra.mxu1 %v15321_v43 }
 0xfb2   :  { %14380 = vmatpush3.bf16.msra.mxu0 %v15307_v35 }
 0xfb3   :  { %14381 = vmatprep.subr.bf16.mxu0 %v15309_v42 }
 0xfb6   :  { %14382 = vmatpush3.bf16.msra.mxu0 %v15310_v37 }
 0xfb7   :  { %14383 = vmatprep.subr.bf16.mxu0 %v15312_v1 }
 0xfba   :  { %14384 = vmatpush3.bf16.msra.mxu0 %v15313_v40 }
 0xfbb   :  { %14385 = vmatprep.subr.bf16.mxu0 %v15315_v53 }
 0xfbe   :  { %14386 = vmatpush3.bf16.msra.mxu0 %v15316_v3 }
 0xfbf   :  { %14387 = vmatprep.subr.bf16.mxu0 %v15318_v21 }
 0xfc2   :  { %14388 = vmatpush3.bf16.msra.mxu0 %v15319_v50 }
0x105d   :  { %v11900_v9 = vpop.f32.mrf.mxu0 }
0x105e   :  { %v11947_v57 = vpack.c.bf16 %v11900_v9, %v11900_v9 }
0x105f   :  { %v11902_v25 = vpop.f32.mrf.mxu0 }
0x1060   :  { %v11948_v49 = vpack.c.bf16 %v11902_v25, %v11902_v25 }
0x1061   :  { %v11904_v15 = vpop.f32.mrf.mxu0 }
0x1062   :  { %12180 = vmatprep.mubr.bf16.mxu0 %v11948_v49 }
0x1063   :  { %v11905_v29 = vpop.f32.mrf.mxu0  ;;  %12181 = vmatmul.mubr.bf16.vlgmr.msra.gmra.mxu0 %v11947_v57 }
0x1065   :  { %v11941_v7 = vpop.f32.mrf.mxu0 }
0x1066   :  { %v11949_v10 = vpack.c.bf16 %v11941_v7, %v11941_v7 }
0x1067   :  { %v14706_v38 = vpop.f32.mrf.mxu0 }
0x1068   :  { %14725 = vmatmul.mubr.bf16.vlgmr.msra.gmra.mxu1 %v11949_v10 }
0x1069   :  { %v11944_v44 = vpop.f32.mrf.mxu0 }
0x106b   :  { %v14707_v34 = vpop.f32.mrf.mxu0 }
0x1123   :  { %v14389_v27 = vpop.f32.mrf.mxu0 }
0x1125   :  { %v14390_v61 = vpop.f32.mrf.mxu0 }
0x1126   :  { %v14391_v63 = vadd.f32 %v14390_v61, %v14389_v27 }
0x1127   :  { %v14392_v46 = vpop.f32.mrf.mxu0 }
0x1128   :  { %v12183_v8 = vadd.f32 %v14391_v63, %v13151_v39  ;;  %v12222_v52 = vpop.f32.mrf.mxu1 }
0x1129   :  { %v14393_v22 = vpop.f32.mrf.mxu0 }
0x112a   :  { %v12223_v58 = vadd.f32 %v12222_v52, %v12183_v8  ;;  %v14726_v56 = vpop.f32.mrf.mxu1 }
0x112c   :  { %12228 = vst [vmem:[#allocation14] sm:$0x3] %v12223_v58  ;;  %v12225_v55 = vpop.f32.mrf.mxu1 }
0x112d   :  { %15333 = shalt.err (!%p15330_p4)
}
0x112e   :  { %12238 = dma.vmem_to_hbm [thread:$0]  %s12236_s28, 32, %s20362_s27, [#allocation15]   ;;  %v14727_v13 = vpop.f32.mrf.mxu1 }
0x112f   :  { %15354 = dma.done.wait [#allocation15], 32  }
0x1130   :  { %15355 = vsyncadd [#allocation15], 4294967264 }
0x1131   :  { %12242 = vsyncpa [#allocation15], 1 }
0x1132   :  { %12243 = vsyncmov [#allocation13] }
0x1135   :  { %s12244_s25 = vpop.sfrf %12243 }
0x1136   :  { %p13176_p5 = scmp.ne.s32.totalorder %s12244_s25, 0 }
0x1138   :  { %12248 = shalt.err (%p13176_p5)  }
0x1139   :  { %12250 = vsyncmov [#allocation13 + $0x1] }
0x113c   :  { %s12251_s23 = vpop.sfrf %12250 }
0x113d   :  { %p13177_p6 = scmp.ne.s32.totalorder %s12251_s23, 0 }
0x113f   :  { %12255 = shalt.err (%p13177_p6)  }
0x1140   :  { %12257 = vsyncmov [#allocation13 + $0x2] }
0x1143   :  { %s12258_s10 = vpop.sfrf %12257 }
0x1144   :  { %p13178_p7 = scmp.ne.s32.totalorder %s12258_s10, 0 }
0x1146   :  { %12262 = shalt.err (%p13178_p7)  }
0x1147   :  { %12264 = vsyncmov [#allocation13 + $0x3] }
0x114a   :  { %s12265_s29 = vpop.sfrf %12264 }
0x114b   :  { %p13179_p8 = scmp.ne.s32.totalorder %s12265_s29, 0 }
0x114d   :  { %12269 = shalt.err (%p13179_p8)  }
0x114e   :  { %12271 = vsyncmov [#allocation13 + $0x4] }
0x1151   :  { %s12272_s27 = vpop.sfrf %12271 }
0x1152   :  { %p13180_p9 = scmp.ne.s32.totalorder %s12272_s27, 0 }
0x1154   :  { %12276 = shalt.err (%p13180_p9)  }
0x1155   :  { %12278 = vsyncmov [#allocation13 + $0x5] }
0x1158   :  { %s12279_s1 = vpop.sfrf %12278 }
0x1159   :  { %p13181_p10 = scmp.ne.s32.totalorder %s12279_s1, 0 }
0x115b   :  { %12283 = shalt.err (%p13181_p10)  }

</bundles_post_ra>
